<compile_context>
chip_gen: v7x
topology: tpu7x:2x2x1
jax: 0.10.0
libtpu: 0.0.40
codegen_flags: <defaults>
</compile_context>

<pallas_src>
import functools

import numpy as np
import jax
import jax.numpy as jnp
from jax import lax
from jax.experimental import pallas as pl
from jax.experimental.pallas import tpu as pltpu

NEG_SLOPE = 0.1
PAD = 2
KSIZE = 5
STRIDES = (1, 1, 2, 2, 2, 2)


def _leaky(v):
    return jnp.where(v >= 0.0, v, NEG_SLOPE * v)


def _conv_out(n, stride):
    return (n + 2 * PAD - KSIZE) // stride + 1


# ---------------------------------------------------------------------------
# Fused whole-network kernel: one grid step == block_b batch samples.
# ---------------------------------------------------------------------------
def _fused_kernel(x_ref, band1, band2, band3, band4, w5, w6, wfc1, wfc2,
                  b1, b2, b3, b4, b5, b6, bfc1, bfc2,
                  o_ref, s1, s2, s3, *, d):
    bb = d["bb"]
    s = d["size"]
    cin = d["cin"]
    oh3, oh4 = s // 2, s // 4
    bf16 = jnp.bfloat16
    f32 = jnp.float32

    # ---- conv1 (stride 1): kh windows pre-gathered on the host into lanes ----
    a = jnp.dot(x_ref[...].reshape(bb * s, KSIZE * s * cin), band1[...],
                preferred_element_type=f32)
    a = _leaky(a + b1[...])
    s1[:, PAD:PAD + s, :] = a.astype(bf16).reshape(bb, s, s * 16)
    s1[:, :PAD, :] = jnp.zeros((bb, PAD, s * 16), bf16)        # halo rows only
    s1[:, PAD + s:, :] = jnp.zeros((bb, PAD, s * 16), bf16)

    # ---- conv2 (stride 1): 5 shifted row windows -> one matmul (K stacked) ----
    xc = jnp.concatenate([s1[:, k:k + s, :] for k in range(KSIZE)], axis=-1)
    a = jnp.dot(xc.reshape(bb * s, KSIZE * s * 16), band2[...],
                preferred_element_type=f32)
    a = _leaky(a + b2[...])
    s2[:, PAD:PAD + s, :] = a.astype(bf16).reshape(bb, s, s * 32)
    s2[:, :PAD, :] = jnp.zeros((bb, PAD, s * 32), bf16)
    s2[:, PAD + s:, :] = jnp.zeros((bb, PAD, s * 32), bf16)

    # ---- conv3 (stride 2): W-stride folded into the band; compute stride-1
    #      rows and keep the even rows at write time (no selection matmuls) ----
    xc = jnp.concatenate([s2[:, k:k + s, :] for k in range(KSIZE)], axis=-1)
    a = jnp.dot(xc.reshape(bb * s, KSIZE * s * 32), band3[...],
                preferred_element_type=f32)
    a = _leaky(a + b3[...]).reshape(bb, s, oh3 * 32)
    for r in range(oh3):
        s3[:, PAD + r:PAD + r + 1, :] = a[:, 2 * r:2 * r + 1, :]
    s3[:, :PAD, :] = jnp.zeros((bb, PAD, oh3 * 32), f32)
    s3[:, PAD + oh3:, :] = jnp.zeros((bb, PAD, oh3 * 32), f32)

    # ---- conv4 (stride 2): same trick; output flattened straight into lanes ----
    xc = jnp.concatenate([s3[:, k:k + oh3, :] for k in range(KSIZE)], axis=-1)
    a = jnp.dot(xc.reshape(bb * oh3, KSIZE * oh3 * 32), band4[...],
                preferred_element_type=f32)
    a = _leaky(a + b4[...]).reshape(bb, oh3, oh4 * 64)
    x5 = jnp.concatenate([a[:, 2 * r, :] for r in range(oh4)], axis=-1)

    # ---- conv5 / conv6: whole sample in lanes, single im2col matmul (M = bb) ----
    a = jnp.dot(x5.astype(bf16), w5[...], preferred_element_type=f32)
    a = _leaky(a + b5[...])
    a = jnp.dot(a.astype(bf16), w6[...], preferred_element_type=f32)
    a = _leaky(a + b6[...])

    # ---- FC head (kept in f32; tiny) ----
    z = _leaky(jnp.dot(a, wfc1[...], preferred_element_type=f32) + bfc1[...])
    out = jnp.sum(z * wfc2[...], axis=1, keepdims=True) + bfc2[...]
    o_ref[...] = out


# ---------------------------------------------------------------------------
# Parameters + one-time (hoisted) weight preprocessing
# ---------------------------------------------------------------------------
def init_params(key, n_chan=1, size=16):
    """Raw parameters with the same shapes as the PyTorch module."""
    conv_io = [(16, n_chan), (32, 16), (32, 32), (64, 32), (64, 64), (128, 64)]
    keys = jax.random.split(key, 2 * len(conv_io) + 4)
    ki = 0
    convs = []
    for oc, ic in conv_io:
        w = 0.05 * jax.random.normal(keys[ki], (oc, ic, KSIZE, KSIZE), jnp.float32)
        b = 0.05 * jax.random.normal(keys[ki + 1], (oc,), jnp.float32)
        convs.append((w, b))
        ki += 2
    flat = 128 * (size // 16) ** 2
    fc1_w = 0.05 * jax.random.normal(keys[ki], (256, flat), jnp.float32)
    fc1_b = 0.05 * jax.random.normal(keys[ki + 1], (256,), jnp.float32)
    fc2_w = 0.05 * jax.random.normal(keys[ki + 2], (1, 256), jnp.float32)
    fc2_b = 0.05 * jax.random.normal(keys[ki + 3], (1,), jnp.float32)
    return {"convs": convs, "fc1": (fc1_w, fc1_b), "fc2": (fc2_w, fc2_b)}


def _band_weight(w_oihw, w_in, stride):
    """OIHW conv weight -> (5, W*Cin, OW*Cout) banded matmul weights.

    band[kh, w*Cin + c, ow*Cout + oc] = W[oc, c, kh, kw], kw = w - stride*ow + PAD
    (zero outside the 5-tap band), folding the kw taps and the width zero
    padding of the conv into one matmul per kernel row kh.
    """
    ocn, icn, khn, kwn = w_oihw.shape
    own = _conv_out(w_in, stride)
    wn = np.asarray(w_oihw, dtype=np.float32)
    band = np.zeros((khn, w_in * icn, own * ocn), np.float32)
    for kh in range(khn):
        for ow in range(own):
            for kw in range(kwn):
                wpos = stride * ow + kw - PAD
                if 0 <= wpos < w_in:
                    band[kh,
                         wpos * icn:(wpos + 1) * icn,
                         ow * ocn:(ow + 1) * ocn] = wn[:, :, kh, kw].T
    return band


def _im2col_weight(w_oihw, hw_in, stride):
    """Full im2col weight for a small layer whose sample fits in lanes.

    Input flat order (h, w, c); output flat order (h, w, c); spatial padding is
    folded in (out-of-range taps simply have no entry).
    """
    ocn, icn, khn, kwn = w_oihw.shape
    hw_out = _conv_out(hw_in, stride)
    wn = np.asarray(w_oihw, dtype=np.float32)
    mat = np.zeros((hw_in * hw_in * icn, hw_out * hw_out * ocn), np.float32)
    for ho in range(hw_out):
        for wo in range(hw_out):
            for kh in range(khn):
                for kw in range(kwn):
                    hi = stride * ho + kh - PAD
                    wi = stride * wo + kw - PAD
                    if 0 <= hi < hw_in and 0 <= wi < hw_in:
                        rin = (hi * hw_in + wi) * icn
                        rout = (ho * hw_out + wo) * ocn
                        mat[rin:rin + icn, rout:rout + ocn] = wn[:, :, kh, kw].T
    return mat


def prepare_params(params, n_chan=1, size=16):
    """One-time weight preprocessing, hoisted out of the forward path."""
    assert size % 16 == 0
    sf = size // 16
    s = size
    oh3, oh4, oh5, oh6 = s // 2, s // 4, s // 8, s // 16
    (w1c, b1c), (w2c, b2c), (w3c, b3c), (w4c, b4c), (w5c, b5c), (w6c, b6c) = \
        params["convs"]
    bf = jnp.bfloat16

    band1 = _band_weight(w1c, s, 1).reshape(KSIZE * s * n_chan, s * 16)
    band2 = _band_weight(w2c, s, 1).reshape(KSIZE * s * 16, s * 32)
    band3 = _band_weight(w3c, s, 2).reshape(KSIZE * s * 32, oh3 * 32)
    band4 = _band_weight(w4c, oh3, 2).reshape(KSIZE * oh3 * 32, oh4 * 64)
    w5m = _im2col_weight(w5c, oh4, 2)                # (oh4^2*64, oh5^2*64)
    w6m = _im2col_weight(w6c, oh5, 2)                # (oh5^2*64, sf^2*128)

    fc1_w, fc1_b = params["fc1"]
    # Our conv6 output flat order is (h, w, c); PyTorch flattens NCHW as (c, h, w).
    pyt_idx = np.transpose(
        np.arange(128 * sf * sf).reshape(128, sf, sf), (1, 2, 0)).reshape(-1)
    wfc1 = np.asarray(fc1_w, np.float32)[:, pyt_idx].T        # (sf^2*128, 256)
    fc2_w, fc2_b = params["fc2"]

    def bias_row(b, reps):
        return jnp.asarray(np.tile(np.asarray(b, np.float32), reps)[None, :])

    return {
        "size": s, "n_chan": n_chan, "sf": sf,
        "band1": jnp.asarray(band1, bf), "band2": jnp.asarray(band2, bf),
        "band3": jnp.asarray(band3, bf), "band4": jnp.asarray(band4, bf),
        "w5": jnp.asarray(w5m, bf), "w6": jnp.asarray(w6m, bf),
        "wfc1": jnp.asarray(wfc1, jnp.float32),
        "wfc2": jnp.asarray(fc2_w, jnp.float32),              # (1, 256)
        "b1": bias_row(b1c, s), "b2": bias_row(b2c, s),
        "b3": bias_row(b3c, oh3), "b4": bias_row(b4c, oh4),
        "b5": bias_row(b5c, oh5 * oh5), "b6": bias_row(b6c, oh6 * oh6),
        "bfc1": jnp.reshape(jnp.asarray(fc1_b, jnp.float32), (1, 256)),
        "bfc2": jnp.reshape(jnp.asarray(fc2_b, jnp.float32), (1, 1)),
    }


def _const_index_map(ndim):
    return lambda i: (0,) * ndim


# ---------------------------------------------------------------------------
# Forward wrapper (single pallas_call, block_b samples per grid step)
# ---------------------------------------------------------------------------
def mynet_forward(prepped, x, block_b=8):
    """x: (N, n_chan, size, size) NCHW f32 -> (N, 1) f32."""
    s, n_chan = prepped["size"], prepped["n_chan"]
    n, c, h, w = x.shape
    assert (c, h, w) == (n_chan, s, s)
    assert block_b % 8 == 0
    n_pad = ((n + block_b - 1) // block_b) * block_b
    bb = block_b
    oh3, oh4 = s // 2, s // 4

    # Module-boundary layout glue only: NCHW -> (N, H, 5*W*C) with the conv1 kh
    # row-windows pre-gathered on the host (folds the H zero-padding of conv1).
    x2 = jnp.transpose(x, (0, 2, 3, 1)).reshape(n, h, w * c)
    x2 = jnp.pad(x2, ((0, 0), (PAD, PAD), (0, 0)))
    x2 = jnp.concatenate([x2[:, k:k + h, :] for k in range(KSIZE)], axis=-1)
    if n_pad != n:
        x2 = jnp.pad(x2, ((0, n_pad - n), (0, 0), (0, 0)))
    x2 = x2.astype(jnp.bfloat16)

    wkeys = ("band1", "band2", "band3", "band4", "w5", "w6", "wfc1", "wfc2",
             "b1", "b2", "b3", "b4", "b5", "b6", "bfc1", "bfc2")
    weights = [prepped[k] for k in wkeys]
    wspecs = [pl.BlockSpec(a.shape, _const_index_map(a.ndim)) for a in weights]

    scratch = [
        pltpu.VMEM((bb, s + 2 * PAD, s * 16), jnp.bfloat16),    # conv1 out slab
        pltpu.VMEM((bb, s + 2 * PAD, s * 32), jnp.bfloat16),    # conv2 out slab
        pltpu.VMEM((bb, oh3 + 2 * PAD, oh3 * 32), jnp.float32), # conv3 out slab
    ]

    d = dict(bb=bb, size=s, cin=n_chan)
    out = pl.pallas_call(
        functools.partial(_fused_kernel, d=d),
        out_shape=jax.ShapeDtypeStruct((n_pad, 1), jnp.float32),
        grid=(n_pad // bb,),
        in_specs=[pl.BlockSpec((bb, s, KSIZE * s * n_chan),
                               lambda i: (i, 0, 0))] + wspecs,
        out_specs=pl.BlockSpec((bb, 1), lambda i: (i, 0)),
        scratch_shapes=scratch,
        compiler_params=pltpu.CompilerParams(
            dimension_semantics=("parallel",),
            vmem_limit_bytes=32 * 1024 * 1024),
    )(x2, *weights)
    return out[:n]


# ---------------------------------------------------------------------------
# Pure-JAX reference (lax conv) for correctness check
# ---------------------------------------------------------------------------
def mynet_ref(params, x):
    acts = x
    for (w, b), st in zip(params["convs"], STRIDES):
        acts = lax.conv_general_dilated(
            acts, w, window_strides=(st, st), padding=((PAD, PAD), (PAD, PAD)),
            dimension_numbers=("NCHW", "OIHW", "NCHW"))
        acts = _leaky(acts + b[None, :, None, None])
    n = acts.shape[0]
    acts = acts.reshape(n, -1)
    w1, b1 = params["fc1"]
    acts = _leaky(acts @ w1.T + b1)
    w2, b2 = params["fc2"]
    return acts @ w2.T + b2


if __name__ == "__main__":
    key = jax.random.PRNGKey(0)
    k_param, k_x = jax.random.split(key)

    size, n_chan, batch = 16, 1, 16     # config.size == 16 -> fc input dim 128
    x = jax.random.normal(k_x, (batch, n_chan, size, size), jnp.float32)

    params = init_params(k_param, n_chan=n_chan, size=size)
    prepped = prepare_params(params, n_chan=n_chan, size=size)

    fwd = jax.jit(lambda inp: mynet_forward(prepped, inp, block_b=8))
    out = jax.block_until_ready(fwd(x))
    assert out.shape == (batch, 1), out.shape

    ref = jax.block_until_ready(mynet_ref(params, x))
    assert jnp.allclose(out, ref, rtol=1e-2, atol=1e-3), (
        "mismatch vs reference", float(jnp.max(jnp.abs(out - ref))))

    print("KERNEL_OK")
</pallas_src>

<mosaic_0001>
module attributes {stable_mosaic.version = 11 : i64} {
  func.func @_fused_kernel(%arg0: i32, %arg1: memref<8x16x80xbf16, #tpu.memory_space<vmem>>, %arg2: memref<80x256xbf16, #tpu.memory_space<vmem>>, %arg3: memref<1280x512xbf16, #tpu.memory_space<vmem>>, %arg4: memref<2560x256xbf16, #tpu.memory_space<vmem>>, %arg5: memref<1280x256xbf16, #tpu.memory_space<vmem>>, %arg6: memref<1024x256xbf16, #tpu.memory_space<vmem>>, %arg7: memref<256x128xbf16, #tpu.memory_space<vmem>>, %arg8: memref<128x256xf32, #tpu.memory_space<vmem>>, %arg9: memref<1x256xf32, #tpu.memory_space<vmem>>, %arg10: memref<1x256xf32, #tpu.memory_space<vmem>>, %arg11: memref<1x512xf32, #tpu.memory_space<vmem>>, %arg12: memref<1x256xf32, #tpu.memory_space<vmem>>, %arg13: memref<1x256xf32, #tpu.memory_space<vmem>>, %arg14: memref<1x256xf32, #tpu.memory_space<vmem>>, %arg15: memref<1x128xf32, #tpu.memory_space<vmem>>, %arg16: memref<1x256xf32, #tpu.memory_space<vmem>>, %arg17: memref<1x1xf32, #tpu.memory_space<vmem>>, %arg18: memref<8x1xf32, #tpu.memory_space<vmem>>, %arg19: memref<8x20x256xbf16, #tpu.memory_space<vmem>>, %arg20: memref<8x20x512xbf16, #tpu.memory_space<vmem>>, %arg21: memref<8x12x256xf32, #tpu.memory_space<vmem>>) attributes {dimension_semantics = [#tpu.dimension_semantics<parallel>], iteration_bounds = array<i64: 2>, scalar_prefetch = 0 : i64, scratch_operands = 3 : i64, tpu.core_type = #tpu.core_type<tc>, window_params = [{transform_indices = @transform_0, window_bounds = array<i64: 8, 16, 80>}, {pipeline_mode = #tpu.pipeline_mode<synchronous>, transform_indices = @transform_1, window_bounds = array<i64: 80, 256>}, {pipeline_mode = #tpu.pipeline_mode<synchronous>, transform_indices = @transform_2, window_bounds = array<i64: 1280, 512>}, {pipeline_mode = #tpu.pipeline_mode<synchronous>, transform_indices = @transform_3, window_bounds = array<i64: 2560, 256>}, {pipeline_mode = #tpu.pipeline_mode<synchronous>, transform_indices = @transform_4, window_bounds = array<i64: 1280, 256>}, {pipeline_mode = #tpu.pipeline_mode<synchronous>, transform_indices = @transform_5, window_bounds = array<i64: 1024, 256>}, {pipeline_mode = #tpu.pipeline_mode<synchronous>, transform_indices = @transform_6, window_bounds = array<i64: 256, 128>}, {pipeline_mode = #tpu.pipeline_mode<synchronous>, transform_indices = @transform_7, window_bounds = array<i64: 128, 256>}, {pipeline_mode = #tpu.pipeline_mode<synchronous>, transform_indices = @transform_8, window_bounds = array<i64: 1, 256>}, {pipeline_mode = #tpu.pipeline_mode<synchronous>, transform_indices = @transform_9, window_bounds = array<i64: 1, 256>}, {pipeline_mode = #tpu.pipeline_mode<synchronous>, transform_indices = @transform_10, window_bounds = array<i64: 1, 512>}, {pipeline_mode = #tpu.pipeline_mode<synchronous>, transform_indices = @transform_11, window_bounds = array<i64: 1, 256>}, {pipeline_mode = #tpu.pipeline_mode<synchronous>, transform_indices = @transform_12, window_bounds = array<i64: 1, 256>}, {pipeline_mode = #tpu.pipeline_mode<synchronous>, transform_indices = @transform_13, window_bounds = array<i64: 1, 256>}, {pipeline_mode = #tpu.pipeline_mode<synchronous>, transform_indices = @transform_14, window_bounds = array<i64: 1, 128>}, {pipeline_mode = #tpu.pipeline_mode<synchronous>, transform_indices = @transform_15, window_bounds = array<i64: 1, 256>}, {pipeline_mode = #tpu.pipeline_mode<synchronous>, transform_indices = @transform_16, window_bounds = array<i64: 1, 1>}, {transform_indices = @transform_17, window_bounds = array<i64: 8, 1>}]} {
    %c0 = arith.constant 0 : index
    %c0_0 = arith.constant 0 : index
    %c0_1 = arith.constant 0 : index
    %0 = vector.load %arg1[%c0, %c0_0, %c0_1] : memref<8x16x80xbf16, #tpu.memory_space<vmem>>, vector<8x16x80xbf16>
    %1 = vector.shape_cast %0 : vector<8x16x80xbf16> to vector<128x80xbf16>
    %c0_2 = arith.constant 0 : index
    %c0_3 = arith.constant 0 : index
    %2 = vector.load %arg2[%c0_2, %c0_3] : memref<80x256xbf16, #tpu.memory_space<vmem>>, vector<80x256xbf16>
    %cst = arith.constant dense<0.000000e+00> : vector<128x256xf32>
    %3 = tpu.matmul %1, %2, %cst {dimension_numbers = #tpu.dot_dimension_numbers<[1], [0], [0], [1], [0, 0, 1, 1], [], []>} : vector<128x80xbf16>, vector<80x256xbf16>, vector<128x256xf32> -> vector<128x256xf32>
    %c0_4 = arith.constant 0 : index
    %c0_5 = arith.constant 0 : index
    %4 = vector.load %arg10[%c0_4, %c0_5] : memref<1x256xf32, #tpu.memory_space<vmem>>, vector<1x256xf32>
    %5 = vector.broadcast %4 : vector<1x256xf32> to vector<128x256xf32>
    %6 = arith.addf %3, %5 : vector<128x256xf32>
    %cst_6 = arith.constant 0.000000e+00 : f32
    %7 = vector.broadcast %cst_6 : f32 to vector<128x256xf32>
    %8 = arith.cmpf oge, %6, %7 : vector<128x256xf32>
    %cst_7 = arith.constant 1.000000e-01 : f32
    %9 = vector.broadcast %cst_7 : f32 to vector<128x256xf32>
    %10 = arith.mulf %9, %6 : vector<128x256xf32>
    %11 = arith.select %8, %6, %10 : vector<128x256xi1>, vector<128x256xf32>
    %12 = arith.truncf %11 : vector<128x256xf32> to vector<128x256xbf16>
    %13 = vector.shape_cast %12 : vector<128x256xbf16> to vector<8x16x256xbf16>
    %c0_8 = arith.constant 0 : index
    %c2 = arith.constant 2 : index
    %c0_9 = arith.constant 0 : index
    %14 = vector.load %arg19[%c0_8, %c2, %c0_9] : memref<8x20x256xbf16, #tpu.memory_space<vmem>>, vector<8x16x256xbf16>
    tpu.vector_store %arg19[%c0_8, %c2, %c0_9], %13 {strides = array<i32>} : memref<8x20x256xbf16, #tpu.memory_space<vmem>>, vector<8x16x256xbf16>,
    %cst_10 = arith.constant 0.000000e+00 : bf16
    %15 = vector.broadcast %cst_10 : bf16 to vector<8x2x256xbf16>
    %c0_11 = arith.constant 0 : index
    %c0_12 = arith.constant 0 : index
    %c0_13 = arith.constant 0 : index
    %16 = vector.load %arg19[%c0_11, %c0_12, %c0_13] : memref<8x20x256xbf16, #tpu.memory_space<vmem>>, vector<8x2x256xbf16>
    tpu.vector_store %arg19[%c0_11, %c0_12, %c0_13], %15 {strides = array<i32>} : memref<8x20x256xbf16, #tpu.memory_space<vmem>>, vector<8x2x256xbf16>,
    %cst_14 = arith.constant 0.000000e+00 : bf16
    %17 = vector.broadcast %cst_14 : bf16 to vector<8x2x256xbf16>
    %c0_15 = arith.constant 0 : index
    %c18 = arith.constant 18 : index
    %c0_16 = arith.constant 0 : index
    %18 = vector.load %arg19[%c0_15, %c18, %c0_16] : memref<8x20x256xbf16, #tpu.memory_space<vmem>>, vector<8x2x256xbf16>
    tpu.vector_store %arg19[%c0_15, %c18, %c0_16], %17 {strides = array<i32>} : memref<8x20x256xbf16, #tpu.memory_space<vmem>>, vector<8x2x256xbf16>,
    %c0_17 = arith.constant 0 : index
    %c0_18 = arith.constant 0 : index
    %c0_19 = arith.constant 0 : index
    %19 = vector.load %arg19[%c0_17, %c0_18, %c0_19] : memref<8x20x256xbf16, #tpu.memory_space<vmem>>, vector<8x16x256xbf16>
    %c0_20 = arith.constant 0 : index
    %c1 = arith.constant 1 : index
    %c0_21 = arith.constant 0 : index
    %20 = vector.load %arg19[%c0_20, %c1, %c0_21] : memref<8x20x256xbf16, #tpu.memory_space<vmem>>, vector<8x16x256xbf16>
    %c0_22 = arith.constant 0 : index
    %c2_23 = arith.constant 2 : index
    %c0_24 = arith.constant 0 : index
    %21 = vector.load %arg19[%c0_22, %c2_23, %c0_24] : memref<8x20x256xbf16, #tpu.memory_space<vmem>>, vector<8x16x256xbf16>
    %c0_25 = arith.constant 0 : index
    %c3 = arith.constant 3 : index
    %c0_26 = arith.constant 0 : index
    %22 = vector.load %arg19[%c0_25, %c3, %c0_26] : memref<8x20x256xbf16, #tpu.memory_space<vmem>>, vector<8x16x256xbf16>
    %c0_27 = arith.constant 0 : index
    %c4 = arith.constant 4 : index
    %c0_28 = arith.constant 0 : index
    %23 = vector.load %arg19[%c0_27, %c4, %c0_28] : memref<8x20x256xbf16, #tpu.memory_space<vmem>>, vector<8x16x256xbf16>
    %24 = tpu.concatenate %19, %20, %21, %22, %23 in 2 : vector<8x16x256xbf16>, vector<8x16x256xbf16>, vector<8x16x256xbf16>, vector<8x16x256xbf16>, vector<8x16x256xbf16> -> vector<8x16x1280xbf16>
    %25 = vector.shape_cast %24 : vector<8x16x1280xbf16> to vector<128x1280xbf16>
    %c0_29 = arith.constant 0 : index
    %c0_30 = arith.constant 0 : index
    %26 = vector.load %arg3[%c0_29, %c0_30] : memref<1280x512xbf16, #tpu.memory_space<vmem>>, vector<1280x512xbf16>
    %cst_31 = arith.constant dense<0.000000e+00> : vector<128x512xf32>
    %27 = tpu.matmul %25, %26, %cst_31 {dimension_numbers = #tpu.dot_dimension_numbers<[1], [0], [0], [1], [0, 0, 1, 1], [], []>} : vector<128x1280xbf16>, vector<1280x512xbf16>, vector<128x512xf32> -> vector<128x512xf32>
    %c0_32 = arith.constant 0 : index
    %c0_33 = arith.constant 0 : index
    %28 = vector.load %arg11[%c0_32, %c0_33] : memref<1x512xf32, #tpu.memory_space<vmem>>, vector<1x512xf32>
    %29 = vector.broadcast %28 : vector<1x512xf32> to vector<128x512xf32>
    %30 = arith.addf %27, %29 : vector<128x512xf32>
    %cst_34 = arith.constant 0.000000e+00 : f32
    %31 = vector.broadcast %cst_34 : f32 to vector<128x512xf32>
    %32 = arith.cmpf oge, %30, %31 : vector<128x512xf32>
    %cst_35 = arith.constant 1.000000e-01 : f32
    %33 = vector.broadcast %cst_35 : f32 to vector<128x512xf32>
    %34 = arith.mulf %33, %30 : vector<128x512xf32>
    %35 = arith.select %32, %30, %34 : vector<128x512xi1>, vector<128x512xf32>
    %36 = arith.truncf %35 : vector<128x512xf32> to vector<128x512xbf16>
    %37 = vector.shape_cast %36 : vector<128x512xbf16> to vector<8x16x512xbf16>
    %c0_36 = arith.constant 0 : index
    %c2_37 = arith.constant 2 : index
    %c0_38 = arith.constant 0 : index
    %38 = vector.load %arg20[%c0_36, %c2_37, %c0_38] : memref<8x20x512xbf16, #tpu.memory_space<vmem>>, vector<8x16x512xbf16>
    tpu.vector_store %arg20[%c0_36, %c2_37, %c0_38], %37 {strides = array<i32>} : memref<8x20x512xbf16, #tpu.memory_space<vmem>>, vector<8x16x512xbf16>,
    %cst_39 = arith.constant 0.000000e+00 : bf16
    %39 = vector.broadcast %cst_39 : bf16 to vector<8x2x512xbf16>
    %c0_40 = arith.constant 0 : index
    %c0_41 = arith.constant 0 : index
    %c0_42 = arith.constant 0 : index
    %40 = vector.load %arg20[%c0_40, %c0_41, %c0_42] : memref<8x20x512xbf16, #tpu.memory_space<vmem>>, vector<8x2x512xbf16>
    tpu.vector_store %arg20[%c0_40, %c0_41, %c0_42], %39 {strides = array<i32>} : memref<8x20x512xbf16, #tpu.memory_space<vmem>>, vector<8x2x512xbf16>,
    %cst_43 = arith.constant 0.000000e+00 : bf16
    %41 = vector.broadcast %cst_43 : bf16 to vector<8x2x512xbf16>
    %c0_44 = arith.constant 0 : index
    %c18_45 = arith.constant 18 : index
    %c0_46 = arith.constant 0 : index
    %42 = vector.load %arg20[%c0_44, %c18_45, %c0_46] : memref<8x20x512xbf16, #tpu.memory_space<vmem>>, vector<8x2x512xbf16>
    tpu.vector_store %arg20[%c0_44, %c18_45, %c0_46], %41 {strides = array<i32>} : memref<8x20x512xbf16, #tpu.memory_space<vmem>>, vector<8x2x512xbf16>,
    %c0_47 = arith.constant 0 : index
    %c0_48 = arith.constant 0 : index
    %c0_49 = arith.constant 0 : index
    %43 = vector.load %arg20[%c0_47, %c0_48, %c0_49] : memref<8x20x512xbf16, #tpu.memory_space<vmem>>, vector<8x16x512xbf16>
    %c0_50 = arith.constant 0 : index
    %c1_51 = arith.constant 1 : index
    %c0_52 = arith.constant 0 : index
    %44 = vector.load %arg20[%c0_50, %c1_51, %c0_52] : memref<8x20x512xbf16, #tpu.memory_space<vmem>>, vector<8x16x512xbf16>
    %c0_53 = arith.constant 0 : index
    %c2_54 = arith.constant 2 : index
    %c0_55 = arith.constant 0 : index
    %45 = vector.load %arg20[%c0_53, %c2_54, %c0_55] : memref<8x20x512xbf16, #tpu.memory_space<vmem>>, vector<8x16x512xbf16>
    %c0_56 = arith.constant 0 : index
    %c3_57 = arith.constant 3 : index
    %c0_58 = arith.constant 0 : index
    %46 = vector.load %arg20[%c0_56, %c3_57, %c0_58] : memref<8x20x512xbf16, #tpu.memory_space<vmem>>, vector<8x16x512xbf16>
    %c0_59 = arith.constant 0 : index
    %c4_60 = arith.constant 4 : index
    %c0_61 = arith.constant 0 : index
    %47 = vector.load %arg20[%c0_59, %c4_60, %c0_61] : memref<8x20x512xbf16, #tpu.memory_space<vmem>>, vector<8x16x512xbf16>
    %48 = tpu.concatenate %43, %44, %45, %46, %47 in 2 : vector<8x16x512xbf16>, vector<8x16x512xbf16>, vector<8x16x512xbf16>, vector<8x16x512xbf16>, vector<8x16x512xbf16> -> vector<8x16x2560xbf16>
    %49 = vector.shape_cast %48 : vector<8x16x2560xbf16> to vector<128x2560xbf16>
    %c0_62 = arith.constant 0 : index
    %c0_63 = arith.constant 0 : index
    %50 = vector.load %arg4[%c0_62, %c0_63] : memref<2560x256xbf16, #tpu.memory_space<vmem>>, vector<2560x256xbf16>
    %cst_64 = arith.constant dense<0.000000e+00> : vector<128x256xf32>
    %51 = tpu.matmul %49, %50, %cst_64 {dimension_numbers = #tpu.dot_dimension_numbers<[1], [0], [0], [1], [0, 0, 1, 1], [], []>} : vector<128x2560xbf16>, vector<2560x256xbf16>, vector<128x256xf32> -> vector<128x256xf32>
    %c0_65 = arith.constant 0 : index
    %c0_66 = arith.constant 0 : index
    %52 = vector.load %arg12[%c0_65, %c0_66] : memref<1x256xf32, #tpu.memory_space<vmem>>, vector<1x256xf32>
    %53 = vector.broadcast %52 : vector<1x256xf32> to vector<128x256xf32>
    %54 = arith.addf %51, %53 : vector<128x256xf32>
    %cst_67 = arith.constant 0.000000e+00 : f32
    %55 = vector.broadcast %cst_67 : f32 to vector<128x256xf32>
    %56 = arith.cmpf oge, %54, %55 : vector<128x256xf32>
    %cst_68 = arith.constant 1.000000e-01 : f32
    %57 = vector.broadcast %cst_68 : f32 to vector<128x256xf32>
    %58 = arith.mulf %57, %54 : vector<128x256xf32>
    %59 = arith.select %56, %54, %58 : vector<128x256xi1>, vector<128x256xf32>
    %60 = vector.shape_cast %59 : vector<128x256xf32> to vector<8x16x256xf32>
    %61 = vector.extract_strided_slice %60 {offsets = [0, 0, 0], sizes = [8, 1, 256], strides = [1, 1, 1]} : vector<8x16x256xf32> to vector<8x1x256xf32>
    %c0_69 = arith.constant 0 : index
    %c2_70 = arith.constant 2 : index
    %c0_71 = arith.constant 0 : index
    %62 = vector.load %arg21[%c0_69, %c2_70, %c0_71] : memref<8x12x256xf32, #tpu.memory_space<vmem>>, vector<8x1x256xf32>
    tpu.vector_store %arg21[%c0_69, %c2_70, %c0_71], %61 {strides = array<i32>} : memref<8x12x256xf32, #tpu.memory_space<vmem>>, vector<8x1x256xf32>,
    %63 = vector.extract_strided_slice %60 {offsets = [0, 2, 0], sizes = [8, 1, 256], strides = [1, 1, 1]} : vector<8x16x256xf32> to vector<8x1x256xf32>
    %c0_72 = arith.constant 0 : index
    %c3_73 = arith.constant 3 : index
    %c0_74 = arith.constant 0 : index
    %64 = vector.load %arg21[%c0_72, %c3_73, %c0_74] : memref<8x12x256xf32, #tpu.memory_space<vmem>>, vector<8x1x256xf32>
    tpu.vector_store %arg21[%c0_72, %c3_73, %c0_74], %63 {strides = array<i32>} : memref<8x12x256xf32, #tpu.memory_space<vmem>>, vector<8x1x256xf32>,
    %65 = vector.extract_strided_slice %60 {offsets = [0, 4, 0], sizes = [8, 1, 256], strides = [1, 1, 1]} : vector<8x16x256xf32> to vector<8x1x256xf32>
    %c0_75 = arith.constant 0 : index
    %c4_76 = arith.constant 4 : index
    %c0_77 = arith.constant 0 : index
    %66 = vector.load %arg21[%c0_75, %c4_76, %c0_77] : memref<8x12x256xf32, #tpu.memory_space<vmem>>, vector<8x1x256xf32>
    tpu.vector_store %arg21[%c0_75, %c4_76, %c0_77], %65 {strides = array<i32>} : memref<8x12x256xf32, #tpu.memory_space<vmem>>, vector<8x1x256xf32>,
    %67 = vector.extract_strided_slice %60 {offsets = [0, 6, 0], sizes = [8, 1, 256], strides = [1, 1, 1]} : vector<8x16x256xf32> to vector<8x1x256xf32>
    %c0_78 = arith.constant 0 : index
    %c5 = arith.constant 5 : index
    %c0_79 = arith.constant 0 : index
    %68 = vector.load %arg21[%c0_78, %c5, %c0_79] : memref<8x12x256xf32, #tpu.memory_space<vmem>>, vector<8x1x256xf32>
    tpu.vector_store %arg21[%c0_78, %c5, %c0_79], %67 {strides = array<i32>} : memref<8x12x256xf32, #tpu.memory_space<vmem>>, vector<8x1x256xf32>,
    %69 = vector.extract_strided_slice %60 {offsets = [0, 8, 0], sizes = [8, 1, 256], strides = [1, 1, 1]} : vector<8x16x256xf32> to vector<8x1x256xf32>
    %c0_80 = arith.constant 0 : index
    %c6 = arith.constant 6 : index
    %c0_81 = arith.constant 0 : index
    %70 = vector.load %arg21[%c0_80, %c6, %c0_81] : memref<8x12x256xf32, #tpu.memory_space<vmem>>, vector<8x1x256xf32>
    tpu.vector_store %arg21[%c0_80, %c6, %c0_81], %69 {strides = array<i32>} : memref<8x12x256xf32, #tpu.memory_space<vmem>>, vector<8x1x256xf32>,
    %71 = vector.extract_strided_slice %60 {offsets = [0, 10, 0], sizes = [8, 1, 256], strides = [1, 1, 1]} : vector<8x16x256xf32> to vector<8x1x256xf32>
    %c0_82 = arith.constant 0 : index
    %c7 = arith.constant 7 : index
    %c0_83 = arith.constant 0 : index
    %72 = vector.load %arg21[%c0_82, %c7, %c0_83] : memref<8x12x256xf32, #tpu.memory_space<vmem>>, vector<8x1x256xf32>
    tpu.vector_store %arg21[%c0_82, %c7, %c0_83], %71 {strides = array<i32>} : memref<8x12x256xf32, #tpu.memory_space<vmem>>, vector<8x1x256xf32>,
    %73 = vector.extract_strided_slice %60 {offsets = [0, 12, 0], sizes = [8, 1, 256], strides = [1, 1, 1]} : vector<8x16x256xf32> to vector<8x1x256xf32>
    %c0_84 = arith.constant 0 : index
    %c8 = arith.constant 8 : index
    %c0_85 = arith.constant 0 : index
    %74 = vector.load %arg21[%c0_84, %c8, %c0_85] : memref<8x12x256xf32, #tpu.memory_space<vmem>>, vector<8x1x256xf32>
    tpu.vector_store %arg21[%c0_84, %c8, %c0_85], %73 {strides = array<i32>} : memref<8x12x256xf32, #tpu.memory_space<vmem>>, vector<8x1x256xf32>,
    %75 = vector.extract_strided_slice %60 {offsets = [0, 14, 0], sizes = [8, 1, 256], strides = [1, 1, 1]} : vector<8x16x256xf32> to vector<8x1x256xf32>
    %c0_86 = arith.constant 0 : index
    %c9 = arith.constant 9 : index
    %c0_87 = arith.constant 0 : index
    %76 = vector.load %arg21[%c0_86, %c9, %c0_87] : memref<8x12x256xf32, #tpu.memory_space<vmem>>, vector<8x1x256xf32>
    tpu.vector_store %arg21[%c0_86, %c9, %c0_87], %75 {strides = array<i32>} : memref<8x12x256xf32, #tpu.memory_space<vmem>>, vector<8x1x256xf32>,
    %cst_88 = arith.constant 0.000000e+00 : f32
    %77 = vector.broadcast %cst_88 : f32 to vector<8x2x256xf32>
    %c0_89 = arith.constant 0 : index
    %c0_90 = arith.constant 0 : index
    %c0_91 = arith.constant 0 : index
    %78 = vector.load %arg21[%c0_89, %c0_90, %c0_91] : memref<8x12x256xf32, #tpu.memory_space<vmem>>, vector<8x2x256xf32>
    tpu.vector_store %arg21[%c0_89, %c0_90, %c0_91], %77 {strides = array<i32>} : memref<8x12x256xf32, #tpu.memory_space<vmem>>, vector<8x2x256xf32>,
    %cst_92 = arith.constant 0.000000e+00 : f32
    %79 = vector.broadcast %cst_92 : f32 to vector<8x2x256xf32>
    %c0_93 = arith.constant 0 : index
    %c10 = arith.constant 10 : index
    %c0_94 = arith.constant 0 : index
    %80 = vector.load %arg21[%c0_93, %c10, %c0_94] : memref<8x12x256xf32, #tpu.memory_space<vmem>>, vector<8x2x256xf32>
    tpu.vector_store %arg21[%c0_93, %c10, %c0_94], %79 {strides = array<i32>} : memref<8x12x256xf32, #tpu.memory_space<vmem>>, vector<8x2x256xf32>,
    %c0_95 = arith.constant 0 : index
    %c0_96 = arith.constant 0 : index
    %c0_97 = arith.constant 0 : index
    %81 = vector.load %arg21[%c0_95, %c0_96, %c0_97] : memref<8x12x256xf32, #tpu.memory_space<vmem>>, vector<8x8x256xf32>
    %c0_98 = arith.constant 0 : index
    %c1_99 = arith.constant 1 : index
    %c0_100 = arith.constant 0 : index
    %82 = vector.load %arg21[%c0_98, %c1_99, %c0_100] : memref<8x12x256xf32, #tpu.memory_space<vmem>>, vector<8x8x256xf32>
    %c0_101 = arith.constant 0 : index
    %c2_102 = arith.constant 2 : index
    %c0_103 = arith.constant 0 : index
    %83 = vector.load %arg21[%c0_101, %c2_102, %c0_103] : memref<8x12x256xf32, #tpu.memory_space<vmem>>, vector<8x8x256xf32>
    %c0_104 = arith.constant 0 : index
    %c3_105 = arith.constant 3 : index
    %c0_106 = arith.constant 0 : index
    %84 = vector.load %arg21[%c0_104, %c3_105, %c0_106] : memref<8x12x256xf32, #tpu.memory_space<vmem>>, vector<8x8x256xf32>
    %c0_107 = arith.constant 0 : index
    %c4_108 = arith.constant 4 : index
    %c0_109 = arith.constant 0 : index
    %85 = vector.load %arg21[%c0_107, %c4_108, %c0_109] : memref<8x12x256xf32, #tpu.memory_space<vmem>>, vector<8x8x256xf32>
    %86 = tpu.concatenate %81, %82, %83, %84, %85 in 2 : vector<8x8x256xf32>, vector<8x8x256xf32>, vector<8x8x256xf32>, vector<8x8x256xf32>, vector<8x8x256xf32> -> vector<8x8x1280xf32>
    %87 = vector.shape_cast %86 : vector<8x8x1280xf32> to vector<64x1280xf32>
    %c0_110 = arith.constant 0 : index
    %c0_111 = arith.constant 0 : index
    %88 = vector.load %arg5[%c0_110, %c0_111] : memref<1280x256xbf16, #tpu.memory_space<vmem>>, vector<1280x256xbf16>
    %cst_112 = arith.constant dense<0.000000e+00> : vector<64x256xf32>
    %89 = tpu.matmul %87, %88, %cst_112 {dimension_numbers = #tpu.dot_dimension_numbers<[1], [0], [0], [1], [0, 0, 1, 1], [], []>} : vector<64x1280xf32>, vector<1280x256xbf16>, vector<64x256xf32> -> vector<64x256xf32>
    %c0_113 = arith.constant 0 : index
    %c0_114 = arith.constant 0 : index
    %90 = vector.load %arg13[%c0_113, %c0_114] : memref<1x256xf32, #tpu.memory_space<vmem>>, vector<1x256xf32>
    %91 = vector.broadcast %90 : vector<1x256xf32> to vector<64x256xf32>
    %92 = arith.addf %89, %91 : vector<64x256xf32>
    %cst_115 = arith.constant 0.000000e+00 : f32
    %93 = vector.broadcast %cst_115 : f32 to vector<64x256xf32>
    %94 = arith.cmpf oge, %92, %93 : vector<64x256xf32>
    %cst_116 = arith.constant 1.000000e-01 : f32
    %95 = vector.broadcast %cst_116 : f32 to vector<64x256xf32>
    %96 = arith.mulf %95, %92 : vector<64x256xf32>
    %97 = arith.select %94, %92, %96 : vector<64x256xi1>, vector<64x256xf32>
    %98 = vector.shape_cast %97 : vector<64x256xf32> to vector<8x8x256xf32>
    %99 = vector.extract_strided_slice %98 {offsets = [0, 0, 0], sizes = [8, 1, 256], strides = [1, 1, 1]} : vector<8x8x256xf32> to vector<8x1x256xf32>
    %100 = vector.shape_cast %99 : vector<8x1x256xf32> to vector<8x256xf32>
    %101 = vector.extract_strided_slice %98 {offsets = [0, 2, 0], sizes = [8, 1, 256], strides = [1, 1, 1]} : vector<8x8x256xf32> to vector<8x1x256xf32>
    %102 = vector.shape_cast %101 : vector<8x1x256xf32> to vector<8x256xf32>
    %103 = vector.extract_strided_slice %98 {offsets = [0, 4, 0], sizes = [8, 1, 256], strides = [1, 1, 1]} : vector<8x8x256xf32> to vector<8x1x256xf32>
    %104 = vector.shape_cast %103 : vector<8x1x256xf32> to vector<8x256xf32>
    %105 = vector.extract_strided_slice %98 {offsets = [0, 6, 0], sizes = [8, 1, 256], strides = [1, 1, 1]} : vector<8x8x256xf32> to vector<8x1x256xf32>
    %106 = vector.shape_cast %105 : vector<8x1x256xf32> to vector<8x256xf32>
    %107 = tpu.concatenate %100, %102, %104, %106 in 1 : vector<8x256xf32>, vector<8x256xf32>, vector<8x256xf32>, vector<8x256xf32> -> vector<8x1024xf32>
    %108 = arith.truncf %107 : vector<8x1024xf32> to vector<8x1024xbf16>
    %c0_117 = arith.constant 0 : index
    %c0_118 = arith.constant 0 : index
    %109 = vector.load %arg6[%c0_117, %c0_118] : memref<1024x256xbf16, #tpu.memory_space<vmem>>, vector<1024x256xbf16>
    %cst_119 = arith.constant dense<0.000000e+00> : vector<8x256xf32>
    %110 = tpu.matmul %108, %109, %cst_119 {dimension_numbers = #tpu.dot_dimension_numbers<[1], [0], [0], [1], [0, 0, 1, 1], [], []>} : vector<8x1024xbf16>, vector<1024x256xbf16>, vector<8x256xf32> -> vector<8x256xf32>
    %c0_120 = arith.constant 0 : index
    %c0_121 = arith.constant 0 : index
    %111 = vector.load %arg14[%c0_120, %c0_121] : memref<1x256xf32, #tpu.memory_space<vmem>>, vector<1x256xf32>
    %112 = vector.broadcast %111 : vector<1x256xf32> to vector<8x256xf32>
    %113 = arith.addf %110, %112 : vector<8x256xf32>
    %cst_122 = arith.constant 0.000000e+00 : f32
    %114 = vector.broadcast %cst_122 : f32 to vector<8x256xf32>
    %115 = arith.cmpf oge, %113, %114 : vector<8x256xf32>
    %cst_123 = arith.constant 1.000000e-01 : f32
    %116 = vector.broadcast %cst_123 : f32 to vector<8x256xf32>
    %117 = arith.mulf %116, %113 : vector<8x256xf32>
    %118 = arith.select %115, %113, %117 : vector<8x256xi1>, vector<8x256xf32>
    %119 = arith.truncf %118 : vector<8x256xf32> to vector<8x256xbf16>
    %c0_124 = arith.constant 0 : index
    %c0_125 = arith.constant 0 : index
    %120 = vector.load %arg7[%c0_124, %c0_125] : memref<256x128xbf16, #tpu.memory_space<vmem>>, vector<256x128xbf16>
    %cst_126 = arith.constant dense<0.000000e+00> : vector<8x128xf32>
    %121 = tpu.matmul %119, %120, %cst_126 {dimension_numbers = #tpu.dot_dimension_numbers<[1], [0], [0], [1], [0, 0, 1, 1], [], []>} : vector<8x256xbf16>, vector<256x128xbf16>, vector<8x128xf32> -> vector<8x128xf32>
    %c0_127 = arith.constant 0 : index
    %c0_128 = arith.constant 0 : index
    %122 = vector.load %arg15[%c0_127, %c0_128] : memref<1x128xf32, #tpu.memory_space<vmem>>, vector<1x128xf32>
    %123 = vector.broadcast %122 : vector<1x128xf32> to vector<8x128xf32>
    %124 = arith.addf %121, %123 : vector<8x128xf32>
    %cst_129 = arith.constant 0.000000e+00 : f32
    %125 = vector.broadcast %cst_129 : f32 to vector<8x128xf32>
    %126 = arith.cmpf oge, %124, %125 : vector<8x128xf32>
    %cst_130 = arith.constant 1.000000e-01 : f32
    %127 = vector.broadcast %cst_130 : f32 to vector<8x128xf32>
    %128 = arith.mulf %127, %124 : vector<8x128xf32>
    %129 = arith.select %126, %124, %128 : vector<8x128xi1>, vector<8x128xf32>
    %c0_131 = arith.constant 0 : index
    %c0_132 = arith.constant 0 : index
    %130 = vector.load %arg8[%c0_131, %c0_132] : memref<128x256xf32, #tpu.memory_space<vmem>>, vector<128x256xf32>
    %cst_133 = arith.constant dense<0.000000e+00> : vector<8x256xf32>
    %131 = tpu.matmul %129, %130, %cst_133 {dimension_numbers = #tpu.dot_dimension_numbers<[1], [0], [0], [1], [0, 0, 1, 1], [], []>} : vector<8x128xf32>, vector<128x256xf32>, vector<8x256xf32> -> vector<8x256xf32>
    %c0_134 = arith.constant 0 : index
    %c0_135 = arith.constant 0 : index
    %132 = vector.load %arg16[%c0_134, %c0_135] : memref<1x256xf32, #tpu.memory_space<vmem>>, vector<1x256xf32>
    %133 = vector.broadcast %132 : vector<1x256xf32> to vector<8x256xf32>
    %134 = arith.addf %131, %133 : vector<8x256xf32>
    %cst_136 = arith.constant 0.000000e+00 : f32
    %135 = vector.broadcast %cst_136 : f32 to vector<8x256xf32>
    %136 = arith.cmpf oge, %134, %135 : vector<8x256xf32>
    %cst_137 = arith.constant 1.000000e-01 : f32
    %137 = vector.broadcast %cst_137 : f32 to vector<8x256xf32>
    %138 = arith.mulf %137, %134 : vector<8x256xf32>
    %139 = arith.select %136, %134, %138 : vector<8x256xi1>, vector<8x256xf32>
    %c0_138 = arith.constant 0 : index
    %c0_139 = arith.constant 0 : index
    %140 = vector.load %arg9[%c0_138, %c0_139] : memref<1x256xf32, #tpu.memory_space<vmem>>, vector<1x256xf32>
    %141 = vector.broadcast %140 : vector<1x256xf32> to vector<8x256xf32>
    %142 = arith.mulf %139, %141 : vector<8x256xf32>
    %cst_140 = arith.constant dense<0.000000e+00> : vector<8xf32>
    %143 = vector.multi_reduction <add>, %142, %cst_140 [1] : vector<8x256xf32> to vector<8xf32>
    %144 = vector.shape_cast %143 : vector<8xf32> to vector<8x1xf32>
    %c0_141 = arith.constant 0 : index
    %c0_142 = arith.constant 0 : index
    %145 = vector.load %arg17[%c0_141, %c0_142] : memref<1x1xf32, #tpu.memory_space<vmem>>, vector<1x1xf32>
    %146 = vector.broadcast %145 : vector<1x1xf32> to vector<8x1xf32>
    %147 = arith.addf %144, %146 : vector<8x1xf32>
    %c0_143 = arith.constant 0 : index
    %c0_144 = arith.constant 0 : index
    %148 = vector.load %arg18[%c0_143, %c0_144] : memref<8x1xf32, #tpu.memory_space<vmem>>, vector<8x1xf32>
    tpu.vector_store %arg18[%c0_143, %c0_144], %147 {strides = array<i32>} : memref<8x1xf32, #tpu.memory_space<vmem>>, vector<8x1xf32>,
    return
  }
  func.func @transform_0(%arg0: i32) -> (i32, i32, i32) {
    %c0_i32 = arith.constant 0 : i32
    %c0_i32_0 = arith.constant 0 : i32
    %c0_i32_1 = arith.constant 0 : i32
    return %arg0, %c0_i32, %c0_i32_0 : i32, i32, i32
  }
  func.func @transform_1(%arg0: i32) -> (i32, i32) {
    %c0_i32 = arith.constant 0 : i32
    %c0_i32_0 = arith.constant 0 : i32
    %c0_i32_1 = arith.constant 0 : i32
    return %c0_i32, %c0_i32_0 : i32, i32
  }
  func.func @transform_2(%arg0: i32) -> (i32, i32) {
    %c0_i32 = arith.constant 0 : i32
    %c0_i32_0 = arith.constant 0 : i32
    %c0_i32_1 = arith.constant 0 : i32
    return %c0_i32, %c0_i32_0 : i32, i32
  }
  func.func @transform_3(%arg0: i32) -> (i32, i32) {
    %c0_i32 = arith.constant 0 : i32
    %c0_i32_0 = arith.constant 0 : i32
    %c0_i32_1 = arith.constant 0 : i32
    return %c0_i32, %c0_i32_0 : i32, i32
  }
  func.func @transform_4(%arg0: i32) -> (i32, i32) {
    %c0_i32 = arith.constant 0 : i32
    %c0_i32_0 = arith.constant 0 : i32
    %c0_i32_1 = arith.constant 0 : i32
    return %c0_i32, %c0_i32_0 : i32, i32
  }
  func.func @transform_5(%arg0: i32) -> (i32, i32) {
    %c0_i32 = arith.constant 0 : i32
    %c0_i32_0 = arith.constant 0 : i32
    %c0_i32_1 = arith.constant 0 : i32
    return %c0_i32, %c0_i32_0 : i32, i32
  }
  func.func @transform_6(%arg0: i32) -> (i32, i32) {
    %c0_i32 = arith.constant 0 : i32
    %c0_i32_0 = arith.constant 0 : i32
    %c0_i32_1 = arith.constant 0 : i32
    return %c0_i32, %c0_i32_0 : i32, i32
  }
  func.func @transform_7(%arg0: i32) -> (i32, i32) {
    %c0_i32 = arith.constant 0 : i32
    %c0_i32_0 = arith.constant 0 : i32
    %c0_i32_1 = arith.constant 0 : i32
    return %c0_i32, %c0_i32_0 : i32, i32
  }
  func.func @transform_8(%arg0: i32) -> (i32, i32) {
    %c0_i32 = arith.constant 0 : i32
    %c0_i32_0 = arith.constant 0 : i32
    %c0_i32_1 = arith.constant 0 : i32
    return %c0_i32, %c0_i32_0 : i32, i32
  }
  func.func @transform_9(%arg0: i32) -> (i32, i32) {
    %c0_i32 = arith.constant 0 : i32
    %c0_i32_0 = arith.constant 0 : i32
    %c0_i32_1 = arith.constant 0 : i32
    return %c0_i32, %c0_i32_0 : i32, i32
  }
  func.func @transform_10(%arg0: i32) -> (i32, i32) {
    %c0_i32 = arith.constant 0 : i32
    %c0_i32_0 = arith.constant 0 : i32
    %c0_i32_1 = arith.constant 0 : i32
    return %c0_i32, %c0_i32_0 : i32, i32
  }
  func.func @transform_11(%arg0: i32) -> (i32, i32) {
    %c0_i32 = arith.constant 0 : i32
    %c0_i32_0 = arith.constant 0 : i32
    %c0_i32_1 = arith.constant 0 : i32
    return %c0_i32, %c0_i32_0 : i32, i32
  }
  func.func @transform_12(%arg0: i32) -> (i32, i32) {
    %c0_i32 = arith.constant 0 : i32
    %c0_i32_0 = arith.constant 0 : i32
    %c0_i32_1 = arith.constant 0 : i32
    return %c0_i32, %c0_i32_0 : i32, i32
  }
  func.func @transform_13(%arg0: i32) -> (i32, i32) {
    %c0_i32 = arith.constant 0 : i32
    %c0_i32_0 = arith.constant 0 : i32
    %c0_i32_1 = arith.constant 0 : i32
    return %c0_i32, %c0_i32_0 : i32, i32
  }
  func.func @transform_14(%arg0: i32) -> (i32, i32) {
    %c0_i32 = arith.constant 0 : i32
    %c0_i32_0 = arith.constant 0 : i32
    %c0_i32_1 = arith.constant 0 : i32
    return %c0_i32, %c0_i32_0 : i32, i32
  }
  func.func @transform_15(%arg0: i32) -> (i32, i32) {
    %c0_i32 = arith.constant 0 : i32
    %c0_i32_0 = arith.constant 0 : i32
    %c0_i32_1 = arith.constant 0 : i32
    return %c0_i32, %c0_i32_0 : i32, i32
  }
  func.func @transform_16(%arg0: i32) -> (i32, i32) {
    %c0_i32 = arith.constant 0 : i32
    %c0_i32_0 = arith.constant 0 : i32
    %c0_i32_1 = arith.constant 0 : i32
    return %c0_i32, %c0_i32_0 : i32, i32
  }
  func.func @transform_17(%arg0: i32) -> (i32, i32) {
    %c0_i32 = arith.constant 0 : i32
    %c0_i32_0 = arith.constant 0 : i32
    return %arg0, %c0_i32 : i32, i32
  }
}

</mosaic_0001>

<bundles_post_ra>
// kernel: _lambda_.1
= control target key start
LH: loop header
LB: loop body
LE: loop exit
PB: predicated region body
PF: predicated region fallthrough
CT: control target
= control target key end

     0   :  { %s18719_s26 = smov 0   ;;  %s23838_s0 = inlined_call_operand.vmem [shape: bf16[16,16,80], index: 0, kind: input, shape index: {}]   ;;  %s23839_s1 = inlined_call_operand.vmem [shape: bf16[80,256], index: 1, kind: input, shape index: {}]   ;;  %s23840_s2 = inlined_call_operand.vmem [shape: bf16[1280,512], index: 2, kind: input, shape index: {}]   ;;  %s23841_s3 = inlined_call_operand.vmem [shape: bf16[2560,256], index: 3, kind: input, shape index: {}]   ;;  %s23842_s4 = inlined_call_operand.vmem [shape: bf16[1280,256], index: 4, kind: input, shape index: {}]   ;;  %s23843_s5 = inlined_call_operand.vmem [shape: bf16[1024,256], index: 5, kind: input, shape index: {}]   ;;  %s23844_s6 = inlined_call_operand.vmem [shape: bf16[256,128], index: 6, kind: input, shape index: {}]   ;;  %s23845_s7 = inlined_call_operand.vmem [shape: f32[128,256], index: 7, kind: input, shape index: {}]   ;;  %s23846_s8 = inlined_call_operand.vmem [shape: f32[1,256], index: 8, kind: input, shape index: {}]   ;;  %s23847_s9 = inlined_call_operand.vmem [shape: f32[1,256], index: 9, kind: input, shape index: {}]   ;;  %s23848_s10 = inlined_call_operand.vmem [shape: f32[1,512], index: 10, kind: input, shape index: {}]   ;;  %s23849_s11 = inlined_call_operand.vmem [shape: f32[1,256], index: 11, kind: input, shape index: {}]   ;;  %s23850_s12 = inlined_call_operand.vmem [shape: f32[1,256], index: 12, kind: input, shape index: {}]   ;;  %s23851_s13 = inlined_call_operand.vmem [shape: f32[1,256], index: 13, kind: input, shape index: {}]   ;;  %s23852_s14 = inlined_call_operand.vmem [shape: f32[1,128], index: 14, kind: input, shape index: {}]   ;;  %s23853_s15 = inlined_call_operand.vmem [shape: f32[1,256], index: 15, kind: input, shape index: {}]   ;;  %s23854_s16 = inlined_call_operand.<no memory space> [shape: f32[1,1], index: 16, kind: input, shape index: {}]   ;;  %s23855_s17 = inlined_call_operand.vmem [shape: f32[16,1], index: 17, kind: output, shape index: {}]  }
   0x1   :  { %23857 = sst [smem:[#allocation6_spill]] %s23838_s0  ;;  %v22_v0 = vstv %s23854_s16 }
   0x2   :  { %23858 = sst [smem:[#allocation7_spill]] %s23839_s1  ;;  %23 = vst [vmem:[#allocation5] sm:$0x1] %v22_v0 }
   0x3 LB: > { %s18725_s27 = sadd.s32 4294967295, %s18621_s26   ;;  %p14913_p0 = scmp.ge.s32.totalorder %s18621_s26, 1  ;;  %s18621_s26 = sphi %s18719_s26, %s29_s26  }
   0x4   : > { %p491_p1 = scmp.lt.s32.totalorder %s18621_s26, 3 }
   0x6   : > { %p492_p2 = pnand %p14913_p0, %p491_p1 }
   0x7   : > { %s23859_s16 = sld [smem:[#allocation7_spill]] (!%p492_p2)  ;;  %s14914_s0 = sshll.u32 (!%p492_p2), %s18725_s27, 3  ;;  %v18623_v3 = vmov (!%p492_p2), 0   ;;  %v17051_v12 = vld [vmem:[%s23840_s2 + $0x4] ss:$16 sps:$4 sm:$0xff] (!%p492_p2)   ;;  %vm683_vm0 = vcmask (!%p492_p2), 654336  }
   0x8   : > { %495 = sbr.rel (%p492_p2) target bundleno = 3132 (0xc3c), region = 88  ;;  %740 = vmatprep.mubr.bf16.mxu0 (!%p492_p2), %v18623_v3  ;;  %1088 = vst [vmem:[#allocation2] sm:$0x11] (!%p492_p2), %v18623_v3  ;;  %1089 = vst [vmem:[#allocation2 + $0x18] sm:$0x11] (!%p492_p2), %v18623_v3  ;;  %p544_p3 = scmp.lt.s32.totalorder (!%p492_p2), %s14914_s0, 15  ;;  %3962 = vmatprep.subr.bf16.mxu1 (!%p492_p2), %v17051_v12 }
   0x9   : > { %1090 = vst [vmem:[#allocation2 + $0x30] sm:$0x11] (!%p492_p2), %v18623_v3  ;;  %1091 = vst [vmem:[#allocation2 + $0x48] sm:$0x11] (!%p492_p2), %v18623_v3  ;;  %s23860_s29 = sld [smem:[#allocation6_spill]] (!%p492_p2)  ;;  %vm997_vm5 = vcmask (!%p492_p2), 1040384  }
   0xa   : > { %1092 = vst [vmem:[#allocation2 + $0x60] sm:$0x11] (!%p492_p2), %v18623_v3  ;;  %1093 = vst [vmem:[#allocation2 + $0x78] sm:$0x11] (!%p492_p2), %v18623_v3  ;;  %v17053_v13 = vld [vmem:[%s23840_s2] ss:$16 sps:$4 sm:$0xff] (!%p492_p2)  }
   0xb   : > { %1094 = vst [vmem:[#allocation2 + $0x90] sm:$0x11] (!%p492_p2), %v18623_v3  ;;  %1095 = vst [vmem:[#allocation2 + $0xa8] sm:$0x11] (!%p492_p2), %v18623_v3  ;;  %v17056_v15 = vld [vmem:[%s23840_s2 + $0xc] ss:$16 sps:$4 sm:$0xff] (!%p492_p2)   ;;  %3963 = vmatpush1.bf16.msra.mxu1 (!%p492_p2), %v17053_v13 }
   0xc   : > { %1096 = vst [vmem:[#allocation2 + $0x10] sm:$0x22] (!%p492_p2), %v18623_v3  ;;  %1097 = vst [vmem:[#allocation2 + $0x28] sm:$0x22] (!%p492_p2), %v18623_v3  ;;  %v17057_v16 = vld [vmem:[%s23840_s2 + $0x24] ss:$16 sps:$4 sm:$0xff] (!%p492_p2)  }
   0xd   : > { %v17028_v1 = vld [vmem:[%s23859_s16 + $0x4] ss:$8 sps:$4 sm:$0xff] (!%p492_p2)   ;;  %v17030_v2 = vld [vmem:[%s23859_s16] ss:$8 sps:$4 sm:$0xff] (!%p492_p2)   ;;  %1098 = vst [vmem:[#allocation2 + $0x40] sm:$0x22] (!%p492_p2), %v18623_v3  ;;  %3964 = vmatprep.subr.bf16.mxu1 (!%p492_p2), %v17057_v16 }
   0xe   : > { %1099 = vst [vmem:[#allocation2 + $0x58] sm:$0x22] (!%p492_p2), %v18623_v3  ;;  %1100 = vst [vmem:[#allocation2 + $0x70] sm:$0x22] (!%p492_p2), %v18623_v3  ;;  %708 = vmatprep.subr.bf16.mxu0 (!%p492_p2), %v17028_v1  ;;  %v17031_v4 = vld [vmem:[%s23859_s16 + $0x14] ss:$8 sps:$4 sm:$0xff] (!%p492_p2)  }
   0xf   : > { %1101 = vst [vmem:[#allocation2 + $0x88] sm:$0x22] %v18623_v3  ;;  %1102 = vst [vmem:[#allocation2 + $0xa0] sm:$0x22] %v18623_v3  ;;  %709 = vmatpush1.bf16.msra.mxu0 %v17030_v2  ;;  %v17033_v5 = vld [vmem:[%s23859_s16 + $0x10] ss:$8 sps:$4 sm:$0xff]  }
  0x10   : > { %1103 = vst [vmem:[#allocation2 + $0xb8] sm:$0x22] %v18623_v3  ;;  %5620 = vst [vmem:[#allocation3] sm:$0x11] %v18623_v3  ;;  %s23866_s0 = smov (!%p544_p3, %s14914_s0), 15  ;;  %710 = vmatprep.subr.bf16.mxu0 %v17031_v4  ;;  %vm998_vm6 = vcmask 1044484  }
  0x11   : > { %5621 = vst [vmem:[#allocation3 + $0x8] sm:$0x11] %v18623_v3  ;;  %5622 = vst [vmem:[#allocation3 + $0x30] sm:$0x11] %v18623_v3  ;;  %v17034_v6 = vld [vmem:[%s23859_s16 + $0x24] ss:$8 sps:$4 sm:$0xff]  }
  0x12   : > { %5623 = vst [vmem:[#allocation3 + $0x38] sm:$0x11] %v18623_v3  ;;  %5624 = vst [vmem:[#allocation3 + $0x60] sm:$0x11] %v18623_v3  ;;  %s16180_s24 = sshll.u32 %s23866_s0, 3  ;;  %p550_p4 = scmp.lt.s32.totalorder %s18725_s27, 1 }
  0x13   : > { %5625 = vst [vmem:[#allocation3 + $0x68] sm:$0x11] %v18623_v3  ;;  %5626 = vst [vmem:[#allocation3 + $0x90] sm:$0x11] %v18623_v3  ;;  %s18801_s30 = scalar_lea.vmem %s23860_s29, %s16180_s24  ;;  %711 = vmatpush1.bf16.msra.mxu0 %v17033_v5  ;;  %v17036_v7 = vld [vmem:[%s23859_s16 + $0x20] ss:$8 sps:$4 sm:$0xff]  }
  0x14   : > { %5627 = vst [vmem:[#allocation3 + $0x98] sm:$0x11] %v18623_v3  ;;  %5628 = vst [vmem:[#allocation3 + $0xc0] sm:$0x11] %v18623_v3  ;;  %712 = vmatprep.subr.bf16.mxu0 %v17034_v6  ;;  %v17037_v8 = vld [vmem:[%s23859_s16 + $0x34] ss:$8 sps:$4 sm:$0xff]  }
  0x15   : > { %5629 = vst [vmem:[#allocation3 + $0xc8] sm:$0x11] %v18623_v3  ;;  %5630 = vst [vmem:[#allocation3 + $0xf0] sm:$0x11] %v18623_v3  ;;  %v17039_v9 = vld [vmem:[%s23859_s16 + $0x30] ss:$8 sps:$4 sm:$0xff]  }
  0x16   : > { %5631 = vst [vmem:[#allocation3 + $0xf8] sm:$0x11] %v18623_v3  ;;  %5632 = vst [vmem:[#allocation3 + $0x120] sm:$0x11] %v18623_v3  ;;  %v17040_v10 = vld [vmem:[%s23859_s16 + $0x44] ss:$8 sps:$4 sm:$0xff]  }
  0x17   : > { %5633 = vst [vmem:[#allocation3 + $0x128] sm:$0x11] %v18623_v3  ;;  %5634 = vst [vmem:[#allocation3 + $0x150] sm:$0x11] %v18623_v3  ;;  %713 = vmatpush1.bf16.msra.mxu0 %v17036_v7  ;;  %v17042_v11 = vld [vmem:[%s23859_s16 + $0x40] ss:$8 sps:$4 sm:$0xff]  }
  0x18   : > { %5635 = vst [vmem:[#allocation3 + $0x158] sm:$0x11] %v18623_v3  ;;  %5636 = vst [vmem:[#allocation3 + $0x20] sm:$0x22] %v18623_v3  ;;  %714 = vmatprep.subr.bf16.mxu0 %v17037_v8  ;;  %v17043_v14 = vld [vmem:[%s18801_s30] sm:$0xff]   ;;  %v17044_v25 = vld [vmem:[%s18801_s30 + $0x8] sm:$0xff]  }
  0x19   : > { %5637 = vst [vmem:[#allocation3 + $0x28] sm:$0x22] %v18623_v3  ;;  %5638 = vst [vmem:[#allocation3 + $0x50] sm:$0x22] %v18623_v3  ;;  %v17059_v17 = vld [vmem:[%s23840_s2 + $0x20] ss:$16 sps:$4 sm:$0xff]  }
  0x1a   : > { %5639 = vst [vmem:[#allocation3 + $0x58] sm:$0x22] %v18623_v3  ;;  %5640 = vst [vmem:[#allocation3 + $0x80] sm:$0x22] %v18623_v3  ;;  %v17054_v18 = vld [vmem:[%s23840_s2 + $0x8] ss:$16 sps:$4 sm:$0xff]   ;;  %3965 = vmatpush1.bf16.msra.mxu1 %v17059_v17 }
  0x1b   : > { %5641 = vst [vmem:[#allocation3 + $0x88] sm:$0x22] %v18623_v3  ;;  %5642 = vst [vmem:[#allocation3 + $0xb0] sm:$0x22] %v18623_v3  ;;  %715 = vmatpush1.bf16.msra.mxu0 %v17039_v9  ;;  %v17062_v19 = vld [vmem:[%s23840_s2 + $0x2c] ss:$16 sps:$4 sm:$0xff]  }
  0x1c   : > { %5643 = vst [vmem:[#allocation3 + $0xb8] sm:$0x22] %v18623_v3  ;;  %5644 = vst [vmem:[#allocation3 + $0xe0] sm:$0x22] %v18623_v3  ;;  %716 = vmatprep.subr.bf16.mxu0 %v17040_v10  ;;  %v17063_v20 = vld [vmem:[%s23840_s2 + $0x44] ss:$16 sps:$4 sm:$0xff]  }
  0x1d   : > { %5645 = vst [vmem:[#allocation3 + $0xe8] sm:$0x22] %v18623_v3  ;;  %5646 = vst [vmem:[#allocation3 + $0x110] sm:$0x22] %v18623_v3  ;;  %v17065_v21 = vld [vmem:[%s23840_s2 + $0x40] ss:$16 sps:$4 sm:$0xff]   ;;  %3966 = vmatprep.subr.bf16.mxu1 %v17063_v20 }
  0x1e   : > { %5647 = vst [vmem:[#allocation3 + $0x118] sm:$0x22] %v18623_v3  ;;  %5648 = vst [vmem:[#allocation3 + $0x140] sm:$0x22] %v18623_v3  ;;  %v17060_v22 = vld [vmem:[%s23840_s2 + $0x28] ss:$16 sps:$4 sm:$0xff]   ;;  %3967 = vmatpush1.bf16.msra.mxu1 %v17065_v21 }
  0x1f   : > { %5649 = vst [vmem:[#allocation3 + $0x148] sm:$0x22] %v18623_v3  ;;  %5650 = vst [vmem:[#allocation3 + $0x170] sm:$0x22] %v18623_v3  ;;  %717 = vmatpush1.bf16.msra.mxu0 %v17042_v11  ;;  %v17069_v23 = vld [vmem:[%s23840_s2 + $0x64] ss:$16 sps:$4 sm:$0xff]  }
  0x20   : > { %5651 = vst [vmem:[#allocation3 + $0x178] sm:$0x22] %v18623_v3  ;;  %4527 = vmatprep.subr.bf16.mxu0 %v17056_v15  ;;  %v17068_v24 = vld [vmem:[%s23840_s2 + $0x4c] ss:$16 sps:$4 sm:$0xff]   ;;  %v17071_v26 = vld [vmem:[%s23840_s2 + $0x60] ss:$16 sps:$4 sm:$0xff]   ;;  %3968 = vmatprep.subr.bf16.mxu1 %v17069_v23  ;;  %vm19063_vm7 = vmor %vm997_vm5, %vm998_vm6 }
  0x21   : > { %v17066_v27 = vld [vmem:[%s23840_s2 + $0x48] ss:$16 sps:$4 sm:$0xff]   ;;  %v17074_v28 = vld [vmem:[%s23840_s2 + $0x6c] ss:$16 sps:$4 sm:$0xff]   ;;  %v17075_v29 = vld [vmem:[%s23840_s2 + $0x84] ss:$16 sps:$4 sm:$0xff]  }
  0x22   : > { %14936 = vmatmul.mubr.msk.bf16.vlgmr.msra.gmra.mrb[0].mxu0 %vm683_vm0, %v17043_v14  ;;  %3969 = vmatpush1.bf16.msra.mxu1 %v17071_v26  ;;  %v17077_v30 = vld [vmem:[%s23840_s2 + $0x80] ss:$16 sps:$4 sm:$0xff]   ;;  %v17072_v31 = vld [vmem:[%s23840_s2 + $0x68] ss:$16 sps:$4 sm:$0xff]   ;;  %v17081_v32 = vld [vmem:[%s23840_s2 + $0xa4] ss:$16 sps:$4 sm:$0xff]  }
  0x23   : > { %750 = vmatprep.mubr.bf16.mxu0 %v18623_v3  ;;  %4528 = vmatpush1.bf16.msra.mxu0 %v17054_v18  ;;  %v17080_v33 = vld [vmem:[%s23840_s2 + $0x8c] ss:$16 sps:$4 sm:$0xff]   ;;  %v17045_v34 = vld [vmem:[%s18801_s30 + $0x10] sm:$0xff]   ;;  %v17078_v36 = vld [vmem:[%s23840_s2 + $0x88] ss:$16 sps:$4 sm:$0xff]   ;;  %s23868_s27 = smov (!%p550_p4, %s18725_s27), 1 }
  0x24   : > { %4529 = vmatprep.subr.bf16.mxu0 %v17062_v19  ;;  %3970 = vmatprep.subr.bf16.mxu1 %v17075_v29  ;;  %v17083_v35 = vld [vmem:[%s23840_s2 + $0xa0] ss:$16 sps:$4 sm:$0xff]   ;;  %v17086_v37 = vld [vmem:[%s23840_s2 + $0xac] ss:$16 sps:$4 sm:$0xff]   ;;  %v17087_v38 = vld [vmem:[%s23840_s2 + $0xc4] ss:$16 sps:$4 sm:$0xff]  }
  0x25   : > { %v17089_v39 = vld [vmem:[%s23840_s2 + $0xc0] ss:$16 sps:$4 sm:$0xff]   ;;  %v17084_v40 = vld [vmem:[%s23840_s2 + $0xa8] ss:$16 sps:$4 sm:$0xff]   ;;  %v17093_v41 = vld [vmem:[%s23840_s2 + $0xe4] ss:$16 sps:$4 sm:$0xff]  }
  0x26   : > { %3971 = vmatpush1.bf16.msra.mxu1 %v17077_v30  ;;  %v17046_v42 = vld [vmem:[%s18801_s30 + $0x18] sm:$0xff]   ;;  %v17095_v45 = vld [vmem:[%s23840_s2 + $0xe0] ss:$16 sps:$4 sm:$0xff]   ;;  %v17099_v47 = vld [vmem:[%s23840_s2 + $0x104] ss:$16 sps:$4 sm:$0xff]   ;;  %s14917_s25 = sshll.u32 %s23868_s27, 3 }
  0x27   : > { %4530 = vmatpush1.bf16.msra.mxu0 %v17060_v22  ;;  %3972 = vmatprep.subr.bf16.mxu1 %v17081_v32  ;;  %v17092_v43 = vld [vmem:[%s23840_s2 + $0xcc] ss:$16 sps:$4 sm:$0xff]   ;;  %v17090_v44 = vld [vmem:[%s23840_s2 + $0xc8] ss:$16 sps:$4 sm:$0xff]   ;;  %v17101_v48 = vld [vmem:[%s23840_s2 + $0x100] ss:$16 sps:$4 sm:$0xff]   ;;  %v583_v22 = vlaneseq  ;;  %s553_s18 = scalar_lea.vmem %s23855_s17, %s14917_s25 }
  0x28   : > { %4531 = vmatprep.subr.bf16.mxu0 %v17068_v24  ;;  %v17098_v46 = vld [vmem:[%s23840_s2 + $0xec] ss:$16 sps:$4 sm:$0xff]   ;;  %v17096_v49 = vld [vmem:[%s23840_s2 + $0xe8] ss:$16 sps:$4 sm:$0xff]   ;;  %v17105_v50 = vld [vmem:[%s23840_s2 + $0x124] ss:$16 sps:$4 sm:$0xff]  }
  0x29   : > { %v17104_v51 = vld [vmem:[%s23840_s2 + $0x10c] ss:$16 sps:$4 sm:$0xff]   ;;  %v17047_v52 = vld [vmem:[%s18801_s30 + $0x20] sm:$0xff]   ;;  %v17102_v54 = vld [vmem:[%s23840_s2 + $0x108] ss:$16 sps:$4 sm:$0xff]   ;;  %v19040_v23 = vshrl.u32 %v583_v22, 7 }
  0x2a   : > { %14937 = vmatmul.mubr.msk.bf16.gmra.mrb[4].mxu0 %vm683_vm0, %v17044_v25  ;;  %3973 = vmatpush1.bf16.msra.mxu1 %v17083_v35  ;;  %v17107_v53 = vld [vmem:[%s23840_s2 + $0x120] ss:$16 sps:$4 sm:$0xff]   ;;  %v17110_v55 = vld [vmem:[%s23840_s2 + $0x12c] ss:$16 sps:$4 sm:$0xff]   ;;  %v17108_v56 = vld [vmem:[%s23840_s2 + $0x128] ss:$16 sps:$4 sm:$0xff]  }
  0x2b   : > { %760 = vmatprep.mubr.bf16.mxu0 %v18623_v3  ;;  %4532 = vmatpush1.bf16.msra.mxu0 %v17066_v27  ;;  %v17048_v57 = vld [vmem:[%s18801_s30 + $0x28] sm:$0xff]   ;;  %v17049_v58 = vld [vmem:[%s18801_s30 + $0x30] sm:$0xff]   ;;  %v17050_v59 = vld [vmem:[%s18801_s30 + $0x38] sm:$0xff]   ;;  %v19043_v24 = vsub.s32 0, %v19040_v23  ;;  %v19049_v26 = vsub.s32 1, %v19040_v23 }
  0x2c   : > { %4533 = vmatprep.subr.bf16.mxu0 %v17074_v28  ;;  %3974 = vmatprep.subr.bf16.mxu1 %v17087_v38  ;;  %v17111_v60 = vld [vmem:[%s23840_s2 + $0x144] ss:$16 sps:$4 sm:$0xff]   ;;  %v17116_v61 = vld [vmem:[%s23840_s2 + $0x14c] ss:$16 sps:$4 sm:$0xff]   ;;  %v17113_v62 = vld [vmem:[%s23840_s2 + $0x140] ss:$16 sps:$4 sm:$0xff]  }
  0x2d   : > { %v17114_v63 = vld [vmem:[%s23840_s2 + $0x148] ss:$16 sps:$4 sm:$0xff]   ;;  %v17117_v0 = vld [vmem:[%s23840_s2 + $0x164] ss:$16 sps:$4 sm:$0xff]   ;;  %v17122_v1 = vld [vmem:[%s23840_s2 + $0x16c] ss:$16 sps:$4 sm:$0xff]  }
  0x2e   : > { %3975 = vmatpush1.bf16.msra.mxu1 %v17089_v39  ;;  %v17119_v2 = vld [vmem:[%s23840_s2 + $0x160] ss:$16 sps:$4 sm:$0xff]   ;;  %v17123_v4 = vld [vmem:[%s23840_s2 + $0x184] ss:$16 sps:$4 sm:$0xff]   ;;  %v17128_v5 = vld [vmem:[%s23840_s2 + $0x18c] ss:$16 sps:$4 sm:$0xff]  }
  0x2f   : > { %4534 = vmatpush1.bf16.msra.mxu0 %v17072_v31  ;;  %3976 = vmatprep.subr.bf16.mxu1 %v17093_v41  ;;  %v17125_v6 = vld [vmem:[%s23840_s2 + $0x180] ss:$16 sps:$4 sm:$0xff]   ;;  %v17126_v7 = vld [vmem:[%s23840_s2 + $0x188] ss:$16 sps:$4 sm:$0xff]   ;;  %v17129_v8 = vld [vmem:[%s23840_s2 + $0x1a4] ss:$16 sps:$4 sm:$0xff]  }
  0x30   : > { %4535 = vmatprep.subr.bf16.mxu0 %v17080_v33  ;;  %v17134_v9 = vld [vmem:[%s23840_s2 + $0x1ac] ss:$16 sps:$4 sm:$0xff]   ;;  %v17131_v10 = vld [vmem:[%s23840_s2 + $0x1a0] ss:$16 sps:$4 sm:$0xff]   ;;  %v17132_v11 = vld [vmem:[%s23840_s2 + $0x1a8] ss:$16 sps:$4 sm:$0xff]  }
  0x31   : > { %v17135_v12 = vld [vmem:[%s23840_s2 + $0x1c4] ss:$16 sps:$4 sm:$0xff]   ;;  %v17140_v13 = vld [vmem:[%s23840_s2 + $0x1cc] ss:$16 sps:$4 sm:$0xff]   ;;  %v17137_v14 = vld [vmem:[%s23840_s2 + $0x1c0] ss:$16 sps:$4 sm:$0xff]  }
  0x32   : > { %14938 = vmatmul.mubr.msk.bf16.gmra.mrb[8].mxu0 %vm683_vm0, %v17045_v34  ;;  %3977 = vmatpush1.bf16.msra.mxu1 %v17095_v45  ;;  %v17138_v15 = vld [vmem:[%s23840_s2 + $0x1c8] ss:$16 sps:$4 sm:$0xff]   ;;  %v17141_v16 = vld [vmem:[%s23840_s2 + $0x1e4] ss:$16 sps:$4 sm:$0xff]   ;;  %v17146_v17 = vld [vmem:[%s23840_s2 + $0x1ec] ss:$16 sps:$4 sm:$0xff]  }
  0x33   : > { %770 = vmatprep.mubr.bf16.mxu0 %v18623_v3  ;;  %4536 = vmatpush1.bf16.msra.mxu0 %v17078_v36  ;;  %v17143_v18 = vld [vmem:[%s23840_s2 + $0x1e0] ss:$16 sps:$4 sm:$0xff]   ;;  %v17144_v19 = vld [vmem:[%s23840_s2 + $0x1e8] ss:$16 sps:$4 sm:$0xff]   ;;  %v17149_v20 = vld [vmem:[%s23840_s2 + $0x204] ss:$16 sps:$4 sm:$0xff]  }
  0x34   : > { %4537 = vmatprep.subr.bf16.mxu0 %v17086_v37  ;;  %3978 = vmatprep.subr.bf16.mxu1 %v17099_v47  ;;  %v17152_v21 = vld [vmem:[%s23840_s2 + $0x20c] ss:$16 sps:$4 sm:$0xff]   ;;  %v581_v25 = vld [vmem:[%s23847_s9] sm:$0x3] }
  0x35   : > { %v19052_v27 = vrot.slane %v581_v25, %v19043_v24  ;;  %v19055_v28 = vrot.slane %v581_v25, %v19049_v26 }
  0x36   : > { %3979 = vmatpush1.bf16.msra.mxu1 %v17101_v48 }
  0x37   : > { %4538 = vmatpush1.bf16.msra.mxu0 %v17084_v40  ;;  %3980 = vmatprep.subr.bf16.mxu1 %v17105_v50 }
  0x38   : > { %4539 = vmatprep.subr.bf16.mxu0 %v17092_v43 }
  0x3a   : > { %14939 = vmatmul.mubr.msk.bf16.gmra.mrb[12].mxu0 %vm683_vm0, %v17046_v42  ;;  %3981 = vmatpush1.bf16.msra.mxu1 %v17107_v53 }
  0x3b   : > { %780 = vmatprep.mubr.bf16.mxu0 %v18623_v3  ;;  %4540 = vmatpush1.bf16.msra.mxu0 %v17090_v44 }
  0x3c   : > { %4541 = vmatprep.subr.bf16.mxu0 %v17098_v46  ;;  %3982 = vmatprep.subr.bf16.mxu1 %v17111_v60 }
  0x3e   : > { %3983 = vmatpush1.bf16.msra.mxu1 %v17113_v62 }
  0x3f   : > { %4542 = vmatpush1.bf16.msra.mxu0 %v17096_v49  ;;  %3984 = vmatprep.subr.bf16.mxu1 %v17117_v0 }
  0x40   : > { %4543 = vmatprep.subr.bf16.mxu0 %v17104_v51 }
  0x42   : > { %14940 = vmatmul.mubr.msk.bf16.gmra.mrb[16].mxu0 %vm683_vm0, %v17047_v52  ;;  %3985 = vmatpush1.bf16.msra.mxu1 %v17119_v2 }
  0x43   : > { %790 = vmatprep.mubr.bf16.mxu0 %v18623_v3  ;;  %4544 = vmatpush1.bf16.msra.mxu0 %v17102_v54 }
  0x44   : > { %4545 = vmatprep.subr.bf16.mxu0 %v17110_v55  ;;  %3986 = vmatprep.subr.bf16.mxu1 %v17123_v4 }
  0x46   : > { %3987 = vmatpush1.bf16.msra.mxu1 %v17125_v6 }
  0x47   : > { %4546 = vmatpush1.bf16.msra.mxu0 %v17108_v56  ;;  %3988 = vmatprep.subr.bf16.mxu1 %v17129_v8 }
  0x48   : > { %4547 = vmatprep.subr.bf16.mxu0 %v17116_v61 }
  0x4a   : > { %14941 = vmatmul.mubr.msk.bf16.gmra.mrb[20].mxu0 %vm683_vm0, %v17048_v57  ;;  %3989 = vmatpush1.bf16.msra.mxu1 %v17131_v10 }
  0x4b   : > { %800 = vmatprep.mubr.bf16.mxu0 %v18623_v3  ;;  %4548 = vmatpush1.bf16.msra.mxu0 %v17114_v63 }
  0x4c   : > { %4549 = vmatprep.subr.bf16.mxu0 %v17122_v1  ;;  %3990 = vmatprep.subr.bf16.mxu1 %v17135_v12 }
  0x4e   : > { %3991 = vmatpush1.bf16.msra.mxu1 %v17137_v14 }
  0x4f   : > { %3992 = vmatprep.subr.bf16.mxu1 %v17141_v16 }
  0x52   : > { %14942 = vmatmul.mubr.msk.bf16.gmra.mrb[24].mxu0 %vm683_vm0, %v17049_v58  ;;  %3993 = vmatpush1.bf16.msra.mxu1 %v17143_v18 }
  0x53   : > { %810 = vmatprep.mubr.bf16.mxu0 %v18623_v3  ;;  %v17120_v3 = vld [vmem:[%s23840_s2 + $0x168] ss:$16 sps:$4 sm:$0xff]   ;;  %4075 = vmatprep.subr.bf16.mxu1 %v17149_v20 }
  0x54   : > { %4550 = vmatpush1.bf16.msra.mxu0 %v17120_v3 }
  0x55   : > { %4551 = vmatprep.subr.bf16.mxu0 %v17128_v5 }
  0x58   : > { %4552 = vmatpush1.bf16.msra.mxu0 %v17126_v7 }
  0x59   : > { %4553 = vmatprep.subr.bf16.mxu0 %v17134_v9 }
  0x5a   : > { %14943 = vmatmul.mubr.msk.bf16.gmra.mrb[28].mxu0 %vm683_vm0, %v17050_v59 }
  0x5c   : > { %4554 = vmatpush1.bf16.msra.mxu0 %v17132_v11 }
  0x5d   : > { %4555 = vmatprep.subr.bf16.mxu0 %v17140_v13 }
  0x60   : > { %4556 = vmatpush1.bf16.msra.mxu0 %v17138_v15 }
  0x61   : > { %4557 = vmatprep.subr.bf16.mxu0 %v17146_v17 }
  0x64   : > { %4558 = vmatpush1.bf16.msra.mxu0 %v17144_v19 }
  0x65   : > { %4640 = vmatprep.subr.bf16.mxu0 %v17152_v21 }
  0xf5   : > { %v742_v29 = vpop.f32.mrb[0].mxu0 }
  0xf6   : > { %v743_v30 = vadd.f32 %v742_v29, %v19052_v27  ;;  %v744_v31 = vpop.f32.mrb[1].mxu0 }
  0xf7   : > { %v745_v32 = vadd.f32 %v744_v31, %v19055_v28  ;;  %v746_v33 = vpop.f32.mrb[2].mxu0 }
  0xf8   : > { %vm821_vm1 = vcmp.ge.f32.partialorder %v743_v30, 0.0  ;;  %v853_v34 = vmul.f32 0.1, %v743_v30  ;;  %v747_v35 = vadd.f32 %v746_v33, %v19052_v27  ;;  %v748_v36 = vpop.f32.mrb[3].mxu0  ;;  %v17147_v33 = vld [vmem:[%s23840_s2 + $0x200] ss:$16 sps:$4 sm:$0xff]  }
  0xf9   : > { %vm822_vm2 = vcmp.ge.f32.partialorder %v745_v32, 0.0  ;;  %v854_v37 = vmul.f32 0.1, %v745_v32  ;;  %v749_v38 = vadd.f32 %v748_v36, %v19055_v28 }
  0xfa   : > { %v885_v39 = vsel %vm821_vm1, %v743_v30, %v853_v34  ;;  %vm823_vm3 = vcmp.ge.f32.partialorder %v747_v35, 0.0  ;;  %v855_v40 = vmul.f32 0.1, %v747_v35  ;;  %v17150_v34 = vld [vmem:[%s23840_s2 + $0x208] ss:$16 sps:$4 sm:$0xff]  }
  0xfb   : > { %v886_v41 = vsel %vm822_vm2, %v745_v32, %v854_v37  ;;  %vm824_vm4 = vcmp.ge.f32.partialorder %v749_v38, 0.0  ;;  %v856_v42 = vmul.f32 0.1, %v749_v38 }
  0xfc   : > { %v16181_v43 = vpack.c.bf16 %v886_v41, %v885_v39  ;;  %v887_v44 = vsel %vm823_vm3, %v747_v35, %v855_v40  ;;  %v17155_v39 = vld [vmem:[%s23840_s2 + $0x224] ss:$16 sps:$4 sm:$0xff]   ;;  %v17158_v40 = vld [vmem:[%s23840_s2 + $0x22c] ss:$16 sps:$4 sm:$0xff]  }
  0xfd   : > { %v888_v45 = vsel %vm824_vm4, %v749_v38, %v856_v42  ;;  %v752_v46 = vpop.f32.mrb[4].mxu0 }
  0xfe   : > { %v1000_v47 = vrot.slane %v16181_v43, 7  ;;  %v16182_v48 = vpack.c.bf16 %v888_v45, %v887_v44  ;;  %v753_v49 = vadd.f32 %v752_v46, %v19052_v27  ;;  %v754_v50 = vpop.f32.mrb[5].mxu0  ;;  %v17153_v46 = vld [vmem:[%s23840_s2 + $0x220] ss:$16 sps:$4 sm:$0xff]  }
  0xff   : > { %v755_v52 = vadd.f32 %v754_v50, %v19055_v28  ;;  %v756_v53 = vpop.f32.mrb[6].mxu0  ;;  %v17156_v50 = vld [vmem:[%s23840_s2 + $0x228] ss:$16 sps:$4 sm:$0xff]  }
 0x100   : > { %v1001_v54 = vrot.slane %v1000_v47, 4  ;;  %1064 = vst [vmem:[#allocation2] sm:$0xee] %v1000_v47  ;;  %v1002_v55 = vrot.slane %v16182_v48, 7  ;;  %vm825_vm8 = vcmp.ge.f32.partialorder %v753_v49, 0.0  ;;  %v758_v57 = vpop.f32.mrb[7].mxu0  ;;  %v757_v59 = vadd.f32 %v756_v53, %v19052_v27 }
 0x101   : > { %v857_v56 = vmul.f32 0.1, %v753_v49  ;;  %vm826_vm9 = vcmp.ge.f32.partialorder %v755_v52, 0.0  ;;  %v858_v58 = vmul.f32 0.1, %v755_v52  ;;  %v759_v60 = vadd.f32 %v758_v57, %v19055_v28 }
 0x102   : > { %v1003_v61 = vsel %vm19063_vm7, %v1001_v54, %v1002_v55  ;;  %v1004_v62 = vrot.slane %v1002_v55, 4  ;;  %vm827_vm10 = vcmp.ge.f32.partialorder %v757_v59, 0.0  ;;  %v859_v1 = vmul.f32 0.1, %v757_v59  ;;  %v17161_v53 = vld [vmem:[%s23840_s2 + $0x244] ss:$16 sps:$4 sm:$0xff]  }
 0x103   : > { %v889_v63 = vsel %vm825_vm8, %v753_v49, %v857_v56  ;;  %1065 = vst [vmem:[#allocation2 + $0x8] sm:$0xff] %v1003_v61  ;;  %v890_v0 = vsel %vm826_vm9, %v755_v52, %v858_v58  ;;  %vm828_vm11 = vcmp.ge.f32.partialorder %v759_v60, 0.0  ;;  %v860_v3 = vmul.f32 0.1, %v759_v60 }
 0x104   : > { %1066 = vst [vmem:[#allocation2 + $0x10] sm:$0x11] %v1004_v62  ;;  %v16183_v2 = vpack.c.bf16 %v890_v0, %v889_v63  ;;  %v891_v4 = vsel %vm827_vm10, %v757_v59, %v859_v1 }
 0x105   : > { %v762_v5 = vpop.f32.mrb[8].mxu0  ;;  %v892_v7 = vsel %vm828_vm11, %v759_v60, %v860_v3 }
 0x106   : > { %v1005_v6 = vrot.slane %v16183_v2, 7  ;;  %v763_v8 = vadd.f32 %v762_v5, %v19052_v27  ;;  %v764_v9 = vpop.f32.mrb[9].mxu0  ;;  %v16184_v10 = vpack.c.bf16 %v892_v7, %v891_v4  ;;  %v17159_v4 = vld [vmem:[%s23840_s2 + $0x240] ss:$16 sps:$4 sm:$0xff]   ;;  %v17162_v5 = vld [vmem:[%s23840_s2 + $0x248] ss:$16 sps:$4 sm:$0xff]  }
 0x107   : > { %v765_v11 = vadd.f32 %v764_v9, %v19055_v28  ;;  %v766_v12 = vpop.f32.mrb[10].mxu0  ;;  %v1104_v13 = vld [vmem:[#allocation2] sm:$0xff] }
 0x108   : > { %v1006_v14 = vrot.slane %v1005_v6, 4  ;;  %1067 = vst [vmem:[#allocation2 + $0x18] sm:$0xee] %v1005_v6  ;;  %vm829_vm12 = vcmp.ge.f32.partialorder %v763_v8, 0.0  ;;  %v861_v15 = vmul.f32 0.1, %v763_v8  ;;  %v767_v16 = vadd.f32 %v766_v12, %v19052_v27 }
 0x109   : > { %v768_v17 = vpop.f32.mrb[11].mxu0  ;;  %v1007_v18 = vrot.slane %v16184_v10, 7  ;;  %vm830_vm13 = vcmp.ge.f32.partialorder %v765_v11, 0.0  ;;  %v862_v19 = vmul.f32 0.1, %v765_v11  ;;  %v19076_v29 = vcombine.high %v1104_v13, %v1003_v61 }
 0x10a   : > { %v769_v20 = vadd.f32 %v768_v17, %v19055_v28  ;;  %v893_v21 = vsel %vm829_vm12, %v763_v8, %v861_v15  ;;  %vm831_vm14 = vcmp.ge.f32.partialorder %v767_v16, 0.0  ;;  %v863_v25 = vmul.f32 0.1, %v767_v16  ;;  %v17167_v10 = vld [vmem:[%s23840_s2 + $0x264] ss:$16 sps:$4 sm:$0xff]  }
 0x10b   : > { %v19080_v30 = vsel %vm19063_vm7, %v1006_v14, %v1007_v18  ;;  %v1009_v31 = vrot.slane %v1007_v18, 4  ;;  %v894_v32 = vsel %vm830_vm13, %v765_v11, %v862_v19  ;;  %3994 = vmatprep.mubr.bf16.mxu1 %v19076_v29  ;;  %4559 = vmatprep.mubr.bf16.mxu0 %v19076_v29  ;;  %v19091_v38 = vcombine.low %v1104_v13, %v1003_v61  ;;  %v17164_v61 = vld [vmem:[%s23840_s2 + $0x24c] ss:$16 sps:$4 sm:$0xff]   ;;  %v17165_v17 = vld [vmem:[%s23840_s2 + $0x260] ss:$16 sps:$4 sm:$0xff]  }
 0x10c   : > { %vm832_vm15 = vcmp.ge.f32.partialorder %v769_v20, 0.0  ;;  %1068 = vst [vmem:[#allocation2 + $0x20] sm:$0xff] %v19080_v30  ;;  %v16185_v35 = vpack.c.bf16 %v894_v32, %v893_v21  ;;  %v895_v36 = vsel %vm831_vm14, %v767_v16, %v863_v25  ;;  %v864_v37 = vmul.f32 0.1, %v769_v20  ;;  %v17170_v11 = vld [vmem:[%s23840_s2 + $0x26c] ss:$16 sps:$4 sm:$0xff]  }
 0x10d   : > { %1069 = vst [vmem:[#allocation2 + $0x28] sm:$0x11] %v1009_v31  ;;  %v772_v41 = vpop.f32.mrb[12].mxu0  ;;  %3995 = vmatmul.mubr.bf16.vlgmr.msra.gmra.mrb[0].mxu1 %v19091_v38  ;;  %4560 = vmatmul.mubr.bf16.vlgmr.msra.gmra.mrb[32].mxu0 %v19091_v38  ;;  %v17168_v18 = vld [vmem:[%s23840_s2 + $0x268] ss:$16 sps:$4 sm:$0xff]  }
 0x10e   : > { %v1010_v42 = vrot.slane %v16185_v35, 7  ;;  %v896_v43 = vsel %vm832_vm15, %v769_v20, %v864_v37  ;;  %v773_v44 = vadd.f32 %v772_v41, %v19052_v27  ;;  %v774_v45 = vpop.f32.mrb[13].mxu0  ;;  %4076 = vmatpush1.bf16.msra.mxu1 %v17147_v33  ;;  %4641 = vmatpush1.bf16.msra.mxu0 %v17150_v34 }
 0x10f   : > { %v16186_v47 = vpack.c.bf16 %v896_v43, %v895_v36  ;;  %v775_v48 = vadd.f32 %v774_v45, %v19055_v28  ;;  %v776_v49 = vpop.f32.mrb[14].mxu0  ;;  %v1106_v52 = vld [vmem:[#allocation2 + $0x18] sm:$0xff]  ;;  %4077 = vmatprep.subr.bf16.mxu1 %v17155_v39  ;;  %4642 = vmatprep.subr.bf16.mxu0 %v17158_v40 }
 0x110   : > { %v1011_v54 = vrot.slane %v1010_v42, 4  ;;  %1070 = vst [vmem:[#allocation2 + $0x30] sm:$0xee] %v1010_v42  ;;  %vm833_vm0 = vcmp.ge.f32.partialorder %v773_v44, 0.0  ;;  %v865_v55 = vmul.f32 0.1, %v773_v44  ;;  %v777_v56 = vadd.f32 %v776_v49, %v19052_v27 }
 0x111   : > { %v778_v57 = vpop.f32.mrb[15].mxu0  ;;  %v1012_v58 = vrot.slane %v16186_v47, 7  ;;  %vm834_vm1 = vcmp.ge.f32.partialorder %v775_v48, 0.0  ;;  %v866_v59 = vmul.f32 0.1, %v775_v48  ;;  %v19118_v0 = vcombine.high %v1106_v52, %v19080_v30 }
 0x112   : > { %v779_v60 = vadd.f32 %v778_v57, %v19055_v28  ;;  %v897_v62 = vsel %vm833_vm0, %v773_v44, %v865_v55  ;;  %vm835_vm2 = vcmp.ge.f32.partialorder %v777_v56, 0.0  ;;  %v867_v63 = vmul.f32 0.1, %v777_v56  ;;  %4078 = vmatpush1.bf16.msra.mxu1 %v17153_v46  ;;  %4643 = vmatpush1.bf16.msra.mxu0 %v17156_v50  ;;  %v17176_v39 = vld [vmem:[%s23840_s2 + $0x28c] ss:$16 sps:$4 sm:$0xff]  }
 0x113   : > { %v19122_v1 = vsel %vm19063_vm7, %v1011_v54, %v1012_v58  ;;  %v1014_v2 = vrot.slane %v1012_v58, 4  ;;  %v898_v3 = vsel %vm834_vm1, %v775_v48, %v866_v59  ;;  %4004 = vmatprep.mubr.bf16.mxu1 %v19118_v0  ;;  %4079 = vmatprep.subr.bf16.mxu1 %v17161_v53  ;;  %v19133_v9 = vcombine.low %v1106_v52, %v19080_v30  ;;  %v17173_v30 = vld [vmem:[%s23840_s2 + $0x284] ss:$16 sps:$4 sm:$0xff]   ;;  %v17171_v46 = vld [vmem:[%s23840_s2 + $0x280] ss:$16 sps:$4 sm:$0xff]  }
 0x114   : > { %vm836_vm3 = vcmp.ge.f32.partialorder %v779_v60, 0.0  ;;  %1071 = vst [vmem:[#allocation2 + $0x38] sm:$0xff] %v19122_v1  ;;  %v16187_v6 = vpack.c.bf16 %v898_v3, %v897_v62  ;;  %v899_v7 = vsel %vm835_vm2, %v777_v56, %v867_v63  ;;  %v868_v8 = vmul.f32 0.1, %v779_v60  ;;  %4569 = vmatprep.mubr.bf16.mxu0 %v19118_v0  ;;  %4644 = vmatprep.subr.bf16.mxu0 %v17164_v61  ;;  %v17174_v47 = vld [vmem:[%s23840_s2 + $0x288] ss:$16 sps:$4 sm:$0xff]  }
 0x115   : > { %1072 = vst [vmem:[#allocation2 + $0x40] sm:$0x11] %v1014_v2  ;;  %v782_v12 = vpop.f32.mrb[16].mxu0  ;;  %4005 = vmatmul.mubr.bf16.gmra.mrb[4].mxu1 %v19133_v9  ;;  %4570 = vmatmul.mubr.bf16.gmra.mrb[36].mxu0 %v19133_v9  ;;  %v17179_v53 = vld [vmem:[%s23840_s2 + $0x2a4] ss:$16 sps:$4 sm:$0xff]  }
 0x116   : > { %v1015_v13 = vrot.slane %v16187_v6, 7  ;;  %v900_v14 = vsel %vm836_vm3, %v779_v60, %v868_v8  ;;  %v783_v15 = vadd.f32 %v782_v12, %v19052_v27  ;;  %v784_v16 = vpop.f32.mrb[17].mxu0  ;;  %4080 = vmatpush1.bf16.msra.mxu1 %v17159_v4  ;;  %4645 = vmatpush1.bf16.msra.mxu0 %v17162_v5  ;;  %v17182_v54 = vld [vmem:[%s23840_s2 + $0x2ac] ss:$16 sps:$4 sm:$0xff]   ;;  %v17177_v56 = vld [vmem:[%s23840_s2 + $0x2a0] ss:$16 sps:$4 sm:$0xff]  }
 0x117   : > { %v16188_v19 = vpack.c.bf16 %v900_v14, %v899_v7  ;;  %v785_v20 = vadd.f32 %v784_v16, %v19055_v28  ;;  %v786_v21 = vpop.f32.mrb[18].mxu0  ;;  %v1108_v25 = vld [vmem:[#allocation2 + $0x30] sm:$0xff]  ;;  %4081 = vmatprep.subr.bf16.mxu1 %v17167_v10  ;;  %4646 = vmatprep.subr.bf16.mxu0 %v17170_v11  ;;  %v17180_v61 = vld [vmem:[%s23840_s2 + $0x2a8] ss:$16 sps:$4 sm:$0xff]   ;;  %v17188_v12 = vld [vmem:[%s23840_s2 + $0x2cc] ss:$16 sps:$4 sm:$0xff]  }
 0x118   : > { %v1016_v31 = vrot.slane %v1015_v13, 4  ;;  %1073 = vst [vmem:[#allocation2 + $0x48] sm:$0xee] %v1015_v13  ;;  %vm837_vm4 = vcmp.ge.f32.partialorder %v783_v15, 0.0  ;;  %v869_v32 = vmul.f32 0.1, %v783_v15  ;;  %v787_v33 = vadd.f32 %v786_v21, %v19052_v27 }
 0x119   : > { %v788_v34 = vpop.f32.mrb[19].mxu0  ;;  %v1017_v35 = vrot.slane %v16188_v19, 7  ;;  %vm838_vm5 = vcmp.ge.f32.partialorder %v785_v20, 0.0  ;;  %v870_v36 = vmul.f32 0.1, %v785_v20  ;;  %v19162_v42 = vcombine.high %v1108_v25, %v19122_v1 }
 0x11a   : > { %v789_v37 = vadd.f32 %v788_v34, %v19055_v28  ;;  %v901_v40 = vsel %vm837_vm4, %v783_v15, %v869_v32  ;;  %vm839_vm8 = vcmp.ge.f32.partialorder %v787_v33, 0.0  ;;  %v871_v41 = vmul.f32 0.1, %v787_v33  ;;  %4082 = vmatpush1.bf16.msra.mxu1 %v17165_v17  ;;  %4647 = vmatpush1.bf16.msra.mxu0 %v17168_v18  ;;  %v17185_v3 = vld [vmem:[%s23840_s2 + $0x2c4] ss:$16 sps:$4 sm:$0xff]  }
 0x11b   : > { %v19166_v43 = vsel %vm19063_vm7, %v1016_v31, %v1017_v35  ;;  %v1019_v44 = vrot.slane %v1017_v35, 4  ;;  %v902_v45 = vsel %vm838_vm5, %v785_v20, %v870_v36  ;;  %4014 = vmatprep.mubr.bf16.mxu1 %v19162_v42  ;;  %4083 = vmatprep.subr.bf16.mxu1 %v17173_v30  ;;  %v19177_v52 = vcombine.low %v1108_v25, %v19122_v1  ;;  %v17183_v19 = vld [vmem:[%s23840_s2 + $0x2c0] ss:$16 sps:$4 sm:$0xff]   ;;  %v17186_v20 = vld [vmem:[%s23840_s2 + $0x2c8] ss:$16 sps:$4 sm:$0xff]  }
 0x11c   : > { %vm840_vm9 = vcmp.ge.f32.partialorder %v789_v37, 0.0  ;;  %1074 = vst [vmem:[#allocation2 + $0x50] sm:$0xff] %v19166_v43  ;;  %v16189_v48 = vpack.c.bf16 %v902_v45, %v901_v40  ;;  %v903_v49 = vsel %vm839_vm8, %v787_v33, %v871_v41  ;;  %v872_v50 = vmul.f32 0.1, %v789_v37  ;;  %4579 = vmatprep.mubr.bf16.mxu0 %v19162_v42  ;;  %4648 = vmatprep.subr.bf16.mxu0 %v17176_v39  ;;  %v17191_v32 = vld [vmem:[%s23840_s2 + $0x2e4] ss:$16 sps:$4 sm:$0xff]  }
 0x11d   : > { %1075 = vst [vmem:[#allocation2 + $0x58] sm:$0x11] %v1019_v44  ;;  %v792_v55 = vpop.f32.mrb[20].mxu0  ;;  %4015 = vmatmul.mubr.bf16.gmra.mrb[8].mxu1 %v19177_v52  ;;  %4580 = vmatmul.mubr.bf16.gmra.mrb[40].mxu0 %v19177_v52  ;;  %v17194_v33 = vld [vmem:[%s23840_s2 + $0x2ec] ss:$16 sps:$4 sm:$0xff]  }
 0x11e   : > { %v1020_v57 = vrot.slane %v16189_v48, 7  ;;  %v904_v58 = vsel %vm840_vm9, %v789_v37, %v872_v50  ;;  %v793_v59 = vadd.f32 %v792_v55, %v19052_v27  ;;  %v794_v60 = vpop.f32.mrb[21].mxu0  ;;  %4084 = vmatpush1.bf16.msra.mxu1 %v17171_v46  ;;  %4649 = vmatpush1.bf16.msra.mxu0 %v17174_v47  ;;  %v17189_v35 = vld [vmem:[%s23840_s2 + $0x2e0] ss:$16 sps:$4 sm:$0xff]   ;;  %v17192_v41 = vld [vmem:[%s23840_s2 + $0x2e8] ss:$16 sps:$4 sm:$0xff]  }
 0x11f   : > { %v16190_v62 = vpack.c.bf16 %v904_v58, %v903_v49  ;;  %v795_v63 = vadd.f32 %v794_v60, %v19055_v28  ;;  %v796_v1 = vpop.f32.mrb[22].mxu0  ;;  %v1110_v2 = vld [vmem:[#allocation2 + $0x48] sm:$0xff]  ;;  %4085 = vmatprep.subr.bf16.mxu1 %v17179_v53  ;;  %4650 = vmatprep.subr.bf16.mxu0 %v17182_v54  ;;  %v17197_v47 = vld [vmem:[%s23840_s2 + $0x304] ss:$16 sps:$4 sm:$0xff]   ;;  %vm1272_vm8 = vsmask.f32 7424 }
 0x120   : > { %v1021_v4 = vrot.slane %v1020_v57, 4  ;;  %1076 = vst [vmem:[#allocation2 + $0x60] sm:$0xee] %v1020_v57  ;;  %vm841_vm10 = vcmp.ge.f32.partialorder %v793_v59, 0.0  ;;  %v873_v5 = vmul.f32 0.1, %v793_v59  ;;  %v797_v6 = vadd.f32 %v796_v1, %v19052_v27 }
 0x121   : > { %v798_v7 = vpop.f32.mrb[23].mxu0  ;;  %v1022_v8 = vrot.slane %v16190_v62, 7  ;;  %vm842_vm11 = vcmp.ge.f32.partialorder %v795_v63, 0.0  ;;  %v874_v10 = vmul.f32 0.1, %v795_v63  ;;  %v19206_v15 = vcombine.high %v1110_v2, %v19166_v43 }
 0x122   : > { %v799_v11 = vadd.f32 %v798_v7, %v19055_v28  ;;  %v905_v13 = vsel %vm841_vm10, %v793_v59, %v873_v5  ;;  %vm843_vm12 = vcmp.ge.f32.partialorder %v797_v6, 0.0  ;;  %v875_v14 = vmul.f32 0.1, %v797_v6  ;;  %4086 = vmatpush1.bf16.msra.mxu1 %v17177_v56  ;;  %4651 = vmatpush1.bf16.msra.mxu0 %v17180_v61  ;;  %v17200_v57 = vld [vmem:[%s23840_s2 + $0x30c] ss:$16 sps:$4 sm:$0xff]  }
 0x123   : > { %v19210_v16 = vsel %vm19063_vm7, %v1021_v4, %v1022_v8  ;;  %v1024_v17 = vrot.slane %v1022_v8, 4  ;;  %v906_v18 = vsel %vm842_vm11, %v795_v63, %v874_v10  ;;  %4024 = vmatprep.mubr.bf16.mxu1 %v19206_v15  ;;  %4087 = vmatprep.subr.bf16.mxu1 %v17185_v3  ;;  %v19221_v31 = vcombine.low %v1110_v2, %v19166_v43  ;;  %v17195_v1 = vld [vmem:[%s23840_s2 + $0x300] ss:$16 sps:$4 sm:$0xff]   ;;  %v17198_v2 = vld [vmem:[%s23840_s2 + $0x308] ss:$16 sps:$4 sm:$0xff]  }
 0x124   : > { %vm844_vm13 = vcmp.ge.f32.partialorder %v799_v11, 0.0  ;;  %1077 = vst [vmem:[#allocation2 + $0x68] sm:$0xff] %v19210_v16  ;;  %v16191_v21 = vpack.c.bf16 %v906_v18, %v905_v13  ;;  %v907_v25 = vsel %vm843_vm12, %v797_v6, %v875_v14  ;;  %v876_v30 = vmul.f32 0.1, %v799_v11  ;;  %4589 = vmatprep.mubr.bf16.mxu0 %v19206_v15  ;;  %4652 = vmatprep.subr.bf16.mxu0 %v17188_v12  ;;  %v17203_v7 = vld [vmem:[%s23840_s2 + $0x324] ss:$16 sps:$4 sm:$0xff]  }
 0x125   : > { %1078 = vst [vmem:[#allocation2 + $0x70] sm:$0x11] %v1024_v17  ;;  %v802_v34 = vpop.f32.mrb[24].mxu0  ;;  %4025 = vmatmul.mubr.bf16.gmra.mrb[12].mxu1 %v19221_v31  ;;  %4590 = vmatmul.mubr.bf16.gmra.mrb[44].mxu0 %v19221_v31  ;;  %v17206_v8 = vld [vmem:[%s23840_s2 + $0x32c] ss:$16 sps:$4 sm:$0xff]   ;;  %vm1521_vm9 = vcmask 1046528  }
 0x126   : > { %v1025_v36 = vrot.slane %v16191_v21, 7  ;;  %v908_v37 = vsel %vm844_vm13, %v799_v11, %v876_v30  ;;  %v803_v39 = vadd.f32 %v802_v34, %v19052_v27  ;;  %v804_v40 = vpop.f32.mrb[25].mxu0  ;;  %4088 = vmatpush1.bf16.msra.mxu1 %v17183_v19  ;;  %4653 = vmatpush1.bf16.msra.mxu0 %v17186_v20  ;;  %v17201_v11 = vld [vmem:[%s23840_s2 + $0x320] ss:$16 sps:$4 sm:$0xff]   ;;  %v17204_v17 = vld [vmem:[%s23840_s2 + $0x328] ss:$16 sps:$4 sm:$0xff]  }
 0x127   : > { %v16192_v43 = vpack.c.bf16 %v908_v37, %v907_v25  ;;  %v805_v44 = vadd.f32 %v804_v40, %v19055_v28  ;;  %v806_v45 = vpop.f32.mrb[26].mxu0  ;;  %v1112_v46 = vld [vmem:[#allocation2 + $0x60] sm:$0xff]  ;;  %4089 = vmatprep.subr.bf16.mxu1 %v17191_v32  ;;  %4654 = vmatprep.subr.bf16.mxu0 %v17194_v33  ;;  %vm1626_vm10 = vsmask.f32 6400  ;;  %vm1955_vm11 = vcmask 1045504  }
 0x128   : > { %v1026_v48 = vrot.slane %v1025_v36, 4  ;;  %1079 = vst [vmem:[#allocation2 + $0x78] sm:$0xee] %v1025_v36  ;;  %vm845_vm14 = vcmp.ge.f32.partialorder %v803_v39, 0.0  ;;  %v877_v49 = vmul.f32 0.1, %v803_v39  ;;  %v807_v50 = vadd.f32 %v806_v45, %v19052_v27 }
 0x129   : > { %v808_v53 = vpop.f32.mrb[27].mxu0  ;;  %v1027_v54 = vrot.slane %v16192_v43, 7  ;;  %vm846_vm15 = vcmp.ge.f32.partialorder %v805_v44, 0.0  ;;  %v878_v55 = vmul.f32 0.1, %v805_v44  ;;  %v19250_v60 = vcombine.high %v1112_v46, %v19210_v16 }
 0x12a   : > { %v809_v56 = vadd.f32 %v808_v53, %v19055_v28  ;;  %v909_v58 = vsel %vm845_vm14, %v803_v39, %v877_v49  ;;  %vm847_vm0 = vcmp.ge.f32.partialorder %v807_v50, 0.0  ;;  %v879_v59 = vmul.f32 0.1, %v807_v50  ;;  %4090 = vmatpush1.bf16.msra.mxu1 %v17189_v35  ;;  %4655 = vmatpush1.bf16.msra.mxu0 %v17192_v41  ;;  %v17209_v25 = vld [vmem:[%s23840_s2 + $0x344] ss:$16 sps:$4 sm:$0xff]  }
 0x12b   : > { %v19254_v61 = vsel %vm19063_vm7, %v1026_v48, %v1027_v54  ;;  %v1029_v62 = vrot.slane %v1027_v54, 4  ;;  %v910_v63 = vsel %vm846_vm15, %v805_v44, %v878_v55  ;;  %4034 = vmatprep.mubr.bf16.mxu1 %v19250_v60  ;;  %4091 = vmatprep.subr.bf16.mxu1 %v17197_v47  ;;  %v19265_v6 = vcombine.low %v1112_v46, %v19210_v16  ;;  %v17212_v39 = vld [vmem:[%s23840_s2 + $0x34c] ss:$16 sps:$4 sm:$0xff]   ;;  %v17210_v46 = vld [vmem:[%s23840_s2 + $0x348] ss:$16 sps:$4 sm:$0xff]  }
 0x12c   : > { %vm848_vm1 = vcmp.ge.f32.partialorder %v809_v56, 0.0  ;;  %1080 = vst [vmem:[#allocation2 + $0x80] sm:$0xff] %v19254_v61  ;;  %v16193_v3 = vpack.c.bf16 %v910_v63, %v909_v58  ;;  %v911_v4 = vsel %vm847_vm0, %v807_v50, %v879_v59  ;;  %v880_v5 = vmul.f32 0.1, %v809_v56  ;;  %4599 = vmatprep.mubr.bf16.mxu0 %v19250_v60  ;;  %4656 = vmatprep.subr.bf16.mxu0 %v17200_v57  ;;  %v17215_v53 = vld [vmem:[%s23840_s2 + $0x364] ss:$16 sps:$4 sm:$0xff]  }
 0x12d   : > { %1081 = vst [vmem:[#allocation2 + $0x88] sm:$0x11] %v1029_v62  ;;  %v812_v10 = vpop.f32.mrb[28].mxu0  ;;  %4035 = vmatmul.mubr.bf16.gmra.mrb[16].mxu1 %v19265_v6  ;;  %4600 = vmatmul.mubr.bf16.gmra.mrb[48].mxu0 %v19265_v6  ;;  %v17218_v54 = vld [vmem:[%s23840_s2 + $0x36c] ss:$16 sps:$4 sm:$0xff]  }
 0x12e   : > { %v1030_v12 = vrot.slane %v16193_v3, 7  ;;  %v912_v13 = vsel %vm848_vm1, %v809_v56, %v880_v5  ;;  %v813_v14 = vadd.f32 %v812_v10, %v19052_v27  ;;  %v814_v16 = vpop.f32.mrb[29].mxu0  ;;  %4092 = vmatpush1.bf16.msra.mxu1 %v17195_v1  ;;  %4657 = vmatpush1.bf16.msra.mxu0 %v17198_v2  ;;  %v17213_v57 = vld [vmem:[%s23840_s2 + $0x360] ss:$16 sps:$4 sm:$0xff]   ;;  %v17216_v59 = vld [vmem:[%s23840_s2 + $0x368] ss:$16 sps:$4 sm:$0xff]  }
 0x12f   : > { %v16194_v18 = vpack.c.bf16 %v912_v13, %v911_v4  ;;  %v815_v19 = vadd.f32 %v814_v16, %v19055_v28  ;;  %v816_v20 = vpop.f32.mrb[30].mxu0  ;;  %v1114_v21 = vld [vmem:[#allocation2 + $0x78] sm:$0xff]  ;;  %4093 = vmatprep.subr.bf16.mxu1 %v17203_v7  ;;  %4658 = vmatprep.subr.bf16.mxu0 %v17206_v8  ;;  %v1120_v62 = vld [vmem:[#allocation2 + $0x10] sm:$0x11]  ;;  %v1288_v16 = vshll.u32 %v19076_v29, 16 }
 0x130   : > { %v1031_v30 = vrot.slane %v1030_v12, 4  ;;  %1082 = vst [vmem:[#allocation2 + $0x90] sm:$0xee] %v1030_v12  ;;  %vm849_vm2 = vcmp.ge.f32.partialorder %v813_v14, 0.0  ;;  %v881_v32 = vmul.f32 0.1, %v813_v14  ;;  %v817_v33 = vadd.f32 %v816_v20, %v19052_v27 }
 0x131   : > { %v818_v34 = vpop.f32.mrb[31].mxu0  ;;  %v1032_v35 = vrot.slane %v16194_v18, 7  ;;  %vm850_vm3 = vcmp.ge.f32.partialorder %v815_v19, 0.0  ;;  %v882_v36 = vmul.f32 0.1, %v815_v19  ;;  %v19294_v43 = vcombine.high %v1114_v21, %v19254_v61 }
 0x132   : > { %v819_v37 = vadd.f32 %v818_v34, %v19055_v28  ;;  %v913_v40 = vsel %vm849_vm2, %v813_v14, %v881_v32  ;;  %vm851_vm4 = vcmp.ge.f32.partialorder %v817_v33, 0.0  ;;  %v883_v41 = vmul.f32 0.1, %v817_v33  ;;  %4094 = vmatpush1.bf16.msra.mxu1 %v17201_v11  ;;  %4659 = vmatpush1.bf16.msra.mxu0 %v17204_v17  ;;  %v17207_v28 = vld [vmem:[%s23840_s2 + $0x340] ss:$16 sps:$4 sm:$0xff]  }
 0x133   : > { %v1033_v27 = vsel %vm19063_vm7, %v1031_v30, %v1032_v35  ;;  %v1034_v44 = vrot.slane %v1032_v35, 4  ;;  %v914_v45 = vsel %vm850_vm3, %v815_v19, %v882_v36  ;;  %4044 = vmatprep.mubr.bf16.mxu1 %v19294_v43  ;;  %4095 = vmatprep.subr.bf16.mxu1 %v17209_v25  ;;  %v19306_v50 = vcombine.low %v1114_v21, %v19254_v61  ;;  %v17221_v2 = vld [vmem:[%s23840_s2 + $0x384] ss:$16 sps:$4 sm:$0xff]   ;;  %v17224_v3 = vld [vmem:[%s23840_s2 + $0x38c] ss:$16 sps:$4 sm:$0xff]  }
 0x134   : > { %vm852_vm5 = vcmp.ge.f32.partialorder %v819_v37, 0.0  ;;  %1083 = vst [vmem:[#allocation2 + $0x98] sm:$0xff] %v1033_v27  ;;  %v16195_v47 = vpack.c.bf16 %v914_v45, %v913_v40  ;;  %v915_v48 = vsel %vm851_vm4, %v817_v33, %v883_v41  ;;  %v884_v49 = vmul.f32 0.1, %v819_v37  ;;  %4609 = vmatprep.mubr.bf16.mxu0 %v19294_v43  ;;  %4660 = vmatprep.subr.bf16.mxu0 %v17212_v39  ;;  %v17219_v11 = vld [vmem:[%s23840_s2 + $0x380] ss:$16 sps:$4 sm:$0xff]  }
 0x135   : > { %1084 = vst [vmem:[#allocation2 + $0xa0] sm:$0x11] %v1034_v44  ;;  %4045 = vmatmul.mubr.bf16.gmra.mrb[20].mxu1 %v19306_v50  ;;  %4610 = vmatmul.mubr.bf16.gmra.mrb[52].mxu0 %v19306_v50  ;;  %v19336_v7 = vcombine.high %v1120_v62, %v1120_v62  ;;  %v17222_v12 = vld [vmem:[%s23840_s2 + $0x388] ss:$16 sps:$4 sm:$0xff]   ;;  %v17227_v13 = vld [vmem:[%s23840_s2 + $0x3a4] ss:$16 sps:$4 sm:$0xff]   ;;  %v19370_v34 = vcombine.low %v1120_v62, %v1120_v62 }
 0x136   : > { %v1035_v55 = vrot.slane %v16195_v47, 7  ;;  %v916_v56 = vsel %vm852_vm5, %v819_v37, %v884_v49  ;;  %4096 = vmatpush1.bf16.msra.mxu1 %v17207_v28  ;;  %4661 = vmatpush1.bf16.msra.mxu0 %v17210_v46  ;;  %v17230_v14 = vld [vmem:[%s23840_s2 + $0x3ac] ss:$16 sps:$4 sm:$0xff]   ;;  %v17225_v17 = vld [vmem:[%s23840_s2 + $0x3a0] ss:$16 sps:$4 sm:$0xff]   ;;  %v1290_v32 = vrot.slane %v1288_v16, 1 }
 0x137   : > { %v16196_v58 = vpack.c.bf16 %v916_v56, %v915_v48  ;;  %v1116_v61 = vld [vmem:[#allocation2 + $0x90] sm:$0xff]  ;;  %4097 = vmatprep.subr.bf16.mxu1 %v17215_v53  ;;  %4662 = vmatprep.subr.bf16.mxu0 %v17218_v54  ;;  %v1293_v18 = vshll.u32 %v19336_v7, 16  ;;  %v17228_v19 = vld [vmem:[%s23840_s2 + $0x3a8] ss:$16 sps:$4 sm:$0xff]   ;;  %v17236_v30 = vld [vmem:[%s23840_s2 + $0x3cc] ss:$16 sps:$4 sm:$0xff]  }
 0x138   : > { %v1036_v63 = vrot.slane %v1035_v55, 4  ;;  %1085 = vst [vmem:[#allocation2 + $0xa8] sm:$0xee] %v1035_v55  ;;  %v19324_v1 = vcombine.high %v1116_v61, %v1033_v27  ;;  %v19334_v5 = vcombine.low %v1116_v61, %v1033_v27  ;;  %v17233_v21 = vld [vmem:[%s23840_s2 + $0x3c4] ss:$16 sps:$4 sm:$0xff]   ;;  %v1286_v36 = vshrl.u32 %v19076_v29, 16 }
 0x139   : > { %v1037_v4 = vrot.slane %v16196_v58, 7  ;;  %v1121_v33 = vld [vmem:[#allocation2 + $0x28] sm:$0x11]  ;;  %v1295_v37 = vrot.slane %v1293_v18, 1  ;;  %v1276_v39 = vshll.u32 %v19091_v38, 16  ;;  %v1281_v28 = vshll.u32 %v19370_v34, 16 }
 0x13a   : > { %4054 = vmatprep.mubr.bf16.mxu1 %v19324_v1  ;;  %4619 = vmatprep.mubr.bf16.mxu0 %v19324_v1  ;;  %v17231_v40 = vld [vmem:[%s23840_s2 + $0x3c0] ss:$16 sps:$4 sm:$0xff]   ;;  %v19381_v41 = vcombine.high %v1121_v33, %v1121_v33  ;;  %v17234_v27 = vld [vmem:[%s23840_s2 + $0x3c8] ss:$16 sps:$4 sm:$0xff]   ;;  %v1291_v44 = vor.u32 %v1290_v32, %v1286_v36  ;;  %v17241_v29 = vld [vmem:[%s23840_s2 + $0x3e4] ss:$16 sps:$4 sm:$0xff]   ;;  %v19411_v62 = vcombine.low %v1121_v33, %v1121_v33 }
 0x13b   : > { %v1038_v8 = vsel %vm19063_vm7, %v1036_v63, %v1037_v4  ;;  %v1039_v10 = vrot.slane %v1037_v4, 4  ;;  %4098 = vmatpush1.bf16.msra.mxu1 %v17213_v57  ;;  %4663 = vmatpush1.bf16.msra.mxu0 %v17216_v59  ;;  %v17244_v45 = vld [vmem:[%s23840_s2 + $0x3ec] ss:$16 sps:$4 sm:$0xff]   ;;  %v1312_v46 = vshll.u32 %v19118_v0, 16  ;;  %v1278_v48 = vrot.slane %v1276_v39, 1 }
 0x13c   : > { %1086 = vst [vmem:[#allocation2 + $0xb0] sm:$0xff] %v1038_v8  ;;  %4099 = vmatprep.subr.bf16.mxu1 %v17221_v2  ;;  %4664 = vmatprep.subr.bf16.mxu0 %v17224_v3  ;;  %v1296_v47 = vsel %vm1272_vm8, %v1291_v44, %v1295_v37  ;;  %v17239_v49 = vld [vmem:[%s23840_s2 + $0x3e0] ss:$16 sps:$4 sm:$0xff]   ;;  %v17242_v53 = vld [vmem:[%s23840_s2 + $0x3e8] ss:$16 sps:$4 sm:$0xff]   ;;  %v1317_v54 = vshll.u32 %v19381_v41, 16 }
 0x13d   : > { %1087 = vst [vmem:[#allocation2 + $0xb8] sm:$0x11] %v1039_v10  ;;  %4055 = vmatmul.mubr.bf16.gmra.mrb[24].mxu1 %v19334_v5  ;;  %4620 = vmatmul.mubr.bf16.gmra.mrb[56].mxu0 %v19334_v5  ;;  %v17247_v55 = vld [vmem:[%s23840_s2 + $0x404] ss:$16 sps:$4 sm:$0xff]   ;;  %v1274_v56 = vshrl.u32 %v19091_v38, 16  ;;  %v1283_v58 = vrot.slane %v1281_v28, 1 }
 0x13e   : > { %v1122_v57 = vld [vmem:[#allocation2 + $0x40] sm:$0x11]  ;;  %v17250_v59 = vld [vmem:[%s23840_s2 + $0x40c] ss:$16 sps:$4 sm:$0xff]   ;;  %v1314_v61 = vrot.slane %v1312_v46, 1  ;;  %v1310_v3 = vshrl.u32 %v19118_v0, 16 }
 0x13f   : > { %4100 = vmatpush1.bf16.msra.mxu1 %v17219_v11  ;;  %4665 = vmatpush1.bf16.msra.mxu0 %v17222_v12  ;;  %v1118_v20 = vld [vmem:[#allocation2 + $0xa8] sm:$0xff]  ;;  %v1279_v63 = vor.u32 %v1278_v48, %v1274_v56  ;;  %v17245_v2 = vld [vmem:[%s23840_s2 + $0x400] ss:$16 sps:$4 sm:$0xff]   ;;  %v1319_v38 = vrot.slane %v1317_v54, 1  ;;  %v1300_v4 = vshll.u32 %v19133_v9, 16  ;;  %v1305_v0 = vshll.u32 %v19411_v62, 16 }
 0x140   : > { %4101 = vmatprep.subr.bf16.mxu1 %v17227_v13  ;;  %4666 = vmatprep.subr.bf16.mxu0 %v17230_v14  ;;  %v19365_v25 = vcombine.high %v1118_v20, %v1038_v8  ;;  %v19374_v35 = vcombine.low %v1118_v20, %v1038_v8  ;;  %v19418_v8 = vcombine.high %v1122_v57, %v1122_v57  ;;  %v17248_v11 = vld [vmem:[%s23840_s2 + $0x408] ss:$16 sps:$4 sm:$0xff]   ;;  %v17254_v13 = vld [vmem:[%s23840_s2 + $0x424] ss:$16 sps:$4 sm:$0xff]   ;;  %v1336_v14 = vshll.u32 %v19162_v42, 16 }
 0x141   : > { %v1284_v10 = vsel %vm1272_vm8, %v1279_v63, %v1283_v58  ;;  %v1315_v12 = vor.u32 %v1314_v61, %v1310_v3  ;;  %v17257_v16 = vld [vmem:[%s23840_s2 + $0x42c] ss:$16 sps:$4 sm:$0xff]   ;;  %v17252_v18 = vld [vmem:[%s23840_s2 + $0x420] ss:$16 sps:$4 sm:$0xff]   ;;  %v17255_v32 = vld [vmem:[%s23840_s2 + $0x428] ss:$16 sps:$4 sm:$0xff]   ;;  %v19444_v39 = vcombine.low %v1122_v57, %v1122_v57 }
 0x142   : > { %4064 = vmatprep.mubr.bf16.mxu1 %v19365_v25  ;;  %4629 = vmatprep.mubr.bf16.mxu0 %v19365_v25  ;;  %v1341_v20 = vshll.u32 %v19418_v8, 16  ;;  %v1298_v33 = vshrl.u32 %v19133_v9, 16  ;;  %v1307_v36 = vrot.slane %v1305_v0, 1  ;;  %v1338_v37 = vrot.slane %v1336_v14, 1  ;;  %v17258_v44 = vld [vmem:[%s23840_s2 + $0x440] ss:$16 sps:$4 sm:$0xff]  }
 0x143   : > { %4102 = vmatpush1.bf16.msra.mxu1 %v17225_v17  ;;  %4667 = vmatpush1.bf16.msra.mxu0 %v17228_v19  ;;  %v1320_v17 = vsel %vm1272_vm8, %v1315_v12, %v1319_v38  ;;  %v1302_v19 = vrot.slane %v1300_v4, 1  ;;  %v1324_v9 = vshll.u32 %v19177_v52, 16  ;;  %v17262_v46 = vld [vmem:[%s23840_s2 + $0x448] ss:$16 sps:$4 sm:$0xff]   ;;  %v17268_v48 = vld [vmem:[%s23840_s2 + $0x464] ss:$16 sps:$4 sm:$0xff]  }
 0x144   : > { %4103 = vmatprep.subr.bf16.mxu1 %v17233_v21  ;;  %4668 = vmatprep.subr.bf16.mxu0 %v17236_v30  ;;  %v17260_v21 = vld [vmem:[%s23840_s2 + $0x444] ss:$16 sps:$4 sm:$0xff]   ;;  %v1123_v30 = vld [vmem:[#allocation2 + $0x58] sm:$0x11]  ;;  %v17266_v56 = vld [vmem:[%s23840_s2 + $0x460] ss:$16 sps:$4 sm:$0xff]  }
 0x145   : > { %4065 = vmatmul.mubr.bf16.gmra.mrb[28].mxu1 %v19374_v35  ;;  %4630 = vmatmul.mubr.bf16.gmra.mrb[60].mxu0 %v19374_v35  ;;  %v19454_v28 = vcombine.high %v1123_v30, %v1123_v30  ;;  %v17271_v54 = vld [vmem:[%s23840_s2 + $0x46c] ss:$16 sps:$4 sm:$0xff]   ;;  %v1326_v57 = vrot.slane %v1324_v9, 1  ;;  %v1124_v61 = vld [vmem:[#allocation2 + $0x70] sm:$0x11]  ;;  %v19480_v4 = vcombine.low %v1123_v30, %v1123_v30  ;;  %v1384_v30 = vshll.u32 %v19250_v60, 16 }
 0x146   : > { %4107 = vmatprep.mubr.bf16.mxu1 %v1296_v47  ;;  %4672 = vmatprep.mubr.bf16.mxu0 %v1296_v47  ;;  %v17269_v63 = vld [vmem:[%s23840_s2 + $0x468] ss:$16 sps:$4 sm:$0xff]   ;;  %v17272_v12 = vld [vmem:[%s23840_s2 + $0x480] ss:$16 sps:$4 sm:$0xff]   ;;  %v19490_v14 = vcombine.high %v1124_v61, %v1124_v61  ;;  %v19516_v9 = vcombine.low %v1124_v61, %v1124_v61 }
 0x147   : > { %4104 = vmatpush1.bf16.msra.mxu1 %v17231_v40  ;;  %4669 = vmatpush1.bf16.msra.mxu0 %v17234_v27  ;;  %v17264_v40 = vld [vmem:[%s23840_s2 + $0x44c] ss:$16 sps:$4 sm:$0xff]   ;;  %v1334_v27 = vshrl.u32 %v19162_v42, 16  ;;  %v1365_v58 = vshll.u32 %v19454_v28, 16 }
 0x148   : > { %4105 = vmatprep.subr.bf16.mxu1 %v17241_v29  ;;  %4670 = vmatprep.subr.bf16.mxu0 %v17244_v45  ;;  %v1303_v29 = vor.u32 %v1302_v19, %v1298_v33  ;;  %v1343_v45 = vrot.slane %v1341_v20, 1  ;;  %v17282_v19 = vld [vmem:[%s23840_s2 + $0x4a4] ss:$16 sps:$4 sm:$0xff]   ;;  %v17285_v20 = vld [vmem:[%s23840_s2 + $0x4ac] ss:$16 sps:$4 sm:$0xff]  }
 0x149   : > { %v1339_v42 = vor.u32 %v1338_v37, %v1334_v27  ;;  %v1367_v0 = vrot.slane %v1365_v58, 1  ;;  %v17288_v37 = vld [vmem:[%s23840_s2 + $0x4c4] ss:$16 sps:$4 sm:$0xff]   ;;  %v17283_v27 = vld [vmem:[%s23840_s2 + $0x4a8] ss:$16 sps:$4 sm:$0xff]   ;;  %v1408_v58 = vshll.u32 %v19294_v43, 16 }
 0x14a   : > { %v1308_v47 = vsel %vm1272_vm8, %v1303_v29, %v1307_v36  ;;  %v1389_v36 = vshll.u32 %v19490_v14, 16 }
 0x14b   : > { %4106 = vmatpush1.bf16.msra.mxu1 %v17239_v49  ;;  %4671 = vmatpush1.bf16.msra.mxu0 %v17242_v53  ;;  %v1329_v49 = vshll.u32 %v19444_v39, 16  ;;  %v1360_v53 = vshll.u32 %v19206_v15, 16 }
 0x14c   : > { %4188 = vmatprep.subr.bf16.mxu1 %v17247_v55  ;;  %4753 = vmatprep.subr.bf16.mxu0 %v17250_v59  ;;  %v1344_v55 = vsel %vm1272_vm8, %v1339_v42, %v1343_v45  ;;  %v17274_v59 = vld [vmem:[%s23840_s2 + $0x484] ss:$16 sps:$4 sm:$0xff]   ;;  %v1386_v45 = vrot.slane %v1384_v30, 1  ;;  %v17286_v42 = vld [vmem:[%s23840_s2 + $0x4c0] ss:$16 sps:$4 sm:$0xff]  }
 0x14d   : > { %v1331_v3 = vrot.slane %v1329_v49, 1  ;;  %v1362_v38 = vrot.slane %v1360_v53, 1  ;;  %v1391_v49 = vrot.slane %v1389_v36, 1 }
 0x14e   : > { %4108 = vmatmul.mubr.bf16.vlgmr.msra.gmra.mrb[0].mxu1 %v1284_v10  ;;  %4673 = vmatmul.mubr.bf16.vlgmr.msra.gmra.mrb[32].mxu0 %v1284_v10  ;;  %v17278_v10 = vld [vmem:[%s23840_s2 + $0x48c] ss:$16 sps:$4 sm:$0xff]  }
 0x14f   : > { %4189 = vmatpush1.bf16.msra.mxu1 %v17245_v2  ;;  %4117 = vmatprep.mubr.bf16.mxu1 %v1320_v17  ;;  %v1322_v2 = vshrl.u32 %v19177_v52, 16  ;;  %v1348_v52 = vshll.u32 %v19221_v31, 16 }
 0x150   : > { %4682 = vmatprep.mubr.bf16.mxu0 %v1320_v17  ;;  %4754 = vmatpush1.bf16.msra.mxu0 %v17248_v11  ;;  %v1358_v11 = vshrl.u32 %v19206_v15, 16 }
 0x151   : > { %4190 = vmatprep.subr.bf16.mxu1 %v17254_v13  ;;  %4755 = vmatprep.subr.bf16.mxu0 %v17257_v16  ;;  %v1327_v13 = vor.u32 %v1326_v57, %v1322_v2  ;;  %v17276_v16 = vld [vmem:[%s23840_s2 + $0x488] ss:$16 sps:$4 sm:$0xff]   ;;  %v1350_v33 = vrot.slane %v1348_v52, 1  ;;  %v1377_v57 = vshll.u32 %v19516_v9, 16  ;;  %v1410_v52 = vrot.slane %v1408_v58, 1 }
 0x152   : > { %v1363_v15 = vor.u32 %v1362_v38, %v1358_v11  ;;  %v17297_v38 = vld [vmem:[%s23840_s2 + $0x4e8] ss:$16 sps:$4 sm:$0xff]   ;;  %v1126_v11 = vld [vmem:[#allocation2 + $0xa0] sm:$0x11] }
 0x153   : > { %4191 = vmatpush1.bf16.msra.mxu1 %v17252_v18  ;;  %v1332_v17 = vsel %vm1272_vm8, %v1327_v13, %v1331_v3  ;;  %v17280_v18 = vld [vmem:[%s23840_s2 + $0x4a0] ss:$16 sps:$4 sm:$0xff]   ;;  %v1379_v13 = vrot.slane %v1377_v57, 1 }
 0x154   : > { %4192 = vmatprep.subr.bf16.mxu1 %v17260_v21  ;;  %4756 = vmatpush1.bf16.msra.mxu0 %v17255_v32  ;;  %v1353_v21 = vshll.u32 %v19480_v4, 16  ;;  %v1368_v32 = vsel %vm1272_vm8, %v1363_v15, %v1367_v0  ;;  %v17306_v0 = vld [vmem:[%s23840_s2 + $0x50c] ss:$16 sps:$4 sm:$0xff]   ;;  %v17300_v15 = vld [vmem:[%s23840_s2 + $0x500] ss:$16 sps:$4 sm:$0xff]  }
 0x155   : > { %4757 = vmatprep.subr.bf16.mxu0 %v17264_v40  ;;  %v1125_v40 = vld [vmem:[#allocation2 + $0x88] sm:$0x11] }
 0x156   : > { %4118 = vmatmul.mubr.bf16.gmra.mrb[4].mxu1 %v1308_v47  ;;  %4683 = vmatmul.mubr.bf16.gmra.mrb[36].mxu0 %v1308_v47  ;;  %v1355_v29 = vrot.slane %v1353_v21, 1  ;;  %v1382_v47 = vshrl.u32 %v19250_v60, 16  ;;  %v19526_v53 = vcombine.high %v1125_v40, %v1125_v40  ;;  %v19565_v21 = vcombine.high %v1126_v11, %v1126_v11 }
 0x157   : > { %4193 = vmatpush1.bf16.msra.mxu1 %v17258_v44  ;;  %4127 = vmatprep.mubr.bf16.mxu1 %v1344_v55  ;;  %v1346_v44 = vshrl.u32 %v19221_v31, 16  ;;  %v1372_v31 = vshll.u32 %v19265_v6, 16 }
 0x158   : > { %4692 = vmatprep.mubr.bf16.mxu0 %v1344_v55  ;;  %4758 = vmatpush1.bf16.msra.mxu0 %v17262_v46  ;;  %v17292_v46 = vld [vmem:[%s23840_s2 + $0x4cc] ss:$16 sps:$4 sm:$0xff]   ;;  %v1387_v60 = vor.u32 %v1386_v45, %v1382_v47  ;;  %v1413_v3 = vshll.u32 %v19526_v53, 16  ;;  %v17316_v45 = vld [vmem:[%s23840_s2 + $0x544] ss:$16 sps:$4 sm:$0xff]  }
 0x159   : > { %4194 = vmatprep.subr.bf16.mxu1 %v17268_v48  ;;  %4759 = vmatprep.subr.bf16.mxu0 %v17271_v54  ;;  %v1351_v48 = vor.u32 %v1350_v33, %v1346_v44  ;;  %v17290_v54 = vld [vmem:[%s23840_s2 + $0x4c8] ss:$16 sps:$4 sm:$0xff]   ;;  %v1374_v2 = vrot.slane %v1372_v31, 1  ;;  %v17310_v33 = vld [vmem:[%s23840_s2 + $0x524] ss:$16 sps:$4 sm:$0xff]   ;;  %v19588_v31 = vcombine.low %v1126_v11, %v1126_v11 }
 0x15a   : > { %v1392_v61 = vsel %vm1272_vm8, %v1387_v60, %v1391_v49  ;;  %v17311_v47 = vld [vmem:[%s23840_s2 + $0x528] ss:$16 sps:$4 sm:$0xff]   ;;  %v17314_v60 = vld [vmem:[%s23840_s2 + $0x540] ss:$16 sps:$4 sm:$0xff]  }
 0x15b   : > { %4195 = vmatpush1.bf16.msra.mxu1 %v17266_v56  ;;  %v1356_v55 = vsel %vm1272_vm8, %v1351_v48, %v1355_v29  ;;  %v17296_v56 = vld [vmem:[%s23840_s2 + $0x4e4] ss:$16 sps:$4 sm:$0xff]   ;;  %v1437_v29 = vshll.u32 %v19565_v21, 16 }
 0x15c   : > { %4196 = vmatprep.subr.bf16.mxu1 %v17274_v59  ;;  %4760 = vmatpush1.bf16.msra.mxu0 %v17269_v63  ;;  %v17299_v59 = vld [vmem:[%s23840_s2 + $0x4ec] ss:$16 sps:$4 sm:$0xff]   ;;  %v17294_v63 = vld [vmem:[%s23840_s2 + $0x4e0] ss:$16 sps:$4 sm:$0xff]  }
 0x15d   : > { %4761 = vmatprep.subr.bf16.mxu0 %v17278_v10  ;;  %v17302_v10 = vld [vmem:[%s23840_s2 + $0x504] ss:$16 sps:$4 sm:$0xff]   ;;  %v1439_v57 = vrot.slane %v1437_v29, 1 }
 0x15e   : > { %4128 = vmatmul.mubr.bf16.gmra.mrb[8].mxu1 %v1332_v17  ;;  %4693 = vmatmul.mubr.bf16.gmra.mrb[40].mxu0 %v1332_v17  ;;  %v1406_v17 = vshrl.u32 %v19294_v43, 16  ;;  %v1128_v29 = vld [vmem:[#allocation2] sm:$0xee] }
 0x15f   : > { %4197 = vmatpush1.bf16.msra.mxu1 %v17272_v12  ;;  %4137 = vmatprep.mubr.bf16.mxu1 %v1368_v32  ;;  %v1370_v12 = vshrl.u32 %v19265_v6, 16  ;;  %v17304_v6 = vld [vmem:[%s23840_s2 + $0x508] ss:$16 sps:$4 sm:$0xff]  }
 0x160   : > { %4702 = vmatprep.mubr.bf16.mxu0 %v1368_v32  ;;  %4762 = vmatpush1.bf16.msra.mxu0 %v17276_v16  ;;  %v19555_v16 = vcombine.low %v1125_v40, %v1125_v40  ;;  %v1411_v43 = vor.u32 %v1410_v52, %v1406_v17  ;;  %v17308_v32 = vld [vmem:[%s23840_s2 + $0x520] ss:$16 sps:$4 sm:$0xff]   ;;  %v17313_v40 = vld [vmem:[%s23840_s2 + $0x52c] ss:$16 sps:$4 sm:$0xff]   ;;  %v17325_v52 = vld [vmem:[%s23840_s2 + $0x568] ss:$16 sps:$4 sm:$0xff]  }
 0x161   : > { %4198 = vmatprep.subr.bf16.mxu1 %v17282_v19  ;;  %4763 = vmatprep.subr.bf16.mxu0 %v17285_v20  ;;  %v1415_v19 = vrot.slane %v1413_v3, 1  ;;  %v1396_v20 = vshll.u32 %v19306_v50, 16  ;;  %v17327_v3 = vld [vmem:[%s23840_s2 + $0x56c] ss:$16 sps:$4 sm:$0xff]   ;;  %v1418_v17 = vshrl.u32 %v19334_v5, 16 }
 0x162   : > { %v1401_v36 = vshll.u32 %v19555_v16, 16 }
 0x163   : > { %4199 = vmatpush1.bf16.msra.mxu1 %v17280_v18  ;;  %v1375_v18 = vor.u32 %v1374_v2, %v1370_v12  ;;  %v1398_v44 = vrot.slane %v1396_v20, 1  ;;  %v17324_v2 = vld [vmem:[%s23840_s2 + $0x564] ss:$16 sps:$4 sm:$0xff]   ;;  %v17334_v20 = vld [vmem:[%s23840_s2 + $0x58c] ss:$16 sps:$4 sm:$0xff]  }
 0x164   : > { %4200 = vmatprep.subr.bf16.mxu1 %v17288_v37  ;;  %4764 = vmatpush1.bf16.msra.mxu0 %v17283_v27  ;;  %v1432_v37 = vshll.u32 %v19324_v1, 16  ;;  %v1416_v27 = vsel %vm1272_vm8, %v1411_v43, %v1415_v19  ;;  %v1403_v48 = vrot.slane %v1401_v36, 1  ;;  %v17328_v19 = vld [vmem:[%s23840_s2 + $0x580] ss:$16 sps:$4 sm:$0xff]   ;;  %v17332_v43 = vld [vmem:[%s23840_s2 + $0x588] ss:$16 sps:$4 sm:$0xff]  }
 0x165   : > { %4765 = vmatprep.subr.bf16.mxu0 %v17292_v46  ;;  %v1380_v30 = vsel %vm1272_vm8, %v1375_v18, %v1379_v13  ;;  %v1127_v46 = vld [vmem:[#allocation2 + $0xb8] sm:$0x11]  ;;  %v1444_v36 = vshll.u32 %v19374_v35, 16 }
 0x166   : > { %4138 = vmatmul.mubr.bf16.gmra.mrb[12].mxu1 %v1356_v55  ;;  %4703 = vmatmul.mubr.bf16.gmra.mrb[44].mxu0 %v1356_v55  ;;  %v1434_v49 = vrot.slane %v1432_v37, 1  ;;  %v1430_v55 = vshrl.u32 %v19324_v1, 16  ;;  %v19598_v58 = vcombine.high %v1127_v46, %v1127_v46 }
 0x167   : > { %4201 = vmatpush1.bf16.msra.mxu1 %v17286_v42  ;;  %4147 = vmatprep.mubr.bf16.mxu1 %v1392_v61  ;;  %v1394_v42 = vshrl.u32 %v19306_v50, 16  ;;  %v1420_v50 = vshll.u32 %v19334_v5, 16  ;;  %v1454_v5 = vshrl.u32 %v19365_v25, 16 }
 0x168   : > { %4712 = vmatprep.mubr.bf16.mxu0 %v1392_v61  ;;  %4766 = vmatpush1.bf16.msra.mxu0 %v17290_v54  ;;  %v17320_v54 = vld [vmem:[%s23840_s2 + $0x54c] ss:$16 sps:$4 sm:$0xff]   ;;  %v1435_v1 = vor.u32 %v1434_v49, %v1430_v55  ;;  %v1461_v13 = vshll.u32 %v19598_v58, 16 }
 0x169   : > { %4202 = vmatprep.subr.bf16.mxu1 %v17296_v56  ;;  %4767 = vmatprep.subr.bf16.mxu0 %v17299_v59  ;;  %v1399_v56 = vor.u32 %v1398_v44, %v1394_v42  ;;  %v17318_v59 = vld [vmem:[%s23840_s2 + $0x548] ss:$16 sps:$4 sm:$0xff]   ;;  %v1422_v12 = vrot.slane %v1420_v50, 1 }
 0x16a   : > { %v1440_v11 = vsel %vm1272_vm8, %v1435_v1, %v1439_v57  ;;  %v17339_v42 = vld [vmem:[%s23840_s2 + $0x5a8] ss:$16 sps:$4 sm:$0xff]   ;;  %v17349_v1 = vld [vmem:[%s23840_s2 + $0x5e0] ss:$16 sps:$4 sm:$0xff]  }
 0x16b   : > { %4203 = vmatpush1.bf16.msra.mxu1 %v17294_v63  ;;  %v1404_v61 = vsel %vm1272_vm8, %v1399_v56, %v1403_v48  ;;  %v17322_v63 = vld [vmem:[%s23840_s2 + $0x560] ss:$16 sps:$4 sm:$0xff]   ;;  %v1442_v48 = vshrl.u32 %v19374_v35, 16  ;;  %v18567_v55 = vld [vmem:[#allocation2 + $0x8] sm:$0xff]  ;;  %v1526_v35 = vrot.slane %v19336_v7, 1 }
 0x16c   : > { %4204 = vmatprep.subr.bf16.mxu1 %v17302_v10  ;;  %4768 = vmatpush1.bf16.msra.mxu0 %v17297_v38  ;;  %v1425_v38 = vshll.u32 %v19588_v31, 16  ;;  %v1456_v10 = vshll.u32 %v19365_v25, 16  ;;  %v17342_v56 = vld [vmem:[%s23840_s2 + $0x5c0] ss:$16 sps:$4 sm:$0xff]   ;;  %v17346_v50 = vld [vmem:[%s23840_s2 + $0x5c8] ss:$16 sps:$4 sm:$0xff]  }
 0x16d   : > { %4769 = vmatprep.subr.bf16.mxu0 %v17306_v0  ;;  %v17330_v0 = vld [vmem:[%s23840_s2 + $0x584] ss:$16 sps:$4 sm:$0xff]   ;;  %v17354_v7 = vld [vmem:[%s23840_s2 + $0x5ec] ss:$16 sps:$4 sm:$0xff]  }
 0x16e   : > { %4148 = vmatmul.mubr.bf16.gmra.mrb[16].mxu1 %v1380_v30  ;;  %4713 = vmatmul.mubr.bf16.gmra.mrb[48].mxu0 %v1380_v30  ;;  %v1458_v18 = vrot.slane %v1456_v10, 1  ;;  %v1423_v30 = vor.u32 %v1422_v12, %v1418_v17  ;;  %v17357_v10 = vld [vmem:[%s23840_s2 + $0x604] ss:$16 sps:$4 sm:$0xff]   ;;  %v17360_v17 = vld [vmem:[%s23840_s2 + $0x60c] ss:$16 sps:$4 sm:$0xff]  }
 0x16f   : > { %4205 = vmatpush1.bf16.msra.mxu1 %v17300_v15  ;;  %4157 = vmatprep.mubr.bf16.mxu1 %v1416_v27  ;;  %v1427_v15 = vrot.slane %v1425_v38, 1 }
 0x170   : > { %4722 = vmatprep.mubr.bf16.mxu0 %v1416_v27  ;;  %4770 = vmatpush1.bf16.msra.mxu0 %v17304_v6  ;;  %v19624_v6 = vcombine.low %v1127_v46, %v1127_v46  ;;  %v17341_v27 = vld [vmem:[%s23840_s2 + $0x5ac] ss:$16 sps:$4 sm:$0xff]   ;;  %v1446_v46 = vrot.slane %v1444_v36, 1  ;;  %v17364_v36 = vld [vmem:[%s23840_s2 + $0x628] ss:$16 sps:$4 sm:$0xff]  }
 0x171   : > { %4206 = vmatprep.subr.bf16.mxu1 %v17310_v33  ;;  %4771 = vmatprep.subr.bf16.mxu0 %v17313_v40  ;;  %v17338_v33 = vld [vmem:[%s23840_s2 + $0x5a4] ss:$16 sps:$4 sm:$0xff]   ;;  %v1428_v37 = vsel %vm1272_vm8, %v1423_v30, %v1427_v15  ;;  %v1459_v40 = vor.u32 %v1458_v18, %v1454_v5  ;;  %v1532_v15 = vrot.slane %v19381_v41, 1  ;;  %v17366_v30 = vld [vmem:[%s23840_s2 + $0x62c] ss:$16 sps:$4 sm:$0xff]  }
 0x172   : > { %v1449_v44 = vshll.u32 %v19624_v6, 16  ;;  %v1447_v57 = vor.u32 %v1446_v46, %v1442_v48  ;;  %v17361_v5 = vld [vmem:[%s23840_s2 + $0x620] ss:$16 sps:$4 sm:$0xff]   ;;  %v17375_v46 = vld [vmem:[%s23840_s2 + $0x664] ss:$16 sps:$4 sm:$0xff]  }
 0x173   : > { %4207 = vmatpush1.bf16.msra.mxu1 %v17308_v32  ;;  %v1463_v32 = vrot.slane %v1461_v13, 1  ;;  %v17352_v13 = vld [vmem:[%s23840_s2 + $0x5e8] ss:$16 sps:$4 sm:$0xff]  }
 0x174   : > { %4208 = vmatprep.subr.bf16.mxu1 %v17316_v45  ;;  %4772 = vmatpush1.bf16.msra.mxu0 %v17311_v47  ;;  %v17336_v45 = vld [vmem:[%s23840_s2 + $0x5a0] ss:$16 sps:$4 sm:$0xff]   ;;  %v17344_v47 = vld [vmem:[%s23840_s2 + $0x5c4] ss:$16 sps:$4 sm:$0xff]   ;;  %v1451_v49 = vrot.slane %v1449_v44, 1 }
 0x175   : > { %4773 = vmatprep.subr.bf16.mxu0 %v17320_v54  ;;  %v1464_v25 = vsel %vm1272_vm8, %v1459_v40, %v1463_v32  ;;  %v17348_v54 = vld [vmem:[%s23840_s2 + $0x5cc] ss:$16 sps:$4 sm:$0xff]  }
 0x176   : > { %4158 = vmatmul.mubr.bf16.gmra.mrb[20].mxu1 %v1404_v61  ;;  %4723 = vmatmul.mubr.bf16.gmra.mrb[52].mxu0 %v1404_v61  ;;  %v17372_v40 = vld [vmem:[%s23840_s2 + $0x64c] ss:$16 sps:$4 sm:$0xff]  }
 0x177   : > { %4209 = vmatpush1.bf16.msra.mxu1 %v17314_v60  ;;  %4167 = vmatprep.mubr.bf16.mxu1 %v1440_v11  ;;  %v19659_v60 = vcombine.high %v1128_v29, %v18567_v55  ;;  %v1131_v48 = vld [vmem:[#allocation2 + $0x48] sm:$0xee] }
 0x178   : > { %4732 = vmatprep.mubr.bf16.mxu0 %v1440_v11  ;;  %4774 = vmatpush1.bf16.msra.mxu0 %v17318_v59  ;;  %v1452_v59 = vsel %vm1272_vm8, %v1447_v57, %v1451_v49  ;;  %v18568_v11 = vld [vmem:[#allocation2 + $0x20] sm:$0xff]  ;;  %v17376_v57 = vld [vmem:[%s23840_s2 + $0x668] ss:$16 sps:$4 sm:$0xff]  }
 0x179   : > { %4210 = vmatprep.subr.bf16.mxu1 %v17324_v2  ;;  %4775 = vmatprep.subr.bf16.mxu0 %v17327_v3  ;;  %v1525_v61 = vrot.slane %v19659_v60, 1  ;;  %v1129_v2 = vld [vmem:[#allocation2 + $0x18] sm:$0xee]  ;;  %v19679_v3 = vcombine.low %v1128_v29, %v18567_v55  ;;  %v17367_v29 = vld [vmem:[%s23840_s2 + $0x640] ss:$16 sps:$4 sm:$0xff]  }
 0x17a   : > { %v19685_v12 = vcombine.high %v1129_v2, %v18568_v11 }
 0x17b   : > { %4211 = vmatpush1.bf16.msra.mxu1 %v17322_v63  ;;  %v17351_v63 = vld [vmem:[%s23840_s2 + $0x5e4] ss:$16 sps:$4 sm:$0xff]   ;;  %v1527_v38 = vsel %vm1521_vm9, %v1525_v61, %v1526_v35  ;;  %v1522_v18 = vrot.slane %v19679_v3, 1  ;;  %v17384_v35 = vld [vmem:[%s23840_s2 + $0x68c] ss:$16 sps:$4 sm:$0xff]  }
 0x17c   : > { %4212 = vmatprep.subr.bf16.mxu1 %v17330_v0  ;;  %4776 = vmatpush1.bf16.msra.mxu0 %v17325_v52  ;;  %v1523_v0 = vrot.slane %v19370_v34, 1  ;;  %v17355_v52 = vld [vmem:[%s23840_s2 + $0x600] ss:$16 sps:$4 sm:$0xff]   ;;  %v17363_v34 = vld [vmem:[%s23840_s2 + $0x624] ss:$16 sps:$4 sm:$0xff]  }
 0x17d   : > { %4777 = vmatprep.subr.bf16.mxu0 %v17334_v20  ;;  %v1531_v20 = vrot.slane %v19685_v12, 1 }
 0x17e   : > { %4168 = vmatmul.mubr.bf16.gmra.mrb[24].mxu1 %v1428_v37  ;;  %4733 = vmatmul.mubr.bf16.gmra.mrb[56].mxu0 %v1428_v37  ;;  %v1524_v41 = vsel %vm1521_vm9, %v1522_v18, %v1523_v0  ;;  %v19720_v37 = vcombine.low %v1129_v2, %v18568_v11  ;;  %v1544_v2 = vrot.slane %v19454_v28, 1  ;;  %v1132_v11 = vld [vmem:[#allocation2 + $0x60] sm:$0xee] }
 0x17f   : > { %4213 = vmatpush1.bf16.msra.mxu1 %v17328_v19  ;;  %4177 = vmatprep.mubr.bf16.mxu1 %v1464_v25  ;;  %v17358_v19 = vld [vmem:[%s23840_s2 + $0x608] ss:$16 sps:$4 sm:$0xff]   ;;  %v1533_v32 = vsel %vm1521_vm9, %v1531_v20, %v1532_v15  ;;  %v17385_v0 = vld [vmem:[%s23840_s2 + $0x6a0] ss:$16 sps:$4 sm:$0xff]  }
 0x180   : > { %4742 = vmatprep.mubr.bf16.mxu0 %v1464_v25  ;;  %4778 = vmatpush1.bf16.msra.mxu0 %v17332_v43  ;;  %v1130_v43 = vld [vmem:[#allocation2 + $0x30] sm:$0xee]  ;;  %v1529_v25 = vrot.slane %v19411_v62, 1  ;;  %v17378_v62 = vld [vmem:[%s23840_s2 + $0x66c] ss:$16 sps:$4 sm:$0xff]  }
 0x181   : > { %4214 = vmatprep.subr.bf16.mxu1 %v17338_v33  ;;  %4779 = vmatprep.subr.bf16.mxu0 %v17341_v27  ;;  %v17369_v33 = vld [vmem:[%s23840_s2 + $0x644] ss:$16 sps:$4 sm:$0xff]   ;;  %v18569_v27 = vld [vmem:[#allocation2 + $0x38] sm:$0xff] }
 0x182   : > { %v19725_v44 = vcombine.high %v1130_v43, %v18569_v27  ;;  %v17388_v15 = vld [vmem:[%s23840_s2 + $0x6a8] ss:$16 sps:$4 sm:$0xff]  }
 0x183   : > { %4215 = vmatpush1.bf16.msra.mxu1 %v17336_v45  ;;  %v1538_v45 = vrot.slane %v19418_v8, 1 }
 0x184   : > { %4216 = vmatprep.subr.bf16.mxu1 %v17344_v47  ;;  %4780 = vmatpush1.bf16.msra.mxu0 %v17339_v42  ;;  %v1528_v47 = vrot.slane %v19720_v37, 1  ;;  %v17370_v42 = vld [vmem:[%s23840_s2 + $0x648] ss:$16 sps:$4 sm:$0xff]   ;;  %v1537_v49 = vrot.slane %v19725_v44, 1 }
 0x185   : > { %4781 = vmatprep.subr.bf16.mxu0 %v17348_v54  ;;  %v17373_v54 = vld [vmem:[%s23840_s2 + $0x660] ss:$16 sps:$4 sm:$0xff]  }
 0x186   : > { %4178 = vmatmul.mubr.bf16.gmra.mrb[28].mxu1 %v1452_v59  ;;  %4743 = vmatmul.mubr.bf16.gmra.mrb[60].mxu0 %v1452_v59  ;;  %v1530_v8 = vsel %vm1521_vm9, %v1528_v47, %v1529_v25  ;;  %v1539_v55 = vsel %vm1521_vm9, %v1537_v49, %v1538_v45  ;;  %v18570_v59 = vld [vmem:[#allocation2 + $0x50] sm:$0xff]  ;;  %v17400_v45 = vld [vmem:[%s23840_s2 + $0x6e8] ss:$16 sps:$4 sm:$0xff]   ;;  %v17408_v47 = vld [vmem:[%s23840_s2 + $0x70c] ss:$16 sps:$4 sm:$0xff]  }
 0x187   : > { %4217 = vmatpush1.bf16.msra.mxu1 %v17342_v56  ;;  %4220 = vmatprep.mubr.bf16.mxu1 %v1527_v38  ;;  %v17381_v56 = vld [vmem:[%s23840_s2 + $0x684] ss:$16 sps:$4 sm:$0xff]   ;;  %v19759_v61 = vcombine.high %v1131_v48, %v18570_v59  ;;  %v19788_v18 = vcombine.low %v1131_v48, %v18570_v59  ;;  %v17403_v49 = vld [vmem:[%s23840_s2 + $0x700] ss:$16 sps:$4 sm:$0xff]  }
 0x188   : > { %4785 = vmatprep.mubr.bf16.mxu0 %v1527_v38  ;;  %4782 = vmatpush1.bf16.msra.mxu0 %v17346_v50  ;;  %v19754_v50 = vcombine.low %v1130_v43, %v18569_v27  ;;  %v1541_v43 = vrot.slane %v19480_v4, 1  ;;  %v17402_v4 = vld [vmem:[%s23840_s2 + $0x6ec] ss:$16 sps:$4 sm:$0xff]   ;;  %v17397_v27 = vld [vmem:[%s23840_s2 + $0x6e0] ss:$16 sps:$4 sm:$0xff]  }
 0x189   : > { %4218 = vmatprep.subr.bf16.mxu1 %v17351_v63  ;;  %4783 = vmatprep.subr.bf16.mxu0 %v17354_v7  ;;  %v1535_v63 = vrot.slane %v19444_v39, 1  ;;  %v17387_v7 = vld [vmem:[%s23840_s2 + $0x6a4] ss:$16 sps:$4 sm:$0xff]   ;;  %v17390_v39 = vld [vmem:[%s23840_s2 + $0x6ac] ss:$16 sps:$4 sm:$0xff]  }
 0x18a   : > { %v1534_v38 = vrot.slane %v19754_v50, 1  ;;  %v17405_v25 = vld [vmem:[%s23840_s2 + $0x704] ss:$16 sps:$4 sm:$0xff]   ;;  %v17409_v59 = vld [vmem:[%s23840_s2 + $0x720] ss:$16 sps:$4 sm:$0xff]  }
 0x18b   : > { %4219 = vmatpush1.bf16.msra.mxu1 %v17349_v1  ;;  %v17379_v1 = vld [vmem:[%s23840_s2 + $0x680] ss:$16 sps:$4 sm:$0xff]  }
 0x18c   : > { %4301 = vmatprep.subr.bf16.mxu1 %v17357_v10  ;;  %4784 = vmatpush1.bf16.msra.mxu0 %v17352_v13  ;;  %v17382_v10 = vld [vmem:[%s23840_s2 + $0x688] ss:$16 sps:$4 sm:$0xff]   ;;  %v1543_v13 = vrot.slane %v19759_v61, 1  ;;  %v1536_v28 = vsel %vm1521_vm9, %v1534_v38, %v1535_v63  ;;  %v17417_v63 = vld [vmem:[%s23840_s2 + $0x744] ss:$16 sps:$4 sm:$0xff]  }
 0x18d   : > { %4866 = vmatprep.subr.bf16.mxu0 %v17360_v17  ;;  %v17393_v17 = vld [vmem:[%s23840_s2 + $0x6c4] ss:$16 sps:$4 sm:$0xff]   ;;  %v17420_v38 = vld [vmem:[%s23840_s2 + $0x74c] ss:$16 sps:$4 sm:$0xff]  }
 0x18e   : > { %4221 = vmatmul.mubr.bf16.vlgmr.msra.gmra.mrb[0].mxu1 %v1524_v41 }
 0x18f   : > { %4302 = vmatpush1.bf16.msra.mxu1 %v17355_v52  ;;  %4230 = vmatprep.mubr.bf16.mxu1 %v1533_v32  ;;  %v1545_v52 = vsel %vm1521_vm9, %v1543_v13, %v1544_v2  ;;  %v17412_v2 = vld [vmem:[%s23840_s2 + $0x728] ss:$16 sps:$4 sm:$0xff]   ;;  %v17415_v13 = vld [vmem:[%s23840_s2 + $0x740] ss:$16 sps:$4 sm:$0xff]  }
 0x190   : > { %4786 = vmatmul.mubr.bf16.vlgmr.msra.gmra.mrb[32].mxu0 %v1524_v41  ;;  %4303 = vmatprep.subr.bf16.mxu1 %v17363_v34  ;;  %v18571_v34 = vld [vmem:[#allocation2 + $0x68] sm:$0xff]  ;;  %v1550_v41 = vrot.slane %v19490_v14, 1 }
 0x191   : > { %4795 = vmatprep.mubr.bf16.mxu0 %v1533_v32  ;;  %4867 = vmatpush1.bf16.msra.mxu0 %v17358_v19  ;;  %v17396_v19 = vld [vmem:[%s23840_s2 + $0x6cc] ss:$16 sps:$4 sm:$0xff]   ;;  %v19793_v20 = vcombine.high %v1132_v11, %v18571_v34  ;;  %v1540_v32 = vrot.slane %v19788_v18, 1 }
 0x192   : > { %4868 = vmatprep.subr.bf16.mxu0 %v17366_v30  ;;  %v17391_v30 = vld [vmem:[%s23840_s2 + $0x6c0] ss:$16 sps:$4 sm:$0xff]  }
 0x193   : > { %4304 = vmatpush1.bf16.msra.mxu1 %v17361_v5  ;;  %v17399_v5 = vld [vmem:[%s23840_s2 + $0x6e4] ss:$16 sps:$4 sm:$0xff]   ;;  %v1542_v14 = vsel %vm1521_vm9, %v1540_v32, %v1541_v43  ;;  %v17424_v32 = vld [vmem:[%s23840_s2 + $0x768] ss:$16 sps:$4 sm:$0xff]  }
 0x194   : > { %4305 = vmatprep.subr.bf16.mxu1 %v17369_v33  ;;  %v17394_v33 = vld [vmem:[%s23840_s2 + $0x6c8] ss:$16 sps:$4 sm:$0xff]  }
 0x195   : > { %4869 = vmatpush1.bf16.msra.mxu0 %v17364_v36  ;;  %v1133_v36 = vld [vmem:[#allocation2 + $0x78] sm:$0xee] }
 0x196   : > { %4231 = vmatmul.mubr.bf16.gmra.mrb[4].mxu1 %v1530_v8  ;;  %4870 = vmatprep.subr.bf16.mxu0 %v17372_v40  ;;  %v1549_v40 = vrot.slane %v19793_v20, 1 }
 0x197   : > { %4306 = vmatpush1.bf16.msra.mxu1 %v17367_v29  ;;  %4240 = vmatprep.mubr.bf16.mxu1 %v1539_v55 }
 0x198   : > { %4796 = vmatmul.mubr.bf16.gmra.mrb[36].mxu0 %v1530_v8  ;;  %4307 = vmatprep.subr.bf16.mxu1 %v17375_v46  ;;  %v1551_v29 = vsel %vm1521_vm9, %v1549_v40, %v1550_v41  ;;  %v19822_v46 = vcombine.low %v1132_v11, %v18571_v34  ;;  %v1556_v8 = vrot.slane %v19526_v53, 1  ;;  %v17429_v41 = vld [vmem:[%s23840_s2 + $0x784] ss:$16 sps:$4 sm:$0xff]  }
 0x199   : > { %4805 = vmatprep.mubr.bf16.mxu0 %v1539_v55  ;;  %4871 = vmatpush1.bf16.msra.mxu0 %v17370_v42  ;;  %v18572_v42 = vld [vmem:[#allocation2 + $0x80] sm:$0xff]  ;;  %v18574_v40 = vld [vmem:[#allocation2 + $0xb0] sm:$0xff] }
 0x19a   : > { %4872 = vmatprep.subr.bf16.mxu0 %v17378_v62  ;;  %v19827_v48 = vcombine.high %v1133_v36, %v18572_v42  ;;  %v1547_v62 = vrot.slane %v19516_v9, 1  ;;  %v1546_v55 = vrot.slane %v19822_v46, 1  ;;  %v17414_v9 = vld [vmem:[%s23840_s2 + $0x72c] ss:$16 sps:$4 sm:$0xff]  }
 0x19b   : > { %4308 = vmatpush1.bf16.msra.mxu1 %v17373_v54  ;;  %v17411_v54 = vld [vmem:[%s23840_s2 + $0x724] ss:$16 sps:$4 sm:$0xff]  }
 0x19c   : > { %4309 = vmatprep.subr.bf16.mxu1 %v17381_v56  ;;  %v17406_v56 = vld [vmem:[%s23840_s2 + $0x708] ss:$16 sps:$4 sm:$0xff]   ;;  %v1548_v53 = vsel %vm1521_vm9, %v1546_v55, %v1547_v62 }
 0x19d   : > { %4873 = vmatpush1.bf16.msra.mxu0 %v17376_v57  ;;  %v1134_v57 = vld [vmem:[#allocation2 + $0x90] sm:$0xee]  ;;  %v17430_v62 = vld [vmem:[%s23840_s2 + $0x788] ss:$16 sps:$4 sm:$0xff]  }
 0x19e   : > { %4241 = vmatmul.mubr.bf16.gmra.mrb[8].mxu1 %v1536_v28  ;;  %4874 = vmatprep.subr.bf16.mxu0 %v17384_v35  ;;  %v1555_v35 = vrot.slane %v19827_v48, 1 }
 0x19f   : > { %4310 = vmatpush1.bf16.msra.mxu1 %v17379_v1  ;;  %4250 = vmatprep.mubr.bf16.mxu1 %v1545_v52 }
 0x1a0   : > { %4806 = vmatmul.mubr.bf16.gmra.mrb[40].mxu0 %v1536_v28  ;;  %4311 = vmatprep.subr.bf16.mxu1 %v17387_v7  ;;  %v1557_v1 = vsel %vm1521_vm9, %v1555_v35, %v1556_v8  ;;  %v19856_v7 = vcombine.low %v1133_v36, %v18572_v42  ;;  %v1136_v28 = vld [vmem:[#allocation2 + $0x10] sm:$0x33]  ;;  %v17432_v36 = vld [vmem:[%s23840_s2 + $0x78c] ss:$16 sps:$4 sm:$0xff]   ;;  %v1645_v8 = vshrl.u32 %v19659_v60, 16 }
 0x1a1   : > { %4815 = vmatprep.mubr.bf16.mxu0 %v1545_v52  ;;  %4875 = vmatpush1.bf16.msra.mxu0 %v17382_v10  ;;  %v18573_v10 = vld [vmem:[#allocation2 + $0x98] sm:$0xff]  ;;  %v17423_v52 = vld [vmem:[%s23840_s2 + $0x764] ss:$16 sps:$4 sm:$0xff]  }
 0x1a2   : > { %4876 = vmatprep.subr.bf16.mxu0 %v17390_v39  ;;  %v19861_v11 = vcombine.high %v1134_v57, %v18573_v10  ;;  %v1553_v39 = vrot.slane %v19555_v16, 1  ;;  %v17426_v16 = vld [vmem:[%s23840_s2 + $0x76c] ss:$16 sps:$4 sm:$0xff]  }
 0x1a3   : > { %4312 = vmatpush1.bf16.msra.mxu1 %v17385_v0  ;;  %v1562_v0 = vrot.slane %v19565_v21, 1 }
 0x1a4   : > { %4313 = vmatprep.subr.bf16.mxu1 %v17393_v17  ;;  %v1552_v17 = vrot.slane %v19856_v7, 1  ;;  %v1561_v34 = vrot.slane %v19861_v11, 1 }
 0x1a5   : > { %4877 = vmatpush1.bf16.msra.mxu0 %v17388_v15  ;;  %v17418_v15 = vld [vmem:[%s23840_s2 + $0x748] ss:$16 sps:$4 sm:$0xff]  }
 0x1a6   : > { %4251 = vmatmul.mubr.bf16.gmra.mrb[12].mxu1 %v1542_v14  ;;  %4878 = vmatprep.subr.bf16.mxu0 %v17396_v19  ;;  %v1135_v19 = vld [vmem:[#allocation2 + $0xa8] sm:$0xee]  ;;  %v1554_v21 = vsel %vm1521_vm9, %v1552_v17, %v1553_v39  ;;  %v1563_v43 = vsel %vm1521_vm9, %v1561_v34, %v1562_v0  ;;  %v1565_v39 = vrot.slane %v19624_v6, 1 }
 0x1a7   : > { %4314 = vmatpush1.bf16.msra.mxu1 %v17391_v30  ;;  %4260 = vmatprep.mubr.bf16.mxu1 %v1551_v29  ;;  %v17421_v30 = vld [vmem:[%s23840_s2 + $0x760] ss:$16 sps:$4 sm:$0xff]   ;;  %v17442_v6 = vld [vmem:[%s23840_s2 + $0x7c8] ss:$16 sps:$4 sm:$0xff]  }
 0x1a8   : > { %4816 = vmatmul.mubr.bf16.gmra.mrb[44].mxu0 %v1542_v14  ;;  %4315 = vmatprep.subr.bf16.mxu1 %v17399_v5  ;;  %v19887_v5 = vcombine.high %v1136_v28, %v1136_v28  ;;  %v17427_v14 = vld [vmem:[%s23840_s2 + $0x780] ss:$16 sps:$4 sm:$0xff]  }
 0x1a9   : > { %4825 = vmatprep.mubr.bf16.mxu0 %v1551_v29  ;;  %4879 = vmatpush1.bf16.msra.mxu0 %v17394_v33  ;;  %v19892_v33 = vcombine.low %v1134_v57, %v18573_v10  ;;  %v1137_v29 = vld [vmem:[#allocation2 + $0x28] sm:$0x33]  ;;  %v19923_v57 = vcombine.low %v1136_v28, %v1136_v28 }
 0x1aa   : > { %4880 = vmatprep.subr.bf16.mxu0 %v17402_v4  ;;  %v19897_v4 = vcombine.high %v1135_v19, %v18574_v40  ;;  %v1656_v42 = vshll.u32 %v19887_v5, 16 }
 0x1ab   : > { %4316 = vmatpush1.bf16.msra.mxu1 %v17397_v27  ;;  %v1559_v27 = vrot.slane %v19588_v31, 1  ;;  %v1636_v28 = vshrl.u32 %v19923_v57, 16  ;;  %v1639_v0 = vshll.u32 %v19923_v57, 16 }
 0x1ac   : > { %4317 = vmatprep.subr.bf16.mxu1 %v17405_v25  ;;  %v1568_v25 = vrot.slane %v19598_v58, 1  ;;  %v1567_v31 = vrot.slane %v19897_v4, 1  ;;  %v17438_v58 = vld [vmem:[%s23840_s2 + $0x7ac] ss:$16 sps:$4 sm:$0xff]  }
 0x1ad   : > { %4881 = vmatpush1.bf16.msra.mxu0 %v17400_v45  ;;  %v17435_v45 = vld [vmem:[%s23840_s2 + $0x7a4] ss:$16 sps:$4 sm:$0xff]  }
 0x1ae   : > { %4261 = vmatmul.mubr.bf16.gmra.mrb[16].mxu1 %v1548_v53  ;;  %4882 = vmatprep.subr.bf16.mxu0 %v17408_v47  ;;  %v1653_v47 = vshrl.u32 %v19887_v5, 16  ;;  %v1569_v35 = vsel %vm1521_vm9, %v1567_v31, %v1568_v25  ;;  %v1641_v25 = vrot.slane %v1639_v0, 2  ;;  %v1713_v0 = vshrl.u32 %v19725_v44, 16 }
 0x1af   : > { %4318 = vmatpush1.bf16.msra.mxu1 %v17403_v49  ;;  %4270 = vmatprep.mubr.bf16.mxu1 %v1557_v1  ;;  %v1558_v49 = vrot.slane %v19892_v33, 1 }
 0x1b0   : > { %4826 = vmatmul.mubr.bf16.gmra.mrb[48].mxu0 %v1548_v53  ;;  %4319 = vmatprep.subr.bf16.mxu1 %v17411_v54  ;;  %v1648_v54 = vshll.u32 %v19659_v60, 16  ;;  %v1655_v53 = vrot.slane %v1653_v47, 1  ;;  %v19929_v60 = vcombine.high %v1137_v29, %v1137_v29 }
 0x1b1   : > { %4835 = vmatprep.mubr.bf16.mxu0 %v1557_v1  ;;  %4883 = vmatpush1.bf16.msra.mxu0 %v17406_v56  ;;  %v1560_v55 = vsel %vm1521_vm9, %v1558_v49, %v1559_v27  ;;  %v17433_v56 = vld [vmem:[%s23840_s2 + $0x7a0] ss:$16 sps:$4 sm:$0xff]   ;;  %v17436_v1 = vld [vmem:[%s23840_s2 + $0x7a8] ss:$16 sps:$4 sm:$0xff]   ;;  %v1638_v27 = vrot.slane %v1636_v28, 1 }
 0x1b2   : > { %4884 = vmatprep.subr.bf16.mxu0 %v17414_v9  ;;  %v17441_v9 = vld [vmem:[%s23840_s2 + $0x7c4] ss:$16 sps:$4 sm:$0xff]   ;;  %v1650_v10 = vrot.slane %v1648_v54, 2  ;;  %v1690_v34 = vshll.u32 %v19929_v60, 16 }
 0x1b3   : > { %4320 = vmatpush1.bf16.msra.mxu1 %v17409_v59  ;;  %v1658_v59 = vrot.slane %v1656_v42, 2  ;;  %v1642_v54 = vor.u32 %v1641_v25, %v1638_v27  ;;  %v17462_v28 = vld [vmem:[%s23840_s2 + $0x824] ss:$16 sps:$4 sm:$0xff]   ;;  %v1715_v27 = vrot.slane %v1713_v0, 1 }
 0x1b4   : > { %4321 = vmatprep.subr.bf16.mxu1 %v17417_v63  ;;  %v19934_v63 = vcombine.low %v1135_v19, %v18574_v40  ;;  %v1687_v19 = vshrl.u32 %v19929_v60, 16  ;;  %v1692_v42 = vrot.slane %v1690_v34, 2  ;;  %v17482_v0 = vld [vmem:[%s23840_s2 + $0x884] ss:$16 sps:$4 sm:$0xff]  }
 0x1b5   : > { %4885 = vmatpush1.bf16.msra.mxu0 %v17412_v2  ;;  %v17444_v2 = vld [vmem:[%s23840_s2 + $0x7cc] ss:$16 sps:$4 sm:$0xff]   ;;  %v1659_v17 = vor.u32 %v1658_v59, %v1655_v53 }
 0x1b6   : > { %4271 = vmatmul.mubr.bf16.gmra.mrb[20].mxu1 %v1554_v21  ;;  %4886 = vmatprep.subr.bf16.mxu0 %v17420_v38  ;;  %v1647_v38 = vrot.slane %v1645_v8, 1  ;;  %v1689_v47 = vrot.slane %v1687_v19, 1  ;;  %v17450_v8 = vld [vmem:[%s23840_s2 + $0x7e8] ss:$16 sps:$4 sm:$0xff]  }
 0x1b7   : > { %4322 = vmatpush1.bf16.msra.mxu1 %v17415_v13  ;;  %4280 = vmatprep.mubr.bf16.mxu1 %v1563_v43  ;;  %v17439_v13 = vld [vmem:[%s23840_s2 + $0x7c0] ss:$16 sps:$4 sm:$0xff]   ;;  %v17456_v19 = vld [vmem:[%s23840_s2 + $0x808] ss:$16 sps:$4 sm:$0xff]  }
 0x1b8   : > { %4836 = vmatmul.mubr.bf16.gmra.mrb[52].mxu0 %v1554_v21  ;;  %4323 = vmatprep.subr.bf16.mxu1 %v17423_v52  ;;  %v19945_v52 = vld [vmem:[#allocation2 + $0x40] sm:$0x33]  ;;  %v1628_v21 = vshrl.u32 %v19679_v3, 16 }
 0x1b9   : > { %4845 = vmatprep.mubr.bf16.mxu0 %v1563_v43  ;;  %4887 = vmatpush1.bf16.msra.mxu0 %v17418_v15  ;;  %v17449_v15 = vld [vmem:[%s23840_s2 + $0x7e4] ss:$16 sps:$4 sm:$0xff]   ;;  %v1651_v43 = vor.u32 %v1650_v10, %v1647_v38  ;;  %v1662_v38 = vshrl.u32 %v19720_v37, 16  ;;  %v1665_v10 = vshll.u32 %v19720_v37, 16  ;;  %v17460_v37 = vld [vmem:[%s23840_s2 + $0x820] ss:$16 sps:$4 sm:$0xff]  }
 0x1ba   : > { %4888 = vmatprep.subr.bf16.mxu0 %v17426_v16  ;;  %v1564_v16 = vrot.slane %v19934_v63, 1  ;;  %v1630_v49 = vrot.slane %v1628_v21, 1  ;;  %v17465_v21 = vld [vmem:[%s23840_s2 + $0x82c] ss:$16 sps:$4 sm:$0xff]  }
 0x1bb   : > { %4324 = vmatpush1.bf16.msra.mxu1 %v17421_v30  ;;  %v1631_v30 = vshll.u32 %v19679_v3, 16  ;;  %v19967_v3 = vcombine.low %v1137_v29, %v1137_v29  ;;  %v17455_v29 = vld [vmem:[%s23840_s2 + $0x804] ss:$16 sps:$4 sm:$0xff]  }
 0x1bc   : > { %4325 = vmatprep.subr.bf16.mxu1 %v17429_v41  ;;  %v17452_v41 = vld [vmem:[%s23840_s2 + $0x7ec] ss:$16 sps:$4 sm:$0xff]   ;;  %v1566_v40 = vsel %vm1521_vm9, %v1564_v16, %v1565_v39 }
 0x1bd   : > { %4889 = vmatpush1.bf16.msra.mxu0 %v17424_v32  ;;  %v1679_v32 = vshrl.u32 %v19685_v12, 16 }
 0x1be   : > { %4281 = vmatmul.mubr.bf16.gmra.mrb[24].mxu1 %v1560_v55  ;;  %4890 = vmatprep.subr.bf16.mxu0 %v17432_v36  ;;  %v1682_v36 = vshll.u32 %v19685_v12, 16  ;;  %v19972_v12 = vcombine.high %v19945_v52, %v19945_v52 }
 0x1bf   : > { %4326 = vmatpush1.bf16.msra.mxu1 %v17427_v14  ;;  %4290 = vmatprep.mubr.bf16.mxu1 %v1569_v35  ;;  %v17447_v14 = vld [vmem:[%s23840_s2 + $0x7e0] ss:$16 sps:$4 sm:$0xff]   ;;  %v1681_v31 = vrot.slane %v1679_v32, 1 }
 0x1c0   : > { %4846 = vmatmul.mubr.bf16.gmra.mrb[56].mxu0 %v1560_v55  ;;  %4327 = vmatprep.subr.bf16.mxu1 %v17435_v45  ;;  %v1660_v45 = vsel %vm1626_vm10, %v1651_v43, %v1659_v17  ;;  %v1670_v55 = vshrl.u32 %v19967_v3, 16  ;;  %v1721_v53 = vshrl.u32 %v19972_v12, 16  ;;  %v1724_v59 = vshll.u32 %v19972_v12, 16 }
 0x1c1   : > { %4855 = vmatprep.mubr.bf16.mxu0 %v1569_v35  ;;  %4891 = vmatpush1.bf16.msra.mxu0 %v17430_v62  ;;  %v1633_v62 = vrot.slane %v1631_v30, 2  ;;  %v17458_v35 = vld [vmem:[%s23840_s2 + $0x80c] ss:$16 sps:$4 sm:$0xff]   ;;  %v1716_v17 = vshll.u32 %v19725_v44, 16  ;;  %v17468_v30 = vld [vmem:[%s23840_s2 + $0x844] ss:$16 sps:$4 sm:$0xff]  }
 0x1c2   : > { %4892 = vmatprep.subr.bf16.mxu0 %v17438_v58  ;;  %v1684_v58 = vrot.slane %v1682_v36, 2  ;;  %v1672_v34 = vrot.slane %v1670_v55, 1  ;;  %v1723_v43 = vrot.slane %v1721_v53, 1  ;;  %v1664_v36 = vrot.slane %v1662_v38, 1  ;;  %v17470_v55 = vld [vmem:[%s23840_s2 + $0x848] ss:$16 sps:$4 sm:$0xff]  }
 0x1c3   : > { %4328 = vmatpush1.bf16.msra.mxu1 %v17433_v56  ;;  %v1673_v56 = vshll.u32 %v19967_v3, 16  ;;  %v1718_v25 = vrot.slane %v1716_v17, 2  ;;  %v17479_v53 = vld [vmem:[%s23840_s2 + $0x86c] ss:$16 sps:$4 sm:$0xff]   ;;  %v17474_v38 = vld [vmem:[%s23840_s2 + $0x860] ss:$16 sps:$4 sm:$0xff]  }
 0x1c4   : > { %4329 = vmatprep.subr.bf16.mxu1 %v17441_v9  ;;  %v1693_v9 = vor.u32 %v1692_v42, %v1689_v47  ;;  %v1685_v39 = vor.u32 %v1684_v58, %v1681_v31  ;;  %v17476_v31 = vld [vmem:[%s23840_s2 + $0x864] ss:$16 sps:$4 sm:$0xff]  }
 0x1c5   : > { %4893 = vmatpush1.bf16.msra.mxu0 %v17436_v1  ;;  %v17453_v1 = vld [vmem:[%s23840_s2 + $0x800] ss:$16 sps:$4 sm:$0xff]   ;;  %v1675_v16 = vrot.slane %v1673_v56, 2  ;;  %v1696_v56 = vshrl.u32 %v19754_v50, 16 }
 0x1c6   : > { %4291 = vmatmul.mubr.bf16.gmra.mrb[28].mxu1 %v1566_v40  ;;  %4894 = vmatprep.subr.bf16.mxu0 %v17444_v2  ;;  %v1634_v2 = vor.u32 %v1633_v62, %v1630_v49  ;;  %v1694_v44 = vsel %vm1626_vm10, %v1685_v39, %v1693_v9  ;;  %v20028_v62 = vld [vmem:[#allocation2 + $0x70] sm:$0x33]  ;;  %v1719_v9 = vor.u32 %v1718_v25, %v1715_v27 }
 0x1c7   : > { %4330 = vmatpush1.bf16.msra.mxu1 %v17439_v13  ;;  %4333 = vmatprep.mubr.bf16.mxu1 %v1660_v45  ;;  %v1139_v13 = vld [vmem:[#allocation2 + $0x58] sm:$0x33]  ;;  %v1676_v47 = vor.u32 %v1675_v16, %v1672_v34 }
 0x1c8   : > { %4856 = vmatmul.mubr.bf16.gmra.mrb[60].mxu0 %v1566_v40  ;;  %4331 = vmatprep.subr.bf16.mxu1 %v17449_v15  ;;  %v1643_v15 = vsel %vm1626_vm10, %v1634_v2, %v1642_v54  ;;  %v20015_v32 = vcombine.high %v1139_v13, %v1139_v13  ;;  %v1667_v40 = vrot.slane %v1665_v10, 2  ;;  %v17486_v34 = vld [vmem:[%s23840_s2 + $0x88c] ss:$16 sps:$4 sm:$0xff]  }
 0x1c9   : > { %4895 = vmatpush1.bf16.msra.mxu0 %v17442_v6  ;;  %4898 = vmatprep.mubr.bf16.mxu0 %v1660_v45  ;;  %v20006_v6 = vcombine.low %v19945_v52, %v19945_v52  ;;  %v17463_v52 = vld [vmem:[%s23840_s2 + $0x828] ss:$16 sps:$4 sm:$0xff]   ;;  %v17466_v45 = vld [vmem:[%s23840_s2 + $0x840] ss:$16 sps:$4 sm:$0xff]  }
 0x1ca   : > { %4896 = vmatprep.subr.bf16.mxu0 %v17452_v41  ;;  %v1726_v41 = vrot.slane %v1724_v59, 2  ;;  %v1755_v58 = vshrl.u32 %v20015_v32, 16  ;;  %v1668_v54 = vor.u32 %v1667_v40, %v1664_v36  ;;  %v1747_v59 = vshrl.u32 %v19759_v61, 16  ;;  %v17490_v40 = vld [vmem:[%s23840_s2 + $0x8a4] ss:$16 sps:$4 sm:$0xff]  }
 0x1cb   : > { %4332 = vmatpush1.bf16.msra.mxu1 %v17447_v14  ;;  %v17472_v14 = vld [vmem:[%s23840_s2 + $0x84c] ss:$16 sps:$4 sm:$0xff]   ;;  %v1704_v42 = vshrl.u32 %v20006_v6, 16  ;;  %v1707_v49 = vshll.u32 %v20006_v6, 16 }
 0x1cc   : > { %4414 = vmatprep.subr.bf16.mxu1 %v17455_v29  ;;  %v1727_v29 = vor.u32 %v1726_v41, %v1723_v43  ;;  %v1677_v2 = vsel %vm1626_vm10, %v1668_v54, %v1676_v47  ;;  %v1749_v16 = vrot.slane %v1747_v59, 1  ;;  %v1730_v47 = vshrl.u32 %v19788_v18, 16  ;;  %v17488_v54 = vld [vmem:[%s23840_s2 + $0x8a0] ss:$16 sps:$4 sm:$0xff]  }
 0x1cd   : > { %4897 = vmatpush1.bf16.msra.mxu0 %v17450_v8  ;;  %v1758_v8 = vshll.u32 %v20015_v32, 16  ;;  %v1706_v10 = vrot.slane %v1704_v42, 1  ;;  %v1709_v39 = vrot.slane %v1707_v49, 2  ;;  %v1733_v42 = vshll.u32 %v19788_v18, 16 }
 0x1ce   : > { %4334 = vmatmul.mubr.bf16.vlgmr.msra.gmra.mrb[0].mxu1 %v1643_v15  ;;  %4979 = vmatprep.subr.bf16.mxu0 %v17458_v35  ;;  %v1699_v35 = vshll.u32 %v19754_v50, 16  ;;  %v20049_v50 = vcombine.low %v1139_v13, %v1139_v13  ;;  %v17477_v13 = vld [vmem:[%s23840_s2 + $0x868] ss:$16 sps:$4 sm:$0xff]   ;;  %v20093_v18 = vcombine.low %v20028_v62, %v20028_v62 }
 0x1cf   : > { %4415 = vmatpush1.bf16.msra.mxu1 %v17453_v1  ;;  %4343 = vmatprep.mubr.bf16.mxu1 %v1694_v44  ;;  %v1750_v1 = vshll.u32 %v19759_v61, 16  ;;  %v1757_v61 = vrot.slane %v1755_v58, 1  ;;  %v1760_v17 = vrot.slane %v1758_v8, 2  ;;  %v1784_v58 = vshll.u32 %v19793_v20, 16 }
 0x1d0   : > { %4899 = vmatmul.mubr.bf16.vlgmr.msra.gmra.mrb[32].mxu0 %v1643_v15  ;;  %4416 = vmatprep.subr.bf16.mxu1 %v17462_v28  ;;  %v1728_v28 = vsel %vm1626_vm10, %v1719_v9, %v1727_v29  ;;  %v20057_v15 = vcombine.high %v20028_v62, %v20028_v62  ;;  %v1738_v43 = vshrl.u32 %v20049_v50, 16  ;;  %v1741_v41 = vshll.u32 %v20049_v50, 16  ;;  %v17493_v29 = vld [vmem:[%s23840_s2 + $0x8ac] ss:$16 sps:$4 sm:$0xff]   ;;  %v17491_v62 = vld [vmem:[%s23840_s2 + $0x8a8] ss:$16 sps:$4 sm:$0xff]  }
 0x1d1   : > { %4908 = vmatprep.mubr.bf16.mxu0 %v1694_v44  ;;  %4980 = vmatpush1.bf16.msra.mxu0 %v17456_v19  ;;  %v1698_v19 = vrot.slane %v1696_v56, 1  ;;  %v1752_v44 = vrot.slane %v1750_v1, 2  ;;  %v1761_v36 = vor.u32 %v1760_v17, %v1757_v61  ;;  %v1732_v1 = vrot.slane %v1730_v47, 1 }
 0x1d2   : > { %4981 = vmatprep.subr.bf16.mxu0 %v17465_v21  ;;  %v17480_v21 = vld [vmem:[%s23840_s2 + $0x880] ss:$16 sps:$4 sm:$0xff]   ;;  %v1792_v27 = vshll.u32 %v20057_v15, 16  ;;  %v1743_v56 = vrot.slane %v1741_v41, 2  ;;  %v1772_v61 = vshrl.u32 %v20093_v18, 16  ;;  %v1775_v17 = vshll.u32 %v20093_v18, 16 }
 0x1d3   : > { %4417 = vmatpush1.bf16.msra.mxu1 %v17460_v37  ;;  %v1701_v37 = vrot.slane %v1699_v35, 2  ;;  %v1753_v49 = vor.u32 %v1752_v44, %v1749_v16 }
 0x1d4   : > { %4418 = vmatprep.subr.bf16.mxu1 %v17468_v30  ;;  %v1710_v30 = vor.u32 %v1709_v39, %v1706_v10  ;;  %v1786_v39 = vrot.slane %v1784_v58, 2  ;;  %v1777_v47 = vrot.slane %v1775_v17, 2 }
 0x1d5   : > { %4982 = vmatpush1.bf16.msra.mxu0 %v17463_v52  ;;  %v20070_v52 = vld [vmem:[#allocation2 + $0x88] sm:$0x33]  ;;  %v1702_v25 = vor.u32 %v1701_v37, %v1698_v19  ;;  %v1762_v35 = vsel %vm1626_vm10, %v1753_v49, %v1761_v36  ;;  %v17504_v37 = vld [vmem:[%s23840_s2 + $0x8e4] ss:$16 sps:$4 sm:$0xff]  }
 0x1d6   : > { %4344 = vmatmul.mubr.bf16.gmra.mrb[4].mxu1 %v1677_v2  ;;  %4983 = vmatprep.subr.bf16.mxu0 %v17472_v14  ;;  %v1789_v14 = vshrl.u32 %v20057_v15, 16  ;;  %v20101_v59 = vcombine.high %v20070_v52, %v20070_v52  ;;  %v17507_v36 = vld [vmem:[%s23840_s2 + $0x8ec] ss:$16 sps:$4 sm:$0xff]  }
 0x1d7   : > { %4419 = vmatpush1.bf16.msra.mxu1 %v17466_v45  ;;  %4353 = vmatprep.mubr.bf16.mxu1 %v1728_v28  ;;  %v17484_v45 = vld [vmem:[%s23840_s2 + $0x888] ss:$16 sps:$4 sm:$0xff]   ;;  %v1711_v8 = vsel %vm1626_vm10, %v1702_v25, %v1710_v30  ;;  %v1764_v30 = vshrl.u32 %v19822_v46, 16  ;;  %v17502_v25 = vld [vmem:[%s23840_s2 + $0x8e0] ss:$16 sps:$4 sm:$0xff]  }
 0x1d8   : > { %4909 = vmatmul.mubr.bf16.gmra.mrb[36].mxu0 %v1677_v2  ;;  %4420 = vmatprep.subr.bf16.mxu1 %v17476_v31  ;;  %v1781_v31 = vshrl.u32 %v19793_v20, 16  ;;  %v17496_v20 = vld [vmem:[%s23840_s2 + $0x8c4] ss:$16 sps:$4 sm:$0xff]   ;;  %v1791_v9 = vrot.slane %v1789_v14, 1  ;;  %v1735_v2 = vrot.slane %v1733_v42, 2  ;;  %v1826_v16 = vshll.u32 %v20101_v59, 16 }
 0x1d9   : > { %4918 = vmatprep.mubr.bf16.mxu0 %v1728_v28  ;;  %4984 = vmatpush1.bf16.msra.mxu0 %v17470_v55  ;;  %v1740_v55 = vrot.slane %v1738_v43, 1  ;;  %v17494_v28 = vld [vmem:[%s23840_s2 + $0x8c0] ss:$16 sps:$4 sm:$0xff]   ;;  %v1767_v43 = vshll.u32 %v19822_v46, 16  ;;  %v1818_v14 = vshll.u32 %v19827_v48, 16  ;;  %v20137_v46 = vcombine.low %v20070_v52, %v20070_v52 }
 0x1da   : > { %4985 = vmatprep.subr.bf16.mxu0 %v17479_v53  ;;  %v1794_v53 = vrot.slane %v1792_v27, 2  ;;  %v1783_v10 = vrot.slane %v1781_v31, 1  ;;  %v1736_v44 = vor.u32 %v1735_v2, %v1732_v1  ;;  %v17505_v52 = vld [vmem:[%s23840_s2 + $0x8e8] ss:$16 sps:$4 sm:$0xff]   ;;  %v1766_v58 = vrot.slane %v1764_v30, 1 }
 0x1db   : > { %4421 = vmatpush1.bf16.msra.mxu1 %v17474_v38  ;;  %v17500_v38 = vld [vmem:[%s23840_s2 + $0x8cc] ss:$16 sps:$4 sm:$0xff]   ;;  %v17518_v2 = vld [vmem:[%s23840_s2 + $0x924] ss:$16 sps:$4 sm:$0xff]  }
 0x1dc   : > { %4422 = vmatprep.subr.bf16.mxu1 %v17482_v0  ;;  %v1744_v0 = vor.u32 %v1743_v56, %v1740_v55  ;;  %v1795_v19 = vor.u32 %v1794_v53, %v1791_v9  ;;  %v1787_v41 = vor.u32 %v1786_v39, %v1783_v10  ;;  %v1820_v56 = vrot.slane %v1818_v14, 2  ;;  %v17519_v14 = vld [vmem:[%s23840_s2 + $0x928] ss:$16 sps:$4 sm:$0xff]  }
 0x1dd   : > { %4986 = vmatpush1.bf16.msra.mxu0 %v17477_v13  ;;  %v20114_v13 = vld [vmem:[#allocation2 + $0xa0] sm:$0x33]  ;;  %v1806_v9 = vshrl.u32 %v20137_v46, 16  ;;  %v1809_v53 = vshll.u32 %v20137_v46, 16 }
 0x1de   : > { %4354 = vmatmul.mubr.bf16.gmra.mrb[8].mxu1 %v1711_v8  ;;  %4987 = vmatprep.subr.bf16.mxu0 %v17486_v34  ;;  %v1823_v34 = vshrl.u32 %v20101_v59, 16  ;;  %v1745_v27 = vsel %vm1626_vm10, %v1736_v44, %v1744_v0  ;;  %v1796_v42 = vsel %vm1626_vm10, %v1787_v41, %v1795_v19  ;;  %v20145_v31 = vcombine.high %v20114_v13, %v20114_v13  ;;  %v17521_v19 = vld [vmem:[%s23840_s2 + $0x92c] ss:$16 sps:$4 sm:$0xff]   ;;  %v17516_v44 = vld [vmem:[%s23840_s2 + $0x920] ss:$16 sps:$4 sm:$0xff]  }
 0x1df   : > { %4423 = vmatpush1.bf16.msra.mxu1 %v17480_v21  ;;  %4363 = vmatprep.mubr.bf16.mxu1 %v1762_v35  ;;  %v17498_v21 = vld [vmem:[%s23840_s2 + $0x8c8] ss:$16 sps:$4 sm:$0xff]   ;;  %v1798_v0 = vshrl.u32 %v19856_v7, 16  ;;  %v1811_v30 = vrot.slane %v1809_v53, 2  ;;  %v1886_v53 = vshll.u32 %v19897_v4, 16 }
 0x1e0   : > { %4919 = vmatmul.mubr.bf16.gmra.mrb[40].mxu0 %v1711_v8  ;;  %4424 = vmatprep.subr.bf16.mxu1 %v17490_v40  ;;  %v1815_v40 = vshrl.u32 %v19827_v48, 16  ;;  %v17510_v48 = vld [vmem:[%s23840_s2 + $0x904] ss:$16 sps:$4 sm:$0xff]   ;;  %v1825_v49 = vrot.slane %v1823_v34, 1  ;;  %v1769_v8 = vrot.slane %v1767_v43, 2  ;;  %v1860_v10 = vshll.u32 %v20145_v31, 16 }
 0x1e1   : > { %4928 = vmatprep.mubr.bf16.mxu0 %v1762_v35  ;;  %4988 = vmatpush1.bf16.msra.mxu0 %v17484_v45  ;;  %v1774_v45 = vrot.slane %v1772_v61, 1  ;;  %v17508_v35 = vld [vmem:[%s23840_s2 + $0x900] ss:$16 sps:$4 sm:$0xff]   ;;  %v1801_v61 = vshll.u32 %v19856_v7, 16  ;;  %v1852_v34 = vshll.u32 %v19861_v11, 16  ;;  %v20179_v7 = vcombine.low %v20114_v13, %v20114_v13 }
 0x1e2   : > { %4989 = vmatprep.subr.bf16.mxu0 %v17493_v29  ;;  %v1828_v29 = vrot.slane %v1826_v16, 2  ;;  %v1817_v55 = vrot.slane %v1815_v40, 1  ;;  %v1770_v39 = vor.u32 %v1769_v8, %v1766_v58  ;;  %v1800_v13 = vrot.slane %v1798_v0, 1  ;;  %v17532_v8 = vld [vmem:[%s23840_s2 + $0x964] ss:$16 sps:$4 sm:$0xff]  }
 0x1e3   : > { %4425 = vmatpush1.bf16.msra.mxu1 %v17488_v54  ;;  %v17514_v54 = vld [vmem:[%s23840_s2 + $0x90c] ss:$16 sps:$4 sm:$0xff]  }
 0x1e4   : > { %4426 = vmatprep.subr.bf16.mxu1 %v17496_v20  ;;  %v1778_v20 = vor.u32 %v1777_v47, %v1774_v45  ;;  %v1829_v1 = vor.u32 %v1828_v29, %v1825_v49  ;;  %v1821_v17 = vor.u32 %v1820_v56, %v1817_v55  ;;  %v1854_v47 = vrot.slane %v1852_v34, 2  ;;  %v17533_v34 = vld [vmem:[%s23840_s2 + $0x968] ss:$16 sps:$4 sm:$0xff]  }
 0x1e5   : > { %4990 = vmatpush1.bf16.msra.mxu0 %v17491_v62  ;;  %v1143_v62 = vld [vmem:[#allocation2 + $0xb8] sm:$0x33]  ;;  %v1832_v49 = vshrl.u32 %v19892_v33, 16  ;;  %v1840_v29 = vshrl.u32 %v20179_v7, 16 }
 0x1e6   : > { %4364 = vmatmul.mubr.bf16.gmra.mrb[12].mxu1 %v1745_v27  ;;  %4991 = vmatprep.subr.bf16.mxu0 %v17500_v38  ;;  %v1857_v38 = vshrl.u32 %v20145_v31, 16  ;;  %v1779_v16 = vsel %vm1626_vm10, %v1770_v39, %v1778_v20  ;;  %v1830_v43 = vsel %vm1626_vm10, %v1821_v17, %v1829_v1  ;;  %v20185_v40 = vcombine.high %v1143_v62, %v1143_v62  ;;  %v17526_v20 = vld [vmem:[%s23840_s2 + $0x948] ss:$16 sps:$4 sm:$0xff]   ;;  %v17530_v39 = vld [vmem:[%s23840_s2 + $0x960] ss:$16 sps:$4 sm:$0xff]  }
 0x1e7   : > { %4427 = vmatpush1.bf16.msra.mxu1 %v17494_v28  ;;  %4373 = vmatprep.mubr.bf16.mxu1 %v1796_v42  ;;  %v17512_v28 = vld [vmem:[%s23840_s2 + $0x908] ss:$16 sps:$4 sm:$0xff]   ;;  %v1842_v0 = vrot.slane %v1840_v29, 1 }
 0x1e8   : > { %4929 = vmatmul.mubr.bf16.gmra.mrb[44].mxu0 %v1745_v27  ;;  %4428 = vmatprep.subr.bf16.mxu1 %v17504_v37  ;;  %v1849_v37 = vshrl.u32 %v19861_v11, 16  ;;  %v17524_v11 = vld [vmem:[%s23840_s2 + $0x944] ss:$16 sps:$4 sm:$0xff]   ;;  %v1859_v41 = vrot.slane %v1857_v38, 1  ;;  %v1803_v27 = vrot.slane %v1801_v61, 2  ;;  %v1891_v55 = vshrl.u32 %v20185_v40, 16 }
 0x1e9   : > { %4938 = vmatprep.mubr.bf16.mxu0 %v1796_v42  ;;  %4992 = vmatpush1.bf16.msra.mxu0 %v17498_v21  ;;  %v1808_v21 = vrot.slane %v1806_v9, 1  ;;  %v17522_v42 = vld [vmem:[%s23840_s2 + $0x940] ss:$16 sps:$4 sm:$0xff]   ;;  %v1894_v56 = vshll.u32 %v20185_v40, 16  ;;  %v1883_v9 = vshrl.u32 %v19897_v4, 16 }
 0x1ea   : > { %4993 = vmatprep.subr.bf16.mxu0 %v17507_v36  ;;  %v1862_v36 = vrot.slane %v1860_v10, 2  ;;  %v1851_v45 = vrot.slane %v1849_v37, 1  ;;  %v20215_v38 = vld [vmem:[#allocation2] sm:$0xcc] }
 0x1eb   : > { %4429 = vmatpush1.bf16.msra.mxu1 %v17502_v25  ;;  %v17528_v25 = vld [vmem:[%s23840_s2 + $0x94c] ss:$16 sps:$4 sm:$0xff]   ;;  %v1896_v37 = vrot.slane %v1894_v56, 2  ;;  %v1960_v56 = vrot.slane %v19887_v5, 2 }
 0x1ec   : > { %4430 = vmatprep.subr.bf16.mxu1 %v17510_v48  ;;  %v1812_v48 = vor.u32 %v1811_v30, %v1808_v21  ;;  %v1863_v58 = vor.u32 %v1862_v36, %v1859_v41  ;;  %v1855_v1 = vor.u32 %v1854_v47, %v1851_v45  ;;  %v1866_v21 = vshrl.u32 %v19934_v63, 16  ;;  %v17542_v30 = vld [vmem:[%s23840_s2 + $0x98c] ss:$16 sps:$4 sm:$0xff]   ;;  %v17536_v36 = vld [vmem:[%s23840_s2 + $0x980] ss:$16 sps:$4 sm:$0xff]  }
 0x1ed   : > { %4994 = vmatpush1.bf16.msra.mxu0 %v17505_v52  ;;  %v1843_v52 = vshll.u32 %v20179_v7, 16  ;;  %v17540_v47 = vld [vmem:[%s23840_s2 + $0x988] ss:$16 sps:$4 sm:$0xff]   ;;  %v17556_v5 = vld [vmem:[%s23840_s2 + $0x9cc] ss:$16 sps:$4 sm:$0xff]  }
 0x1ee   : > { %4374 = vmatmul.mubr.bf16.gmra.mrb[16].mxu1 %v1779_v16  ;;  %4995 = vmatprep.subr.bf16.mxu0 %v17514_v54  ;;  %v1835_v54 = vshll.u32 %v19892_v33, 16  ;;  %v17535_v33 = vld [vmem:[%s23840_s2 + $0x96c] ss:$16 sps:$4 sm:$0xff]   ;;  %v1864_v61 = vsel %vm1626_vm10, %v1855_v1, %v1863_v58 }
 0x1ef   : > { %4431 = vmatpush1.bf16.msra.mxu1 %v17508_v35  ;;  %4383 = vmatprep.mubr.bf16.mxu1 %v1830_v43  ;;  %v1804_v35 = vor.u32 %v1803_v27, %v1800_v13  ;;  %v1845_v4 = vrot.slane %v1843_v52, 2  ;;  %v20238_v13 = vld [vmem:[#allocation2 + $0x8] sm:$0xff] }
 0x1f0   : > { %4939 = vmatmul.mubr.bf16.gmra.mrb[48].mxu0 %v1779_v16  ;;  %4432 = vmatprep.subr.bf16.mxu1 %v17518_v2  ;;  %v20213_v2 = vcombine.low %v1143_v62, %v1143_v62  ;;  %v17538_v62 = vld [vmem:[%s23840_s2 + $0x984] ss:$16 sps:$4 sm:$0xff]   ;;  %v1837_v17 = vrot.slane %v1835_v54, 2  ;;  %v1885_v16 = vrot.slane %v1883_v9, 1  ;;  %v15025_v27 = vcombine.high %v20215_v38, %v20238_v13  ;;  %v17544_v54 = vld [vmem:[%s23840_s2 + $0x9a0] ss:$16 sps:$4 sm:$0xff]  }
 0x1f1   : > { %4948 = vmatprep.mubr.bf16.mxu0 %v1830_v43  ;;  %4996 = vmatpush1.bf16.msra.mxu0 %v17512_v28  ;;  %v1813_v10 = vsel %vm1626_vm10, %v1804_v35, %v1812_v48  ;;  %v1834_v28 = vrot.slane %v1832_v49, 1  ;;  %v1869_v43 = vshll.u32 %v19934_v63, 16  ;;  %v17546_v63 = vld [vmem:[%s23840_s2 + $0x9a4] ss:$16 sps:$4 sm:$0xff]   ;;  %v17549_v49 = vld [vmem:[%s23840_s2 + $0x9ac] ss:$16 sps:$4 sm:$0xff]  }
 0x1f2   : > { %4997 = vmatprep.subr.bf16.mxu0 %v17521_v19  ;;  %v1893_v19 = vrot.slane %v1891_v55, 1  ;;  %v1877_v41 = vshll.u32 %v20213_v2, 16  ;;  %v1959_v55 = vrot.slane %v15025_v27, 2  ;;  %v17547_v9 = vld [vmem:[%s23840_s2 + $0x9a8] ss:$16 sps:$4 sm:$0xff]  }
 0x1f3   : > { %4433 = vmatpush1.bf16.msra.mxu1 %v17516_v44  ;;  %v1888_v44 = vrot.slane %v1886_v53, 2  ;;  %v1838_v45 = vor.u32 %v1837_v17, %v1834_v28  ;;  %v1871_v29 = vrot.slane %v1869_v43, 2  ;;  %v17550_v53 = vld [vmem:[%s23840_s2 + $0x9c0] ss:$16 sps:$4 sm:$0xff]   ;;  %v1145_v28 = vld [vmem:[#allocation2 + $0x18] sm:$0xcc]  ;;  %v15024_v17 = vcombine.low %v20215_v38, %v20238_v13 }
 0x1f4   : > { %4434 = vmatprep.subr.bf16.mxu1 %v17524_v11  ;;  %v1874_v11 = vshrl.u32 %v20213_v2, 16  ;;  %v1879_v58 = vrot.slane %v1877_v41, 2  ;;  %v1966_v38 = vrot.slane %v19929_v60, 2  ;;  %v18577_v13 = vld [vmem:[#allocation2 + $0x38] sm:$0xff] }
 0x1f5   : > { %4998 = vmatpush1.bf16.msra.mxu0 %v17519_v14  ;;  %v1846_v14 = vor.u32 %v1845_v4, %v1842_v0  ;;  %v1889_v48 = vor.u32 %v1888_v44, %v1885_v16  ;;  %v17562_v0 = vld [vmem:[%s23840_s2 + $0x9ec] ss:$16 sps:$4 sm:$0xff]   ;;  %v17560_v16 = vld [vmem:[%s23840_s2 + $0x9e8] ss:$16 sps:$4 sm:$0xff]   ;;  %v1957_v44 = vrot.slane %v19923_v57, 2 }
 0x1f6   : > { %4384 = vmatmul.mubr.bf16.gmra.mrb[20].mxu1 %v1813_v10  ;;  %4999 = vmatprep.subr.bf16.mxu0 %v17528_v25  ;;  %v1897_v25 = vor.u32 %v1896_v37, %v1893_v19  ;;  %v1876_v52 = vrot.slane %v1874_v11, 1  ;;  %v18576_v19 = vld [vmem:[#allocation2 + $0x20] sm:$0xff]  ;;  %v17568_v11 = vld [vmem:[%s23841_s3 + $0x14] ss:$8 sps:$4 sm:$0xff]  }
 0x1f7   : > { %4435 = vmatpush1.bf16.msra.mxu1 %v17522_v42  ;;  %4393 = vmatprep.mubr.bf16.mxu1 %v1864_v61  ;;  %v1868_v42 = vrot.slane %v1866_v21, 1  ;;  %v15027_v37 = vcombine.high %v1145_v28, %v18576_v19  ;;  %v1956_v21 = vrot.slane %v15024_v17, 2  ;;  %v15026_v60 = vcombine.low %v1145_v28, %v18576_v19  ;;  %v17581_v17 = vld [vmem:[%s23841_s3 + $0x60] ss:$8 sps:$4 sm:$0xff]  }
 0x1f8   : > { %4949 = vmatmul.mubr.bf16.gmra.mrb[52].mxu0 %v1813_v10  ;;  %4436 = vmatprep.subr.bf16.mxu1 %v17532_v8  ;;  %v1847_v8 = vsel %vm1626_vm10, %v1838_v45, %v1846_v14  ;;  %v1898_v35 = vsel %vm1626_vm10, %v1889_v48, %v1897_v25  ;;  %v1880_v1 = vor.u32 %v1879_v58, %v1876_v52  ;;  %v17566_v14 = vld [vmem:[%s23841_s3 + $0x10] ss:$8 sps:$4 sm:$0xff]   ;;  %v17571_v25 = vld [vmem:[%s23841_s3 + $0x24] ss:$8 sps:$4 sm:$0xff]   ;;  %v1972_v45 = vrot.slane %v19972_v12, 2 }
 0x1f9   : > { %4958 = vmatprep.mubr.bf16.mxu0 %v1864_v61  ;;  %5000 = vmatpush1.bf16.msra.mxu0 %v17526_v20  ;;  %v17552_v20 = vld [vmem:[%s23840_s2 + $0x9c4] ss:$16 sps:$4 sm:$0xff]   ;;  %v1872_v10 = vor.u32 %v1871_v29, %v1868_v42  ;;  %v17557_v61 = vld [vmem:[%s23840_s2 + $0x9e0] ss:$16 sps:$4 sm:$0xff]   ;;  %v1965_v43 = vrot.slane %v15027_v37, 2  ;;  %v1958_v41 = vsel %vm1955_vm11, %v1956_v21, %v1957_v44 }
 0x1fa   : > { %5001 = vmatprep.subr.bf16.mxu0 %v17535_v33  ;;  %v17559_v33 = vld [vmem:[%s23840_s2 + $0x9e4] ss:$16 sps:$4 sm:$0xff]   ;;  %v17569_v42 = vld [vmem:[%s23841_s3 + $0x20] ss:$8 sps:$4 sm:$0xff]   ;;  %v17572_v58 = vld [vmem:[%s23841_s3 + $0x30] ss:$8 sps:$4 sm:$0xff]  }
 0x1fb   : > { %4437 = vmatpush1.bf16.msra.mxu1 %v17530_v39  ;;  %v17554_v39 = vld [vmem:[%s23840_s2 + $0x9c8] ss:$16 sps:$4 sm:$0xff]   ;;  %v1881_v4 = vsel %vm1626_vm10, %v1872_v10, %v1880_v1  ;;  %v1967_v57 = vsel %vm1955_vm11, %v1965_v43, %v1966_v38  ;;  %v17586_v37 = vld [vmem:[%s23841_s3 + $0x74] ss:$8 sps:$4 sm:$0xff]   ;;  %v18580_v38 = vld [vmem:[#allocation2 + $0x80] sm:$0xff]  ;;  %v1981_v43 = vrot.slane %v20093_v18, 2 }
 0x1fc   : > { %4438 = vmatprep.subr.bf16.mxu1 %v17538_v62  ;;  %v1961_v62 = vsel %vm1955_vm11, %v1959_v55, %v1960_v56  ;;  %v1147_v52 = vld [vmem:[#allocation2 + $0x48] sm:$0xcc]  ;;  %v1969_v56 = vrot.slane %v20006_v6, 2  ;;  %v17578_v10 = vld [vmem:[%s23841_s3 + $0x50] ss:$8 sps:$4 sm:$0xff]  }
 0x1fd   : > { %5002 = vmatpush1.bf16.msra.mxu0 %v17533_v34  ;;  %v17565_v34 = vld [vmem:[%s23841_s3 + $0x4] ss:$8 sps:$4 sm:$0xff]   ;;  %v17584_v44 = vld [vmem:[%s23841_s3 + $0x70] ss:$8 sps:$4 sm:$0xff]  }
 0x1fe   : > { %4394 = vmatmul.mubr.bf16.gmra.mrb[24].mxu1 %v1847_v8  ;;  %5003 = vmatprep.subr.bf16.mxu0 %v17542_v30  ;;  %v17563_v30 = vld [vmem:[%s23841_s3] ss:$8 sps:$4 sm:$0xff]   ;;  %v17577_v55 = vld [vmem:[%s23841_s3 + $0x44] ss:$8 sps:$4 sm:$0xff]  }
 0x1ff   : > { %4439 = vmatpush1.bf16.msra.mxu1 %v17536_v36  ;;  %4403 = vmatprep.mubr.bf16.mxu1 %v1898_v35  ;;  %v1146_v36 = vld [vmem:[#allocation2 + $0x30] sm:$0xcc] }
 0x200   : > { %4959 = vmatmul.mubr.bf16.gmra.mrb[56].mxu0 %v1847_v8  ;;  %4440 = vmatprep.subr.bf16.mxu1 %v17546_v63  ;;  %v15029_v27 = vcombine.high %v1146_v36, %v18577_v13  ;;  %v1963_v63 = vrot.slane %v19967_v3, 2  ;;  %v15028_v12 = vcombine.low %v1146_v36, %v18577_v13  ;;  %v18578_v8 = vld [vmem:[#allocation2 + $0x50] sm:$0xff]  ;;  %v17587_v36 = vld [vmem:[%s23841_s3 + $0x80] ss:$8 sps:$4 sm:$0xff]  }
 0x201   : > { %4968 = vmatprep.mubr.bf16.mxu0 %v1898_v35  ;;  %5004 = vmatpush1.bf16.msra.mxu0 %v17540_v47  ;;  %v1962_v47 = vrot.slane %v15026_v60, 2  ;;  %v1978_v35 = vrot.slane %v20015_v32, 2  ;;  %v15030_v32 = vcombine.low %v1147_v52, %v18578_v8  ;;  %v17592_v60 = vld [vmem:[%s23841_s3 + $0x94] ss:$8 sps:$4 sm:$0xff]  }
 0x202   : > { %5005 = vmatprep.subr.bf16.mxu0 %v17549_v49  ;;  %v1971_v48 = vrot.slane %v15029_v27, 2  ;;  %v17574_v49 = vld [vmem:[%s23841_s3 + $0x34] ss:$8 sps:$4 sm:$0xff]   ;;  %v17590_v27 = vld [vmem:[%s23841_s3 + $0x90] ss:$8 sps:$4 sm:$0xff]  }
 0x203   : > { %4441 = vmatpush1.bf16.msra.mxu1 %v17544_v54  ;;  %v1964_v29 = vsel %vm1955_vm11, %v1962_v47, %v1963_v63  ;;  %v15031_v54 = vcombine.high %v1147_v52, %v18578_v8  ;;  %v1150_v13 = vld [vmem:[#allocation2 + $0x90] sm:$0xcc]  ;;  %v1996_v47 = vrot.slane %v20145_v31, 2  ;;  %v1993_v8 = vrot.slane %v20179_v7, 2  ;;  %v17593_v7 = vld [vmem:[%s23841_s3 + $0xa0] ss:$8 sps:$4 sm:$0xff]  }
 0x204   : > { %4442 = vmatprep.subr.bf16.mxu1 %v17552_v20  ;;  %v1973_v3 = vsel %vm1955_vm11, %v1971_v48, %v1972_v45  ;;  %v1968_v20 = vrot.slane %v15028_v12, 2  ;;  %v1987_v45 = vrot.slane %v20137_v46, 2  ;;  %v18582_v12 = vld [vmem:[#allocation2 + $0xb0] sm:$0xff]  ;;  %v2002_v46 = vrot.slane %v20185_v40, 2  ;;  %v17595_v40 = vld [vmem:[%s23841_s3 + $0xa4] ss:$8 sps:$4 sm:$0xff]  }
 0x205   : > { %5006 = vmatpush1.bf16.msra.mxu0 %v17547_v9  ;;  %v17575_v9 = vld [vmem:[%s23841_s3 + $0x40] ss:$8 sps:$4 sm:$0xff]  }
 0x206   : > { %4404 = vmatmul.mubr.bf16.gmra.mrb[28].mxu1 %v1881_v4  ;;  %5007 = vmatprep.subr.bf16.mxu0 %v17556_v5  ;;  %v1977_v5 = vrot.slane %v15031_v54, 2  ;;  %v1970_v1 = vsel %vm1955_vm11, %v1968_v20, %v1969_v56  ;;  %v1999_v20 = vrot.slane %v20213_v2, 2  ;;  %v17598_v2 = vld [vmem:[%s23841_s3 + $0xb4] ss:$8 sps:$4 sm:$0xff]  }
 0x207   : > { %4443 = vmatpush1.bf16.msra.mxu1 %v17550_v53  ;;  %4446 = vmatprep.mubr.bf16.mxu1 %v1961_v62  ;;  %v17580_v53 = vld [vmem:[%s23841_s3 + $0x54] ss:$8 sps:$4 sm:$0xff]  }
 0x208   : > { %4969 = vmatmul.mubr.bf16.gmra.mrb[60].mxu0 %v1881_v4  ;;  %4444 = vmatprep.subr.bf16.mxu1 %v17559_v33  ;;  %v1148_v33 = vld [vmem:[#allocation2 + $0x60] sm:$0xcc]  ;;  %v1979_v6 = vsel %vm1955_vm11, %v1977_v5, %v1978_v35  ;;  %v1975_v4 = vrot.slane %v20049_v50, 2 }
 0x209   : > { %5008 = vmatpush1.bf16.msra.mxu0 %v17554_v39  ;;  %5011 = vmatprep.mubr.bf16.mxu0 %v1961_v62  ;;  %v18579_v39 = vld [vmem:[#allocation2 + $0x68] sm:$0xff]  ;;  %v1974_v62 = vrot.slane %v15030_v32, 2  ;;  %v17604_v32 = vld [vmem:[%s23841_s3 + $0xd4] ss:$8 sps:$4 sm:$0xff]  }
 0x20a   : > { %5009 = vmatprep.subr.bf16.mxu0 %v17562_v0  ;;  %v15033_v28 = vcombine.high %v1148_v33, %v18579_v39  ;;  %v17583_v0 = vld [vmem:[%s23841_s3 + $0x64] ss:$8 sps:$4 sm:$0xff]  }
 0x20b   : > { %4445 = vmatpush1.bf16.msra.mxu1 %v17557_v61  ;;  %v1984_v61 = vrot.slane %v20057_v15, 2  ;;  %v15032_v15 = vcombine.low %v1148_v33, %v18579_v39  ;;  %v17599_v33 = vld [vmem:[%s23841_s3 + $0xc0] ss:$8 sps:$4 sm:$0xff]  }
 0x20c   : > { %9408 = vmatprep.subr.bf16.mxu1 %v17565_v34  ;;  %v1983_v19 = vrot.slane %v15033_v28, 2  ;;  %v1976_v34 = vsel %vm1955_vm11, %v1974_v62, %v1975_v4  ;;  %v17605_v39 = vld [vmem:[%s23841_s3 + $0xe0] ss:$8 sps:$4 sm:$0xff]   ;;  %v17608_v28 = vld [vmem:[%s23841_s3 + $0xf0] ss:$8 sps:$4 sm:$0xff]   ;;  %v2352_v62 = vsub.s32 2, %v19040_v23 }
 0x20d   : > { %5010 = vmatpush1.bf16.msra.mxu0 %v17560_v16  ;;  %v1149_v16 = vld [vmem:[#allocation2 + $0x78] sm:$0xcc]  ;;  %v17613_v4 = vld [vmem:[%s23841_s3 + $0x104] ss:$8 sps:$4 sm:$0xff]  }
 0x20e   : > { %4447 = vmatmul.mubr.bf16.vlgmr.msra.gmra.mrb[0].mxu1 %v1958_v41  ;;  %v1985_v50 = vsel %vm1955_vm11, %v1983_v19, %v1984_v61  ;;  %v15035_v21 = vcombine.high %v1149_v16, %v18580_v38  ;;  %v2340_v61 = vld [vmem:[%s23848_s10] sm:$0xf] }
 0x20f   : > { %4456 = vmatprep.mubr.bf16.mxu1 %v1967_v57  ;;  %9409 = vmatpush1.bf16.msra.mxu1 %v17563_v30  ;;  %v17589_v30 = vld [vmem:[%s23841_s3 + $0x84] ss:$8 sps:$4 sm:$0xff]   ;;  %v20423_v19 = vrot.slane %v2340_v61, %v19043_v24 }
 0x210   : > { %5012 = vmatmul.mubr.bf16.vlgmr.msra.gmra.mrb[32].mxu0 %v1958_v41  ;;  %9410 = vmatprep.subr.bf16.mxu1 %v17568_v11  ;;  %v1990_v11 = vrot.slane %v20101_v59, 2  ;;  %v1980_v41 = vrot.slane %v15032_v15, 2  ;;  %v15034_v59 = vcombine.low %v1149_v16, %v18580_v38 }
 0x211   : > { %5021 = vmatprep.mubr.bf16.mxu0 %v1967_v57  ;;  %v1989_v57 = vrot.slane %v15035_v21, 2 }
 0x213   : > { %9411 = vmatpush1.bf16.msra.mxu1 %v17566_v14  ;;  %v1982_v14 = vsel %vm1955_vm11, %v1980_v41, %v1981_v43  ;;  %v1991_v18 = vsel %vm1955_vm11, %v1989_v57, %v1990_v11 }
 0x214   : > { %9412 = vmatprep.subr.bf16.mxu1 %v17571_v25  ;;  %v18581_v25 = vld [vmem:[#allocation2 + $0x98] sm:$0xff] }
 0x215   : > { %v15037_v63 = vcombine.high %v1150_v13, %v18581_v25 }
 0x216   : > { %4457 = vmatmul.mubr.bf16.gmra.mrb[4].mxu1 %v1964_v29 }
 0x217   : > { %4466 = vmatprep.mubr.bf16.mxu1 %v1973_v3  ;;  %9413 = vmatpush1.bf16.msra.mxu1 %v17569_v42  ;;  %v1986_v42 = vrot.slane %v15034_v59, 2  ;;  %v1995_v48 = vrot.slane %v15037_v63, 2 }
 0x218   : > { %5022 = vmatmul.mubr.bf16.gmra.mrb[36].mxu0 %v1964_v29  ;;  %9414 = vmatprep.subr.bf16.mxu1 %v17574_v49  ;;  %v1151_v29 = vld [vmem:[#allocation2 + $0xa8] sm:$0xcc] }
 0x219   : > { %5031 = vmatprep.mubr.bf16.mxu0 %v1973_v3  ;;  %v1988_v49 = vsel %vm1955_vm11, %v1986_v42, %v1987_v45  ;;  %v1997_v52 = vsel %vm1955_vm11, %v1995_v48, %v1996_v47  ;;  %v15036_v3 = vcombine.low %v1150_v13, %v18581_v25  ;;  %v15038_v35 = vcombine.low %v1151_v29, %v18582_v12 }
 0x21b   : > { %9415 = vmatpush1.bf16.msra.mxu1 %v17572_v58  ;;  %v15039_v58 = vcombine.high %v1151_v29, %v18582_v12  ;;  %v1992_v31 = vrot.slane %v15036_v3, 2 }
 0x21c   : > { %9416 = vmatprep.subr.bf16.mxu1 %v17577_v55 }
 0x21d   : > { %v2001_v54 = vrot.slane %v15039_v58, 2  ;;  %v1994_v55 = vsel %vm1955_vm11, %v1992_v31, %v1993_v8 }
 0x21e   : > { %4467 = vmatmul.mubr.bf16.gmra.mrb[8].mxu1 %v1970_v1 }
 0x21f   : > { %4476 = vmatprep.mubr.bf16.mxu1 %v1979_v6  ;;  %9417 = vmatpush1.bf16.msra.mxu1 %v17575_v9  ;;  %v2003_v56 = vsel %vm1955_vm11, %v2001_v54, %v2002_v46  ;;  %v1998_v9 = vrot.slane %v15038_v35, 2 }
 0x220   : > { %5032 = vmatmul.mubr.bf16.gmra.mrb[40].mxu0 %v1970_v1  ;;  %9418 = vmatprep.subr.bf16.mxu1 %v17580_v53  ;;  %v17596_v53 = vld [vmem:[%s23841_s3 + $0xb0] ss:$8 sps:$4 sm:$0xff]   ;;  %v17601_v1 = vld [vmem:[%s23841_s3 + $0xc4] ss:$8 sps:$4 sm:$0xff]  }
 0x221   : > { %5041 = vmatprep.mubr.bf16.mxu0 %v1979_v6  ;;  %v2000_v5 = vsel %vm1955_vm11, %v1998_v9, %v1999_v20  ;;  %v17602_v6 = vld [vmem:[%s23841_s3 + $0xd0] ss:$8 sps:$4 sm:$0xff]  }
 0x223   : > { %9419 = vmatpush1.bf16.msra.mxu1 %v17578_v10  ;;  %v17607_v10 = vld [vmem:[%s23841_s3 + $0xe4] ss:$8 sps:$4 sm:$0xff]  }
 0x224   : > { %9420 = vmatprep.subr.bf16.mxu1 %v17583_v0  ;;  %v17610_v0 = vld [vmem:[%s23841_s3 + $0xf4] ss:$8 sps:$4 sm:$0xff]  }
 0x226   : > { %4477 = vmatmul.mubr.bf16.gmra.mrb[12].mxu1 %v1976_v34 }
 0x227   : > { %4486 = vmatprep.mubr.bf16.mxu1 %v1985_v50  ;;  %9421 = vmatpush1.bf16.msra.mxu1 %v17581_v17  ;;  %v2356_v17 = vsub.s32 3, %v19040_v23 }
 0x228   : > { %5042 = vmatmul.mubr.bf16.gmra.mrb[44].mxu0 %v1976_v34  ;;  %9422 = vmatprep.subr.bf16.mxu1 %v17586_v37  ;;  %v20426_v37 = vrot.slane %v2340_v61, %v19049_v26  ;;  %v20428_v34 = vrot.slane %v2340_v61, %v2352_v62 }
 0x229   : > { %5051 = vmatprep.mubr.bf16.mxu0 %v1985_v50  ;;  %v20430_v50 = vrot.slane %v2340_v61, %v2356_v17 }
 0x22b   : > { %9423 = vmatpush1.bf16.msra.mxu1 %v17584_v44 }
 0x22c   : > { %9424 = vmatprep.subr.bf16.mxu1 %v17589_v30 }
 0x22e   : > { %4487 = vmatmul.mubr.bf16.gmra.mrb[16].mxu1 %v1982_v14 }
 0x22f   : > { %4496 = vmatprep.mubr.bf16.mxu1 %v1991_v18  ;;  %9425 = vmatpush1.bf16.msra.mxu1 %v17587_v36 }
 0x230   : > { %5052 = vmatmul.mubr.bf16.gmra.mrb[48].mxu0 %v1982_v14  ;;  %9426 = vmatprep.subr.bf16.mxu1 %v17592_v60 }
 0x231   : > { %5061 = vmatprep.mubr.bf16.mxu0 %v1991_v18 }
 0x233   : > { %9427 = vmatpush1.bf16.msra.mxu1 %v17590_v27 }
 0x234   : > { %9428 = vmatprep.subr.bf16.mxu1 %v17595_v40 }
 0x236   : > { %4497 = vmatmul.mubr.bf16.gmra.mrb[20].mxu1 %v1988_v49 }
 0x237   : > { %4506 = vmatprep.mubr.bf16.mxu1 %v1997_v52  ;;  %9429 = vmatpush1.bf16.msra.mxu1 %v17593_v7 }
 0x238   : > { %5062 = vmatmul.mubr.bf16.gmra.mrb[52].mxu0 %v1988_v49  ;;  %9430 = vmatprep.subr.bf16.mxu1 %v17598_v2 }
 0x239   : > { %5071 = vmatprep.mubr.bf16.mxu0 %v1997_v52 }
 0x23b   : > { %9431 = vmatpush1.bf16.msra.mxu1 %v17596_v53 }
 0x23c   : > { %9432 = vmatprep.subr.bf16.mxu1 %v17601_v1 }
 0x23e   : > { %4507 = vmatmul.mubr.bf16.gmra.mrb[24].mxu1 %v1994_v55 }
 0x23f   : > { %4516 = vmatprep.mubr.bf16.mxu1 %v2003_v56  ;;  %9433 = vmatpush1.bf16.msra.mxu1 %v17599_v33 }
 0x240   : > { %5072 = vmatmul.mubr.bf16.gmra.mrb[56].mxu0 %v1994_v55  ;;  %9434 = vmatprep.subr.bf16.mxu1 %v17604_v32 }
 0x241   : > { %5081 = vmatprep.mubr.bf16.mxu0 %v2003_v56 }
 0x243   : > { %9435 = vmatpush1.bf16.msra.mxu1 %v17602_v6 }
 0x244   : > { %9436 = vmatprep.subr.bf16.mxu1 %v17607_v10 }
 0x246   : > { %4517 = vmatmul.mubr.bf16.gmra.mrb[28].mxu1 %v2000_v5 }
 0x247   : > { %9437 = vmatpush1.bf16.msra.mxu1 %v17605_v39 }
 0x248   : > { %5082 = vmatmul.mubr.bf16.gmra.mrb[60].mxu0 %v2000_v5  ;;  %9438 = vmatprep.subr.bf16.mxu1 %v17610_v0 }
 0x24b   : > { %9439 = vmatpush1.bf16.msra.mxu1 %v17608_v28 }
 0x24c   : > { %9521 = vmatprep.subr.bf16.mxu1 %v17613_v4 }
 0x2e1   : > { %v4448_v16 = vpop.f32.mrb[0].mxu1 }
 0x2e2   : > { %v16283_v15 = vadd.f32 %v4448_v16, %v20423_v19  ;;  %v4450_v44 = vpop.f32.mrb[1].mxu1 }
 0x2e3   : > { %v5013_v38 = vpop.f32.mrb[32].mxu0  ;;  %v16284_v21 = vadd.f32 %v4450_v44, %v20426_v37  ;;  %v4452_v30 = vpop.f32.mrb[2].mxu1 }
 0x2e4   : > { %vm5092_vm12 = vcmp.ge.f32.partialorder %v16283_v15, 0.0  ;;  %v5156_v43 = vmul.f32 0.1, %v16283_v15  ;;  %v16315_v11 = vadd.f32 %v5013_v38, %v20428_v34  ;;  %v5015_v41 = vpop.f32.mrb[33].mxu0  ;;  %v16285_v36 = vadd.f32 %v4452_v30, %v20423_v19  ;;  %v4454_v57 = vpop.f32.mrb[3].mxu1 }
 0x2e5   : > { %vm5093_vm13 = vcmp.ge.f32.partialorder %v16284_v21, 0.0  ;;  %v5157_v60 = vmul.f32 0.1, %v16284_v21  ;;  %v16316_v14 = vadd.f32 %v5015_v41, %v20430_v50  ;;  %v5017_v13 = vpop.f32.mrb[34].mxu0  ;;  %v16286_v18 = vadd.f32 %v4454_v57, %v20426_v37 }
 0x2e6   : > { %v5220_v59 = vsel %vm5092_vm12, %v16283_v15, %v5156_v43  ;;  %vm5094_vm14 = vcmp.ge.f32.partialorder %v16315_v11, 0.0  ;;  %v5158_v27 = vmul.f32 0.1, %v16315_v11  ;;  %vm5096_vm15 = vcmp.ge.f32.partialorder %v16285_v36, 0.0  ;;  %v5019_v25 = vpop.f32.mrb[35].mxu0 }
 0x2e7   : > { %v5221_v63 = vsel %vm5093_vm13, %v16284_v21, %v5157_v60  ;;  %vm5095_vm0 = vcmp.ge.f32.partialorder %v16316_v14, 0.0  ;;  %v5159_v45 = vmul.f32 0.1, %v16316_v14  ;;  %v5160_v47 = vmul.f32 0.1, %v16285_v36 }
 0x2e8   : > { %v5222_v42 = vsel %vm5094_vm14, %v16315_v11, %v5158_v27  ;;  %v16197_v48 = vpack.c.bf16 %v5221_v63, %v5220_v59  ;;  %v16317_v49 = vadd.f32 %v5017_v13, %v20428_v34  ;;  %vm5097_vm1 = vcmp.ge.f32.partialorder %v16286_v18, 0.0 }
 0x2e9   : > { %v5223_v29 = vsel %vm5095_vm0, %v16316_v14, %v5159_v45  ;;  %v5224_v52 = vsel %vm5096_vm15, %v16285_v36, %v5160_v47  ;;  %v5161_v3 = vmul.f32 0.1, %v16286_v18  ;;  %v16318_v12 = vadd.f32 %v5019_v25, %v20430_v50  ;;  %v4458_v58 = vpop.f32.mrb[4].mxu1 }
 0x2ea   : > { %v5444_v8 = vrot.slane %v16197_v48, 7  ;;  %v16198_v46 = vpack.c.bf16 %v5223_v29, %v5222_v42  ;;  %vm5098_vm2 = vcmp.ge.f32.partialorder %v16317_v49, 0.0  ;;  %v5162_v31 = vmul.f32 0.1, %v16317_v49  ;;  %v4460_v54 = vpop.f32.mrb[5].mxu1 }
 0x2eb   : > { %v5225_v55 = vsel %vm5097_vm1, %v16286_v18, %v5161_v3  ;;  %vm5099_vm3 = vcmp.ge.f32.partialorder %v16318_v12, 0.0  ;;  %v5163_v56 = vmul.f32 0.1, %v16318_v12  ;;  %v16287_v35 = vadd.f32 %v4458_v58, %v20423_v19  ;;  %v5023_v20 = vpop.f32.mrb[36].mxu0  ;;  %v4462_v9 = vpop.f32.mrb[6].mxu1 }
 0x2ec   : > { %v5446_v5 = vrot.slane %v5444_v8, 4  ;;  %5572 = vst [vmem:[#allocation3] sm:$0xee] %v5444_v8  ;;  %v5445_v7 = vrot.slane %v16198_v46, 7  ;;  %v5226_v40 = vsel %vm5098_vm2, %v16317_v49, %v5162_v31  ;;  %v16199_v53 = vpack.c.bf16 %v5225_v55, %v5224_v52  ;;  %v5025_v2 = vpop.f32.mrb[37].mxu0  ;;  %v4464_v1 = vpop.f32.mrb[7].mxu1 }
 0x2ed   : > { %v5227_v33 = vsel %vm5099_vm3, %v16318_v12, %v5163_v56  ;;  %vm5100_vm4 = vcmp.ge.f32.partialorder %v16287_v35, 0.0  ;;  %v5164_v6 = vmul.f32 0.1, %v16287_v35  ;;  %v16319_v32 = vadd.f32 %v5023_v20, %v20428_v34  ;;  %v5027_v10 = vpop.f32.mrb[38].mxu0 }
 0x2ee   : > { %v5449_v39 = vrot.slane %v5445_v7, 4  ;;  %5573 = vst [vmem:[#allocation3 + $0x8] sm:$0xee] %v5445_v7  ;;  %v5447_v28 = vrot.slane %v16199_v53, 7  ;;  %v16200_v0 = vpack.c.bf16 %v5227_v33, %v5226_v40  ;;  %v16288_v4 = vadd.f32 %v4460_v54, %v20426_v37  ;;  %v5029_v61 = vpop.f32.mrb[39].mxu0 }
 0x2ef   : > { %v5228_v62 = vsel %vm5100_vm4, %v16287_v35, %v5164_v6  ;;  %vm5102_vm5 = vcmp.ge.f32.partialorder %v16319_v32, 0.0  ;;  %v5166_v17 = vmul.f32 0.1, %v16319_v32  ;;  %v16320_v16 = vadd.f32 %v5025_v2, %v20430_v50 }
 0x2f0   : > { %v20446_v15 = vsel %vm19063_vm7, %v5446_v5, %v5447_v28  ;;  %v5452_v44 = vrot.slane %v5447_v28, 4  ;;  %v5450_v38 = vrot.slane %v16200_v0, 7  ;;  %vm5101_vm12 = vcmp.ge.f32.partialorder %v16288_v4, 0.0 }
 0x2f1   : > { %5574 = vst [vmem:[#allocation3 + $0x10] sm:$0xff] %v20446_v15  ;;  %v5230_v21 = vsel %vm5102_vm5, %v16319_v32, %v5166_v17  ;;  %v5165_v30 = vmul.f32 0.1, %v16288_v4  ;;  %vm5103_vm13 = vcmp.ge.f32.partialorder %v16320_v16, 0.0  ;;  %v5167_v43 = vmul.f32 0.1, %v16320_v16 }
 0x2f2   : > { %v4468_v11 = vpop.f32.mrb[8].mxu1  ;;  %5576 = vst [vmem:[#allocation3 + $0x20] sm:$0x11] %v5452_v44  ;;  %v5451_v41 = vsel %vm19063_vm7, %v5449_v39, %v5450_v38  ;;  %v5453_v36 = vrot.slane %v5450_v38, 4  ;;  %v16289_v57 = vadd.f32 %v4462_v9, %v20423_v19  ;;  %v16321_v60 = vadd.f32 %v5027_v10, %v20428_v34 }
 0x2f3   : > { %v4470_v14 = vpop.f32.mrb[9].mxu1  ;;  %5575 = vst [vmem:[#allocation3 + $0x18] sm:$0xff] %v5451_v41  ;;  %v5229_v13 = vsel %vm5101_vm12, %v16288_v4, %v5165_v30  ;;  %v5231_v18 = vsel %vm5103_vm13, %v16320_v16, %v5167_v43  ;;  %v16290_v59 = vadd.f32 %v4464_v1, %v20426_v37  ;;  %v16322_v27 = vadd.f32 %v5029_v61, %v20430_v50  ;;  %v5033_v25 = vpop.f32.mrb[40].mxu0 }
 0x2f4   : > { %v4472_v63 = vpop.f32.mrb[10].mxu1  ;;  %5577 = vst [vmem:[#allocation3 + $0x28] sm:$0x11] %v5453_v36  ;;  %v16201_v45 = vpack.c.bf16 %v5229_v13, %v5228_v62  ;;  %v16202_v47 = vpack.c.bf16 %v5231_v18, %v5230_v21  ;;  %vm5104_vm14 = vcmp.ge.f32.partialorder %v16289_v57, 0.0  ;;  %v5168_v42 = vmul.f32 0.1, %v16289_v57 }
 0x2f5   : > { %v5035_v48 = vpop.f32.mrb[41].mxu0  ;;  %v4474_v49 = vpop.f32.mrb[11].mxu1  ;;  %vm5106_vm15 = vcmp.ge.f32.partialorder %v16321_v60, 0.0  ;;  %v5170_v29 = vmul.f32 0.1, %v16321_v60  ;;  %vm5105_vm0 = vcmp.ge.f32.partialorder %v16290_v59, 0.0  ;;  %v16291_v55 = vadd.f32 %v4468_v11, %v20423_v19 }
 0x2f6   : > { %v5169_v52 = vmul.f32 0.1, %v16290_v59  ;;  %v5454_v3 = vrot.slane %v16201_v45, 7  ;;  %v5455_v12 = vrot.slane %v16202_v47, 7  ;;  %v5232_v58 = vsel %vm5104_vm14, %v16289_v57, %v5168_v42  ;;  %v5037_v8 = vpop.f32.mrb[42].mxu0 }
 0x2f7   : > { %vm5107_vm1 = vcmp.ge.f32.partialorder %v16322_v27, 0.0  ;;  %v5234_v46 = vsel %vm5106_vm15, %v16321_v60, %v5170_v29  ;;  %v5171_v54 = vmul.f32 0.1, %v16322_v27  ;;  %v5039_v56 = vpop.f32.mrb[43].mxu0  ;;  %v16323_v5 = vadd.f32 %v5033_v25, %v20428_v34 }
 0x2f8   : > { %v5233_v31 = vsel %vm5105_vm0, %v16290_v59, %v5169_v52  ;;  %v5456_v35 = vrot.slane %v5454_v3, 4  ;;  %5578 = vst [vmem:[#allocation3 + $0x30] sm:$0xee] %v5454_v3  ;;  %v5459_v20 = vrot.slane %v5455_v12, 4  ;;  %5579 = vst [vmem:[#allocation3 + $0x38] sm:$0xee] %v5455_v12  ;;  %v16292_v53 = vadd.f32 %v4470_v14, %v20426_v37 }
 0x2f9   : > { %v16203_v9 = vpack.c.bf16 %v5233_v31, %v5232_v58  ;;  %v5235_v7 = vsel %vm5107_vm1, %v16322_v27, %v5171_v54  ;;  %vm5108_vm2 = vcmp.ge.f32.partialorder %v16291_v55, 0.0  ;;  %v5172_v40 = vmul.f32 0.1, %v16291_v55  ;;  %v4478_v2 = vpop.f32.mrb[12].mxu1  ;;  %v5652_v12 = vld [vmem:[#allocation3] sm:$0xff] }
 0x2fa   : > { %v16204_v33 = vpack.c.bf16 %v5235_v7, %v5234_v46  ;;  %vm5110_vm3 = vcmp.ge.f32.partialorder %v16323_v5, 0.0  ;;  %v5174_v6 = vmul.f32 0.1, %v16323_v5  ;;  %v20458_v32 = vpop.f32.mrb[13].mxu1  ;;  %vm5109_vm4 = vcmp.ge.f32.partialorder %v16292_v53, 0.0 }
 0x2fb   : > { %v5457_v1 = vrot.slane %v16203_v9, 7  ;;  %v5236_v10 = vsel %vm5108_vm2, %v16291_v55, %v5172_v40  ;;  %v5173_v39 = vmul.f32 0.1, %v16292_v53  ;;  %v16324_v28 = vadd.f32 %v5035_v48, %v20430_v50  ;;  %v5043_v0 = vpop.f32.mrb[44].mxu0  ;;  %v20461_v4 = vpop.f32.mrb[14].mxu1 }
 0x2fc   : > { %v5460_v17 = vrot.slane %v16204_v33, 7  ;;  %v5238_v16 = vsel %vm5110_vm3, %v16323_v5, %v5174_v6  ;;  %v20467_v44 = vpop.f32.mrb[45].mxu0  ;;  %v20469_v38 = vpop.f32.mrb[15].mxu1  ;;  %v16293_v43 = vadd.f32 %v4472_v63, %v20423_v19  ;;  %v16325_v60 = vadd.f32 %v5037_v8, %v20428_v34 }
 0x2fd   : > { %v20465_v61 = vsel %vm19063_vm7, %v5456_v35, %v5457_v1  ;;  %v5462_v62 = vrot.slane %v5457_v1, 4  ;;  %v5237_v21 = vsel %vm5109_vm4, %v16292_v53, %v5173_v39  ;;  %vm5111_vm5 = vcmp.ge.f32.partialorder %v16324_v28, 0.0  ;;  %v20473_v11 = vpop.f32.mrb[46].mxu0 }
 0x2fe   : > { %5580 = vst [vmem:[#allocation3 + $0x40] sm:$0xff] %v20465_v61  ;;  %v5175_v30 = vmul.f32 0.1, %v16324_v28  ;;  %v5461_v41 = vsel %vm19063_vm7, %v5459_v20, %v5460_v17  ;;  %v5463_v36 = vrot.slane %v5460_v17, 4  ;;  %v16205_v57 = vpack.c.bf16 %v5237_v21, %v5236_v10  ;;  %v20478_v14 = vpop.f32.mrb[47].mxu0 }
 0x2ff   : > { %5582 = vst [vmem:[#allocation3 + $0x50] sm:$0x11] %v5462_v62  ;;  %5581 = vst [vmem:[#allocation3 + $0x48] sm:$0xff] %v5461_v41  ;;  %vm5112_vm12 = vcmp.ge.f32.partialorder %v16293_v43, 0.0  ;;  %v5176_v18 = vmul.f32 0.1, %v16293_v43  ;;  %v16294_v59 = vadd.f32 %v4474_v49, %v20426_v37  ;;  %v16326_v42 = vadd.f32 %v5039_v56, %v20430_v50 }
 0x300   : > { %v5239_v13 = vsel %vm5111_vm5, %v16324_v28, %v5175_v30  ;;  %5583 = vst [vmem:[#allocation3 + $0x58] sm:$0x11] %v5463_v36  ;;  %v5464_v27 = vrot.slane %v16205_v57, 7  ;;  %vm5114_vm13 = vcmp.ge.f32.partialorder %v16325_v60, 0.0  ;;  %v5178_v63 = vmul.f32 0.1, %v16325_v60 }
 0x301   : > { %v16206_v25 = vpack.c.bf16 %v5239_v13, %v5238_v16  ;;  %v5240_v45 = vsel %vm5112_vm12, %v16293_v43, %v5176_v18  ;;  %vm5113_vm14 = vcmp.ge.f32.partialorder %v16294_v59, 0.0  ;;  %v5177_v47 = vmul.f32 0.1, %v16294_v59  ;;  %v20482_v48 = vpop.f32.mrb[16].mxu1  ;;  %v17611_v10 = vld [vmem:[%s23841_s3 + $0x100] ss:$8 sps:$4 sm:$0xff]  }
 0x302   : > { %5584 = vst [vmem:[#allocation3 + $0x60] sm:$0xee] %v5464_v27  ;;  %v5242_v52 = vsel %vm5114_vm13, %v16325_v60, %v5178_v63  ;;  %v16295_v3 = vadd.f32 %v4478_v2, %v20423_v19  ;;  %v20485_v58 = vpop.f32.mrb[17].mxu1  ;;  %vm5115_vm15 = vcmp.ge.f32.partialorder %v16326_v42, 0.0  ;;  %v5179_v8 = vmul.f32 0.1, %v16326_v42 }
 0x303   : > { %v5465_v29 = vrot.slane %v16206_v25, 7  ;;  %v5241_v49 = vsel %vm5113_vm14, %v16294_v59, %v5177_v47  ;;  %v16327_v46 = vadd.f32 %v5043_v0, %v20428_v34  ;;  %v20488_v31 = vpop.f32.mrb[48].mxu0  ;;  %v20490_v54 = vpop.f32.mrb[18].mxu1  ;;  %v5466_v55 = vrot.slane %v5464_v27, 4  ;;  %v17616_v0 = vld [vmem:[%s23841_s3 + $0x114] ss:$8 sps:$4 sm:$0xff]  }
 0x304   : > { %v16207_v35 = vpack.c.bf16 %v5241_v49, %v5240_v45  ;;  %v5180_v20 = vmul.f32 0.1, %v16295_v3  ;;  %v20492_v9 = vpop.f32.mrb[49].mxu0  ;;  %v20494_v5 = vpop.f32.mrb[19].mxu1  ;;  %v5243_v7 = vsel %vm5115_vm15, %v16326_v42, %v5179_v8  ;;  %vm5116_vm0 = vcmp.ge.f32.partialorder %v16295_v3, 0.0 }
 0x305   : > { %v5469_v56 = vrot.slane %v5465_v29, 4  ;;  %5585 = vst [vmem:[#allocation3 + $0x68] sm:$0xee] %v5465_v29  ;;  %v5182_v40 = vmul.f32 0.1, %v16327_v46  ;;  %v20497_v53 = vcombine.low %v5652_v12, %v20446_v15  ;;  %v20499_v2 = vpop.f32.mrb[50].mxu0  ;;  %v16208_v33 = vpack.c.bf16 %v5243_v7, %v5242_v52 }
 0x306   : > { %v5467_v1 = vrot.slane %v16207_v35, 7  ;;  %vm5118_vm1 = vcmp.ge.f32.partialorder %v16327_v46, 0.0  ;;  %v20502_v6 = vcombine.high %v5652_v12, %v20446_v15  ;;  %v20507_v39 = vpop.f32.mrb[51].mxu0  ;;  %v16296_v28 = vadd.f32 %v20458_v32, %v20426_v37  ;;  %v17619_v13 = vld [vmem:[%s23841_s3 + $0x124] ss:$8 sps:$4 sm:$0xff]  }
 0x307   : > { %v5470_v15 = vrot.slane %v16208_v33, 7  ;;  %v5244_v16 = vsel %vm5116_vm0, %v16295_v3, %v5180_v20  ;;  %v5246_v21 = vsel %vm5118_vm1, %v16327_v46, %v5182_v40  ;;  %v16328_v32 = vadd.f32 %v20467_v44, %v20430_v50  ;;  %v17614_v44 = vld [vmem:[%s23841_s3 + $0x110] ss:$8 sps:$4 sm:$0xff]  }
 0x308   : > { %v20516_v62 = vsel %vm19063_vm7, %v5466_v55, %v5467_v1  ;;  %v5472_v17 = vrot.slane %v5467_v1, 4  ;;  %9440 = vmatprep.mubr.bf16.mxu1 %v20502_v6  ;;  %vm5117_vm2 = vcmp.ge.f32.partialorder %v16296_v28, 0.0  ;;  %v5181_v30 = vmul.f32 0.1, %v16296_v28  ;;  %v17617_v55 = vld [vmem:[%s23841_s3 + $0x120] ss:$8 sps:$4 sm:$0xff]  }
 0x309   : > { %5586 = vst [vmem:[#allocation3 + $0x70] sm:$0xff] %v20516_v62  ;;  %9441 = vmatmul.mubr.bf16.vlgmr.msra.gmra.mrb[32].mxu1 %v20497_v53  ;;  %v20523_v43 = vpop.f32.mrb[20].mxu1  ;;  %v20527_v41 = vsel %vm19063_vm7, %v5469_v56, %v5470_v15  ;;  %v5473_v36 = vrot.slane %v5470_v15, 4  ;;  %v16297_v57 = vadd.f32 %v20461_v4, %v20423_v19  ;;  %v16329_v60 = vadd.f32 %v20473_v11, %v20428_v34  ;;  %v5656_v40 = vld [vmem:[#allocation3 + $0x30] sm:$0xff] }
 0x30a   : > { %5588 = vst [vmem:[#allocation3 + $0x80] sm:$0x11] %v5472_v17  ;;  %9522 = vmatpush1.bf16.msra.mxu1 %v17611_v10  ;;  %v20539_v18 = vpop.f32.mrb[21].mxu1  ;;  %5587 = vst [vmem:[#allocation3 + $0x78] sm:$0xff] %v20527_v41  ;;  %v5245_v59 = vsel %vm5117_vm2, %v16296_v28, %v5181_v30  ;;  %vm5119_vm3 = vcmp.ge.f32.partialorder %v16328_v32, 0.0  ;;  %v16298_v4 = vadd.f32 %v20469_v38, %v20426_v37 }
 0x30b   : > { %v5183_v27 = vmul.f32 0.1, %v16328_v32  ;;  %9523 = vmatprep.subr.bf16.mxu1 %v17616_v0  ;;  %v20544_v11 = vpop.f32.mrb[52].mxu0  ;;  %v20546_v25 = vpop.f32.mrb[22].mxu1  ;;  %5589 = vst [vmem:[#allocation3 + $0x88] sm:$0x11] %v5473_v36  ;;  %v16209_v63 = vpack.c.bf16 %v5245_v59, %v5244_v16  ;;  %v16330_v46 = vadd.f32 %v20478_v14, %v20430_v50  ;;  %v16299_v20 = vadd.f32 %v20482_v48, %v20423_v19 }
 0x30c   : > { %vm5120_vm4 = vcmp.ge.f32.partialorder %v16297_v57, 0.0  ;;  %v5184_v45 = vmul.f32 0.1, %v16297_v57  ;;  %vm5122_vm5 = vcmp.ge.f32.partialorder %v16329_v60, 0.0  ;;  %v20548_v47 = vpop.f32.mrb[53].mxu0  ;;  %v20550_v42 = vpop.f32.mrb[23].mxu1  ;;  %v16331_v7 = vadd.f32 %v20488_v31, %v20428_v34 }
 0x30d   : > { %v5247_v29 = vsel %vm5119_vm3, %v16328_v32, %v5183_v27  ;;  %v5186_v52 = vmul.f32 0.1, %v16329_v60  ;;  %vm5121_vm12 = vcmp.ge.f32.partialorder %v16298_v4, 0.0  ;;  %v5185_v3 = vmul.f32 0.1, %v16298_v4  ;;  %v20552_v12 = vpop.f32.mrb[54].mxu0 }
 0x30e   : > { %v5474_v38 = vrot.slane %v16209_v63, 7  ;;  %v16210_v49 = vpack.c.bf16 %v5247_v29, %v5246_v21  ;;  %v5248_v8 = vsel %vm5120_vm4, %v16297_v57, %v5184_v45  ;;  %9524 = vmatpush1.bf16.msra.mxu1 %v17614_v44  ;;  %v20559_v56 = vpop.f32.mrb[55].mxu0  ;;  %v17622_v14 = vld [vmem:[%s23841_s3 + $0x134] ss:$8 sps:$4 sm:$0xff]   ;;  %vm5123_vm13 = vcmp.ge.f32.partialorder %v16330_v46, 0.0 }
 0x30f   : > { %v5249_v35 = vsel %vm5121_vm12, %v16298_v4, %v5185_v3  ;;  %9525 = vmatprep.subr.bf16.mxu1 %v17619_v13  ;;  %v17620_v28 = vld [vmem:[%s23841_s3 + $0x130] ss:$8 sps:$4 sm:$0xff]   ;;  %v5250_v48 = vsel %vm5122_vm5, %v16329_v60, %v5186_v52  ;;  %v5187_v0 = vmul.f32 0.1, %v16330_v46  ;;  %vm5124_vm14 = vcmp.ge.f32.partialorder %v16299_v20, 0.0 }
 0x310   : > { %v5476_v1 = vrot.slane %v5474_v38, 4  ;;  %5590 = vst [vmem:[#allocation3 + $0x90] sm:$0xee] %v5474_v38  ;;  %v5475_v33 = vrot.slane %v16210_v49, 7  ;;  %v16211_v10 = vpack.c.bf16 %v5249_v35, %v5248_v8  ;;  %v5188_v31 = vmul.f32 0.1, %v16299_v20 }
 0x311   : > { %vm5126_vm15 = vcmp.ge.f32.partialorder %v16331_v7, 0.0  ;;  %v5190_v15 = vmul.f32 0.1, %v16331_v7  ;;  %v20573_v16 = vcombine.high %v5656_v40, %v20465_v61  ;;  %v20575_v21 = vpop.f32.mrb[24].mxu1  ;;  %v5251_v32 = vsel %vm5123_vm13, %v16330_v46, %v5187_v0  ;;  %v17625_v60 = vld [vmem:[%s23841_s3 + $0x144] ss:$8 sps:$4 sm:$0xff]  }
 0x312   : > { %5591 = vst [vmem:[#allocation3 + $0x98] sm:$0xee] %v5475_v33  ;;  %v5477_v17 = vrot.slane %v16211_v10, 7  ;;  %9526 = vmatpush1.bf16.msra.mxu1 %v17617_v55  ;;  %v5479_v30 = vrot.slane %v5475_v33, 4  ;;  %v16300_v36 = vadd.f32 %v20485_v58, %v20426_v37  ;;  %v16332_v57 = vadd.f32 %v20492_v9, %v20430_v50  ;;  %v20586_v13 = vpop.f32.mrb[25].mxu1 }
 0x313   : > { %9527 = vmatprep.subr.bf16.mxu1 %v17622_v14  ;;  %v20584_v44 = vpop.f32.mrb[56].mxu0  ;;  %v16212_v4 = vpack.c.bf16 %v5251_v32, %v5250_v48  ;;  %v5252_v58 = vsel %vm5124_vm14, %v16299_v20, %v5188_v31  ;;  %9450 = vmatprep.mubr.bf16.mxu1 %v20573_v16  ;;  %v17623_v9 = vld [vmem:[%s23841_s3 + $0x140] ss:$8 sps:$4 sm:$0xff]   ;;  %v20599_v45 = vpop.f32.mrb[26].mxu1  ;;  %v5254_v29 = vsel %vm5126_vm15, %v16331_v7, %v5190_v15  ;;  %v17631_v48 = vld [vmem:[%s23841_s3 + $0x164] ss:$8 sps:$4 sm:$0xff]  }
 0x314   : > { %v20590_v59 = vsel %vm19063_vm7, %v5476_v1, %v5477_v17  ;;  %v5482_v27 = vrot.slane %v5477_v17, 4  ;;  %v20597_v63 = vpop.f32.mrb[57].mxu0  ;;  %vm5125_vm0 = vcmp.ge.f32.partialorder %v16300_v36, 0.0  ;;  %v5189_v52 = vmul.f32 0.1, %v16300_v36  ;;  %v20610_v55 = vpop.f32.mrb[27].mxu1 }
 0x315   : > { %5592 = vst [vmem:[#allocation3 + $0xa0] sm:$0xff] %v20590_v59  ;;  %vm5127_vm1 = vcmp.ge.f32.partialorder %v16332_v57, 0.0  ;;  %v20603_v3 = vpop.f32.mrb[58].mxu0  ;;  %v5480_v38 = vrot.slane %v16212_v4, 7  ;;  %v5191_v49 = vmul.f32 0.1, %v16332_v57  ;;  %v20606_v8 = vcombine.low %v5656_v40, %v20465_v61 }
 0x316   : > { %5594 = vst [vmem:[#allocation3 + $0xb0] sm:$0x11] %v5482_v27  ;;  %v16301_v46 = vadd.f32 %v20490_v54, %v20423_v19  ;;  %9528 = vmatpush1.bf16.msra.mxu1 %v17620_v28  ;;  %v20612_v35 = vpop.f32.mrb[59].mxu0  ;;  %v5253_v20 = vsel %vm5125_vm0, %v16300_v36, %v5189_v52  ;;  %v16333_v7 = vadd.f32 %v20499_v2, %v20428_v34  ;;  %v17628_v61 = vld [vmem:[%s23841_s3 + $0x154] ss:$8 sps:$4 sm:$0xff]   ;;  %v5660_v28 = vld [vmem:[#allocation3 + $0x60] sm:$0xff] }
 0x317   : > { %v16302_v14 = vadd.f32 %v20494_v5, %v20426_v37  ;;  %v16334_v1 = vadd.f32 %v20507_v39, %v20430_v50  ;;  %9529 = vmatprep.subr.bf16.mxu1 %v17625_v60  ;;  %v20625_v54 = vsel %vm19063_vm7, %v5479_v30, %v5480_v38  ;;  %v5483_v40 = vrot.slane %v5480_v38, 4  ;;  %9451 = vmatmul.mubr.bf16.gmra.mrb[36].mxu1 %v20606_v8  ;;  %v17626_v5 = vld [vmem:[%s23841_s3 + $0x150] ss:$8 sps:$4 sm:$0xff]  }
 0x318   : > { %v16213_v33 = vpack.c.bf16 %v5253_v20, %v5252_v58  ;;  %v5255_v10 = vsel %vm5127_vm1, %v16332_v57, %v5191_v49  ;;  %5593 = vst [vmem:[#allocation3 + $0xa8] sm:$0xff] %v20625_v54  ;;  %vm5128_vm2 = vcmp.ge.f32.partialorder %v16301_v46, 0.0  ;;  %v5192_v39 = vmul.f32 0.1, %v16301_v46 }
 0x319   : > { %v16214_v2 = vpack.c.bf16 %v5255_v10, %v5254_v29  ;;  %v20636_v0 = vpop.f32.mrb[28].mxu1  ;;  %5595 = vst [vmem:[#allocation3 + $0xb8] sm:$0x11] %v5483_v40  ;;  %vm5130_vm3 = vcmp.ge.f32.partialorder %v16333_v7, 0.0  ;;  %v5194_v17 = vmul.f32 0.1, %v16333_v7  ;;  %v16303_v58 = vadd.f32 %v20523_v43, %v20423_v19 }
 0x31a   : > { %v5484_v31 = vrot.slane %v16213_v33, 7  ;;  %vm5129_vm4 = vcmp.ge.f32.partialorder %v16302_v14, 0.0  ;;  %9530 = vmatpush1.bf16.msra.mxu1 %v17623_v9  ;;  %v20638_v15 = vpop.f32.mrb[29].mxu1  ;;  %v5256_v32 = vsel %vm5128_vm2, %v16301_v46, %v5192_v39  ;;  %v5193_v36 = vmul.f32 0.1, %v16302_v14 }
 0x31b   : > { %v5485_v30 = vrot.slane %v16214_v2, 7  ;;  %vm5131_vm5 = vcmp.ge.f32.partialorder %v16334_v1, 0.0  ;;  %9531 = vmatprep.subr.bf16.mxu1 %v17628_v61  ;;  %v20640_v57 = vpop.f32.mrb[60].mxu0  ;;  %v20642_v60 = vpop.f32.mrb[30].mxu1  ;;  %v5258_v27 = vsel %vm5130_vm3, %v16333_v7, %v5194_v17  ;;  %v5195_v4 = vmul.f32 0.1, %v16334_v1 }
 0x31c   : > { %5596 = vst [vmem:[#allocation3 + $0xc0] sm:$0xee] %v5484_v31  ;;  %v20646_v29 = vpop.f32.mrb[61].mxu0  ;;  %v20648_v9 = vpop.f32.mrb[31].mxu1  ;;  %v5486_v52 = vrot.slane %v5484_v31, 4  ;;  %v5257_v38 = vsel %vm5129_vm4, %v16302_v14, %v5193_v36  ;;  %v16335_v49 = vadd.f32 %v20544_v11, %v20428_v34  ;;  %v20654_v46 = vcombine.high %v5660_v28, %v20516_v62 }
 0x31d   : > { %5597 = vst [vmem:[#allocation3 + $0xc8] sm:$0xee] %v5485_v30  ;;  %v20656_v20 = vpop.f32.mrb[62].mxu0  ;;  %v16215_v7 = vpack.c.bf16 %v5257_v38, %v5256_v32  ;;  %v5259_v61 = vsel %vm5131_vm5, %v16334_v1, %v5195_v4  ;;  %vm5132_vm12 = vcmp.ge.f32.partialorder %v16303_v58, 0.0  ;;  %v5196_v43 = vmul.f32 0.1, %v16303_v58 }
 0x31e   : > { %9532 = vmatpush1.bf16.msra.mxu1 %v17626_v5  ;;  %v17629_v40 = vld [vmem:[%s23841_s3 + $0x160] ss:$8 sps:$4 sm:$0xff]   ;;  %v20662_v33 = vpop.f32.mrb[63].mxu0  ;;  %v5489_v14 = vrot.slane %v5485_v30, 4  ;;  %v16216_v10 = vpack.c.bf16 %v5259_v61, %v5258_v27  ;;  %vm5134_vm13 = vcmp.ge.f32.partialorder %v16335_v49, 0.0  ;;  %9460 = vmatprep.mubr.bf16.mxu1 %v20654_v46  ;;  %v16304_v5 = vadd.f32 %v20539_v18, %v20426_v37 }
 0x31f   : > { %v5198_v11 = vmul.f32 0.1, %v16335_v49  ;;  %9533 = vmatprep.subr.bf16.mxu1 %v17631_v48  ;;  %v17634_v1 = vld [vmem:[%s23841_s3 + $0x174] ss:$8 sps:$4 sm:$0xff]   ;;  %v5487_v2 = vrot.slane %v16215_v7, 7  ;;  %v5260_v39 = vsel %vm5132_vm12, %v16303_v58, %v5196_v43  ;;  %v16336_v31 = vadd.f32 %v20548_v47, %v20430_v50 }
 0x320   : > { %v5490_v17 = vrot.slane %v16216_v10, 7  ;;  %v20673_v32 = vcombine.low %v5660_v28, %v20516_v62  ;;  %v16305_v48 = vadd.f32 %v20546_v25, %v20423_v19  ;;  %vm5133_vm14 = vcmp.ge.f32.partialorder %v16304_v5, 0.0  ;;  %v17632_v18 = vld [vmem:[%s23841_s3 + $0x170] ss:$8 sps:$4 sm:$0xff]   ;;  %v17637_v28 = vld [vmem:[%s23841_s3 + $0x184] ss:$8 sps:$4 sm:$0xff]  }
 0x321   : > { %v5262_v30 = vsel %vm5134_vm13, %v16335_v49, %v5198_v11  ;;  %v20679_v36 = vsel %vm19063_vm7, %v5486_v52, %v5487_v2  ;;  %v5492_v27 = vrot.slane %v5487_v2, 4  ;;  %v5197_v4 = vmul.f32 0.1, %v16304_v5  ;;  %v17635_v11 = vld [vmem:[%s23841_s3 + $0x180] ss:$8 sps:$4 sm:$0xff]   ;;  %v5664_v2 = vld [vmem:[#allocation3 + $0x90] sm:$0xff] }
 0x322   : > { %9534 = vmatpush1.bf16.msra.mxu1 %v17629_v40  ;;  %5598 = vst [vmem:[#allocation3 + $0xd0] sm:$0xff] %v20679_v36  ;;  %v20687_v62 = vsel %vm19063_vm7, %v5489_v14, %v5490_v17  ;;  %v5493_v47 = vrot.slane %v5490_v17, 4  ;;  %vm5135_vm15 = vcmp.ge.f32.partialorder %v16336_v31, 0.0  ;;  %v5199_v25 = vmul.f32 0.1, %v16336_v31 }
 0x323   : > { %9461 = vmatmul.mubr.bf16.gmra.mrb[40].mxu1 %v20673_v32  ;;  %9535 = vmatprep.subr.bf16.mxu1 %v17634_v1  ;;  %5600 = vst [vmem:[#allocation3 + $0xe0] sm:$0x11] %v5492_v27  ;;  %5599 = vst [vmem:[#allocation3 + $0xd8] sm:$0xff] %v20687_v62  ;;  %v5261_v58 = vsel %vm5133_vm14, %v16304_v5, %v5197_v4  ;;  %vm5136_vm0 = vcmp.ge.f32.partialorder %v16305_v48, 0.0  ;;  %v5200_v52 = vmul.f32 0.1, %v16305_v48 }
 0x324   : > { %5601 = vst [vmem:[#allocation3 + $0xe8] sm:$0x11] %v5493_v47  ;;  %v16217_v38 = vpack.c.bf16 %v5261_v58, %v5260_v39  ;;  %v5263_v49 = vsel %vm5135_vm15, %v16336_v31, %v5199_v25  ;;  %v16337_v7 = vadd.f32 %v20552_v12, %v20428_v34  ;;  %v16306_v61 = vadd.f32 %v20550_v42, %v20426_v37  ;;  %v17640_v12 = vld [vmem:[%s23841_s3 + $0x194] ss:$8 sps:$4 sm:$0xff]   ;;  %v17638_v4 = vld [vmem:[%s23841_s3 + $0x190] ss:$8 sps:$4 sm:$0xff]  }
 0x325   : > { %v16218_v43 = vpack.c.bf16 %v5263_v49, %v5262_v30  ;;  %v5264_v40 = vsel %vm5136_vm0, %v16305_v48, %v5200_v52  ;;  %v16338_v14 = vadd.f32 %v20559_v56, %v20430_v50  ;;  %v16307_v10 = vadd.f32 %v20575_v21, %v20423_v19  ;;  %v17643_v58 = vld [vmem:[%s23841_s3 + $0x1a4] ss:$8 sps:$4 sm:$0xff]  }
 0x326   : > { %9536 = vmatpush1.bf16.msra.mxu1 %v17632_v18  ;;  %v5494_v1 = vrot.slane %v16217_v38, 7  ;;  %vm5138_vm1 = vcmp.ge.f32.partialorder %v16337_v7, 0.0  ;;  %v5202_v42 = vmul.f32 0.1, %v16337_v7  ;;  %vm5137_vm2 = vcmp.ge.f32.partialorder %v16306_v61, 0.0 }
 0x327   : > { %9537 = vmatprep.subr.bf16.mxu1 %v17637_v28  ;;  %v5495_v39 = vrot.slane %v16218_v43, 7  ;;  %v5201_v56 = vmul.f32 0.1, %v16306_v61  ;;  %vm5139_vm3 = vcmp.ge.f32.partialorder %v16338_v14, 0.0  ;;  %v5203_v5 = vmul.f32 0.1, %v16338_v14 }
 0x328   : > { %v5496_v21 = vrot.slane %v5494_v1, 4  ;;  %5602 = vst [vmem:[#allocation3 + $0xf0] sm:$0xee] %v5494_v1  ;;  %v5266_v31 = vsel %vm5138_vm1, %v16337_v7, %v5202_v42  ;;  %vm5140_vm4 = vcmp.ge.f32.partialorder %v16307_v10, 0.0  ;;  %v5204_v48 = vmul.f32 0.1, %v16307_v10 }
 0x329   : > { %5603 = vst [vmem:[#allocation3 + $0xf8] sm:$0xee] %v5495_v39  ;;  %v5265_v17 = vsel %vm5137_vm2, %v16306_v61, %v5201_v56  ;;  %v5267_v30 = vsel %vm5139_vm3, %v16338_v14, %v5203_v5  ;;  %v16339_v27 = vadd.f32 %v20584_v44, %v20428_v34  ;;  %v5499_v18 = vrot.slane %v5495_v39, 4 }
 0x32a   : > { %9538 = vmatpush1.bf16.msra.mxu1 %v17635_v11  ;;  %v16219_v47 = vpack.c.bf16 %v5265_v17, %v5264_v40  ;;  %v16220_v25 = vpack.c.bf16 %v5267_v30, %v5266_v31  ;;  %v20714_v28 = vcombine.high %v5664_v2, %v20590_v59  ;;  %v16308_v44 = vadd.f32 %v20586_v13, %v20426_v37  ;;  %v17641_v13 = vld [vmem:[%s23841_s3 + $0x1a0] ss:$8 sps:$4 sm:$0xff]  }
 0x32b   : > { %9539 = vmatprep.subr.bf16.mxu1 %v17640_v12  ;;  %v5206_v52 = vmul.f32 0.1, %v16339_v27  ;;  %v16340_v38 = vadd.f32 %v20597_v63, %v20430_v50  ;;  %vm5142_vm5 = vcmp.ge.f32.partialorder %v16339_v27, 0.0  ;;  %v20725_v61 = vcombine.low %v5664_v2, %v20590_v59 }
 0x32c   : > { %v5497_v49 = vrot.slane %v16219_v47, 7  ;;  %v5500_v7 = vrot.slane %v16220_v25, 7  ;;  %9470 = vmatprep.mubr.bf16.mxu1 %v20714_v28  ;;  %v5268_v43 = vsel %vm5140_vm4, %v16307_v10, %v5204_v48  ;;  %vm5141_vm12 = vcmp.ge.f32.partialorder %v16308_v44, 0.0  ;;  %v17646_v10 = vld [vmem:[%s23841_s3 + $0x1b4] ss:$8 sps:$4 sm:$0xff]  }
 0x32d   : > { %v5205_v40 = vmul.f32 0.1, %v16308_v44  ;;  %vm5143_vm13 = vcmp.ge.f32.partialorder %v16340_v38, 0.0  ;;  %9471 = vmatmul.mubr.bf16.gmra.mrb[44].mxu1 %v20725_v61  ;;  %v5270_v12 = vsel %vm5142_vm5, %v16339_v27, %v5206_v52  ;;  %v5207_v42 = vmul.f32 0.1, %v16340_v38 }
 0x32e   : > { %9540 = vmatpush1.bf16.msra.mxu1 %v17638_v4  ;;  %v20733_v63 = vsel %vm19063_vm7, %v5496_v21, %v5497_v49  ;;  %v5502_v14 = vrot.slane %v5497_v49, 4  ;;  %v20737_v11 = vsel %vm19063_vm7, %v5499_v18, %v5500_v7  ;;  %v5503_v59 = vrot.slane %v5500_v7, 4  ;;  %v5668_v18 = vld [vmem:[#allocation3 + $0xc0] sm:$0xff] }
 0x32f   : > { %9541 = vmatprep.subr.bf16.mxu1 %v17643_v58  ;;  %5604 = vst [vmem:[#allocation3 + $0x100] sm:$0xff] %v20733_v63  ;;  %5605 = vst [vmem:[#allocation3 + $0x108] sm:$0xff] %v20737_v11  ;;  %v5269_v1 = vsel %vm5141_vm12, %v16308_v44, %v5205_v40  ;;  %v16309_v2 = vadd.f32 %v20599_v45, %v20423_v19  ;;  %v16341_v56 = vadd.f32 %v20603_v3, %v20428_v34  ;;  %v17644_v45 = vld [vmem:[%s23841_s3 + $0x1b0] ss:$8 sps:$4 sm:$0xff]  }
 0x330   : > { %5606 = vst [vmem:[#allocation3 + $0x110] sm:$0x11] %v5502_v14  ;;  %5607 = vst [vmem:[#allocation3 + $0x118] sm:$0x11] %v5503_v59  ;;  %v16221_v39 = vpack.c.bf16 %v5269_v1, %v5268_v43  ;;  %v16310_v5 = vadd.f32 %v20610_v55, %v20426_v37  ;;  %v16342_v21 = vadd.f32 %v20612_v35, %v20430_v50  ;;  %v17649_v55 = vld [vmem:[%s23841_s3 + $0x1c4] ss:$8 sps:$4 sm:$0xff]  }
 0x331   : > { %v5271_v31 = vsel %vm5143_vm13, %v16340_v38, %v5207_v42  ;;  %vm5144_vm14 = vcmp.ge.f32.partialorder %v16309_v2, 0.0  ;;  %v5208_v17 = vmul.f32 0.1, %v16309_v2  ;;  %v16311_v30 = vadd.f32 %v20636_v0, %v20423_v19  ;;  %v17647_v38 = vld [vmem:[%s23841_s3 + $0x1c0] ss:$8 sps:$4 sm:$0xff]  }
 0x332   : > { %9542 = vmatpush1.bf16.msra.mxu1 %v17641_v13  ;;  %v5504_v48 = vrot.slane %v16221_v39, 7  ;;  %v16222_v3 = vpack.c.bf16 %v5271_v31, %v5270_v12  ;;  %vm5146_vm15 = vcmp.ge.f32.partialorder %v16341_v56, 0.0  ;;  %v5210_v27 = vmul.f32 0.1, %v16341_v56  ;;  %v17652_v13 = vld [vmem:[%s23841_s3 + $0x1d4] ss:$8 sps:$4 sm:$0xff]  }
 0x333   : > { %9543 = vmatprep.subr.bf16.mxu1 %v17646_v10  ;;  %v5272_v35 = vsel %vm5144_vm14, %v16309_v2, %v5208_v17  ;;  %vm5145_vm0 = vcmp.ge.f32.partialorder %v16310_v5, 0.0  ;;  %v5209_v4 = vmul.f32 0.1, %v16310_v5  ;;  %vm5147_vm1 = vcmp.ge.f32.partialorder %v16342_v21, 0.0 }
 0x334   : > { %5608 = vst [vmem:[#allocation3 + $0x120] sm:$0xee] %v5504_v48  ;;  %v5505_v0 = vrot.slane %v16222_v3, 7  ;;  %v5274_v47 = vsel %vm5146_vm15, %v16341_v56, %v5210_v27  ;;  %v5211_v25 = vmul.f32 0.1, %v16342_v21  ;;  %vm5148_vm2 = vcmp.ge.f32.partialorder %v16311_v30, 0.0 }
 0x335   : > { %v5273_v58 = vsel %vm5145_vm0, %v16310_v5, %v5209_v4  ;;  %v5212_v52 = vmul.f32 0.1, %v16311_v30  ;;  %v16343_v44 = vadd.f32 %v20640_v57, %v20428_v34  ;;  %v5506_v49 = vrot.slane %v5504_v48, 4  ;;  %v17653_v4 = vld [vmem:[%s23841_s3 + $0x1e0] ss:$8 sps:$4 sm:$0xff]  }
 0x336   : > { %9544 = vmatpush1.bf16.msra.mxu1 %v17644_v45  ;;  %5609 = vst [vmem:[#allocation3 + $0x128] sm:$0xee] %v5505_v0  ;;  %v16223_v7 = vpack.c.bf16 %v5273_v58, %v5272_v35  ;;  %v5275_v43 = vsel %vm5147_vm1, %v16342_v21, %v5211_v25  ;;  %v20769_v40 = vcombine.high %v5668_v18, %v20679_v36  ;;  %v5509_v14 = vrot.slane %v5505_v0, 4  ;;  %v17650_v21 = vld [vmem:[%s23841_s3 + $0x1d0] ss:$8 sps:$4 sm:$0xff]  }
 0x337   : > { %9545 = vmatprep.subr.bf16.mxu1 %v17649_v55  ;;  %v16224_v59 = vpack.c.bf16 %v5275_v43, %v5274_v47  ;;  %vm5150_vm3 = vcmp.ge.f32.partialorder %v16343_v44, 0.0  ;;  %v5214_v57 = vmul.f32 0.1, %v16343_v44  ;;  %v5276_v12 = vsel %vm5148_vm2, %v16311_v30, %v5212_v52  ;;  %v5672_v30 = vld [vmem:[#allocation3 + $0xf0] sm:$0xff] }
 0x338   : > { %v5507_v10 = vrot.slane %v16223_v7, 7  ;;  %9480 = vmatprep.mubr.bf16.mxu1 %v20769_v40  ;;  %v16312_v1 = vadd.f32 %v20638_v15, %v20426_v37  ;;  %v16344_v42 = vadd.f32 %v20646_v29, %v20430_v50  ;;  %v20781_v56 = vcombine.low %v5668_v18, %v20679_v36  ;;  %v17655_v29 = vld [vmem:[%s23841_s3 + $0x1e4] ss:$8 sps:$4 sm:$0xff]  }
 0x339   : > { %v5510_v2 = vrot.slane %v16224_v59, 7  ;;  %v5278_v39 = vsel %vm5150_vm3, %v16343_v44, %v5214_v57  ;;  %v16313_v5 = vadd.f32 %v20642_v60, %v20423_v19  ;;  %v16345_v55 = vadd.f32 %v20656_v20, %v20428_v34  ;;  %v17660_v34 = vld [vmem:[%s23841_s3 + $0x1f4] ss:$8 sps:$4 sm:$0xff]  }
 0x33a   : > { %9546 = vmatpush1.bf16.msra.mxu1 %v17647_v38  ;;  %v5508_v31 = vsel %vm19063_vm7, %v5506_v49, %v5507_v10  ;;  %v5512_v15 = vrot.slane %v5507_v10, 4  ;;  %vm5149_vm4 = vcmp.ge.f32.partialorder %v16312_v1, 0.0  ;;  %v5213_v17 = vmul.f32 0.1, %v16312_v1  ;;  %v17658_v38 = vld [vmem:[%s23841_s3 + $0x1f0] ss:$8 sps:$4 sm:$0xff]  }
 0x33b   : > { %9547 = vmatprep.subr.bf16.mxu1 %v17652_v13  ;;  %5610 = vst [vmem:[#allocation3 + $0x130] sm:$0xff] %v5508_v31  ;;  %v20795_v19 = vsel %vm19063_vm7, %v5509_v14, %v5510_v2  ;;  %v5513_v60 = vrot.slane %v5510_v2, 4  ;;  %vm5151_vm5 = vcmp.ge.f32.partialorder %v16344_v42, 0.0  ;;  %v5215_v36 = vmul.f32 0.1, %v16344_v42  ;;  %9481 = vmatmul.mubr.bf16.gmra.mrb[48].mxu1 %v20781_v56 }
 0x33c   : > { %5612 = vst [vmem:[#allocation3 + $0x140] sm:$0x11] %v5512_v15  ;;  %5611 = vst [vmem:[#allocation3 + $0x138] sm:$0xff] %v20795_v19  ;;  %v5277_v45 = vsel %vm5149_vm4, %v16312_v1, %v5213_v17  ;;  %vm5152_vm12 = vcmp.ge.f32.partialorder %v16313_v5, 0.0  ;;  %v5216_v48 = vmul.f32 0.1, %v16313_v5  ;;  %v16314_v35 = vadd.f32 %v20648_v9, %v20426_v37 }
 0x33d   : > { %5613 = vst [vmem:[#allocation3 + $0x148] sm:$0x11] %v5513_v60  ;;  %v16225_v3 = vpack.c.bf16 %v5277_v45, %v5276_v12  ;;  %v5279_v27 = vsel %vm5151_vm5, %v16344_v42, %v5215_v36  ;;  %v16346_v47 = vadd.f32 %v20662_v33, %v20430_v50  ;;  %v20809_v25 = vcombine.high %v5672_v30, %v20733_v63  ;;  %v5676_v9 = vld [vmem:[#allocation3 + $0x120] sm:$0xff]  ;;  %v5655_v17 = vld [vmem:[#allocation3 + $0x18] sm:$0xff]  ;;  %v5659_v60 = vld [vmem:[#allocation3 + $0x48] sm:$0xff] }
 0x33e   : > { %9548 = vmatpush1.bf16.msra.mxu1 %v17650_v21  ;;  %v16226_v18 = vpack.c.bf16 %v5279_v27, %v5278_v39  ;;  %v5280_v0 = vsel %vm5152_vm12, %v16313_v5, %v5216_v48  ;;  %vm5154_vm13 = vcmp.ge.f32.partialorder %v16345_v55, 0.0  ;;  %v5218_v37 = vmul.f32 0.1, %v16345_v55  ;;  %v17663_v13 = vld [vmem:[%s23841_s3 + $0x204] ss:$8 sps:$4 sm:$0xff]   ;;  %v5657_v45 = vld [vmem:[#allocation3 + $0x38] sm:$0xff] }
 0x33f   : > { %9549 = vmatprep.subr.bf16.mxu1 %v17655_v29  ;;  %v5514_v20 = vrot.slane %v16225_v3, 7  ;;  %vm5153_vm14 = vcmp.ge.f32.partialorder %v16314_v35, 0.0  ;;  %v5217_v52 = vmul.f32 0.1, %v16314_v35  ;;  %vm5155_vm15 = vcmp.ge.f32.partialorder %v16346_v47, 0.0  ;;  %9490 = vmatprep.mubr.bf16.mxu1 %v20809_v25  ;;  %v5653_v29 = vld [vmem:[#allocation3 + $0x8] sm:$0xff] }
 0x340   : > { %v5515_v58 = vrot.slane %v16226_v18, 7  ;;  %v5219_v44 = vmul.f32 0.1, %v16346_v47  ;;  %v5282_v50 = vsel %vm5154_vm13, %v16345_v55, %v5218_v37  ;;  %v20816_v33 = vcombine.low %v5672_v30, %v20733_v63  ;;  %v17661_v36 = vld [vmem:[%s23841_s3 + $0x200] ss:$8 sps:$4 sm:$0xff]   ;;  %v5665_v37 = vld [vmem:[#allocation3 + $0x98] sm:$0xff] }
 0x341   : > { %5614 = vst [vmem:[#allocation3 + $0x150] sm:$0xee] %v5514_v20  ;;  %v5281_v49 = vsel %vm5153_vm14, %v16314_v35, %v5217_v52  ;;  %v20821_v43 = vcombine.high %v5676_v9, %v5508_v31  ;;  %v5516_v14 = vrot.slane %v5514_v20, 4  ;;  %v20828_v1 = vcombine.low %v5676_v9, %v5508_v31  ;;  %v17667_v48 = vld [vmem:[%s23841_s3 + $0x214] ss:$8 sps:$4 sm:$0xff]   ;;  %v5661_v35 = vld [vmem:[#allocation3 + $0x68] sm:$0xff] }
 0x342   : > { %9550 = vmatpush1.bf16.msra.mxu1 %v17653_v4  ;;  %5615 = vst [vmem:[#allocation3 + $0x158] sm:$0xee] %v5515_v58  ;;  %v5283_v7 = vsel %vm5155_vm15, %v16346_v47, %v5219_v44  ;;  %v5519_v59 = vrot.slane %v5515_v58, 4  ;;  %v16227_v57 = vpack.c.bf16 %v5281_v49, %v5280_v0  ;;  %v20843_v51 = vcombine.high %v5653_v29, %v5655_v17  ;;  %v17665_v27 = vld [vmem:[%s23841_s3 + $0x210] ss:$8 sps:$4 sm:$0xff]  }
 0x343   : > { %9551 = vmatprep.subr.bf16.mxu1 %v17660_v34  ;;  %v16228_v63 = vpack.c.bf16 %v5283_v7, %v5282_v50  ;;  %9491 = vmatmul.mubr.bf16.gmra.mrb[52].mxu1 %v20816_v33  ;;  %v20850_v30 = vcombine.low %v5653_v29, %v5655_v17  ;;  %v20855_v3 = vcombine.high %v5657_v45, %v5659_v60  ;;  %v17670_v55 = vld [vmem:[%s23841_s3 + $0x224] ss:$8 sps:$4 sm:$0xff]   ;;  %v17668_v4 = vld [vmem:[%s23841_s3 + $0x220] ss:$8 sps:$4 sm:$0xff]   ;;  %v17674_v0 = vld [vmem:[%s23841_s3 + $0x234] ss:$8 sps:$4 sm:$0xff]  }
 0x344   : > { %9500 = vmatprep.mubr.bf16.mxu1 %v20821_v43  ;;  %v5517_v10 = vrot.slane %v16227_v57, 7  ;;  %v20868_v18 = vcombine.low %v5657_v45, %v5659_v60  ;;  %v20874_v47 = vcombine.high %v5661_v35, %v20527_v41  ;;  %v17672_v34 = vld [vmem:[%s23841_s3 + $0x230] ss:$8 sps:$4 sm:$0xff]   ;;  %v17677_v20 = vld [vmem:[%s23841_s3 + $0x244] ss:$8 sps:$4 sm:$0xff]   ;;  %v20888_v58 = vcombine.low %v5661_v35, %v20527_v41 }
 0x345   : > { %v5520_v12 = vrot.slane %v16228_v63, 7  ;;  %v17675_v9 = vld [vmem:[%s23841_s3 + $0x240] ss:$8 sps:$4 sm:$0xff]   ;;  %v17680_v52 = vld [vmem:[%s23841_s3 + $0x254] ss:$8 sps:$4 sm:$0xff]   ;;  %v20894_v44 = vcombine.high %v5665_v37, %v20625_v54  ;;  %v20908_v7 = vcombine.low %v5665_v37, %v20625_v54  ;;  %v6003_v35 = vshll.u32 %v20502_v6, 16 }
 0x346   : > { %9552 = vmatpush1.bf16.msra.mxu1 %v17658_v38  ;;  %v5518_v42 = vsel %vm19063_vm7, %v5516_v14, %v5517_v10  ;;  %v5522_v2 = vrot.slane %v5517_v10, 4  ;;  %v17678_v50 = vld [vmem:[%s23841_s3 + $0x250] ss:$8 sps:$4 sm:$0xff]   ;;  %v17683_v41 = vld [vmem:[%s23841_s3 + $0x264] ss:$8 sps:$4 sm:$0xff]   ;;  %vm22459_vm1 = vcmp.lt.s32.totalorder %v583_v22, 256 }
 0x347   : > { %9634 = vmatprep.subr.bf16.mxu1 %v17663_v13  ;;  %v20834_v39 = vsel %vm19063_vm7, %v5519_v59, %v5520_v12  ;;  %v5523_v5 = vrot.slane %v5520_v12, 4  ;;  %5616 = vst [vmem:[#allocation3 + $0x160] sm:$0xff] %v5518_v42  ;;  %v5669_v38 = vld [vmem:[#allocation3 + $0xc8] sm:$0xff]  ;;  %v17686_v13 = vld [vmem:[%s23841_s3 + $0x274] ss:$8 sps:$4 sm:$0xff]  }
 0x348   : > { %5617 = vst [vmem:[#allocation3 + $0x168] sm:$0xff] %v20834_v39  ;;  %v5680_v21 = vld [vmem:[#allocation3 + $0x150] sm:$0xff]  ;;  %5618 = vst [vmem:[#allocation3 + $0x170] sm:$0x11] %v5522_v2  ;;  %v17681_v49 = vld [vmem:[%s23841_s3 + $0x260] ss:$8 sps:$4 sm:$0xff]   ;;  %v20914_v14 = vcombine.high %v5669_v38, %v20687_v62  ;;  %v20928_v10 = vcombine.low %v5669_v38, %v20687_v62 }
 0x349   : > { %5619 = vst [vmem:[#allocation3 + $0x178] sm:$0x11] %v5523_v5  ;;  %v20837_v15 = vcombine.high %v5680_v21, %v5518_v42  ;;  %v20841_v31 = vcombine.low %v5680_v21, %v5518_v42  ;;  %v17684_v59 = vld [vmem:[%s23841_s3 + $0x270] ss:$8 sps:$4 sm:$0xff]   ;;  %v17689_v54 = vld [vmem:[%s23841_s3 + $0x284] ss:$8 sps:$4 sm:$0xff]  }
 0x34a   : > { %v5673_v57 = vld [vmem:[#allocation3 + $0xf8] sm:$0xff]  ;;  %v17687_v63 = vld [vmem:[%s23841_s3 + $0x280] ss:$8 sps:$4 sm:$0xff]   ;;  %v17695_v62 = vld [vmem:[%s23841_s3 + $0x2a4] ss:$8 sps:$4 sm:$0xff]  }
 0x34b   : > { %9501 = vmatmul.mubr.bf16.gmra.mrb[56].mxu1 %v20828_v1  ;;  %v17692_v12 = vld [vmem:[%s23841_s3 + $0x294] ss:$8 sps:$4 sm:$0xff]   ;;  %v20934_v42 = vcombine.high %v5673_v57, %v20737_v11  ;;  %v17690_v2 = vld [vmem:[%s23841_s3 + $0x290] ss:$8 sps:$4 sm:$0xff]   ;;  %v5677_v5 = vld [vmem:[#allocation3 + $0x128] sm:$0xff]  ;;  %v20948_v17 = vcombine.low %v5673_v57, %v20737_v11 }
 0x34c   : > { %9510 = vmatprep.mubr.bf16.mxu1 %v20837_v15  ;;  %v17693_v21 = vld [vmem:[%s23841_s3 + $0x2a0] ss:$8 sps:$4 sm:$0xff]   ;;  %v17698_v29 = vld [vmem:[%s23841_s3 + $0x2b4] ss:$8 sps:$4 sm:$0xff]   ;;  %v20954_v60 = vcombine.high %v5677_v5, %v20795_v19  ;;  %v17701_v11 = vld [vmem:[%s23841_s3 + $0x2c4] ss:$8 sps:$4 sm:$0xff]  }
 0x34d   : > { %v5684_v45 = vld [vmem:[#allocation3 + $0x20] sm:$0x11]  ;;  %v17702_v37 = vld [vmem:[%s23841_s3 + $0x2d0] ss:$8 sps:$4 sm:$0xff]  }
 0x353   : > { %9511 = vmatmul.mubr.bf16.gmra.mrb[60].mxu1 %v20841_v31 }
 0x354   : > { %9553 = vmatprep.mubr.bf16.mxu1 %v20843_v51 }
 0x35b   : > { %9554 = vmatmul.mubr.bf16.vlgmr.msra.gmra.mrb[32].mxu1 %v20850_v30 }
 0x35c   : > { %9635 = vmatpush1.bf16.msra.mxu1 %v17661_v36  ;;  %9563 = vmatprep.mubr.bf16.mxu1 %v20855_v3  ;;  %v17696_v36 = vld [vmem:[%s23841_s3 + $0x2b0] ss:$8 sps:$4 sm:$0xff]  }
 0x35d   : > { %9636 = vmatprep.subr.bf16.mxu1 %v17667_v48  ;;  %v5681_v48 = vld [vmem:[#allocation3 + $0x158] sm:$0xff] }
 0x35e   : > { %v20999_v57 = vcombine.low %v5681_v48, %v20834_v39 }
 0x360   : > { %9637 = vmatpush1.bf16.msra.mxu1 %v17665_v27  ;;  %v20964_v27 = vcombine.high %v5684_v45, %v5684_v45 }
 0x361   : > { %9638 = vmatprep.subr.bf16.mxu1 %v17670_v55  ;;  %v17699_v55 = vld [vmem:[%s23841_s3 + $0x2c0] ss:$8 sps:$4 sm:$0xff]  }
 0x363   : > { %9564 = vmatmul.mubr.bf16.gmra.mrb[36].mxu1 %v20868_v18 }
 0x364   : > { %9639 = vmatpush1.bf16.msra.mxu1 %v17668_v4  ;;  %9573 = vmatprep.mubr.bf16.mxu1 %v20874_v47  ;;  %v20971_v4 = vcombine.low %v5677_v5, %v20795_v19  ;;  %v5686_v19 = vld [vmem:[#allocation3 + $0x50] sm:$0x11] }
 0x365   : > { %9640 = vmatprep.subr.bf16.mxu1 %v17674_v0  ;;  %v17704_v0 = vld [vmem:[%s23841_s3 + $0x2d4] ss:$8 sps:$4 sm:$0xff]  }
 0x368   : > { %9641 = vmatpush1.bf16.msra.mxu1 %v17672_v34  ;;  %v20977_v34 = vcombine.high %v5681_v48, %v20834_v39  ;;  %v17710_v39 = vld [vmem:[%s23841_s3 + $0x2f0] ss:$8 sps:$4 sm:$0xff]   ;;  %v21015_v48 = vcombine.low %v5686_v19, %v5686_v19 }
 0x369   : > { %9642 = vmatprep.subr.bf16.mxu1 %v17677_v20  ;;  %v6008_v20 = vshll.u32 %v20964_v27, 16 }
 0x36b   : > { %9574 = vmatmul.mubr.bf16.gmra.mrb[40].mxu1 %v20888_v58  ;;  %v6010_v38 = vrot.slane %v6008_v20, 1  ;;  %v6039_v20 = vshll.u32 %v20606_v8, 16 }
 0x36c   : > { %9643 = vmatpush1.bf16.msra.mxu1 %v17675_v9  ;;  %9583 = vmatprep.mubr.bf16.mxu1 %v20894_v44  ;;  %v17707_v9 = vld [vmem:[%s23841_s3 + $0x2e4] ss:$8 sps:$4 sm:$0xff]  }
 0x36d   : > { %9644 = vmatprep.subr.bf16.mxu1 %v17680_v52  ;;  %v6005_v52 = vrot.slane %v6003_v35, 1 }
 0x370   : > { %9645 = vmatpush1.bf16.msra.mxu1 %v17678_v50  ;;  %v20988_v50 = vcombine.low %v5684_v45, %v5684_v45  ;;  %v5989_v45 = vshrl.u32 %v20497_v53, 16 }
 0x371   : > { %9646 = vmatprep.subr.bf16.mxu1 %v17683_v41  ;;  %v6001_v41 = vshrl.u32 %v20502_v6, 16  ;;  %v17712_v6 = vld [vmem:[%s23841_s3 + $0x2f4] ss:$8 sps:$4 sm:$0xff]  }
 0x373   : > { %9584 = vmatmul.mubr.bf16.gmra.mrb[44].mxu1 %v20908_v7 }
 0x374   : > { %9647 = vmatpush1.bf16.msra.mxu1 %v17681_v49  ;;  %9593 = vmatprep.mubr.bf16.mxu1 %v20914_v14  ;;  %v20991_v49 = vcombine.high %v5686_v19, %v5686_v19  ;;  %v17719_v19 = vld [vmem:[%s23841_s3 + $0x314] ss:$8 sps:$4 sm:$0xff]  }
 0x375   : > { %9648 = vmatprep.subr.bf16.mxu1 %v17686_v13  ;;  %v5991_v13 = vshll.u32 %v20497_v53, 16 }
 0x377   : > { %v5993_v5 = vrot.slane %v5991_v13, 1 }
 0x378   : > { %9649 = vmatpush1.bf16.msra.mxu1 %v17684_v59  ;;  %v17705_v59 = vld [vmem:[%s23841_s3 + $0x2e0] ss:$8 sps:$4 sm:$0xff]  }
 0x379   : > { %9650 = vmatprep.subr.bf16.mxu1 %v17689_v54  ;;  %v6051_v54 = vshll.u32 %v20573_v16, 16 }
 0x37b   : > { %9594 = vmatmul.mubr.bf16.gmra.mrb[48].mxu1 %v20928_v10 }
 0x37c   : > { %9651 = vmatpush1.bf16.msra.mxu1 %v17687_v63  ;;  %9603 = vmatprep.mubr.bf16.mxu1 %v20934_v42  ;;  %v6006_v63 = vor.u32 %v6005_v52, %v6001_v41  ;;  %v6099_v52 = vshll.u32 %v20654_v46, 16  ;;  %v6044_v41 = vshll.u32 %v21015_v48, 16 }
 0x37d   : > { %9652 = vmatprep.subr.bf16.mxu1 %v17692_v12  ;;  %v5996_v12 = vshll.u32 %v20988_v50, 16 }
 0x380   : > { %9653 = vmatpush1.bf16.msra.mxu1 %v17690_v2  ;;  %v6011_v2 = vsel %vm1272_vm8, %v6006_v63, %v6010_v38  ;;  %v5690_v63 = vld [vmem:[#allocation3 + $0xb0] sm:$0x11] }
 0x381   : > { %9654 = vmatprep.subr.bf16.mxu1 %v17695_v62  ;;  %v6056_v62 = vshll.u32 %v20991_v49, 16 }
 0x383   : > { %9604 = vmatmul.mubr.bf16.gmra.mrb[52].mxu1 %v20948_v17  ;;  %v6058_v35 = vrot.slane %v6056_v62, 1  ;;  %v6046_v62 = vrot.slane %v6044_v41, 1 }
 0x384   : > { %9655 = vmatpush1.bf16.msra.mxu1 %v17693_v21  ;;  %9613 = vmatprep.mubr.bf16.mxu1 %v20954_v60  ;;  %v5688_v21 = vld [vmem:[#allocation3 + $0x80] sm:$0x11] }
 0x385   : > { %9656 = vmatprep.subr.bf16.mxu1 %v17698_v29  ;;  %v17715_v29 = vld [vmem:[%s23841_s3 + $0x304] ss:$8 sps:$4 sm:$0xff]  }
 0x388   : > { %9657 = vmatpush1.bf16.msra.mxu1 %v17696_v36  ;;  %v6053_v36 = vrot.slane %v6051_v54, 1  ;;  %v6041_v54 = vrot.slane %v6039_v20, 1 }
 0x389   : > { %9658 = vmatprep.subr.bf16.mxu1 %v17701_v11  ;;  %v5998_v11 = vrot.slane %v5996_v12, 1  ;;  %v6101_v12 = vrot.slane %v6099_v52, 1  ;;  %v17725_v52 = vld [vmem:[%s23841_s3 + $0x330] ss:$8 sps:$4 sm:$0xff]  }
 0x38b   : > { %9614 = vmatmul.mubr.bf16.gmra.mrb[56].mxu1 %v20971_v4 }
 0x38c   : > { %9659 = vmatpush1.bf16.msra.mxu1 %v17699_v55  ;;  %9623 = vmatprep.mubr.bf16.mxu1 %v20977_v34  ;;  %v6049_v55 = vshrl.u32 %v20573_v16, 16 }
 0x38d   : > { %9660 = vmatprep.subr.bf16.mxu1 %v17704_v0  ;;  %v21018_v0 = vcombine.high %v5688_v21, %v5688_v21 }
 0x38e   : > { %v6054_v53 = vor.u32 %v6053_v36, %v6049_v55  ;;  %v21042_v36 = vcombine.high %v5690_v63, %v5690_v63 }
 0x38f   : > { %v6104_v13 = vshll.u32 %v21018_v0, 16 }
 0x390   : > { %9661 = vmatpush1.bf16.msra.mxu1 %v17702_v37  ;;  %v17713_v37 = vld [vmem:[%s23841_s3 + $0x300] ss:$8 sps:$4 sm:$0xff]   ;;  %v6059_v38 = vsel %vm1272_vm8, %v6054_v53, %v6058_v35  ;;  %v6147_v35 = vshll.u32 %v20714_v28, 16 }
 0x391   : > { %9662 = vmatprep.subr.bf16.mxu1 %v17707_v9  ;;  %v5994_v9 = vor.u32 %v5993_v5, %v5989_v45  ;;  %v21039_v5 = vcombine.low %v5688_v21, %v5688_v21  ;;  %v6087_v45 = vshll.u32 %v20673_v32, 16  ;;  %v17727_v21 = vld [vmem:[%s23841_s3 + $0x334] ss:$8 sps:$4 sm:$0xff]  }
 0x392   : > { %v6149_v41 = vrot.slane %v6147_v35, 1  ;;  %v17733_v35 = vld [vmem:[%s23841_s3 + $0x350] ss:$8 sps:$4 sm:$0xff]  }
 0x393   : > { %9624 = vmatmul.mubr.bf16.gmra.mrb[60].mxu1 %v20999_v57  ;;  %v5999_v16 = vsel %vm1272_vm8, %v5994_v9, %v5998_v11  ;;  %v17720_v11 = vld [vmem:[%s23841_s3 + $0x320] ss:$8 sps:$4 sm:$0xff]   ;;  %v6092_v20 = vshll.u32 %v21039_v5, 16  ;;  %v6152_v9 = vshll.u32 %v21042_v36, 16  ;;  %v6089_v53 = vrot.slane %v6087_v45, 1 }
 0x394   : > { %9663 = vmatpush1.bf16.msra.mxu1 %v17705_v59  ;;  %9666 = vmatprep.mubr.bf16.mxu1 %v6011_v2  ;;  %v17717_v59 = vld [vmem:[%s23841_s3 + $0x310] ss:$8 sps:$4 sm:$0xff]   ;;  %v6037_v2 = vshrl.u32 %v20606_v8, 16 }
 0x395   : > { %9664 = vmatprep.subr.bf16.mxu1 %v17712_v6  ;;  %v17722_v6 = vld [vmem:[%s23841_s3 + $0x324] ss:$8 sps:$4 sm:$0xff]  }
 0x396   : > { %v6042_v55 = vor.u32 %v6041_v54, %v6037_v2  ;;  %v6145_v54 = vshrl.u32 %v20714_v28, 16  ;;  %v6135_v2 = vshll.u32 %v20725_v61, 16 }
 0x398   : > { %9665 = vmatpush1.bf16.msra.mxu1 %v17710_v39  ;;  %v6097_v39 = vshrl.u32 %v20654_v46, 16  ;;  %v6047_v46 = vsel %vm1272_vm8, %v6042_v55, %v6046_v62  ;;  %v17728_v62 = vld [vmem:[%s23841_s3 + $0x340] ss:$8 sps:$4 sm:$0xff]  }
 0x399   : > { %9747 = vmatprep.subr.bf16.mxu1 %v17715_v29  ;;  %v6106_v29 = vrot.slane %v6104_v13, 1  ;;  %v6094_v13 = vrot.slane %v6092_v20, 1 }
 0x39a   : > { %v6102_v8 = vor.u32 %v6101_v12, %v6097_v39 }
 0x39b   : > { %9667 = vmatmul.mubr.bf16.vlgmr.msra.gmra.mrb[32].mxu1 %v5999_v16  ;;  %v17730_v16 = vld [vmem:[%s23841_s3 + $0x344] ss:$8 sps:$4 sm:$0xff]  }
 0x39c   : > { %9748 = vmatpush1.bf16.msra.mxu1 %v17713_v37  ;;  %9676 = vmatprep.mubr.bf16.mxu1 %v6059_v38  ;;  %v6107_v37 = vsel %vm1272_vm8, %v6102_v8, %v6106_v29  ;;  %v6085_v38 = vshrl.u32 %v20673_v32, 16  ;;  %v6195_v29 = vshll.u32 %v20769_v40, 16  ;;  %v6150_v32 = vor.u32 %v6149_v41, %v6145_v54 }
 0x39d   : > { %9749 = vmatprep.subr.bf16.mxu1 %v17719_v19  ;;  %v5692_v19 = vld [vmem:[#allocation3 + $0xe0] sm:$0x11]  ;;  %v6137_v8 = vrot.slane %v6135_v2, 1 }
 0x39e   : > { %v21066_v12 = vcombine.high %v5692_v19, %v5692_v19  ;;  %v6090_v39 = vor.u32 %v6089_v53, %v6085_v38  ;;  %v6197_v20 = vrot.slane %v6195_v29, 1  ;;  %v6193_v53 = vshrl.u32 %v20769_v40, 16  ;;  %v17741_v29 = vld [vmem:[%s23841_s3 + $0x370] ss:$8 sps:$4 sm:$0xff]  }
 0x39f   : > { %v6183_v38 = vshll.u32 %v20781_v56, 16 }
 0x3a0   : > { %9750 = vmatpush1.bf16.msra.mxu1 %v17717_v59  ;;  %v21063_v59 = vcombine.low %v5690_v63, %v5690_v63  ;;  %v17735_v63 = vld [vmem:[%s23841_s3 + $0x354] ss:$8 sps:$4 sm:$0xff]   ;;  %v6095_v28 = vsel %vm1272_vm8, %v6090_v39, %v6094_v13  ;;  %v6200_v55 = vshll.u32 %v21066_v12, 16  ;;  %v17736_v13 = vld [vmem:[%s23841_s3 + $0x360] ss:$8 sps:$4 sm:$0xff]  }
 0x3a1   : > { %9751 = vmatprep.subr.bf16.mxu1 %v17722_v6  ;;  %v6154_v6 = vrot.slane %v6152_v9, 1 }
 0x3a2   : > { %v6140_v45 = vshll.u32 %v21063_v59, 16 }
 0x3a3   : > { %9677 = vmatmul.mubr.bf16.gmra.mrb[36].mxu1 %v6047_v46  ;;  %v17738_v46 = vld [vmem:[%s23841_s3 + $0x364] ss:$8 sps:$4 sm:$0xff]  }
 0x3a4   : > { %9752 = vmatpush1.bf16.msra.mxu1 %v17720_v11  ;;  %9686 = vmatprep.mubr.bf16.mxu1 %v6107_v37  ;;  %v6155_v11 = vsel %vm1272_vm8, %v6150_v32, %v6154_v6  ;;  %v6133_v37 = vshrl.u32 %v20725_v61, 16  ;;  %v6142_v9 = vrot.slane %v6140_v45, 1  ;;  %v6243_v6 = vshll.u32 %v20809_v25, 16 }
 0x3a5   : > { %9753 = vmatprep.subr.bf16.mxu1 %v17727_v21  ;;  %v5694_v21 = vld [vmem:[#allocation3 + $0x110] sm:$0x11]  ;;  %v6198_v61 = vor.u32 %v6197_v20, %v6193_v53  ;;  %v6185_v32 = vrot.slane %v6183_v38, 1 }
 0x3a6   : > { %v21090_v41 = vcombine.high %v5694_v21, %v5694_v21  ;;  %v6138_v54 = vor.u32 %v6137_v8, %v6133_v37  ;;  %v6245_v45 = vrot.slane %v6243_v6, 1  ;;  %v6241_v8 = vshrl.u32 %v20809_v25, 16  ;;  %v17749_v6 = vld [vmem:[%s23841_s3 + $0x390] ss:$8 sps:$4 sm:$0xff]  }
 0x3a7   : > { %v6231_v37 = vshll.u32 %v20816_v33, 16 }
 0x3a8   : > { %9754 = vmatpush1.bf16.msra.mxu1 %v17725_v52  ;;  %v21087_v52 = vcombine.low %v5692_v19, %v5692_v19  ;;  %v17743_v19 = vld [vmem:[%s23841_s3 + $0x374] ss:$8 sps:$4 sm:$0xff]   ;;  %v6143_v40 = vsel %vm1272_vm8, %v6138_v54, %v6142_v9  ;;  %v6248_v39 = vshll.u32 %v21090_v41, 16  ;;  %v17744_v9 = vld [vmem:[%s23841_s3 + $0x380] ss:$8 sps:$4 sm:$0xff]  }
 0x3a9   : > { %9755 = vmatprep.subr.bf16.mxu1 %v17730_v16  ;;  %v6202_v16 = vrot.slane %v6200_v55, 1 }
 0x3aa   : > { %v6188_v2 = vshll.u32 %v21087_v52, 16 }
 0x3ab   : > { %9687 = vmatmul.mubr.bf16.gmra.mrb[40].mxu1 %v6095_v28  ;;  %v17746_v28 = vld [vmem:[%s23841_s3 + $0x384] ss:$8 sps:$4 sm:$0xff]  }
 0x3ac   : > { %9756 = vmatpush1.bf16.msra.mxu1 %v17728_v62  ;;  %9696 = vmatprep.mubr.bf16.mxu1 %v6155_v11  ;;  %v6203_v62 = vsel %vm1272_vm8, %v6198_v61, %v6202_v16  ;;  %v6181_v11 = vshrl.u32 %v20781_v56, 16  ;;  %v6190_v55 = vrot.slane %v6188_v2, 1  ;;  %v6291_v16 = vshll.u32 %v20821_v43, 16 }
 0x3ad   : > { %9757 = vmatprep.subr.bf16.mxu1 %v17735_v63  ;;  %v5696_v63 = vld [vmem:[#allocation3 + $0x140] sm:$0x11]  ;;  %v6246_v56 = vor.u32 %v6245_v45, %v6241_v8  ;;  %v6233_v61 = vrot.slane %v6231_v37, 1 }
 0x3ae   : > { %v21114_v20 = vcombine.high %v5696_v63, %v5696_v63  ;;  %v6186_v53 = vor.u32 %v6185_v32, %v6181_v11  ;;  %v6293_v2 = vrot.slane %v6291_v16, 1  ;;  %v6289_v32 = vshrl.u32 %v20821_v43, 16  ;;  %v17757_v16 = vld [vmem:[%s23841_s3 + $0x3b0] ss:$8 sps:$4 sm:$0xff]  }
 0x3af   : > { %v6279_v11 = vshll.u32 %v20828_v1, 16 }
 0x3b0   : > { %9758 = vmatpush1.bf16.msra.mxu1 %v17733_v35  ;;  %v21111_v35 = vcombine.low %v5694_v21, %v5694_v21  ;;  %v17751_v21 = vld [vmem:[%s23841_s3 + $0x394] ss:$8 sps:$4 sm:$0xff]   ;;  %v6191_v25 = vsel %vm1272_vm8, %v6186_v53, %v6190_v55  ;;  %v6296_v54 = vshll.u32 %v21114_v20, 16  ;;  %v17752_v55 = vld [vmem:[%s23841_s3 + $0x3a0] ss:$8 sps:$4 sm:$0xff]  }
 0x3b1   : > { %9759 = vmatprep.subr.bf16.mxu1 %v17738_v46  ;;  %v6250_v46 = vrot.slane %v6248_v39, 1 }
 0x3b2   : > { %v6236_v38 = vshll.u32 %v21111_v35, 16 }
 0x3b3   : > { %9697 = vmatmul.mubr.bf16.gmra.mrb[44].mxu1 %v6143_v40  ;;  %v17754_v40 = vld [vmem:[%s23841_s3 + $0x3a4] ss:$8 sps:$4 sm:$0xff]  }
 0x3b4   : > { %9760 = vmatpush1.bf16.msra.mxu1 %v17736_v13  ;;  %9706 = vmatprep.mubr.bf16.mxu1 %v6203_v62  ;;  %v6251_v13 = vsel %vm1272_vm8, %v6246_v56, %v6250_v46  ;;  %v6229_v62 = vshrl.u32 %v20816_v33, 16  ;;  %v6238_v39 = vrot.slane %v6236_v38, 1  ;;  %v6339_v46 = vshll.u32 %v20837_v15, 16 }
 0x3b5   : > { %9761 = vmatprep.subr.bf16.mxu1 %v17743_v19  ;;  %v5698_v19 = vld [vmem:[#allocation3 + $0x170] sm:$0x11]  ;;  %v6294_v33 = vor.u32 %v6293_v2, %v6289_v32  ;;  %v6281_v56 = vrot.slane %v6279_v11, 1  ;;  %v17760_v32 = vld [vmem:[%s23841_s3 + $0x3c0] ss:$8 sps:$4 sm:$0xff]  }
 0x3b6   : > { %v21138_v45 = vcombine.high %v5698_v19, %v5698_v19  ;;  %v6234_v8 = vor.u32 %v6233_v61, %v6229_v62  ;;  %v6341_v38 = vrot.slane %v6339_v46, 1  ;;  %v6027_v61 = vshll.u32 %v20843_v51, 16 }
 0x3b8   : > { %9762 = vmatpush1.bf16.msra.mxu1 %v17741_v29  ;;  %v21135_v29 = vcombine.low %v5696_v63, %v5696_v63  ;;  %v17759_v63 = vld [vmem:[%s23841_s3 + $0x3b4] ss:$8 sps:$4 sm:$0xff]   ;;  %v6239_v43 = vsel %vm1272_vm8, %v6234_v8, %v6238_v39  ;;  %v6344_v53 = vshll.u32 %v21138_v45, 16  ;;  %v6327_v39 = vshll.u32 %v20841_v31, 16 }
 0x3b9   : > { %9763 = vmatprep.subr.bf16.mxu1 %v17746_v28  ;;  %v6298_v28 = vrot.slane %v6296_v54, 1  ;;  %v6029_v8 = vrot.slane %v6027_v61, 1 }
 0x3ba   : > { %v6284_v37 = vshll.u32 %v21135_v29, 16  ;;  %v6346_v2 = vrot.slane %v6344_v53, 1  ;;  %v6015_v53 = vshll.u32 %v20850_v30, 16 }
 0x3bb   : > { %9707 = vmatmul.mubr.bf16.gmra.mrb[48].mxu1 %v6191_v25  ;;  %v17762_v25 = vld [vmem:[%s23841_s3 + $0x3c4] ss:$8 sps:$4 sm:$0xff]  }
 0x3bc   : > { %9764 = vmatpush1.bf16.msra.mxu1 %v17744_v9  ;;  %9716 = vmatprep.mubr.bf16.mxu1 %v6251_v13  ;;  %v6299_v9 = vsel %vm1272_vm8, %v6294_v33, %v6298_v28  ;;  %v6277_v13 = vshrl.u32 %v20828_v1, 16  ;;  %v6286_v54 = vrot.slane %v6284_v37, 1  ;;  %v17765_v33 = vld [vmem:[%s23841_s3 + $0x3d0] ss:$8 sps:$4 sm:$0xff]   ;;  %v17770_v37 = vld [vmem:[%s23841_s3 + $0x3e4] ss:$8 sps:$4 sm:$0xff]  }
 0x3bd   : > { %9765 = vmatprep.subr.bf16.mxu1 %v17751_v21  ;;  %v5685_v21 = vld [vmem:[#allocation3 + $0x28] sm:$0x11] }
 0x3be   : > { %v21163_v62 = vcombine.high %v5685_v21, %v5685_v21  ;;  %v6282_v28 = vor.u32 %v6281_v56, %v6277_v13 }
 0x3c0   : > { %9766 = vmatpush1.bf16.msra.mxu1 %v17749_v6  ;;  %v21159_v6 = vcombine.low %v5698_v19, %v5698_v19  ;;  %v17767_v19 = vld [vmem:[%s23841_s3 + $0x3d4] ss:$8 sps:$4 sm:$0xff]   ;;  %v6287_v11 = vsel %vm1272_vm8, %v6282_v28, %v6286_v54  ;;  %v6032_v46 = vshll.u32 %v21163_v62, 16 }
 0x3c1   : > { %9767 = vmatprep.subr.bf16.mxu1 %v17754_v40  ;;  %v6337_v40 = vshrl.u32 %v20837_v15, 16 }
 0x3c2   : > { %v6332_v15 = vshll.u32 %v21159_v6, 16  ;;  %v6034_v54 = vrot.slane %v6032_v46, 1  ;;  %v6063_v46 = vshll.u32 %v20868_v18, 16 }
 0x3c3   : > { %9717 = vmatmul.mubr.bf16.gmra.mrb[52].mxu1 %v6239_v43  ;;  %v6342_v1 = vor.u32 %v6341_v38, %v6337_v40  ;;  %v5687_v43 = vld [vmem:[#allocation3 + $0x58] sm:$0x11]  ;;  %v6075_v38 = vshll.u32 %v20855_v3, 16  ;;  %v17768_v40 = vld [vmem:[%s23841_s3 + $0x3e0] ss:$8 sps:$4 sm:$0xff]  }
 0x3c4   : > { %9768 = vmatpush1.bf16.msra.mxu1 %v17752_v55  ;;  %9726 = vmatprep.mubr.bf16.mxu1 %v6299_v9  ;;  %v6025_v9 = vshrl.u32 %v20843_v51, 16  ;;  %v6334_v56 = vrot.slane %v6332_v15, 1  ;;  %v21188_v61 = vcombine.high %v5687_v43, %v5687_v43  ;;  %v6017_v51 = vrot.slane %v6015_v53, 1  ;;  %v5689_v15 = vld [vmem:[#allocation3 + $0x88] sm:$0x11] }
 0x3c5   : > { %9769 = vmatprep.subr.bf16.mxu1 %v17759_v63  ;;  %v6347_v55 = vsel %vm1272_vm8, %v6342_v1, %v6346_v2  ;;  %v6329_v63 = vrot.slane %v6327_v39, 1  ;;  %v6077_v28 = vrot.slane %v6075_v38, 1  ;;  %v21211_v53 = vcombine.high %v5689_v15, %v5689_v15 }
 0x3c6   : > { %v6030_v13 = vor.u32 %v6029_v8, %v6025_v9  ;;  %v6080_v1 = vshll.u32 %v21188_v61, 16  ;;  %v6073_v8 = vshrl.u32 %v20855_v3, 16  ;;  %v17783_v3 = vld [vmem:[%s23841_s3 + $0x414] ss:$8 sps:$4 sm:$0xff]  }
 0x3c8   : > { %9770 = vmatpush1.bf16.msra.mxu1 %v17757_v16  ;;  %v6325_v16 = vshrl.u32 %v20841_v31, 16  ;;  %v17776_v31 = vld [vmem:[%s23841_s3 + $0x3f4] ss:$8 sps:$4 sm:$0xff]   ;;  %v6082_v9 = vrot.slane %v6080_v1, 1  ;;  %v21231_v1 = vcombine.low %v5689_v15, %v5689_v15 }
 0x3c9   : > { %9771 = vmatprep.subr.bf16.mxu1 %v17762_v25  ;;  %v21185_v25 = vcombine.low %v5685_v21, %v5685_v21  ;;  %v17791_v15 = vld [vmem:[%s23841_s3 + $0x434] ss:$8 sps:$4 sm:$0xff]  }
 0x3ca   : > { %v6330_v2 = vor.u32 %v6329_v63, %v6325_v16  ;;  %v17777_v16 = vld [vmem:[%s23841_s3 + $0x400] ss:$8 sps:$4 sm:$0xff]  }
 0x3cb   : > { %9727 = vmatmul.mubr.bf16.gmra.mrb[56].mxu1 %v6287_v11  ;;  %v6020_v39 = vshll.u32 %v21185_v25, 16  ;;  %v17774_v11 = vld [vmem:[%s23841_s3 + $0x3f0] ss:$8 sps:$4 sm:$0xff]  }
 0x3cc   : > { %9772 = vmatpush1.bf16.msra.mxu1 %v17760_v32  ;;  %9736 = vmatprep.mubr.bf16.mxu1 %v6347_v55  ;;  %v6335_v21 = vsel %vm1272_vm8, %v6330_v2, %v6334_v56  ;;  %v6035_v32 = vsel %vm1272_vm8, %v6030_v13, %v6034_v54  ;;  %v17779_v55 = vld [vmem:[%s23841_s3 + $0x404] ss:$8 sps:$4 sm:$0xff]   ;;  %v6123_v56 = vshll.u32 %v20874_v47, 16  ;;  %v17781_v2 = vld [vmem:[%s23841_s3 + $0x410] ss:$8 sps:$4 sm:$0xff]  }
 0x3cd   : > { %9773 = vmatprep.subr.bf16.mxu1 %v17767_v19  ;;  %v6013_v19 = vshrl.u32 %v20850_v30, 16  ;;  %v6022_v63 = vrot.slane %v6020_v39, 1  ;;  %v6078_v30 = vor.u32 %v6077_v28, %v6073_v8  ;;  %v6111_v8 = vshll.u32 %v20888_v58, 16 }
 0x3ce   : > { %v6125_v39 = vrot.slane %v6123_v56, 1 }
 0x3cf   : > { %v6083_v54 = vsel %vm1272_vm8, %v6078_v30, %v6082_v9  ;;  %v6113_v56 = vrot.slane %v6111_v8, 1 }
 0x3d0   : > { %9774 = vmatpush1.bf16.msra.mxu1 %v17765_v33  ;;  %v6018_v33 = vor.u32 %v6017_v51, %v6013_v19  ;;  %v5691_v51 = vld [vmem:[#allocation3 + $0xb8] sm:$0x11]  ;;  %v6121_v19 = vshrl.u32 %v20874_v47, 16 }
 0x3d1   : > { %9775 = vmatprep.subr.bf16.mxu1 %v17770_v37  ;;  %v21209_v37 = vcombine.low %v5687_v43, %v5687_v43  ;;  %v6065_v43 = vrot.slane %v6063_v46, 1  ;;  %v6171_v46 = vshll.u32 %v20894_v44, 16 }
 0x3d2   : > { %v6023_v38 = vsel %vm1272_vm8, %v6018_v33, %v6022_v63  ;;  %v6126_v33 = vor.u32 %v6125_v39, %v6121_v19  ;;  %v6116_v63 = vshll.u32 %v21231_v1, 16  ;;  %v6159_v39 = vshll.u32 %v20908_v7, 16 }
 0x3d3   : > { %9737 = vmatmul.mubr.bf16.gmra.mrb[60].mxu1 %v6335_v21  ;;  %v6068_v13 = vshll.u32 %v21209_v37, 16  ;;  %v17786_v21 = vld [vmem:[%s23841_s3 + $0x424] ss:$8 sps:$4 sm:$0xff]   ;;  %v6219_v19 = vshll.u32 %v20914_v14, 16 }
 0x3d4   : > { %9776 = vmatpush1.bf16.msra.mxu1 %v17768_v40  ;;  %9779 = vmatprep.mubr.bf16.mxu1 %v6035_v32  ;;  %v6128_v40 = vshll.u32 %v21211_v53, 16 }
 0x3d5   : > { %9777 = vmatprep.subr.bf16.mxu1 %v17776_v31  ;;  %v6061_v31 = vshrl.u32 %v20868_v18, 16  ;;  %v6070_v28 = vrot.slane %v6068_v13, 1  ;;  %v17784_v18 = vld [vmem:[%s23841_s3 + $0x420] ss:$8 sps:$4 sm:$0xff]   ;;  %v6109_v13 = vshrl.u32 %v20888_v58, 16 }
 0x3d7   : > { %v6066_v32 = vor.u32 %v6065_v43, %v6061_v31  ;;  %v6173_v43 = vrot.slane %v6171_v46, 1  ;;  %v17797_v46 = vld [vmem:[%s23841_s3 + $0x450] ss:$8 sps:$4 sm:$0xff]  }
 0x3d8   : > { %9778 = vmatpush1.bf16.msra.mxu1 %v17774_v11  ;;  %v6130_v11 = vrot.slane %v6128_v40, 1  ;;  %v21255_v40 = vcombine.low %v5691_v51, %v5691_v51 }
 0x3d9   : > { %9860 = vmatprep.subr.bf16.mxu1 %v17779_v55  ;;  %v21234_v55 = vcombine.high %v5691_v51, %v5691_v51  ;;  %v6071_v47 = vsel %vm1272_vm8, %v6066_v32, %v6070_v28  ;;  %v17792_v32 = vld [vmem:[%s23841_s3 + $0x440] ss:$8 sps:$4 sm:$0xff]   ;;  %v6114_v28 = vor.u32 %v6113_v56, %v6109_v13  ;;  %v17799_v51 = vld [vmem:[%s23841_s3 + $0x454] ss:$8 sps:$4 sm:$0xff]   ;;  %v6217_v56 = vshrl.u32 %v20914_v14, 16 }
 0x3da   : > { %v6131_v30 = vsel %vm1272_vm8, %v6126_v33, %v6130_v11  ;;  %v6164_v11 = vshll.u32 %v21255_v40, 16  ;;  %v6161_v33 = vrot.slane %v6159_v39, 1  ;;  %v6207_v13 = vshll.u32 %v20928_v10, 16 }
 0x3db   : > { %9780 = vmatmul.mubr.bf16.vlgmr.msra.gmra.mrb[32].mxu1 %v6023_v38  ;;  %v6176_v9 = vshll.u32 %v21234_v55, 16  ;;  %v17794_v38 = vld [vmem:[%s23841_s3 + $0x444] ss:$8 sps:$4 sm:$0xff]  }
 0x3dc   : > { %9861 = vmatpush1.bf16.msra.mxu1 %v17777_v16  ;;  %9789 = vmatprep.mubr.bf16.mxu1 %v6083_v54  ;;  %v17789_v16 = vld [vmem:[%s23841_s3 + $0x430] ss:$8 sps:$4 sm:$0xff]   ;;  %v6118_v54 = vrot.slane %v6116_v63, 1  ;;  %v6221_v63 = vrot.slane %v6219_v19, 1 }
 0x3dd   : > { %9862 = vmatprep.subr.bf16.mxu1 %v17783_v3  ;;  %v5693_v3 = vld [vmem:[#allocation3 + $0xe8] sm:$0x11]  ;;  %v6178_v31 = vrot.slane %v6176_v9, 1  ;;  %v6166_v9 = vrot.slane %v6164_v11, 1  ;;  %v17805_v19 = vld [vmem:[%s23841_s3 + $0x470] ss:$8 sps:$4 sm:$0xff]  }
 0x3e0   : > { %9863 = vmatpush1.bf16.msra.mxu1 %v17781_v2  ;;  %v6169_v2 = vshrl.u32 %v20894_v44, 16  ;;  %v6119_v44 = vsel %vm1272_vm8, %v6114_v28, %v6118_v54  ;;  %v17800_v54 = vld [vmem:[%s23841_s3 + $0x460] ss:$8 sps:$4 sm:$0xff]  }
 0x3e1   : > { %9864 = vmatprep.subr.bf16.mxu1 %v17786_v21  ;;  %v21258_v21 = vcombine.high %v5693_v3, %v5693_v3 }
 0x3e2   : > { %v6174_v58 = vor.u32 %v6173_v43, %v6169_v2 }
 0x3e3   : > { %9790 = vmatmul.mubr.bf16.gmra.mrb[36].mxu1 %v6071_v47  ;;  %v17802_v47 = vld [vmem:[%s23841_s3 + $0x464] ss:$8 sps:$4 sm:$0xff]  }
 0x3e4   : > { %9865 = vmatpush1.bf16.msra.mxu1 %v17784_v18  ;;  %9799 = vmatprep.mubr.bf16.mxu1 %v6131_v30  ;;  %v6179_v8 = vsel %vm1272_vm8, %v6174_v58, %v6178_v31  ;;  %v6224_v18 = vshll.u32 %v21258_v21, 16  ;;  %v6157_v30 = vshrl.u32 %v20908_v7, 16  ;;  %v6267_v31 = vshll.u32 %v20934_v42, 16 }
 0x3e5   : > { %9866 = vmatprep.subr.bf16.mxu1 %v17791_v15  ;;  %v5695_v15 = vld [vmem:[#allocation3 + $0x118] sm:$0x11]  ;;  %v6222_v7 = vor.u32 %v6221_v63, %v6217_v56  ;;  %v6209_v58 = vrot.slane %v6207_v13, 1 }
 0x3e6   : > { %v21282_v43 = vcombine.high %v5695_v15, %v5695_v15  ;;  %v6162_v2 = vor.u32 %v6161_v33, %v6157_v30  ;;  %v6269_v11 = vrot.slane %v6267_v31, 1  ;;  %v6265_v33 = vshrl.u32 %v20934_v42, 16  ;;  %v17813_v31 = vld [vmem:[%s23841_s3 + $0x490] ss:$8 sps:$4 sm:$0xff]  }
 0x3e7   : > { %v6255_v30 = vshll.u32 %v20948_v17, 16 }
 0x3e8   : > { %9867 = vmatpush1.bf16.msra.mxu1 %v17789_v16  ;;  %v21279_v16 = vcombine.low %v5693_v3, %v5693_v3  ;;  %v17807_v3 = vld [vmem:[%s23841_s3 + $0x474] ss:$8 sps:$4 sm:$0xff]   ;;  %v6167_v14 = vsel %vm1272_vm8, %v6162_v2, %v6166_v9  ;;  %v6272_v28 = vshll.u32 %v21282_v43, 16  ;;  %v17808_v9 = vld [vmem:[%s23841_s3 + $0x480] ss:$8 sps:$4 sm:$0xff]  }
 0x3e9   : > { %9868 = vmatprep.subr.bf16.mxu1 %v17794_v38  ;;  %v6226_v38 = vrot.slane %v6224_v18, 1 }
 0x3ea   : > { %v6212_v39 = vshll.u32 %v21279_v16, 16 }
 0x3eb   : > { %9800 = vmatmul.mubr.bf16.gmra.mrb[40].mxu1 %v6119_v44  ;;  %v17810_v44 = vld [vmem:[%s23841_s3 + $0x484] ss:$8 sps:$4 sm:$0xff]  }
 0x3ec   : > { %9869 = vmatpush1.bf16.msra.mxu1 %v17792_v32  ;;  %9809 = vmatprep.mubr.bf16.mxu1 %v6179_v8  ;;  %v6227_v32 = vsel %vm1272_vm8, %v6222_v7, %v6226_v38  ;;  %v6205_v8 = vshrl.u32 %v20928_v10, 16  ;;  %v6214_v18 = vrot.slane %v6212_v39, 1  ;;  %v6315_v38 = vshll.u32 %v20954_v60, 16 }
 0x3ed   : > { %9870 = vmatprep.subr.bf16.mxu1 %v17799_v51  ;;  %v5697_v51 = vld [vmem:[#allocation3 + $0x148] sm:$0x11]  ;;  %v6270_v10 = vor.u32 %v6269_v11, %v6265_v33  ;;  %v6257_v7 = vrot.slane %v6255_v30, 1 }
 0x3ee   : > { %v21306_v63 = vcombine.high %v5697_v51, %v5697_v51  ;;  %v6210_v56 = vor.u32 %v6209_v58, %v6205_v8  ;;  %v6317_v39 = vrot.slane %v6315_v38, 1  ;;  %v6313_v58 = vshrl.u32 %v20954_v60, 16  ;;  %v17821_v38 = vld [vmem:[%s23841_s3 + $0x4b0] ss:$8 sps:$4 sm:$0xff]  }
 0x3ef   : > { %v6303_v8 = vshll.u32 %v20971_v4, 16 }
 0x3f0   : > { %9871 = vmatpush1.bf16.msra.mxu1 %v17797_v46  ;;  %v21303_v46 = vcombine.low %v5695_v15, %v5695_v15  ;;  %v17815_v15 = vld [vmem:[%s23841_s3 + $0x494] ss:$8 sps:$4 sm:$0xff]   ;;  %v6215_v42 = vsel %vm1272_vm8, %v6210_v56, %v6214_v18  ;;  %v6320_v2 = vshll.u32 %v21306_v63, 16  ;;  %v17816_v18 = vld [vmem:[%s23841_s3 + $0x4a0] ss:$8 sps:$4 sm:$0xff]  }
 0x3f1   : > { %9872 = vmatprep.subr.bf16.mxu1 %v17802_v47  ;;  %v6274_v47 = vrot.slane %v6272_v28, 1 }
 0x3f2   : > { %v6260_v13 = vshll.u32 %v21303_v46, 16 }
 0x3f3   : > { %9810 = vmatmul.mubr.bf16.gmra.mrb[44].mxu1 %v6167_v14  ;;  %v17818_v14 = vld [vmem:[%s23841_s3 + $0x4a4] ss:$8 sps:$4 sm:$0xff]  }
 0x3f4   : > { %9873 = vmatpush1.bf16.msra.mxu1 %v17800_v54  ;;  %9819 = vmatprep.mubr.bf16.mxu1 %v6227_v32  ;;  %v6275_v54 = vsel %vm1272_vm8, %v6270_v10, %v6274_v47  ;;  %v6253_v32 = vshrl.u32 %v20948_v17, 16  ;;  %v6262_v28 = vrot.slane %v6260_v13, 1  ;;  %v6363_v47 = vshll.u32 %v20977_v34, 16 }
 0x3f5   : > { %9874 = vmatprep.subr.bf16.mxu1 %v17807_v3  ;;  %v5699_v3 = vld [vmem:[#allocation3 + $0x178] sm:$0x11]  ;;  %v6318_v17 = vor.u32 %v6317_v39, %v6313_v58  ;;  %v6305_v10 = vrot.slane %v6303_v8, 1  ;;  %v6301_v13 = vshrl.u32 %v20971_v4, 16  ;;  %v17824_v39 = vld [vmem:[%s23841_s3 + $0x4c0] ss:$8 sps:$4 sm:$0xff]  }
 0x3f6   : > { %v21330_v11 = vcombine.high %v5699_v3, %v5699_v3  ;;  %v6258_v33 = vor.u32 %v6257_v7, %v6253_v32  ;;  %v17831_v4 = vld [vmem:[%s23841_s3 + $0x4d4] ss:$8 sps:$4 sm:$0xff]   ;;  %v17829_v8 = vld [vmem:[%s23841_s3 + $0x4d0] ss:$8 sps:$4 sm:$0xff]  }
 0x3f7   : > { %v6306_v32 = vor.u32 %v6305_v10, %v6301_v13  ;;  %v17838_v10 = vld [vmem:[%s23841_s3 + $0x4f4] ss:$8 sps:$4 sm:$0xff]   ;;  %v17836_v13 = vld [vmem:[%s23841_s3 + $0x4f0] ss:$8 sps:$4 sm:$0xff]  }
 0x3f8   : > { %9875 = vmatpush1.bf16.msra.mxu1 %v17805_v19  ;;  %v21327_v19 = vcombine.low %v5697_v51, %v5697_v51  ;;  %v17823_v51 = vld [vmem:[%s23841_s3 + $0x4b4] ss:$8 sps:$4 sm:$0xff]   ;;  %v6263_v60 = vsel %vm1272_vm8, %v6258_v33, %v6262_v28  ;;  %v6368_v56 = vshll.u32 %v21330_v11, 16  ;;  %v17834_v33 = vld [vmem:[%s23841_s3 + $0x4e4] ss:$8 sps:$4 sm:$0xff]  }
 0x3f9   : > { %9876 = vmatprep.subr.bf16.mxu1 %v17810_v44  ;;  %v6322_v44 = vrot.slane %v6320_v2, 1  ;;  %v21351_v2 = vcombine.low %v5699_v3, %v5699_v3 }
 0x3fa   : > { %v6308_v30 = vshll.u32 %v21327_v19, 16  ;;  %v6370_v7 = vrot.slane %v6368_v56, 1 }
 0x3fb   : > { %9820 = vmatmul.mubr.bf16.gmra.mrb[48].mxu1 %v6215_v42  ;;  %v6365_v42 = vrot.slane %v6363_v47, 1  ;;  %v6356_v58 = vshll.u32 %v21351_v2, 16  ;;  %v18583_v47 = vld [vmem:[#allocation3 + $0x10] sm:$0xff] }
 0x3fc   : > { %9877 = vmatpush1.bf16.msra.mxu1 %v17808_v9  ;;  %9829 = vmatprep.mubr.bf16.mxu1 %v6275_v54  ;;  %v6323_v9 = vsel %vm1272_vm8, %v6318_v17, %v6322_v44  ;;  %v6310_v54 = vrot.slane %v6308_v30, 1  ;;  %v6488_v30 = vrot.slane %v20964_v27, 1 }
 0x3fd   : > { %9878 = vmatprep.subr.bf16.mxu1 %v17815_v15  ;;  %v17826_v15 = vld [vmem:[%s23841_s3 + $0x4c4] ss:$8 sps:$4 sm:$0xff]  }
 0x3fe   : > { %v6311_v3 = vsel %vm1272_vm8, %v6306_v32, %v6310_v54  ;;  %v17841_v54 = vld [vmem:[%s23841_s3 + $0x504] ss:$8 sps:$4 sm:$0xff]   ;;  %v17839_v32 = vld [vmem:[%s23841_s3 + $0x500] ss:$8 sps:$4 sm:$0xff]  }
 0x400   : > { %9879 = vmatpush1.bf16.msra.mxu1 %v17813_v31  ;;  %v6361_v31 = vshrl.u32 %v20977_v34, 16  ;;  %v5700_v34 = vld [vmem:[#allocation3] sm:$0xee] }
 0x401   : > { %9880 = vmatprep.subr.bf16.mxu1 %v17818_v14  ;;  %v6351_v14 = vshll.u32 %v20999_v57, 16  ;;  %v21370_v17 = vcombine.high %v5700_v34, %v18583_v47  ;;  %v21383_v27 = vcombine.low %v5700_v34, %v18583_v47  ;;  %v5704_v34 = vld [vmem:[#allocation3 + $0x60] sm:$0xee]  ;;  %v6497_v47 = vrot.slane %v21015_v48, 1 }
 0x402   : > { %v6366_v28 = vor.u32 %v6365_v42, %v6361_v31  ;;  %v5702_v42 = vld [vmem:[#allocation3 + $0x30] sm:$0xee]  ;;  %v18584_v31 = vld [vmem:[#allocation3 + $0x40] sm:$0xff] }
 0x403   : > { %9830 = vmatmul.mubr.bf16.gmra.mrb[52].mxu1 %v6263_v60  ;;  %v6358_v60 = vrot.slane %v6356_v58, 1 }
 0x404   : > { %9881 = vmatpush1.bf16.msra.mxu1 %v17816_v18  ;;  %9839 = vmatprep.mubr.bf16.mxu1 %v6323_v9  ;;  %v6371_v44 = vsel %vm1272_vm8, %v6366_v28, %v6370_v7  ;;  %v6353_v18 = vrot.slane %v6351_v14, 1  ;;  %v17832_v9 = vld [vmem:[%s23841_s3 + $0x4e0] ss:$8 sps:$4 sm:$0xff]   ;;  %v21391_v7 = vcombine.high %v5702_v42, %v18584_v31  ;;  %v6485_v14 = vrot.slane %v20988_v50, 1 }
 0x405   : > { %9882 = vmatprep.subr.bf16.mxu1 %v17823_v51  ;;  %v6349_v51 = vshrl.u32 %v20999_v57, 16  ;;  %v6484_v28 = vrot.slane %v21383_v27, 1 }
 0x407   : > { %v6354_v56 = vor.u32 %v6353_v18, %v6349_v51  ;;  %v6486_v58 = vsel %vm1521_vm9, %v6484_v28, %v6485_v14  ;;  %v18585_v18 = vld [vmem:[#allocation3 + $0x70] sm:$0xff]  ;;  %v6512_v51 = vrot.slane %v21018_v0, 1  ;;  %v17851_v14 = vld [vmem:[%s23841_s3 + $0x540] ss:$8 sps:$4 sm:$0xff]  }
 0x408   : > { %9883 = vmatpush1.bf16.msra.mxu1 %v17821_v38  ;;  %v6487_v38 = vrot.slane %v21370_v17, 1  ;;  %v17848_v0 = vld [vmem:[%s23841_s3 + $0x530] ss:$8 sps:$4 sm:$0xff]   ;;  %v17856_v28 = vld [vmem:[%s23841_s3 + $0x554] ss:$8 sps:$4 sm:$0xff]  }
 0x409   : > { %9884 = vmatprep.subr.bf16.mxu1 %v17826_v15  ;;  %v6359_v15 = vsel %vm1272_vm8, %v6354_v56, %v6358_v60  ;;  %v17845_v60 = vld [vmem:[%s23841_s3 + $0x520] ss:$8 sps:$4 sm:$0xff]   ;;  %v17850_v56 = vld [vmem:[%s23841_s3 + $0x534] ss:$8 sps:$4 sm:$0xff]  }
 0x40a   : > { %v6489_v57 = vsel %vm1521_vm9, %v6487_v38, %v6488_v30 }
 0x40b   : > { %9840 = vmatmul.mubr.bf16.gmra.mrb[56].mxu1 %v6311_v3  ;;  %v17844_v3 = vld [vmem:[%s23841_s3 + $0x514] ss:$8 sps:$4 sm:$0xff]  }
 0x40c   : > { %9885 = vmatpush1.bf16.msra.mxu1 %v17824_v39  ;;  %9849 = vmatprep.mubr.bf16.mxu1 %v6371_v44  ;;  %v6500_v39 = vrot.slane %v20991_v49, 1  ;;  %v17842_v49 = vld [vmem:[%s23841_s3 + $0x510] ss:$8 sps:$4 sm:$0xff]   ;;  %v21408_v44 = vcombine.low %v5702_v42, %v18584_v31  ;;  %v17853_v42 = vld [vmem:[%s23841_s3 + $0x544] ss:$8 sps:$4 sm:$0xff]   ;;  %v6524_v31 = vrot.slane %v21042_v36, 1 }
 0x40d   : > { %9886 = vmatprep.subr.bf16.mxu1 %v17831_v4  ;;  %v6499_v4 = vrot.slane %v21391_v7, 1  ;;  %v17854_v36 = vld [vmem:[%s23841_s3 + $0x550] ss:$8 sps:$4 sm:$0xff]  }
 0x40e   : > { %v6496_v30 = vrot.slane %v21408_v44, 1 }
 0x40f   : > { %v6501_v50 = vsel %vm1521_vm9, %v6499_v4, %v6500_v39 }
 0x410   : > { %9887 = vmatpush1.bf16.msra.mxu1 %v17829_v8  ;;  %v17847_v8 = vld [vmem:[%s23841_s3 + $0x524] ss:$8 sps:$4 sm:$0xff]   ;;  %v6498_v38 = vsel %vm1521_vm9, %v6496_v30, %v6497_v47  ;;  %v17857_v47 = vld [vmem:[%s23841_s3 + $0x560] ss:$8 sps:$4 sm:$0xff]   ;;  %v17862_v30 = vld [vmem:[%s23841_s3 + $0x574] ss:$8 sps:$4 sm:$0xff]  }
 0x411   : > { %9888 = vmatprep.subr.bf16.mxu1 %v17834_v33  ;;  %v21413_v33 = vcombine.high %v5704_v34, %v18585_v18 }
 0x413   : > { %9850 = vmatmul.mubr.bf16.gmra.mrb[60].mxu1 %v6359_v15  ;;  %v21430_v15 = vcombine.low %v5704_v34, %v18585_v18  ;;  %v17859_v34 = vld [vmem:[%s23841_s3 + $0x564] ss:$8 sps:$4 sm:$0xff]   ;;  %v6536_v18 = vrot.slane %v21066_v12, 1  ;;  %v17860_v12 = vld [vmem:[%s23841_s3 + $0x570] ss:$8 sps:$4 sm:$0xff]  }
 0x414   : > { %9889 = vmatpush1.bf16.msra.mxu1 %v17832_v9  ;;  %9892 = vmatprep.mubr.bf16.mxu1 %v6489_v57  ;;  %v6511_v9 = vrot.slane %v21413_v33, 1  ;;  %v18586_v57 = vld [vmem:[#allocation3 + $0xa0] sm:$0xff] }
 0x415   : > { %9890 = vmatprep.subr.bf16.mxu1 %v17838_v10  ;;  %v5706_v10 = vld [vmem:[#allocation3 + $0x90] sm:$0xee]  ;;  %v6508_v39 = vrot.slane %v21430_v15, 1 }
 0x416   : > { %v6513_v48 = vsel %vm1521_vm9, %v6511_v9, %v6512_v51 }
 0x418   : > { %9891 = vmatpush1.bf16.msra.mxu1 %v17836_v13  ;;  %v21435_v13 = vcombine.high %v5706_v10, %v18586_v57 }
 0x419   : > { %9973 = vmatprep.subr.bf16.mxu1 %v17841_v54  ;;  %v6509_v54 = vrot.slane %v21039_v5, 1 }
 0x41b   : > { %9893 = vmatmul.mubr.bf16.vlgmr.msra.gmra.mrb[32].mxu1 %v6486_v58  ;;  %v6510_v4 = vsel %vm1521_vm9, %v6508_v39, %v6509_v54  ;;  %v21452_v58 = vcombine.low %v5706_v10, %v18586_v57  ;;  %v17865_v10 = vld [vmem:[%s23841_s3 + $0x584] ss:$8 sps:$4 sm:$0xff]   ;;  %v6548_v57 = vrot.slane %v21090_v41, 1  ;;  %v17863_v54 = vld [vmem:[%s23841_s3 + $0x580] ss:$8 sps:$4 sm:$0xff]  }
 0x41c   : > { %9974 = vmatpush1.bf16.msra.mxu1 %v17839_v32  ;;  %9902 = vmatprep.mubr.bf16.mxu1 %v6501_v50  ;;  %v6523_v32 = vrot.slane %v21435_v13, 1  ;;  %v18587_v50 = vld [vmem:[#allocation3 + $0xd0] sm:$0xff] }
 0x41d   : > { %9975 = vmatprep.subr.bf16.mxu1 %v17844_v3  ;;  %v5708_v3 = vld [vmem:[#allocation3 + $0xc0] sm:$0xee]  ;;  %v6520_v51 = vrot.slane %v21452_v58, 1  ;;  %v17868_v39 = vld [vmem:[%s23841_s3 + $0x594] ss:$8 sps:$4 sm:$0xff]  }
 0x41e   : > { %v6525_v5 = vsel %vm1521_vm9, %v6523_v32, %v6524_v31  ;;  %v17866_v41 = vld [vmem:[%s23841_s3 + $0x590] ss:$8 sps:$4 sm:$0xff]  }
 0x420   : > { %9976 = vmatpush1.bf16.msra.mxu1 %v17842_v49  ;;  %v21457_v49 = vcombine.high %v5708_v3, %v18587_v50 }
 0x421   : > { %9977 = vmatprep.subr.bf16.mxu1 %v17847_v8  ;;  %v6521_v8 = vrot.slane %v21063_v59, 1 }
 0x423   : > { %9903 = vmatmul.mubr.bf16.gmra.mrb[36].mxu1 %v6498_v38  ;;  %v6522_v9 = vsel %vm1521_vm9, %v6520_v51, %v6521_v8  ;;  %v21474_v38 = vcombine.low %v5708_v3, %v18587_v50  ;;  %v17871_v3 = vld [vmem:[%s23841_s3 + $0x5a4] ss:$8 sps:$4 sm:$0xff]   ;;  %v6560_v50 = vrot.slane %v21114_v20, 1  ;;  %v17869_v8 = vld [vmem:[%s23841_s3 + $0x5a0] ss:$8 sps:$4 sm:$0xff]  }
 0x424   : > { %9978 = vmatpush1.bf16.msra.mxu1 %v17845_v60  ;;  %9912 = vmatprep.mubr.bf16.mxu1 %v6513_v48  ;;  %v6535_v60 = vrot.slane %v21457_v49, 1  ;;  %v18588_v48 = vld [vmem:[#allocation3 + $0x100] sm:$0xff]  ;;  %v17874_v51 = vld [vmem:[%s23841_s3 + $0x5b4] ss:$8 sps:$4 sm:$0xff]   ;;  %v17872_v20 = vld [vmem:[%s23841_s3 + $0x5b0] ss:$8 sps:$4 sm:$0xff]  }
 0x425   : > { %9979 = vmatprep.subr.bf16.mxu1 %v17850_v56  ;;  %v5710_v56 = vld [vmem:[#allocation3 + $0xf0] sm:$0xee]  ;;  %v6532_v31 = vrot.slane %v21474_v38, 1 }
 0x426   : > { %v6537_v59 = vsel %vm1521_vm9, %v6535_v60, %v6536_v18 }
 0x428   : > { %9980 = vmatpush1.bf16.msra.mxu1 %v17848_v0  ;;  %v21479_v0 = vcombine.high %v5710_v56, %v18588_v48 }
 0x429   : > { %9981 = vmatprep.subr.bf16.mxu1 %v17853_v42  ;;  %v6533_v42 = vrot.slane %v21087_v52, 1 }
 0x42b   : > { %9913 = vmatmul.mubr.bf16.gmra.mrb[40].mxu1 %v6510_v4  ;;  %v6534_v32 = vsel %vm1521_vm9, %v6532_v31, %v6533_v42  ;;  %v21496_v4 = vcombine.low %v5710_v56, %v18588_v48  ;;  %v17877_v56 = vld [vmem:[%s23841_s3 + $0x5c4] ss:$8 sps:$4 sm:$0xff]   ;;  %v6572_v48 = vrot.slane %v21138_v45, 1  ;;  %v17875_v42 = vld [vmem:[%s23841_s3 + $0x5c0] ss:$8 sps:$4 sm:$0xff]   ;;  %v18591_v45 = vld [vmem:[#allocation3 + $0x18] sm:$0xff] }
 0x42c   : > { %9982 = vmatpush1.bf16.msra.mxu1 %v17851_v14  ;;  %9922 = vmatprep.mubr.bf16.mxu1 %v6525_v5  ;;  %v6547_v14 = vrot.slane %v21479_v0, 1  ;;  %v18589_v5 = vld [vmem:[#allocation3 + $0x130] sm:$0xff] }
 0x42d   : > { %9983 = vmatprep.subr.bf16.mxu1 %v17856_v28  ;;  %v5712_v28 = vld [vmem:[#allocation3 + $0x120] sm:$0xee]  ;;  %v6544_v18 = vrot.slane %v21496_v4, 1  ;;  %v17880_v31 = vld [vmem:[%s23841_s3 + $0x5d4] ss:$8 sps:$4 sm:$0xff]  }
 0x42e   : > { %v6549_v52 = vsel %vm1521_vm9, %v6547_v14, %v6548_v57 }
 0x430   : > { %9984 = vmatpush1.bf16.msra.mxu1 %v17854_v36  ;;  %v21501_v36 = vcombine.high %v5712_v28, %v18589_v5 }
 0x431   : > { %9985 = vmatprep.subr.bf16.mxu1 %v17859_v34  ;;  %v6545_v34 = vrot.slane %v21111_v35, 1 }
 0x433   : > { %9923 = vmatmul.mubr.bf16.gmra.mrb[44].mxu1 %v6522_v9  ;;  %v6546_v60 = vsel %vm1521_vm9, %v6544_v18, %v6545_v34  ;;  %v21518_v9 = vcombine.low %v5712_v28, %v18589_v5  ;;  %v17878_v28 = vld [vmem:[%s23841_s3 + $0x5d0] ss:$8 sps:$4 sm:$0xff]   ;;  %v6494_v34 = vrot.slane %v21163_v62, 1  ;;  %v17888_v18 = vld [vmem:[%s23841_s3 + $0x5f4] ss:$8 sps:$4 sm:$0xff]  }
 0x434   : > { %9986 = vmatpush1.bf16.msra.mxu1 %v17857_v47  ;;  %9932 = vmatprep.mubr.bf16.mxu1 %v6537_v59  ;;  %v6559_v47 = vrot.slane %v21501_v36, 1  ;;  %v18590_v59 = vld [vmem:[#allocation3 + $0x160] sm:$0xff] }
 0x435   : > { %9987 = vmatprep.subr.bf16.mxu1 %v17862_v30  ;;  %v5714_v30 = vld [vmem:[#allocation3 + $0x150] sm:$0xee]  ;;  %v6556_v57 = vrot.slane %v21518_v9, 1 }
 0x436   : > { %v6561_v35 = vsel %vm1521_vm9, %v6559_v47, %v6560_v50  ;;  %v17881_v50 = vld [vmem:[%s23841_s3 + $0x5e0] ss:$8 sps:$4 sm:$0xff]  }
 0x438   : > { %9988 = vmatpush1.bf16.msra.mxu1 %v17860_v12  ;;  %v21523_v12 = vcombine.high %v5714_v30, %v18590_v59 }
 0x439   : > { %9989 = vmatprep.subr.bf16.mxu1 %v17865_v10  ;;  %v6557_v10 = vrot.slane %v21135_v29, 1 }
 0x43b   : > { %9933 = vmatmul.mubr.bf16.gmra.mrb[48].mxu1 %v6534_v32  ;;  %v6558_v14 = vsel %vm1521_vm9, %v6556_v57, %v6557_v10  ;;  %v17895_v57 = vld [vmem:[%s23841_s3 + $0x614] ss:$8 sps:$4 sm:$0xff]  }
 0x43c   : > { %9990 = vmatpush1.bf16.msra.mxu1 %v17863_v54  ;;  %9942 = vmatprep.mubr.bf16.mxu1 %v6549_v52  ;;  %v6571_v54 = vrot.slane %v21523_v12, 1  ;;  %v21542_v52 = vcombine.low %v5714_v30, %v18590_v59  ;;  %v6491_v59 = vrot.slane %v21185_v25, 1 }
 0x43d   : > { %9991 = vmatprep.subr.bf16.mxu1 %v17868_v39  ;;  %v5701_v39 = vld [vmem:[#allocation3 + $0x8] sm:$0xee] }
 0x43e   : > { %v6573_v29 = vsel %vm1521_vm9, %v6571_v54, %v6572_v48  ;;  %v21537_v32 = vcombine.high %v5701_v39, %v18591_v45  ;;  %v6506_v48 = vrot.slane %v21188_v61, 1  ;;  %v17893_v61 = vld [vmem:[%s23841_s3 + $0x610] ss:$8 sps:$4 sm:$0xff]  }
 0x440   : > { %9992 = vmatpush1.bf16.msra.mxu1 %v17866_v41  ;;  %v17883_v41 = vld [vmem:[%s23841_s3 + $0x5e4] ss:$8 sps:$4 sm:$0xff]   ;;  %v6493_v5 = vrot.slane %v21537_v32, 1 }
 0x441   : > { %9993 = vmatprep.subr.bf16.mxu1 %v17871_v3  ;;  %v6569_v3 = vrot.slane %v21159_v6, 1  ;;  %v5703_v6 = vld [vmem:[#allocation3 + $0x38] sm:$0xee] }
 0x442   : > { %v6495_v62 = vsel %vm1521_vm9, %v6493_v5, %v6494_v34  ;;  %v17896_v5 = vld [vmem:[%s23841_s3 + $0x620] ss:$8 sps:$4 sm:$0xff]  }
 0x443   : > { %9943 = vmatmul.mubr.bf16.gmra.mrb[52].mxu1 %v6546_v60  ;;  %v18592_v60 = vld [vmem:[#allocation3 + $0x48] sm:$0xff] }
 0x444   : > { %9994 = vmatpush1.bf16.msra.mxu1 %v17869_v8  ;;  %9952 = vmatprep.mubr.bf16.mxu1 %v6561_v35  ;;  %v6568_v8 = vrot.slane %v21542_v52, 1  ;;  %v21561_v30 = vcombine.high %v5703_v6, %v18592_v60  ;;  %v17886_v35 = vld [vmem:[%s23841_s3 + $0x5f0] ss:$8 sps:$4 sm:$0xff]  }
 0x445   : > { %9995 = vmatprep.subr.bf16.mxu1 %v17874_v51  ;;  %v21558_v51 = vcombine.low %v5701_v39, %v18591_v45  ;;  %v17898_v39 = vld [vmem:[%s23841_s3 + $0x624] ss:$8 sps:$4 sm:$0xff]  }
 0x446   : > { %v6570_v47 = vsel %vm1521_vm9, %v6568_v8, %v6569_v3  ;;  %v6505_v10 = vrot.slane %v21561_v30, 1  ;;  %v6518_v3 = vrot.slane %v21211_v53, 1  ;;  %v17900_v53 = vld [vmem:[%s23841_s3 + $0x630] ss:$8 sps:$4 sm:$0xff]  }
 0x448   : > { %9996 = vmatpush1.bf16.msra.mxu1 %v17872_v20  ;;  %v17891_v20 = vld [vmem:[%s23841_s3 + $0x604] ss:$8 sps:$4 sm:$0xff]   ;;  %v6507_v25 = vsel %vm1521_vm9, %v6505_v10, %v6506_v48  ;;  %v17908_v48 = vld [vmem:[%s23841_s3 + $0x654] ss:$8 sps:$4 sm:$0xff]  }
 0x449   : > { %9997 = vmatprep.subr.bf16.mxu1 %v17877_v56  ;;  %v6490_v56 = vrot.slane %v21558_v51, 1 }
 0x44b   : > { %9953 = vmatmul.mubr.bf16.gmra.mrb[56].mxu1 %v6558_v14  ;;  %v6492_v54 = vsel %vm1521_vm9, %v6490_v56, %v6491_v59  ;;  %v5705_v14 = vld [vmem:[#allocation3 + $0x68] sm:$0xee] }
 0x44c   : > { %9998 = vmatpush1.bf16.msra.mxu1 %v17875_v42  ;;  %9962 = vmatprep.mubr.bf16.mxu1 %v6573_v29  ;;  %v17889_v42 = vld [vmem:[%s23841_s3 + $0x600] ss:$8 sps:$4 sm:$0xff]   ;;  %v18593_v29 = vld [vmem:[#allocation3 + $0x78] sm:$0xff] }
 0x44d   : > { %9999 = vmatprep.subr.bf16.mxu1 %v17880_v31  ;;  %v21580_v31 = vcombine.low %v5703_v6, %v18592_v60  ;;  %v21589_v45 = vcombine.high %v5705_v14, %v18593_v29  ;;  %v17905_v6 = vld [vmem:[%s23841_s3 + $0x644] ss:$8 sps:$4 sm:$0xff]   ;;  %v17903_v56 = vld [vmem:[%s23841_s3 + $0x640] ss:$8 sps:$4 sm:$0xff]  }
 0x44f   : > { %v6517_v34 = vrot.slane %v21589_v45, 1 }
 0x450   : > { %10000 = vmatpush1.bf16.msra.mxu1 %v17878_v28  ;;  %v6502_v28 = vrot.slane %v21580_v31, 1 }
 0x451   : > { %10001 = vmatprep.subr.bf16.mxu1 %v17883_v41  ;;  %v6503_v41 = vrot.slane %v21209_v37, 1  ;;  %v6519_v37 = vsel %vm1521_vm9, %v6517_v34, %v6518_v3 }
 0x453   : > { %9963 = vmatmul.mubr.bf16.gmra.mrb[60].mxu1 %v6570_v47  ;;  %v6504_v8 = vsel %vm1521_vm9, %v6502_v28, %v6503_v41  ;;  %v21606_v47 = vcombine.low %v5705_v14, %v18593_v29  ;;  %v17911_v14 = vld [vmem:[%s23841_s3 + $0x664] ss:$8 sps:$4 sm:$0xff]   ;;  %v6542_v29 = vrot.slane %v21258_v21, 1  ;;  %v17909_v28 = vld [vmem:[%s23841_s3 + $0x660] ss:$8 sps:$4 sm:$0xff]  }
 0x454   : > { %10002 = vmatpush1.bf16.msra.mxu1 %v17881_v50  ;;  %10005 = vmatprep.mubr.bf16.mxu1 %v6495_v62  ;;  %v17902_v50 = vld [vmem:[%s23841_s3 + $0x634] ss:$8 sps:$4 sm:$0xff]   ;;  %v18594_v62 = vld [vmem:[#allocation3 + $0xa8] sm:$0xff]  ;;  %v17912_v21 = vld [vmem:[%s23841_s3 + $0x670] ss:$8 sps:$4 sm:$0xff]  }
 0x455   : > { %10003 = vmatprep.subr.bf16.mxu1 %v17888_v18  ;;  %v5707_v18 = vld [vmem:[#allocation3 + $0x98] sm:$0xee]  ;;  %v6514_v59 = vrot.slane %v21606_v47, 1 }
 0x456   : > { %v21611_v60 = vcombine.high %v5707_v18, %v18594_v62 }
 0x458   : > { %10004 = vmatpush1.bf16.msra.mxu1 %v17886_v35  ;;  %v6515_v35 = vrot.slane %v21231_v1, 1  ;;  %v6529_v10 = vrot.slane %v21611_v60, 1 }
 0x459   : > { %10086 = vmatprep.subr.bf16.mxu1 %v17891_v20  ;;  %v6530_v20 = vrot.slane %v21234_v55, 1  ;;  %v17906_v55 = vld [vmem:[%s23841_s3 + $0x650] ss:$8 sps:$4 sm:$0xff]  }
 0x45b   : > { %10006 = vmatmul.mubr.bf16.vlgmr.msra.gmra.mrb[32].mxu1 %v6492_v54  ;;  %v6531_v1 = vsel %vm1521_vm9, %v6529_v10, %v6530_v20  ;;  %v21628_v54 = vcombine.low %v5707_v18, %v18594_v62  ;;  %v17917_v18 = vld [vmem:[%s23841_s3 + $0x684] ss:$8 sps:$4 sm:$0xff]   ;;  %v6554_v62 = vrot.slane %v21282_v43, 1  ;;  %v17918_v43 = vld [vmem:[%s23841_s3 + $0x690] ss:$8 sps:$4 sm:$0xff]  }
 0x45c   : > { %10087 = vmatpush1.bf16.msra.mxu1 %v17889_v42  ;;  %10015 = vmatprep.mubr.bf16.mxu1 %v6507_v25  ;;  %v6516_v42 = vsel %vm1521_vm9, %v6514_v59, %v6515_v35  ;;  %v18595_v25 = vld [vmem:[#allocation3 + $0xd8] sm:$0xff]  ;;  %v17915_v35 = vld [vmem:[%s23841_s3 + $0x680] ss:$8 sps:$4 sm:$0xff]  }
 0x45d   : > { %10088 = vmatprep.subr.bf16.mxu1 %v17895_v57  ;;  %v5709_v57 = vld [vmem:[#allocation3 + $0xc8] sm:$0xee]  ;;  %v6526_v41 = vrot.slane %v21628_v54, 1  ;;  %v17920_v59 = vld [vmem:[%s23841_s3 + $0x694] ss:$8 sps:$4 sm:$0xff]  }
 0x460   : > { %10089 = vmatpush1.bf16.msra.mxu1 %v17893_v61  ;;  %v21633_v61 = vcombine.high %v5709_v57, %v18595_v25 }
 0x461   : > { %10090 = vmatprep.subr.bf16.mxu1 %v17898_v39  ;;  %v6527_v39 = vrot.slane %v21255_v40, 1 }
 0x462   : > { %v6541_v3 = vrot.slane %v21633_v61, 1 }
 0x463   : > { %10016 = vmatmul.mubr.bf16.gmra.mrb[36].mxu1 %v6504_v8  ;;  %v6528_v34 = vsel %vm1521_vm9, %v6526_v41, %v6527_v39  ;;  %v21650_v8 = vcombine.low %v5709_v57, %v18595_v25  ;;  %v17923_v57 = vld [vmem:[%s23841_s3 + $0x6a4] ss:$8 sps:$4 sm:$0xff]   ;;  %v6566_v25 = vrot.slane %v21306_v63, 1  ;;  %v17921_v39 = vld [vmem:[%s23841_s3 + $0x6a0] ss:$8 sps:$4 sm:$0xff]  }
 0x464   : > { %10091 = vmatpush1.bf16.msra.mxu1 %v17896_v5  ;;  %10025 = vmatprep.mubr.bf16.mxu1 %v6519_v37  ;;  %v17914_v5 = vld [vmem:[%s23841_s3 + $0x674] ss:$8 sps:$4 sm:$0xff]   ;;  %v6543_v40 = vsel %vm1521_vm9, %v6541_v3, %v6542_v29  ;;  %v18596_v37 = vld [vmem:[#allocation3 + $0x108] sm:$0xff] }
 0x465   : > { %10092 = vmatprep.subr.bf16.mxu1 %v17902_v50  ;;  %v5711_v50 = vld [vmem:[#allocation3 + $0xf8] sm:$0xee]  ;;  %v6538_v20 = vrot.slane %v21650_v8, 1 }
 0x466   : > { %v17926_v3 = vld [vmem:[%s23841_s3 + $0x6b4] ss:$8 sps:$4 sm:$0xff]  }
 0x468   : > { %10093 = vmatpush1.bf16.msra.mxu1 %v17900_v53  ;;  %v21655_v53 = vcombine.high %v5711_v50, %v18596_v37 }
 0x469   : > { %10094 = vmatprep.subr.bf16.mxu1 %v17905_v6  ;;  %v6539_v6 = vrot.slane %v21279_v16, 1 }
 0x46b   : > { %10026 = vmatmul.mubr.bf16.gmra.mrb[40].mxu1 %v6516_v42  ;;  %v6540_v10 = vsel %vm1521_vm9, %v6538_v20, %v6539_v6  ;;  %v21672_v42 = vcombine.low %v5711_v50, %v18596_v37  ;;  %v17924_v50 = vld [vmem:[%s23841_s3 + $0x6b0] ss:$8 sps:$4 sm:$0xff]   ;;  %v6563_v6 = vrot.slane %v21327_v19, 1  ;;  %v17932_v19 = vld [vmem:[%s23841_s3 + $0x6d4] ss:$8 sps:$4 sm:$0xff]  }
 0x46c   : > { %10095 = vmatpush1.bf16.msra.mxu1 %v17903_v56  ;;  %10035 = vmatprep.mubr.bf16.mxu1 %v6531_v1  ;;  %v6553_v56 = vrot.slane %v21655_v53, 1  ;;  %v18597_v1 = vld [vmem:[#allocation3 + $0x138] sm:$0xff] }
 0x46d   : > { %10096 = vmatprep.subr.bf16.mxu1 %v17908_v48  ;;  %v5713_v48 = vld [vmem:[#allocation3 + $0x128] sm:$0xee]  ;;  %v6550_v29 = vrot.slane %v21672_v42, 1 }
 0x46e   : > { %v6555_v16 = vsel %vm1521_vm9, %v6553_v56, %v6554_v62  ;;  %v6578_v62 = vrot.slane %v21330_v11, 1  ;;  %v17927_v56 = vld [vmem:[%s23841_s3 + $0x6c0] ss:$8 sps:$4 sm:$0xff]   ;;  %v6710_v11 = vshrl.u32 %v21370_v17, 16 }
 0x470   : > { %10097 = vmatpush1.bf16.msra.mxu1 %v17906_v55  ;;  %v21677_v55 = vcombine.high %v5713_v48, %v18597_v1 }
 0x471   : > { %10098 = vmatprep.subr.bf16.mxu1 %v17911_v14  ;;  %v6551_v14 = vrot.slane %v21303_v46, 1  ;;  %v5715_v46 = vld [vmem:[#allocation3 + $0x158] sm:$0xee] }
 0x472   : > { %v6565_v41 = vrot.slane %v21677_v55, 1 }
 0x473   : > { %10036 = vmatmul.mubr.bf16.gmra.mrb[44].mxu1 %v6528_v34 }
 0x474   : > { %10099 = vmatpush1.bf16.msra.mxu1 %v17909_v28  ;;  %10045 = vmatprep.mubr.bf16.mxu1 %v6543_v40  ;;  %v5716_v28 = vld [vmem:[#allocation3 + $0x20] sm:$0x33]  ;;  %v6567_v63 = vsel %vm1521_vm9, %v6565_v41, %v6566_v25  ;;  %v21696_v40 = vcombine.low %v5713_v48, %v18597_v1 }
 0x475   : > { %10100 = vmatprep.subr.bf16.mxu1 %v17914_v5  ;;  %v6552_v5 = vsel %vm1521_vm9, %v6550_v29, %v6551_v14  ;;  %v21691_v34 = vcombine.high %v5716_v28, %v5716_v28  ;;  %v17930_v29 = vld [vmem:[%s23841_s3 + $0x6d0] ss:$8 sps:$4 sm:$0xff]  }
 0x477   : > { %v6721_v20 = vshll.u32 %v21691_v34, 16 }
 0x478   : > { %10101 = vmatpush1.bf16.msra.mxu1 %v17912_v21  ;;  %v17929_v21 = vld [vmem:[%s23841_s3 + $0x6c4] ss:$8 sps:$4 sm:$0xff]  }
 0x479   : > { %10102 = vmatprep.subr.bf16.mxu1 %v17917_v18  ;;  %v18598_v18 = vld [vmem:[#allocation3 + $0x168] sm:$0xff]  ;;  %v6723_v25 = vrot.slane %v6721_v20, 2  ;;  %v6693_v20 = vshrl.u32 %v21383_v27, 16 }
 0x47a   : > { %v21701_v37 = vcombine.high %v5715_v46, %v18598_v18  ;;  %v21726_v41 = vcombine.low %v5715_v46, %v18598_v18  ;;  %v5720_v46 = vld [vmem:[#allocation3 + $0x80] sm:$0x33] }
 0x47b   : > { %10046 = vmatmul.mubr.bf16.gmra.mrb[48].mxu1 %v6540_v10  ;;  %v5718_v10 = vld [vmem:[#allocation3 + $0x50] sm:$0x33]  ;;  %v17933_v18 = vld [vmem:[%s23841_s3 + $0x6e0] ss:$8 sps:$4 sm:$0xff]  }
 0x47c   : > { %10103 = vmatpush1.bf16.msra.mxu1 %v17915_v35  ;;  %10055 = vmatprep.mubr.bf16.mxu1 %v6555_v16  ;;  %v6718_v35 = vshrl.u32 %v21691_v34, 16  ;;  %v6577_v48 = vrot.slane %v21701_v37, 1  ;;  %v6713_v16 = vshll.u32 %v21370_v17, 16  ;;  %v17935_v17 = vld [vmem:[%s23841_s3 + $0x6e4] ss:$8 sps:$4 sm:$0xff]  }
 0x47d   : > { %10104 = vmatprep.subr.bf16.mxu1 %v17920_v59  ;;  %v6562_v59 = vrot.slane %v21696_v40, 1 }
 0x47e   : > { %v6579_v1 = vsel %vm1521_vm9, %v6577_v48, %v6578_v62  ;;  %v6720_v14 = vrot.slane %v6718_v35, 1  ;;  %v6574_v35 = vrot.slane %v21726_v41, 1  ;;  %v6778_v48 = vshrl.u32 %v21391_v7, 16 }
 0x480   : > { %10105 = vmatpush1.bf16.msra.mxu1 %v17918_v43  ;;  %v6564_v43 = vsel %vm1521_vm9, %v6562_v59, %v6563_v6  ;;  %v17940_v59 = vld [vmem:[%s23841_s3 + $0x6f4] ss:$8 sps:$4 sm:$0xff]  }
 0x481   : > { %10106 = vmatprep.subr.bf16.mxu1 %v17923_v57  ;;  %v21718_v57 = vcombine.low %v5716_v28, %v5716_v28  ;;  %v6712_v28 = vrot.slane %v6710_v11, 1 }
 0x483   : > { %10056 = vmatmul.mubr.bf16.gmra.mrb[52].mxu1 %v6552_v5  ;;  %v6575_v5 = vrot.slane %v21351_v2, 1  ;;  %v6696_v2 = vshll.u32 %v21383_v27, 16 }
 0x484   : > { %10107 = vmatpush1.bf16.msra.mxu1 %v17921_v39  ;;  %10065 = vmatprep.mubr.bf16.mxu1 %v6567_v63  ;;  %v21721_v39 = vcombine.high %v5718_v10, %v5718_v10  ;;  %v6701_v63 = vshrl.u32 %v21718_v57, 16 }
 0x485   : > { %10108 = vmatprep.subr.bf16.mxu1 %v17926_v3  ;;  %v6715_v3 = vrot.slane %v6713_v16, 2  ;;  %v6576_v11 = vsel %vm1521_vm9, %v6574_v35, %v6575_v5  ;;  %v17941_v35 = vld [vmem:[%s23841_s3 + $0x700] ss:$8 sps:$4 sm:$0xff]  }
 0x486   : > { %v6786_v6 = vshrl.u32 %v21721_v39, 16  ;;  %v6789_v62 = vshll.u32 %v21721_v39, 16  ;;  %v6703_v16 = vrot.slane %v6701_v63, 1 }
 0x488   : > { %10109 = vmatpush1.bf16.msra.mxu1 %v17924_v50  ;;  %v6704_v50 = vshll.u32 %v21718_v57, 16  ;;  %v6788_v27 = vrot.slane %v6786_v6, 1 }
 0x489   : > { %10110 = vmatprep.subr.bf16.mxu1 %v17929_v21  ;;  %v6724_v21 = vor.u32 %v6723_v25, %v6720_v14  ;;  %v6791_v25 = vrot.slane %v6789_v62, 2 }
 0x48b   : > { %10066 = vmatmul.mubr.bf16.gmra.mrb[56].mxu1 %v6564_v43  ;;  %v6706_v43 = vrot.slane %v6704_v50, 2  ;;  %v6792_v6 = vor.u32 %v6791_v25, %v6788_v27  ;;  %v21774_v25 = vcombine.low %v5720_v46, %v5720_v46 }
 0x48c   : > { %10111 = vmatpush1.bf16.msra.mxu1 %v17927_v56  ;;  %10075 = vmatprep.mubr.bf16.mxu1 %v6579_v1  ;;  %v6716_v56 = vor.u32 %v6715_v3, %v6712_v28  ;;  %v21748_v1 = vcombine.low %v5718_v10, %v5718_v10  ;;  %v6698_v28 = vrot.slane %v6696_v2, 2  ;;  %v17943_v10 = vld [vmem:[%s23841_s3 + $0x704] ss:$8 sps:$4 sm:$0xff]   ;;  %v6780_v3 = vrot.slane %v6778_v48, 1 }
 0x48d   : > { %10112 = vmatprep.subr.bf16.mxu1 %v17932_v19  ;;  %v6781_v19 = vshll.u32 %v21391_v7, 16  ;;  %v6695_v7 = vrot.slane %v6693_v20, 1  ;;  %v6707_v63 = vor.u32 %v6706_v43, %v6703_v16  ;;  %v6761_v2 = vshrl.u32 %v21408_v44, 16 }
 0x48e   : > { %v6725_v14 = vsel %vm1626_vm10, %v6716_v56, %v6724_v21  ;;  %v6769_v50 = vshrl.u32 %v21748_v1, 16  ;;  %v6772_v21 = vshll.u32 %v21748_v1, 16  ;;  %v6764_v56 = vshll.u32 %v21408_v44, 16 }
 0x48f   : > { %v6783_v5 = vrot.slane %v6781_v19, 2  ;;  %v6699_v20 = vor.u32 %v6698_v28, %v6695_v7  ;;  %v17947_v19 = vld [vmem:[%s23841_s3 + $0x714] ss:$8 sps:$4 sm:$0xff]   ;;  %v6849_v16 = vshll.u32 %v21413_v33, 16 }
 0x490   : > { %10113 = vmatpush1.bf16.msra.mxu1 %v17930_v29  ;;  %v21751_v29 = vcombine.high %v5720_v46, %v5720_v46  ;;  %v6774_v27 = vrot.slane %v6772_v21, 2  ;;  %v17950_v46 = vld [vmem:[%s23841_s3 + $0x724] ss:$8 sps:$4 sm:$0xff]   ;;  %v6837_v21 = vshrl.u32 %v21774_v25, 16 }
 0x491   : > { %10114 = vmatprep.subr.bf16.mxu1 %v17935_v17  ;;  %v17938_v17 = vld [vmem:[%s23841_s3 + $0x6f0] ss:$8 sps:$4 sm:$0xff]   ;;  %v6784_v48 = vor.u32 %v6783_v5, %v6780_v3  ;;  %v6708_v43 = vsel %vm1626_vm10, %v6699_v20, %v6707_v63  ;;  %v6766_v3 = vrot.slane %v6764_v56, 2  ;;  %v6851_v63 = vrot.slane %v6849_v16, 2  ;;  %v17948_v20 = vld [vmem:[%s23841_s3 + $0x720] ss:$8 sps:$4 sm:$0xff]  }
 0x492   : > { %v6854_v62 = vshrl.u32 %v21751_v29, 16  ;;  %v6829_v56 = vshrl.u32 %v21430_v15, 16 }
 0x493   : > { %10076 = vmatmul.mubr.bf16.gmra.mrb[60].mxu1 %v6576_v11  ;;  %v6846_v11 = vshrl.u32 %v21413_v33, 16  ;;  %v6793_v44 = vsel %vm1626_vm10, %v6784_v48, %v6792_v6  ;;  %v6763_v33 = vrot.slane %v6761_v2, 1  ;;  %v6840_v6 = vshll.u32 %v21774_v25, 16 }
 0x494   : > { %10115 = vmatpush1.bf16.msra.mxu1 %v17933_v18  ;;  %10118 = vmatprep.mubr.bf16.mxu1 %v6725_v14  ;;  %v6857_v18 = vshll.u32 %v21751_v29, 16  ;;  %v6771_v14 = vrot.slane %v6769_v50, 1  ;;  %v6832_v48 = vshll.u32 %v21430_v15, 16 }
 0x495   : > { %10116 = vmatprep.subr.bf16.mxu1 %v17940_v59  ;;  %v5722_v59 = vld [vmem:[#allocation3 + $0xb0] sm:$0x33]  ;;  %v6848_v5 = vrot.slane %v6846_v11, 1  ;;  %v6767_v2 = vor.u32 %v6766_v3, %v6763_v33  ;;  %v5724_v11 = vld [vmem:[#allocation3 + $0xe0] sm:$0x33] }
 0x496   : > { %v6859_v7 = vrot.slane %v6857_v18, 2  ;;  %v21777_v28 = vcombine.high %v5722_v59, %v5722_v59  ;;  %v6775_v50 = vor.u32 %v6774_v27, %v6771_v14  ;;  %v6914_v14 = vshrl.u32 %v21435_v13, 16  ;;  %v17953_v3 = vld [vmem:[%s23841_s3 + $0x730] ss:$8 sps:$4 sm:$0xff]  }
 0x497   : > { %v6852_v16 = vor.u32 %v6851_v63, %v6848_v5  ;;  %v6917_v27 = vshll.u32 %v21435_v13, 16  ;;  %v21803_v33 = vcombine.high %v5724_v11, %v5724_v11  ;;  %v6834_v5 = vrot.slane %v6832_v48, 2  ;;  %v17956_v48 = vld [vmem:[%s23841_s3 + $0x740] ss:$8 sps:$4 sm:$0xff]  }
 0x498   : > { %10117 = vmatpush1.bf16.msra.mxu1 %v17938_v17  ;;  %v6856_v17 = vrot.slane %v6854_v62, 1  ;;  %v6922_v18 = vshrl.u32 %v21777_v28, 16 }
 0x499   : > { %10199 = vmatprep.subr.bf16.mxu1 %v17943_v10  ;;  %v17945_v10 = vld [vmem:[%s23841_s3 + $0x710] ss:$8 sps:$4 sm:$0xff]  }
 0x49a   : > { %v6860_v62 = vor.u32 %v6859_v7, %v6856_v17  ;;  %v6839_v17 = vrot.slane %v6837_v21, 1  ;;  %v6842_v7 = vrot.slane %v6840_v6, 2  ;;  %v6916_v21 = vrot.slane %v6914_v14, 1  ;;  %v5726_v14 = vld [vmem:[#allocation3 + $0x110] sm:$0x33] }
 0x49b   : > { %10119 = vmatmul.mubr.bf16.vlgmr.msra.gmra.mrb[32].mxu1 %v6708_v43  ;;  %v17955_v43 = vld [vmem:[%s23841_s3 + $0x734] ss:$8 sps:$4 sm:$0xff]   ;;  %v6919_v6 = vrot.slane %v6917_v27, 2 }
 0x49c   : > { %10200 = vmatpush1.bf16.msra.mxu1 %v17941_v35  ;;  %10128 = vmatprep.mubr.bf16.mxu1 %v6793_v44  ;;  %v6925_v35 = vshll.u32 %v21777_v28, 16  ;;  %v6776_v44 = vsel %vm1626_vm10, %v6767_v2, %v6775_v50  ;;  %v6861_v15 = vsel %vm1626_vm10, %v6852_v16, %v6860_v62  ;;  %v17958_v50 = vld [vmem:[%s23841_s3 + $0x744] ss:$8 sps:$4 sm:$0xff]   ;;  %v6843_v62 = vor.u32 %v6842_v7, %v6839_v17 }
 0x49d   : > { %10201 = vmatprep.subr.bf16.mxu1 %v17947_v19  ;;  %v21794_v19 = vcombine.low %v5722_v59, %v5722_v59  ;;  %v6924_v59 = vrot.slane %v6922_v18, 1  ;;  %v6897_v18 = vshrl.u32 %v21452_v58, 16  ;;  %v6990_v2 = vshrl.u32 %v21803_v33, 16 }
 0x49e   : > { %v6920_v27 = vor.u32 %v6919_v6, %v6916_v21  ;;  %v6982_v17 = vshrl.u32 %v21457_v49, 16  ;;  %v6985_v7 = vshll.u32 %v21457_v49, 16 }
 0x49f   : > { %v6905_v13 = vshrl.u32 %v21794_v19, 16  ;;  %v6908_v63 = vshll.u32 %v21794_v19, 16 }
 0x4a0   : > { %10202 = vmatpush1.bf16.msra.mxu1 %v17945_v10  ;;  %v6927_v10 = vrot.slane %v6925_v35, 2  ;;  %v6900_v35 = vshll.u32 %v21452_v58, 16  ;;  %v17963_v58 = vld [vmem:[%s23841_s3 + $0x754] ss:$8 sps:$4 sm:$0xff]   ;;  %v6984_v21 = vrot.slane %v6982_v17, 1  ;;  %v6987_v6 = vrot.slane %v6985_v7, 2 }
 0x4a1   : > { %10203 = vmatprep.subr.bf16.mxu1 %v17950_v46  ;;  %v6831_v46 = vrot.slane %v6829_v56, 1  ;;  %v6993_v56 = vshll.u32 %v21803_v33, 16  ;;  %v7050_v7 = vshrl.u32 %v21479_v0, 16 }
 0x4a3   : > { %10129 = vmatmul.mubr.bf16.gmra.mrb[36].mxu1 %v6776_v44  ;;  %v6835_v16 = vor.u32 %v6834_v5, %v6831_v46  ;;  %v6910_v44 = vrot.slane %v6908_v63, 2  ;;  %v6992_v5 = vrot.slane %v6990_v2, 1  ;;  %v21829_v63 = vcombine.high %v5726_v14, %v5726_v14 }
 0x4a4   : > { %10204 = vmatpush1.bf16.msra.mxu1 %v17948_v20  ;;  %10138 = vmatprep.mubr.bf16.mxu1 %v6861_v15  ;;  %v6928_v20 = vor.u32 %v6927_v10, %v6924_v59  ;;  %v6899_v59 = vrot.slane %v6897_v18, 1  ;;  %v6902_v10 = vrot.slane %v6900_v35, 2  ;;  %v6968_v35 = vshll.u32 %v21474_v38, 16 }
 0x4a5   : > { %10205 = vmatprep.subr.bf16.mxu1 %v17955_v43  ;;  %v6907_v43 = vrot.slane %v6905_v13, 1  ;;  %v6844_v15 = vsel %vm1626_vm10, %v6835_v16, %v6843_v62  ;;  %v6995_v13 = vrot.slane %v6993_v56, 2  ;;  %v6965_v62 = vshrl.u32 %v21474_v38, 16  ;;  %v17971_v38 = vld [vmem:[%s23841_s3 + $0x774] ss:$8 sps:$4 sm:$0xff]  }
 0x4a6   : > { %v6929_v46 = vsel %vm1626_vm10, %v6920_v27, %v6928_v20  ;;  %v6903_v18 = vor.u32 %v6902_v10, %v6899_v59  ;;  %v7061_v16 = vshll.u32 %v21829_v63, 16  ;;  %v5728_v27 = vld [vmem:[#allocation3 + $0x140] sm:$0x33]  ;;  %v6970_v59 = vrot.slane %v6968_v35, 2 }
 0x4a7   : > { %v6911_v49 = vor.u32 %v6910_v44, %v6907_v43  ;;  %v6996_v56 = vor.u32 %v6995_v13, %v6992_v5  ;;  %v17964_v43 = vld [vmem:[%s23841_s3 + $0x760] ss:$8 sps:$4 sm:$0xff]   ;;  %v6967_v17 = vrot.slane %v6965_v62, 1  ;;  %v21852_v5 = vcombine.low %v5726_v14, %v5726_v14 }
 0x4a8   : > { %10206 = vmatpush1.bf16.msra.mxu1 %v17953_v3  ;;  %v21826_v3 = vcombine.low %v5724_v11, %v5724_v11  ;;  %v17966_v11 = vld [vmem:[%s23841_s3 + $0x764] ss:$8 sps:$4 sm:$0xff]   ;;  %v7052_v14 = vrot.slane %v7050_v7, 1  ;;  %v7121_v7 = vshll.u32 %v21501_v36, 16 }
 0x4a9   : > { %10207 = vmatprep.subr.bf16.mxu1 %v17958_v50  ;;  %v17961_v50 = vld [vmem:[%s23841_s3 + $0x750] ss:$8 sps:$4 sm:$0xff]   ;;  %v6912_v44 = vsel %vm1626_vm10, %v6903_v18, %v6911_v49  ;;  %v7063_v49 = vrot.slane %v7061_v16, 2  ;;  %v7041_v18 = vshrl.u32 %v21852_v5, 16  ;;  %v7044_v35 = vshll.u32 %v21852_v5, 16 }
 0x4aa   : > { %v6973_v20 = vshrl.u32 %v21826_v3, 16  ;;  %v6976_v2 = vshll.u32 %v21826_v3, 16  ;;  %v5730_v16 = vld [vmem:[#allocation3 + $0x170] sm:$0x33] }
 0x4ab   : > { %10139 = vmatmul.mubr.bf16.gmra.mrb[40].mxu1 %v6844_v15  ;;  %v7053_v15 = vshll.u32 %v21479_v0, 16  ;;  %v17974_v0 = vld [vmem:[%s23841_s3 + $0x784] ss:$8 sps:$4 sm:$0xff]  }
 0x4ac   : > { %10208 = vmatpush1.bf16.msra.mxu1 %v17956_v48  ;;  %10148 = vmatprep.mubr.bf16.mxu1 %v6929_v46  ;;  %v7058_v48 = vshrl.u32 %v21829_v63, 16  ;;  %v6975_v10 = vrot.slane %v6973_v20, 1  ;;  %v6978_v46 = vrot.slane %v6976_v2, 2  ;;  %v6971_v20 = vor.u32 %v6970_v59, %v6967_v17 }
 0x4ad   : > { %10209 = vmatprep.subr.bf16.mxu1 %v17963_v58  ;;  %v6988_v58 = vor.u32 %v6987_v6, %v6984_v21  ;;  %v17969_v21 = vld [vmem:[%s23841_s3 + $0x770] ss:$8 sps:$4 sm:$0xff]   ;;  %v7055_v6 = vrot.slane %v7053_v15, 2  ;;  %v17979_v15 = vld [vmem:[%s23841_s3 + $0x794] ss:$8 sps:$4 sm:$0xff]   ;;  %v21877_v59 = vcombine.low %v5728_v27, %v5728_v27 }
 0x4ae   : > { %v6979_v62 = vor.u32 %v6978_v46, %v6975_v10  ;;  %v7043_v46 = vrot.slane %v7041_v18, 1 }
 0x4af   : > { %v6997_v13 = vsel %vm1626_vm10, %v6988_v58, %v6996_v56  ;;  %v7036_v58 = vshll.u32 %v21496_v4, 16  ;;  %v7056_v17 = vor.u32 %v7055_v6, %v7052_v14  ;;  %v7123_v6 = vrot.slane %v7121_v7, 2 }
 0x4b0   : > { %10210 = vmatpush1.bf16.msra.mxu1 %v17961_v50  ;;  %v7060_v50 = vrot.slane %v7058_v48, 1  ;;  %v6980_v10 = vsel %vm1626_vm10, %v6971_v20, %v6979_v62  ;;  %v17982_v62 = vld [vmem:[%s23841_s3 + $0x7a4] ss:$8 sps:$4 sm:$0xff]   ;;  %v7109_v18 = vshrl.u32 %v21877_v59, 16 }
 0x4b1   : > { %10211 = vmatprep.subr.bf16.mxu1 %v17966_v11  ;;  %v21855_v11 = vcombine.high %v5728_v27, %v5728_v27  ;;  %v7038_v27 = vrot.slane %v7036_v58, 2  ;;  %v5717_v58 = vld [vmem:[#allocation3 + $0x28] sm:$0x33] }
 0x4b2   : > { %v7064_v2 = vor.u32 %v7063_v49, %v7060_v50 }
 0x4b3   : > { %10149 = vmatmul.mubr.bf16.gmra.mrb[44].mxu1 %v6912_v44  ;;  %v7126_v56 = vshrl.u32 %v21855_v11, 16  ;;  %v7129_v48 = vshll.u32 %v21855_v11, 16  ;;  %v7033_v44 = vshrl.u32 %v21496_v4, 16 }
 0x4b4   : > { %10212 = vmatpush1.bf16.msra.mxu1 %v17964_v43  ;;  %10158 = vmatprep.mubr.bf16.mxu1 %v6997_v13  ;;  %v17972_v43 = vld [vmem:[%s23841_s3 + $0x780] ss:$8 sps:$4 sm:$0xff]   ;;  %v7046_v13 = vrot.slane %v7044_v35, 2  ;;  %v7065_v50 = vsel %vm1626_vm10, %v7056_v17, %v7064_v2  ;;  %v7112_v35 = vshll.u32 %v21877_v59, 16  ;;  %v7101_v2 = vshrl.u32 %v21518_v9, 16 }
 0x4b5   : > { %10213 = vmatprep.subr.bf16.mxu1 %v17971_v38  ;;  %v7118_v38 = vshrl.u32 %v21501_v36, 16  ;;  %v7128_v4 = vrot.slane %v7126_v56, 1  ;;  %v7131_v49 = vrot.slane %v7129_v48, 2  ;;  %v17977_v36 = vld [vmem:[%s23841_s3 + $0x790] ss:$8 sps:$4 sm:$0xff]   ;;  %v7104_v48 = vshll.u32 %v21518_v9, 16 }
 0x4b6   : > { %v7047_v20 = vor.u32 %v7046_v13, %v7043_v46  ;;  %v7111_v9 = vrot.slane %v7109_v18, 1  ;;  %v7114_v46 = vrot.slane %v7112_v35, 2  ;;  %v7189_v13 = vshll.u32 %v21523_v12, 16 }
 0x4b7   : > { %v7120_v14 = vrot.slane %v7118_v38, 1  ;;  %v7132_v56 = vor.u32 %v7131_v49, %v7128_v4  ;;  %v17980_v38 = vld [vmem:[%s23841_s3 + $0x7a0] ss:$8 sps:$4 sm:$0xff]   ;;  %v7103_v49 = vrot.slane %v7101_v2, 1 }
 0x4b8   : > { %10214 = vmatpush1.bf16.msra.mxu1 %v17969_v21  ;;  %v21881_v21 = vcombine.high %v5730_v16, %v5730_v16  ;;  %v7115_v18 = vor.u32 %v7114_v46, %v7111_v9  ;;  %v7191_v35 = vrot.slane %v7189_v13, 2  ;;  %v21926_v9 = vcombine.low %v5717_v58, %v5717_v58  ;;  %v5719_v46 = vld [vmem:[#allocation3 + $0x58] sm:$0x33] }
 0x4b9   : > { %10215 = vmatprep.subr.bf16.mxu1 %v17974_v0  ;;  %v7035_v0 = vrot.slane %v7033_v44, 1  ;;  %v7124_v17 = vor.u32 %v7123_v6, %v7120_v14 }
 0x4ba   : > { %v7197_v44 = vshll.u32 %v21881_v21, 16 }
 0x4bb   : > { %10159 = vmatmul.mubr.bf16.gmra.mrb[48].mxu1 %v6980_v10  ;;  %v7039_v7 = vor.u32 %v7038_v27, %v7035_v0  ;;  %v17987_v10 = vld [vmem:[%s23841_s3 + $0x7b4] ss:$8 sps:$4 sm:$0xff]   ;;  %v7133_v0 = vsel %vm1626_vm10, %v7124_v17, %v7132_v56  ;;  %v7106_v27 = vrot.slane %v7104_v48, 2  ;;  %v6744_v56 = vshrl.u32 %v21537_v32, 16  ;;  %v17988_v17 = vld [vmem:[%s23841_s3 + $0x7c0] ss:$8 sps:$4 sm:$0xff]  }
 0x4bc   : > { %10216 = vmatpush1.bf16.msra.mxu1 %v17972_v43  ;;  %10168 = vmatprep.mubr.bf16.mxu1 %v7065_v50  ;;  %v7194_v43 = vshrl.u32 %v21881_v21, 16  ;;  %v21903_v50 = vcombine.low %v5730_v16, %v5730_v16  ;;  %v7199_v6 = vrot.slane %v7197_v44, 2  ;;  %v17990_v16 = vld [vmem:[%s23841_s3 + $0x7c4] ss:$8 sps:$4 sm:$0xff]   ;;  %v6747_v48 = vshll.u32 %v21537_v32, 16 }
 0x4bd   : > { %10217 = vmatprep.subr.bf16.mxu1 %v17979_v15  ;;  %v7186_v15 = vshrl.u32 %v21523_v12, 16  ;;  %v7048_v4 = vsel %vm1626_vm10, %v7039_v7, %v7047_v20 }
 0x4be   : > { %v7196_v14 = vrot.slane %v7194_v43, 1  ;;  %v7177_v20 = vshrl.u32 %v21903_v50, 16  ;;  %v7180_v2 = vshll.u32 %v21903_v50, 16 }
 0x4bf   : > { %v7188_v12 = vrot.slane %v7186_v15, 1  ;;  %v7169_v15 = vshrl.u32 %v21542_v52, 16 }
 0x4c0   : > { %10218 = vmatpush1.bf16.msra.mxu1 %v17977_v36  ;;  %v21906_v36 = vcombine.high %v5717_v58, %v5717_v58  ;;  %v7200_v7 = vor.u32 %v7199_v6, %v7196_v14  ;;  %v6749_v14 = vrot.slane %v6747_v48, 2  ;;  %v21933_v58 = vcombine.high %v5719_v46, %v5719_v46 }
 0x4c1   : > { %10219 = vmatprep.subr.bf16.mxu1 %v17982_v62  ;;  %v17985_v62 = vld [vmem:[%s23841_s3 + $0x7b0] ss:$8 sps:$4 sm:$0xff]   ;;  %v7192_v13 = vor.u32 %v7191_v35, %v7188_v12  ;;  %v17998_v35 = vld [vmem:[%s23841_s3 + $0x7e4] ss:$8 sps:$4 sm:$0xff]   ;;  %v6738_v48 = vshll.u32 %v21926_v9, 16 }
 0x4c2   : > { %v6752_v43 = vshrl.u32 %v21906_v36, 16  ;;  %v6755_v44 = vshll.u32 %v21906_v36, 16  ;;  %v17993_v12 = vld [vmem:[%s23841_s3 + $0x7d0] ss:$8 sps:$4 sm:$0xff]  }
 0x4c3   : > { %10169 = vmatmul.mubr.bf16.gmra.mrb[52].mxu1 %v7048_v4  ;;  %v17995_v4 = vld [vmem:[%s23841_s3 + $0x7d4] ss:$8 sps:$4 sm:$0xff]  }
 0x4c4   : > { %10220 = vmatpush1.bf16.msra.mxu1 %v17980_v38  ;;  %10178 = vmatprep.mubr.bf16.mxu1 %v7133_v0  ;;  %v7107_v38 = vor.u32 %v7106_v27, %v7103_v49  ;;  %v7179_v49 = vrot.slane %v7177_v20, 1  ;;  %v7182_v0 = vrot.slane %v7180_v2, 2  ;;  %v6746_v27 = vrot.slane %v6744_v56, 1 }
 0x4c5   : > { %10221 = vmatprep.subr.bf16.mxu1 %v17987_v10  ;;  %v7172_v10 = vshll.u32 %v21542_v52, 16  ;;  %v6754_v6 = vrot.slane %v6752_v43, 1  ;;  %v7201_v52 = vsel %vm1626_vm10, %v7192_v13, %v7200_v7  ;;  %v6727_v20 = vshrl.u32 %v21558_v51, 16 }
 0x4c6   : > { %v7116_v32 = vsel %vm1626_vm10, %v7107_v38, %v7115_v18  ;;  %v6730_v2 = vshll.u32 %v21558_v51, 16  ;;  %v6735_v56 = vshrl.u32 %v21926_v9, 16  ;;  %v7183_v43 = vor.u32 %v7182_v0, %v7179_v49  ;;  %v17996_v51 = vld [vmem:[%s23841_s3 + $0x7e0] ss:$8 sps:$4 sm:$0xff]  }
 0x4c7   : > { %v7174_v18 = vrot.slane %v7172_v10, 2  ;;  %v6812_v7 = vshrl.u32 %v21561_v30, 16  ;;  %v6823_v10 = vshll.u32 %v21933_v58, 16  ;;  %v6729_v49 = vrot.slane %v6727_v20, 1  ;;  %v18002_v20 = vld [vmem:[%s23841_s3 + $0x7f0] ss:$8 sps:$4 sm:$0xff]  }
 0x4c8   : > { %10222 = vmatpush1.bf16.msra.mxu1 %v17985_v62  ;;  %v6757_v62 = vrot.slane %v6755_v44, 2  ;;  %v6750_v44 = vor.u32 %v6749_v14, %v6746_v27  ;;  %v6732_v0 = vrot.slane %v6730_v2, 2  ;;  %v6737_v27 = vrot.slane %v6735_v56, 1  ;;  %v18007_v2 = vld [vmem:[%s23841_s3 + $0x804] ss:$8 sps:$4 sm:$0xff]  }
 0x4c9   : > { %10223 = vmatprep.subr.bf16.mxu1 %v17990_v16  ;;  %v7171_v16 = vrot.slane %v7169_v15, 1  ;;  %v6820_v15 = vshrl.u32 %v21933_v58, 16 }
 0x4ca   : > { %v6758_v38 = vor.u32 %v6757_v62, %v6754_v6  ;;  %v21957_v62 = vcombine.low %v5719_v46, %v5719_v46  ;;  %v6733_v46 = vor.u32 %v6732_v0, %v6729_v49  ;;  %v6880_v0 = vshrl.u32 %v21589_v45, 16 }
 0x4cb   : > { %10179 = vmatmul.mubr.bf16.gmra.mrb[56].mxu1 %v7116_v32  ;;  %v5721_v32 = vld [vmem:[#allocation3 + $0x88] sm:$0x33]  ;;  %v7175_v13 = vor.u32 %v7174_v18, %v7171_v16  ;;  %v6822_v18 = vrot.slane %v6820_v15, 1 }
 0x4cc   : > { %10224 = vmatpush1.bf16.msra.mxu1 %v17988_v17  ;;  %10188 = vmatprep.mubr.bf16.mxu1 %v7201_v52  ;;  %v6815_v17 = vshll.u32 %v21561_v30, 16  ;;  %v6740_v30 = vrot.slane %v6738_v48, 2  ;;  %v6759_v6 = vsel %vm1626_vm10, %v6750_v44, %v6758_v38  ;;  %v21959_v52 = vcombine.high %v5721_v32, %v5721_v32 }
 0x4cd   : > { %10225 = vmatprep.subr.bf16.mxu1 %v17995_v4  ;;  %v18004_v4 = vld [vmem:[%s23841_s3 + $0x7f4] ss:$8 sps:$4 sm:$0xff]   ;;  %v7184_v14 = vsel %vm1626_vm10, %v7175_v13, %v7183_v43  ;;  %v6795_v48 = vshrl.u32 %v21580_v31, 16  ;;  %v6798_v43 = vshll.u32 %v21580_v31, 16  ;;  %v6803_v44 = vshrl.u32 %v21957_v62, 16 }
 0x4ce   : > { %v6817_v16 = vrot.slane %v6815_v17, 2  ;;  %v6741_v56 = vor.u32 %v6740_v30, %v6737_v27  ;;  %v6806_v38 = vshll.u32 %v21957_v62, 16  ;;  %v6888_v15 = vshrl.u32 %v21959_v52, 16  ;;  %v5723_v13 = vld [vmem:[#allocation3 + $0xb8] sm:$0x33] }
 0x4cf   : > { %v18011_v31 = vld [vmem:[%s23841_s3 + $0x814] ss:$8 sps:$4 sm:$0xff]   ;;  %v6797_v49 = vrot.slane %v6795_v48, 1  ;;  %v6883_v27 = vshll.u32 %v21589_v45, 16  ;;  %v6800_v30 = vrot.slane %v6798_v43, 2 }
 0x4d0   : > { %10226 = vmatpush1.bf16.msra.mxu1 %v17993_v12  ;;  %v6814_v12 = vrot.slane %v6812_v7, 1  ;;  %v18014_v45 = vld [vmem:[%s23841_s3 + $0x824] ss:$8 sps:$4 sm:$0xff]  }
 0x4d1   : > { %10227 = vmatprep.subr.bf16.mxu1 %v17998_v35  ;;  %v6825_v35 = vrot.slane %v6823_v10, 2  ;;  %v6891_v10 = vshll.u32 %v21959_v52, 16 }
 0x4d2   : > { %v6818_v7 = vor.u32 %v6817_v16, %v6814_v12  ;;  %v21982_v12 = vcombine.low %v5721_v32, %v5721_v32  ;;  %v6882_v32 = vrot.slane %v6880_v0, 1  ;;  %v6948_v0 = vshrl.u32 %v21611_v60, 16 }
 0x4d3   : > { %10189 = vmatmul.mubr.bf16.gmra.mrb[60].mxu1 %v7184_v14  ;;  %v6826_v17 = vor.u32 %v6825_v35, %v6822_v18  ;;  %v6805_v14 = vrot.slane %v6803_v44, 1  ;;  %v6890_v18 = vrot.slane %v6888_v15, 1  ;;  %v6893_v35 = vrot.slane %v6891_v10, 2  ;;  %v18012_v15 = vld [vmem:[%s23841_s3 + $0x820] ss:$8 sps:$4 sm:$0xff]  }
 0x4d4   : > { %10228 = vmatpush1.bf16.msra.mxu1 %v17996_v51  ;;  %10231 = vmatprep.mubr.bf16.mxu1 %v6759_v6  ;;  %v18005_v51 = vld [vmem:[%s23841_s3 + $0x800] ss:$8 sps:$4 sm:$0xff]   ;;  %v6808_v6 = vrot.slane %v6806_v38, 2  ;;  %v6871_v43 = vshrl.u32 %v21982_v12, 16  ;;  %v6874_v44 = vshll.u32 %v21982_v12, 16  ;;  %v6863_v10 = vshrl.u32 %v21606_v47, 16 }
 0x4d5   : > { %10229 = vmatprep.subr.bf16.mxu1 %v18004_v4  ;;  %v6742_v4 = vsel %vm1626_vm10, %v6733_v46, %v6741_v56  ;;  %v6827_v16 = vsel %vm1626_vm10, %v6818_v7, %v6826_v17  ;;  %v6885_v46 = vrot.slane %v6883_v27, 2  ;;  %v6801_v56 = vor.u32 %v6800_v30, %v6797_v49  ;;  %v18019_v49 = vld [vmem:[%s23841_s3 + $0x834] ss:$8 sps:$4 sm:$0xff]  }
 0x4d6   : > { %v6809_v48 = vor.u32 %v6808_v6, %v6805_v14  ;;  %v6894_v38 = vor.u32 %v6893_v35, %v6890_v18  ;;  %v6951_v27 = vshll.u32 %v21611_v60, 16  ;;  %v6873_v14 = vrot.slane %v6871_v43, 1 }
 0x4d7   : > { %v6876_v6 = vrot.slane %v6874_v44, 2  ;;  %v6865_v60 = vrot.slane %v6863_v10, 1 }
 0x4d8   : > { %10230 = vmatpush1.bf16.msra.mxu1 %v18002_v20  ;;  %v21985_v20 = vcombine.high %v5723_v13, %v5723_v13  ;;  %v6810_v30 = vsel %vm1626_vm10, %v6801_v56, %v6809_v48  ;;  %v6953_v56 = vrot.slane %v6951_v27, 2  ;;  %v18027_v27 = vld [vmem:[%s23841_s3 + $0x854] ss:$8 sps:$4 sm:$0xff]  }
 0x4d9   : > { %10312 = vmatprep.subr.bf16.mxu1 %v18007_v2  ;;  %v18009_v2 = vld [vmem:[%s23841_s3 + $0x810] ss:$8 sps:$4 sm:$0xff]   ;;  %v6877_v48 = vor.u32 %v6876_v6, %v6873_v14  ;;  %v7019_v14 = vshll.u32 %v21633_v61, 16 }
 0x4da   : > { %v6956_v7 = vshrl.u32 %v21985_v20, 16  ;;  %v6959_v17 = vshll.u32 %v21985_v20, 16 }
 0x4db   : > { %10232 = vmatmul.mubr.bf16.vlgmr.msra.gmra.mrb[32].mxu1 %v6742_v4  ;;  %v5725_v4 = vld [vmem:[#allocation3 + $0xe8] sm:$0x33] }
 0x4dc   : > { %10313 = vmatpush1.bf16.msra.mxu1 %v18005_v51  ;;  %10241 = vmatprep.mubr.bf16.mxu1 %v6827_v16  ;;  %v6866_v51 = vshll.u32 %v21606_v47, 16  ;;  %v22008_v16 = vcombine.low %v5723_v13, %v5723_v13  ;;  %v6958_v18 = vrot.slane %v6956_v7, 1  ;;  %v6961_v35 = vrot.slane %v6959_v17, 2  ;;  %v18022_v13 = vld [vmem:[%s23841_s3 + $0x844] ss:$8 sps:$4 sm:$0xff]  }
 0x4dd   : > { %10314 = vmatprep.subr.bf16.mxu1 %v18011_v31  ;;  %v6886_v31 = vor.u32 %v6885_v46, %v6882_v32  ;;  %v6950_v46 = vrot.slane %v6948_v0, 1 }
 0x4de   : > { %v6868_v32 = vrot.slane %v6866_v51, 2  ;;  %v6939_v43 = vshrl.u32 %v22008_v16, 16  ;;  %v6942_v44 = vshll.u32 %v22008_v16, 16  ;;  %v6931_v51 = vshrl.u32 %v21628_v54, 16 }
 0x4df   : > { %v6895_v47 = vsel %vm1626_vm10, %v6886_v31, %v6894_v38  ;;  %v6962_v38 = vor.u32 %v6961_v35, %v6958_v18  ;;  %v6934_v31 = vshll.u32 %v21628_v54, 16  ;;  %v6954_v0 = vor.u32 %v6953_v56, %v6950_v46 }
 0x4e0   : > { %10315 = vmatpush1.bf16.msra.mxu1 %v18009_v2  ;;  %v22011_v2 = vcombine.high %v5725_v4, %v5725_v4  ;;  %v6869_v10 = vor.u32 %v6868_v32, %v6865_v60  ;;  %v6944_v18 = vrot.slane %v6942_v44, 2  ;;  %v22034_v35 = vcombine.low %v5725_v4, %v5725_v4  ;;  %v18030_v4 = vld [vmem:[%s23841_s3 + $0x864] ss:$8 sps:$4 sm:$0xff]  }
 0x4e1   : > { %10316 = vmatprep.subr.bf16.mxu1 %v18014_v45  ;;  %v18017_v45 = vld [vmem:[%s23841_s3 + $0x830] ss:$8 sps:$4 sm:$0xff]   ;;  %v6963_v54 = vsel %vm1626_vm10, %v6954_v0, %v6962_v38  ;;  %v6936_v46 = vrot.slane %v6934_v31, 2  ;;  %v6999_v31 = vshrl.u32 %v21650_v8, 16  ;;  %v7002_v0 = vshll.u32 %v21650_v8, 16 }
 0x4e2   : > { %v7024_v7 = vshrl.u32 %v22011_v2, 16  ;;  %v7027_v17 = vshll.u32 %v22011_v2, 16  ;;  %v6878_v6 = vsel %vm1626_vm10, %v6869_v10, %v6877_v48  ;;  %v7021_v48 = vrot.slane %v7019_v14, 2  ;;  %v18028_v10 = vld [vmem:[%s23841_s3 + $0x860] ss:$8 sps:$4 sm:$0xff]  }
 0x4e3   : > { %10242 = vmatmul.mubr.bf16.gmra.mrb[36].mxu1 %v6810_v30  ;;  %v7016_v30 = vshrl.u32 %v21633_v61, 16  ;;  %v6933_v61 = vrot.slane %v6931_v51, 1  ;;  %v7007_v44 = vshrl.u32 %v22034_v35, 16  ;;  %v7010_v38 = vshll.u32 %v22034_v35, 16  ;;  %v18035_v14 = vld [vmem:[%s23841_s3 + $0x874] ss:$8 sps:$4 sm:$0xff]  }
 0x4e4   : > { %10317 = vmatpush1.bf16.msra.mxu1 %v18012_v15  ;;  %10251 = vmatprep.mubr.bf16.mxu1 %v6895_v47  ;;  %v18020_v15 = vld [vmem:[%s23841_s3 + $0x840] ss:$8 sps:$4 sm:$0xff]   ;;  %v6941_v47 = vrot.slane %v6939_v43, 1  ;;  %v7029_v60 = vrot.slane %v7027_v17, 2 }
 0x4e5   : > { %10318 = vmatprep.subr.bf16.mxu1 %v18019_v49  ;;  %v5727_v49 = vld [vmem:[#allocation3 + $0x118] sm:$0x33]  ;;  %v7018_v56 = vrot.slane %v7016_v30, 1  ;;  %v6937_v51 = vor.u32 %v6936_v46, %v6933_v61 }
 0x4e6   : > { %v22037_v32 = vcombine.high %v5727_v49, %v5727_v49  ;;  %v6945_v43 = vor.u32 %v6944_v18, %v6941_v47  ;;  %v7087_v47 = vshll.u32 %v21655_v53, 16 }
 0x4e7   : > { %v7022_v30 = vor.u32 %v7021_v48, %v7018_v56  ;;  %v7004_v56 = vrot.slane %v7002_v0, 2  ;;  %v7067_v0 = vshrl.u32 %v21672_v42, 16 }
 0x4e8   : > { %10319 = vmatpush1.bf16.msra.mxu1 %v18017_v45  ;;  %v7026_v45 = vrot.slane %v7024_v7, 1  ;;  %v7092_v17 = vshrl.u32 %v22037_v32, 16  ;;  %v6946_v18 = vsel %vm1626_vm10, %v6937_v51, %v6945_v43  ;;  %v7089_v43 = vrot.slane %v7087_v47, 2  ;;  %v18036_v51 = vld [vmem:[%s23841_s3 + $0x880] ss:$8 sps:$4 sm:$0xff]  }
 0x4e9   : > { %10320 = vmatprep.subr.bf16.mxu1 %v18022_v13  ;;  %v18025_v13 = vld [vmem:[%s23841_s3 + $0x850] ss:$8 sps:$4 sm:$0xff]   ;;  %v18043_v47 = vld [vmem:[%s23841_s3 + $0x894] ss:$8 sps:$4 sm:$0xff]  }
 0x4ea   : > { %v7030_v7 = vor.u32 %v7029_v60, %v7026_v45  ;;  %v7012_v45 = vrot.slane %v7010_v38, 2  ;;  %v22060_v60 = vcombine.low %v5727_v49, %v5727_v49  ;;  %v18038_v49 = vld [vmem:[%s23841_s3 + $0x884] ss:$8 sps:$4 sm:$0xff]  }
 0x4eb   : > { %10252 = vmatmul.mubr.bf16.gmra.mrb[40].mxu1 %v6878_v6  ;;  %v7084_v6 = vshrl.u32 %v21655_v53, 16  ;;  %v7001_v53 = vrot.slane %v6999_v31, 1 }
 0x4ec   : > { %10321 = vmatpush1.bf16.msra.mxu1 %v18020_v15  ;;  %10261 = vmatprep.mubr.bf16.mxu1 %v6963_v54  ;;  %v7095_v15 = vshll.u32 %v22037_v32, 16  ;;  %v7009_v54 = vrot.slane %v7007_v44, 1  ;;  %v7031_v8 = vsel %vm1626_vm10, %v7022_v30, %v7030_v7  ;;  %v7075_v38 = vshrl.u32 %v22060_v60, 16 }
 0x4ed   : > { %10322 = vmatprep.subr.bf16.mxu1 %v18027_v27  ;;  %v5729_v27 = vld [vmem:[#allocation3 + $0x148] sm:$0x33]  ;;  %v7086_v48 = vrot.slane %v7084_v6, 1  ;;  %v7078_v7 = vshll.u32 %v22060_v60, 16  ;;  %v7005_v31 = vor.u32 %v7004_v56, %v7001_v53  ;;  %v7070_v30 = vshll.u32 %v21672_v42, 16 }
 0x4ee   : > { %v7097_v61 = vrot.slane %v7095_v15, 2  ;;  %v22063_v46 = vcombine.high %v5729_v27, %v5729_v27  ;;  %v7013_v44 = vor.u32 %v7012_v45, %v7009_v54  ;;  %v7155_v54 = vshll.u32 %v21677_v55, 16 }
 0x4ef   : > { %v7090_v6 = vor.u32 %v7089_v43, %v7086_v48  ;;  %v7072_v48 = vrot.slane %v7070_v30, 2  ;;  %v7135_v30 = vshrl.u32 %v21696_v40, 16 }
 0x4f0   : > { %10323 = vmatpush1.bf16.msra.mxu1 %v18025_v13  ;;  %v7094_v13 = vrot.slane %v7092_v17, 1  ;;  %v7160_v15 = vshrl.u32 %v22063_v46, 16  ;;  %v7014_v45 = vsel %vm1626_vm10, %v7005_v31, %v7013_v44  ;;  %v7157_v44 = vrot.slane %v7155_v54, 2  ;;  %v18044_v31 = vld [vmem:[%s23841_s3 + $0x8a0] ss:$8 sps:$4 sm:$0xff]  }
 0x4f1   : > { %10324 = vmatprep.subr.bf16.mxu1 %v18030_v4  ;;  %v18033_v4 = vld [vmem:[%s23841_s3 + $0x870] ss:$8 sps:$4 sm:$0xff]   ;;  %v7220_v54 = vshrl.u32 %v21701_v37, 16 }
 0x4f2   : > { %v7098_v17 = vor.u32 %v7097_v61, %v7094_v13  ;;  %v7080_v13 = vrot.slane %v7078_v7, 2  ;;  %v22086_v61 = vcombine.low %v5729_v27, %v5729_v27  ;;  %v18046_v27 = vld [vmem:[%s23841_s3 + $0x8a4] ss:$8 sps:$4 sm:$0xff]  }
 0x4f3   : > { %10262 = vmatmul.mubr.bf16.gmra.mrb[44].mxu1 %v6946_v18  ;;  %v7152_v18 = vshrl.u32 %v21677_v55, 16  ;;  %v7069_v55 = vrot.slane %v7067_v0, 1 }
 0x4f4   : > { %10325 = vmatpush1.bf16.msra.mxu1 %v18028_v10  ;;  %10271 = vmatprep.mubr.bf16.mxu1 %v7031_v8  ;;  %v7163_v10 = vshll.u32 %v22063_v46, 16  ;;  %v7077_v8 = vrot.slane %v7075_v38, 1  ;;  %v7099_v42 = vsel %vm1626_vm10, %v7090_v6, %v7098_v17  ;;  %v7143_v7 = vshrl.u32 %v22086_v61, 16 }
 0x4f5   : > { %10326 = vmatprep.subr.bf16.mxu1 %v18035_v14  ;;  %v5731_v14 = vld [vmem:[#allocation3 + $0x178] sm:$0x33]  ;;  %v7154_v43 = vrot.slane %v7152_v18, 1  ;;  %v7146_v17 = vshll.u32 %v22086_v61, 16  ;;  %v7073_v0 = vor.u32 %v7072_v48, %v7069_v55  ;;  %v7138_v6 = vshll.u32 %v21696_v40, 16 }
 0x4f6   : > { %v7165_v53 = vrot.slane %v7163_v10, 2  ;;  %v22089_v56 = vcombine.high %v5731_v14, %v5731_v14  ;;  %v7081_v38 = vor.u32 %v7080_v13, %v7077_v8  ;;  %v18051_v18 = vld [vmem:[%s23841_s3 + $0x8b4] ss:$8 sps:$4 sm:$0xff]   ;;  %v7145_v13 = vrot.slane %v7143_v7, 1  ;;  %v18049_v55 = vld [vmem:[%s23841_s3 + $0x8b0] ss:$8 sps:$4 sm:$0xff]  }
 0x4f7   : > { %v7137_v48 = vrot.slane %v7135_v30, 1  ;;  %v18059_v30 = vld [vmem:[%s23841_s3 + $0x8d4] ss:$8 sps:$4 sm:$0xff]  }
 0x4f8   : > { %10327 = vmatpush1.bf16.msra.mxu1 %v18033_v4  ;;  %v7162_v4 = vrot.slane %v7160_v15, 1  ;;  %v7228_v10 = vshrl.u32 %v22089_v56, 16  ;;  %v7082_v8 = vsel %vm1626_vm10, %v7073_v0, %v7081_v38 }
 0x4f9   : > { %10328 = vmatprep.subr.bf16.mxu1 %v18038_v49  ;;  %v18041_v49 = vld [vmem:[%s23841_s3 + $0x890] ss:$8 sps:$4 sm:$0xff]  }
 0x4fa   : > { %v7166_v15 = vor.u32 %v7165_v53, %v7162_v4  ;;  %v22112_v4 = vcombine.low %v5731_v14, %v5731_v14  ;;  %v7230_v40 = vrot.slane %v7228_v10, 1  ;;  %v7222_v14 = vrot.slane %v7220_v54, 1  ;;  %v5732_v54 = vld [vmem:[#allocation3] sm:$0xcc] }
 0x4fb   : > { %10272 = vmatmul.mubr.bf16.gmra.mrb[48].mxu1 %v7014_v45  ;;  %v7223_v45 = vshll.u32 %v21701_v37, 16  ;;  %v18054_v37 = vld [vmem:[%s23841_s3 + $0x8c4] ss:$8 sps:$4 sm:$0xff]  }
 0x4fc   : > { %10329 = vmatpush1.bf16.msra.mxu1 %v18036_v51  ;;  %10281 = vmatprep.mubr.bf16.mxu1 %v7099_v42  ;;  %v7231_v51 = vshll.u32 %v22089_v56, 16  ;;  %v7148_v42 = vrot.slane %v7146_v17, 2  ;;  %v7211_v38 = vshrl.u32 %v22112_v4, 16  ;;  %v7214_v7 = vshll.u32 %v22112_v4, 16 }
 0x4fd   : > { %10330 = vmatprep.subr.bf16.mxu1 %v18043_v47  ;;  %v7158_v47 = vor.u32 %v7157_v44, %v7154_v43  ;;  %v7225_v43 = vrot.slane %v7223_v45, 2 }
 0x4fe   : > { %v7149_v44 = vor.u32 %v7148_v42, %v7145_v13  ;;  %v18062_v42 = vld [vmem:[%s23841_s3 + $0x8e4] ss:$8 sps:$4 sm:$0xff]  }
 0x4ff   : > { %v7167_v53 = vsel %vm1626_vm10, %v7158_v47, %v7166_v15  ;;  %v18052_v15 = vld [vmem:[%s23841_s3 + $0x8c0] ss:$8 sps:$4 sm:$0xff]   ;;  %v7226_v0 = vor.u32 %v7225_v43, %v7222_v14  ;;  %v7213_v47 = vrot.slane %v7211_v38, 1  ;;  %v18066_v14 = vld [vmem:[%s23841_s3 + $0x8f4] ss:$8 sps:$4 sm:$0xff]  }
 0x500   : > { %10331 = vmatpush1.bf16.msra.mxu1 %v18041_v49  ;;  %v7233_v49 = vrot.slane %v7231_v51, 2  ;;  %v7203_v51 = vshrl.u32 %v21726_v41, 16 }
 0x501   : > { %10332 = vmatprep.subr.bf16.mxu1 %v18046_v27  ;;  %v7140_v27 = vrot.slane %v7138_v6, 2 }
 0x502   : > { %v7234_v17 = vor.u32 %v7233_v49, %v7230_v40 }
 0x503   : > { %10282 = vmatmul.mubr.bf16.gmra.mrb[52].mxu1 %v7082_v8  ;;  %v7141_v10 = vor.u32 %v7140_v27, %v7137_v48  ;;  %v7205_v8 = vrot.slane %v7203_v51, 1  ;;  %v18060_v48 = vld [vmem:[%s23841_s3 + $0x8e0] ss:$8 sps:$4 sm:$0xff]   ;;  %v18069_v51 = vld [vmem:[%s23841_s3 + $0x904] ss:$8 sps:$4 sm:$0xff]  }
 0x504   : > { %10333 = vmatpush1.bf16.msra.mxu1 %v18044_v31  ;;  %10291 = vmatprep.mubr.bf16.mxu1 %v7167_v53  ;;  %v7206_v31 = vshll.u32 %v21726_v41, 16  ;;  %v7235_v45 = vsel %vm1626_vm10, %v7226_v0, %v7234_v17  ;;  %v18057_v41 = vld [vmem:[%s23841_s3 + $0x8d0] ss:$8 sps:$4 sm:$0xff]  }
 0x505   : > { %10334 = vmatprep.subr.bf16.mxu1 %v18051_v18  ;;  %v7150_v6 = vsel %vm1626_vm10, %v7141_v10, %v7149_v44  ;;  %v7216_v18 = vrot.slane %v7214_v7, 2  ;;  %v18599_v53 = vld [vmem:[#allocation3 + $0x10] sm:$0xff]  ;;  %v18121_v7 = vld [vmem:[%s23842_s4 + $0x4] ss:$8 sps:$4 sm:$0xff]  }
 0x506   : > { %v7208_v13 = vrot.slane %v7206_v31, 2  ;;  %v15521_v40 = vcombine.high %v5732_v54, %v18599_v53  ;;  %v5734_v44 = vld [vmem:[#allocation3 + $0x30] sm:$0xcc]  ;;  %v15520_v17 = vcombine.low %v5732_v54, %v18599_v53  ;;  %v18600_v31 = vld [vmem:[#allocation3 + $0x40] sm:$0xff]  ;;  %12974 = vmatprep.subr.bf16.mxu0 %v18121_v7 }
 0x507   : > { %v7217_v49 = vor.u32 %v7216_v18, %v7213_v47  ;;  %v18124_v10 = vld [vmem:[%s23842_s4 + $0x14] ss:$8 sps:$4 sm:$0xff]   ;;  %v15525_v0 = vcombine.high %v5734_v44, %v18600_v31  ;;  %v7364_v47 = vrot.slane %v21721_v39, 2  ;;  %v18127_v18 = vld [vmem:[%s23842_s4 + $0x24] ss:$8 sps:$4 sm:$0xff]  }
 0x508   : > { %10335 = vmatpush1.bf16.msra.mxu1 %v18049_v55  ;;  %v7352_v55 = vrot.slane %v21691_v34, 2  ;;  %v7209_v27 = vor.u32 %v7208_v13, %v7205_v8  ;;  %v18119_v34 = vld [vmem:[%s23842_s4] ss:$8 sps:$4 sm:$0xff]   ;;  %v7348_v54 = vrot.slane %v15520_v17, 2  ;;  %v18130_v53 = vld [vmem:[%s23842_s4 + $0x34] ss:$8 sps:$4 sm:$0xff]  }
 0x509   : > { %10336 = vmatprep.subr.bf16.mxu1 %v18054_v37  ;;  %v7351_v37 = vrot.slane %v15521_v40, 2  ;;  %12975 = vmatpush1.bf16.msra.mxu0 %v18119_v34  ;;  %v5736_v39 = vld [vmem:[#allocation3 + $0x60] sm:$0xcc]  ;;  %v18070_v40 = vld [vmem:[%s23841_s3 + $0x910] ss:$8 sps:$4 sm:$0xff]  }
 0x50a   : > { %v7218_v43 = vsel %vm1626_vm10, %v7209_v27, %v7217_v49  ;;  %12976 = vmatprep.subr.bf16.mxu0 %v18124_v10  ;;  %v18125_v13 = vld [vmem:[%s23842_s4 + $0x20] ss:$8 sps:$4 sm:$0xff]   ;;  %v15524_v49 = vcombine.low %v5734_v44, %v18600_v31  ;;  %v18133_v44 = vld [vmem:[%s23842_s4 + $0x44] ss:$8 sps:$4 sm:$0xff]   ;;  %v18078_v7 = vld [vmem:[%s23841_s3 + $0x934] ss:$8 sps:$4 sm:$0xff]  }
 0x50b   : > { %10292 = vmatmul.mubr.bf16.gmra.mrb[56].mxu1 %v7150_v6  ;;  %v7353_v38 = vsel %vm1955_vm11, %v7351_v37, %v7352_v55  ;;  %v18122_v6 = vld [vmem:[%s23842_s4 + $0x10] ss:$8 sps:$4 sm:$0xff]   ;;  %v18075_v55 = vld [vmem:[%s23841_s3 + $0x924] ss:$8 sps:$4 sm:$0xff]   ;;  %v7361_v37 = vrot.slane %v21748_v1, 2 }
 0x50c   : > { %10337 = vmatpush1.bf16.msra.mxu1 %v18052_v15  ;;  %10301 = vmatprep.mubr.bf16.mxu1 %v7235_v45  ;;  %v18064_v15 = vld [vmem:[%s23841_s3 + $0x8f0] ss:$8 sps:$4 sm:$0xff]   ;;  %v18067_v45 = vld [vmem:[%s23841_s3 + $0x900] ss:$8 sps:$4 sm:$0xff]   ;;  %v7360_v34 = vrot.slane %v15524_v49, 2 }
 0x50d   : > { %10338 = vmatprep.subr.bf16.mxu1 %v18059_v30  ;;  %v7349_v30 = vrot.slane %v21718_v57, 2  ;;  %v7363_v57 = vrot.slane %v15525_v0, 2  ;;  %12977 = vmatpush1.bf16.msra.mxu0 %v18122_v6  ;;  %v18076_v31 = vld [vmem:[%s23841_s3 + $0x930] ss:$8 sps:$4 sm:$0xff]   ;;  %v18602_v6 = vld [vmem:[#allocation3 + $0xa0] sm:$0xff] }
 0x50e   : > { %12978 = vmatprep.subr.bf16.mxu0 %v18127_v18  ;;  %v7362_v17 = vsel %vm1955_vm11, %v7360_v34, %v7361_v37  ;;  %v7373_v18 = vrot.slane %v21774_v25, 2  ;;  %v18082_v49 = vld [vmem:[%s23841_s3 + $0x950] ss:$8 sps:$4 sm:$0xff]   ;;  %v18085_v34 = vld [vmem:[%s23841_s3 + $0x960] ss:$8 sps:$4 sm:$0xff]  }
 0x50f   : > { %v7350_v8 = vsel %vm1955_vm11, %v7348_v54, %v7349_v30  ;;  %v18081_v30 = vld [vmem:[%s23841_s3 + $0x944] ss:$8 sps:$4 sm:$0xff]   ;;  %v18134_v54 = vld [vmem:[%s23842_s4 + $0x50] ss:$8 sps:$4 sm:$0xff]  }
 0x510   : > { %10339 = vmatpush1.bf16.msra.mxu1 %v18057_v41  ;;  %v18072_v41 = vld [vmem:[%s23841_s3 + $0x914] ss:$8 sps:$4 sm:$0xff]  }
 0x511   : > { %10340 = vmatprep.subr.bf16.mxu1 %v18062_v42  ;;  %v7365_v42 = vsel %vm1955_vm11, %v7363_v57, %v7364_v47  ;;  %12979 = vmatpush1.bf16.msra.mxu0 %v18125_v13  ;;  %v18139_v57 = vld [vmem:[%s23842_s4 + $0x64] ss:$8 sps:$4 sm:$0xff]  }
 0x512   : > { %12980 = vmatprep.subr.bf16.mxu0 %v18130_v53 }
 0x513   : > { %10302 = vmatmul.mubr.bf16.gmra.mrb[60].mxu1 %v7218_v43  ;;  %v7376_v43 = vrot.slane %v21751_v29, 2  ;;  %v5738_v29 = vld [vmem:[#allocation3 + $0x90] sm:$0xcc] }
 0x514   : > { %10341 = vmatpush1.bf16.msra.mxu1 %v18060_v48  ;;  %10344 = vmatprep.mubr.bf16.mxu1 %v7353_v38  ;;  %v18601_v48 = vld [vmem:[#allocation3 + $0x70] sm:$0xff]  ;;  %v18073_v38 = vld [vmem:[%s23841_s3 + $0x920] ss:$8 sps:$4 sm:$0xff]   ;;  %v15533_v47 = vcombine.high %v5738_v29, %v18602_v6 }
 0x515   : > { %10342 = vmatprep.subr.bf16.mxu1 %v18066_v14  ;;  %v15529_v27 = vcombine.high %v5736_v39, %v18601_v48  ;;  %v18128_v14 = vld [vmem:[%s23842_s4 + $0x30] ss:$8 sps:$4 sm:$0xff]   ;;  %v15528_v0 = vcombine.low %v5736_v39, %v18601_v48  ;;  %v18084_v39 = vld [vmem:[%s23841_s3 + $0x954] ss:$8 sps:$4 sm:$0xff]   ;;  %v18087_v48 = vld [vmem:[%s23841_s3 + $0x964] ss:$8 sps:$4 sm:$0xff]  }
 0x516   : > { %12981 = vmatpush1.bf16.msra.mxu0 %v18128_v14  ;;  %v7387_v25 = vrot.slane %v15533_v47, 2  ;;  %v7385_v14 = vrot.slane %v21794_v19, 2  ;;  %v7397_v47 = vrot.slane %v21826_v3, 2  ;;  %v18096_v3 = vld [vmem:[%s23841_s3 + $0x994] ss:$8 sps:$4 sm:$0xff]  }
 0x517   : > { %v7375_v1 = vrot.slane %v15529_v27, 2  ;;  %12982 = vmatprep.subr.bf16.mxu0 %v18133_v44  ;;  %v18603_v27 = vld [vmem:[#allocation3 + $0xd0] sm:$0xff]  ;;  %v7400_v44 = vrot.slane %v21803_v33, 2 }
 0x518   : > { %10343 = vmatpush1.bf16.msra.mxu1 %v18064_v15  ;;  %v18131_v15 = vld [vmem:[%s23842_s4 + $0x40] ss:$8 sps:$4 sm:$0xff]   ;;  %v5742_v33 = vld [vmem:[#allocation3 + $0xf0] sm:$0xcc] }
 0x519   : > { %10425 = vmatprep.subr.bf16.mxu1 %v18069_v51  ;;  %v7377_v10 = vsel %vm1955_vm11, %v7375_v1, %v7376_v43  ;;  %v18136_v51 = vld [vmem:[%s23842_s4 + $0x54] ss:$8 sps:$4 sm:$0xff]   ;;  %v18140_v43 = vld [vmem:[%s23842_s4 + $0x70] ss:$8 sps:$4 sm:$0xff]  }
 0x51a   : > { %12983 = vmatpush1.bf16.msra.mxu0 %v18131_v15 }
 0x51b   : > { %10345 = vmatmul.mubr.bf16.vlgmr.msra.gmra.mrb[32].mxu1 %v7350_v8  ;;  %12984 = vmatprep.subr.bf16.mxu0 %v18136_v51  ;;  %v7372_v8 = vrot.slane %v15528_v0, 2  ;;  %v18088_v51 = vld [vmem:[%s23841_s3 + $0x970] ss:$8 sps:$4 sm:$0xff]   ;;  %v18093_v0 = vld [vmem:[%s23841_s3 + $0x984] ss:$8 sps:$4 sm:$0xff]  }
 0x51c   : > { %10426 = vmatpush1.bf16.msra.mxu1 %v18067_v45  ;;  %10354 = vmatprep.mubr.bf16.mxu1 %v7365_v42  ;;  %v7388_v45 = vrot.slane %v21777_v28, 2  ;;  %v5740_v28 = vld [vmem:[#allocation3 + $0xc0] sm:$0xcc] }
 0x51d   : > { %10427 = vmatprep.subr.bf16.mxu1 %v18072_v41  ;;  %v18079_v41 = vld [vmem:[%s23841_s3 + $0x940] ss:$8 sps:$4 sm:$0xff]   ;;  %v7374_v13 = vsel %vm1955_vm11, %v7372_v8, %v7373_v18  ;;  %v15537_v37 = vcombine.high %v5740_v28, %v18603_v27  ;;  %v18146_v18 = vld [vmem:[%s23842_s4 + $0x90] ss:$8 sps:$4 sm:$0xff]  }
 0x51e   : > { %12985 = vmatpush1.bf16.msra.mxu0 %v18134_v54  ;;  %v18137_v42 = vld [vmem:[%s23842_s4 + $0x60] ss:$8 sps:$4 sm:$0xff]   ;;  %v7389_v53 = vsel %vm1955_vm11, %v7387_v25, %v7388_v45  ;;  %v7412_v54 = vrot.slane %v21829_v63, 2 }
 0x51f   : > { %12986 = vmatprep.subr.bf16.mxu0 %v18139_v57  ;;  %v7399_v19 = vrot.slane %v15537_v37, 2  ;;  %v18091_v45 = vld [vmem:[%s23841_s3 + $0x980] ss:$8 sps:$4 sm:$0xff]   ;;  %v18102_v37 = vld [vmem:[%s23841_s3 + $0x9b4] ss:$8 sps:$4 sm:$0xff]  }
 0x520   : > { %10428 = vmatpush1.bf16.msra.mxu1 %v18070_v40  ;;  %v18142_v40 = vld [vmem:[%s23842_s4 + $0x74] ss:$8 sps:$4 sm:$0xff]   ;;  %v5744_v25 = vld [vmem:[#allocation3 + $0x120] sm:$0xcc] }
 0x521   : > { %10429 = vmatprep.subr.bf16.mxu1 %v18075_v55  ;;  %v15532_v55 = vcombine.low %v5738_v29, %v18602_v6  ;;  %v18143_v29 = vld [vmem:[%s23842_s4 + $0x80] ss:$8 sps:$4 sm:$0xff]   ;;  %v7401_v15 = vsel %vm1955_vm11, %v7399_v19, %v7400_v44  ;;  %v7421_v19 = vrot.slane %v21877_v59, 2 }
 0x522   : > { %12987 = vmatpush1.bf16.msra.mxu0 %v18137_v42  ;;  %v18605_v42 = vld [vmem:[#allocation3 + $0x130] sm:$0xff] }
 0x523   : > { %10355 = vmatmul.mubr.bf16.gmra.mrb[36].mxu1 %v7362_v17  ;;  %12988 = vmatprep.subr.bf16.mxu0 %v18142_v40  ;;  %v7384_v1 = vrot.slane %v15532_v55, 2  ;;  %v7409_v40 = vrot.slane %v21852_v5, 2  ;;  %v18097_v55 = vld [vmem:[%s23841_s3 + $0x9a0] ss:$8 sps:$4 sm:$0xff]   ;;  %v15544_v44 = vcombine.low %v5744_v25, %v18605_v42 }
 0x524   : > { %10430 = vmatpush1.bf16.msra.mxu1 %v18073_v38  ;;  %10364 = vmatprep.mubr.bf16.mxu1 %v7377_v10  ;;  %v18145_v38 = vld [vmem:[%s23842_s4 + $0x84] ss:$8 sps:$4 sm:$0xff]   ;;  %v18148_v10 = vld [vmem:[%s23842_s4 + $0x94] ss:$8 sps:$4 sm:$0xff]  }
 0x525   : > { %10431 = vmatprep.subr.bf16.mxu1 %v18078_v7  ;;  %v18090_v7 = vld [vmem:[%s23841_s3 + $0x974] ss:$8 sps:$4 sm:$0xff]   ;;  %v7386_v17 = vsel %vm1955_vm11, %v7384_v1, %v7385_v14 }
 0x526   : > { %12989 = vmatpush1.bf16.msra.mxu0 %v18140_v43  ;;  %v5746_v43 = vld [vmem:[#allocation3 + $0x150] sm:$0xcc] }
 0x527   : > { %12990 = vmatprep.subr.bf16.mxu0 %v18145_v38  ;;  %v18105_v38 = vld [vmem:[%s23841_s3 + $0x9c4] ss:$8 sps:$4 sm:$0xff]  }
 0x528   : > { %10432 = vmatpush1.bf16.msra.mxu1 %v18076_v31  ;;  %v15536_v31 = vcombine.low %v5740_v28, %v18603_v27  ;;  %v18099_v28 = vld [vmem:[%s23841_s3 + $0x9a4] ss:$8 sps:$4 sm:$0xff]  }
 0x529   : > { %10433 = vmatprep.subr.bf16.mxu1 %v18081_v30  ;;  %v18604_v30 = vld [vmem:[#allocation3 + $0x100] sm:$0xff] }
 0x52a   : > { %v15541_v6 = vcombine.high %v5742_v33, %v18604_v30  ;;  %12991 = vmatpush1.bf16.msra.mxu0 %v18143_v29  ;;  %v7396_v57 = vrot.slane %v15536_v31, 2  ;;  %v18607_v31 = vld [vmem:[#allocation3 + $0x18] sm:$0xff] }
 0x52b   : > { %10365 = vmatmul.mubr.bf16.gmra.mrb[40].mxu1 %v7374_v13  ;;  %12992 = vmatprep.subr.bf16.mxu0 %v18148_v10  ;;  %v15540_v13 = vcombine.low %v5742_v33, %v18604_v30  ;;  %v7420_v33 = vrot.slane %v15544_v44, 2 }
 0x52c   : > { %10434 = vmatpush1.bf16.msra.mxu1 %v18079_v41  ;;  %10374 = vmatprep.mubr.bf16.mxu1 %v7389_v53  ;;  %v7411_v41 = vrot.slane %v15541_v6, 2  ;;  %v7398_v8 = vsel %vm1955_vm11, %v7396_v57, %v7397_v47  ;;  %v15545_v53 = vcombine.high %v5744_v25, %v18605_v42  ;;  %v18111_v6 = vld [vmem:[%s23841_s3 + $0x9e4] ss:$8 sps:$4 sm:$0xff]   ;;  %v7433_v47 = vrot.slane %v21903_v50, 2  ;;  %v5735_v25 = vld [vmem:[#allocation3 + $0x38] sm:$0xcc] }
 0x52d   : > { %10435 = vmatprep.subr.bf16.mxu1 %v18084_v39  ;;  %v18094_v39 = vld [vmem:[%s23841_s3 + $0x990] ss:$8 sps:$4 sm:$0xff]   ;;  %v7422_v10 = vsel %vm1955_vm11, %v7420_v33, %v7421_v19  ;;  %v7379_v19 = vrot.slane %v21982_v12, 2 }
 0x52e   : > { %12993 = vmatpush1.bf16.msra.mxu0 %v18146_v18  ;;  %v7413_v63 = vsel %vm1955_vm11, %v7411_v41, %v7412_v54  ;;  %v7423_v27 = vrot.slane %v15545_v53, 2  ;;  %v7358_v54 = vrot.slane %v21906_v36, 2  ;;  %v18116_v41 = vld [vmem:[%s23841_s3 + $0x9f4] ss:$8 sps:$4 sm:$0xff]   ;;  %v7370_v53 = vrot.slane %v21933_v58, 2 }
 0x52f   : > { %v5739_v58 = vld [vmem:[#allocation3 + $0x98] sm:$0xcc] }
 0x530   : > { %10436 = vmatpush1.bf16.msra.mxu1 %v18082_v49  ;;  %v7424_v49 = vrot.slane %v21855_v11, 2  ;;  %v18100_v11 = vld [vmem:[%s23841_s3 + $0x9b0] ss:$8 sps:$4 sm:$0xff]  }
 0x531   : > { %10437 = vmatprep.subr.bf16.mxu1 %v18087_v48  ;;  %v7408_v48 = vrot.slane %v15540_v13, 2 }
 0x532   : > { %v7425_v5 = vsel %vm1955_vm11, %v7423_v27, %v7424_v49  ;;  %v18609_v27 = vld [vmem:[#allocation3 + $0x78] sm:$0xff] }
 0x533   : > { %10375 = vmatmul.mubr.bf16.gmra.mrb[44].mxu1 %v7386_v17  ;;  %v7410_v14 = vsel %vm1955_vm11, %v7408_v48, %v7409_v40  ;;  %v18103_v17 = vld [vmem:[%s23841_s3 + $0x9c0] ss:$8 sps:$4 sm:$0xff]  }
 0x534   : > { %10438 = vmatpush1.bf16.msra.mxu1 %v18085_v34  ;;  %10384 = vmatprep.mubr.bf16.mxu1 %v7401_v15  ;;  %v18606_v34 = vld [vmem:[#allocation3 + $0x160] sm:$0xff]  ;;  %v18108_v15 = vld [vmem:[%s23841_s3 + $0x9d4] ss:$8 sps:$4 sm:$0xff]  }
 0x535   : > { %10439 = vmatprep.subr.bf16.mxu1 %v18090_v7  ;;  %v15549_v1 = vcombine.high %v5746_v43, %v18606_v34  ;;  %v7436_v7 = vrot.slane %v21881_v21, 2  ;;  %v15548_v30 = vcombine.low %v5746_v43, %v18606_v34  ;;  %v7367_v43 = vrot.slane %v21957_v62, 2  ;;  %v18610_v34 = vld [vmem:[#allocation3 + $0xa8] sm:$0xff] }
 0x537   : > { %v7435_v29 = vrot.slane %v15549_v1, 2  ;;  %v7432_v57 = vrot.slane %v15548_v30, 2  ;;  %v15535_v1 = vcombine.high %v5739_v58, %v18610_v34 }
 0x538   : > { %10440 = vmatpush1.bf16.msra.mxu1 %v18088_v51  ;;  %v5733_v51 = vld [vmem:[#allocation3 + $0x8] sm:$0xcc] }
 0x539   : > { %10441 = vmatprep.subr.bf16.mxu1 %v18093_v0  ;;  %v7437_v59 = vsel %vm1955_vm11, %v7435_v29, %v7436_v7  ;;  %v15523_v21 = vcombine.high %v5733_v51, %v18607_v31  ;;  %v18106_v0 = vld [vmem:[%s23841_s3 + $0x9d0] ss:$8 sps:$4 sm:$0xff]   ;;  %v7394_v7 = vrot.slane %v21985_v20, 2  ;;  %v7393_v33 = vrot.slane %v15535_v1, 2  ;;  %v18163_v1 = vld [vmem:[%s23842_s4 + $0xe4] ss:$8 sps:$4 sm:$0xff]  }
 0x53b   : > { %10385 = vmatmul.mubr.bf16.gmra.mrb[48].mxu1 %v7398_v8  ;;  %v7357_v18 = vrot.slane %v15523_v21, 2  ;;  %v15522_v8 = vcombine.low %v5733_v51, %v18607_v31  ;;  %v7395_v29 = vsel %vm1955_vm11, %v7393_v33, %v7394_v7  ;;  %v7406_v31 = vrot.slane %v22011_v2, 2  ;;  %v18166_v7 = vld [vmem:[%s23842_s4 + $0xf4] ss:$8 sps:$4 sm:$0xff]  }
 0x53c   : > { %10442 = vmatpush1.bf16.msra.mxu1 %v18091_v45  ;;  %10394 = vmatprep.mubr.bf16.mxu1 %v7413_v63  ;;  %v18109_v45 = vld [vmem:[%s23841_s3 + $0x9e0] ss:$8 sps:$4 sm:$0xff]   ;;  %v18624_v33 = vmov 0.0  }
 0x53d   : > { %10443 = vmatprep.subr.bf16.mxu1 %v18096_v3  ;;  %v7434_v3 = vsel %vm1955_vm11, %v7432_v57, %v7433_v47  ;;  %v7359_v50 = vsel %vm1955_vm11, %v7357_v18, %v7358_v54  ;;  %v18608_v63 = vld [vmem:[#allocation3 + $0x48] sm:$0xff]  ;;  %v7354_v13 = vrot.slane %v15522_v8, 2  ;;  %v7403_v54 = vrot.slane %v22034_v35, 2  ;;  %11439 = vst [vmem:[#allocation4 + $0x8] sm:$0x3] %v18624_v33 }
 0x53e   : > { %v15527_v36 = vcombine.high %v5735_v25, %v18608_v63  ;;  %v15526_v49 = vcombine.low %v5735_v25, %v18608_v63  ;;  %v18612_v47 = vld [vmem:[#allocation3 + $0x108] sm:$0xff]  ;;  %v18613_v25 = vld [vmem:[#allocation3 + $0x138] sm:$0xff]  ;;  %v7415_v63 = vrot.slane %v22060_v60, 2  ;;  %11438 = vst [vmem:[#allocation4] sm:$0x3] %v18624_v33 }
 0x53f   : > { %11440 = vst [vmem:[#allocation4 + $0x20] sm:$0x3] %v18624_v33  ;;  %11441 = vst [vmem:[#allocation4 + $0x28] sm:$0x3] %v18624_v33 }
 0x540   : > { %10444 = vmatpush1.bf16.msra.mxu1 %v18094_v39  ;;  %v18114_v39 = vld [vmem:[%s23841_s3 + $0x9f0] ss:$8 sps:$4 sm:$0xff]   ;;  %v7369_v42 = vrot.slane %v15527_v36, 2  ;;  %v7430_v36 = vrot.slane %v22063_v46, 2  ;;  %11442 = vst [vmem:[#allocation4 + $0x40] sm:$0x3] %v18624_v33 }
 0x541   : > { %10445 = vmatprep.subr.bf16.mxu1 %v18099_v28  ;;  %v7355_v28 = vrot.slane %v21926_v9, 2  ;;  %11443 = vst [vmem:[#allocation4 + $0x48] sm:$0x3] %v18624_v33  ;;  %11444 = vst [vmem:[#allocation4 + $0x60] sm:$0x3] %v18624_v33 }
 0x542   : > { %v7371_v48 = vsel %vm1955_vm11, %v7369_v42, %v7370_v53  ;;  %v18614_v53 = vld [vmem:[#allocation3 + $0x168] sm:$0xff]  ;;  %11445 = vst [vmem:[#allocation4 + $0x68] sm:$0x3] %v18624_v33  ;;  %11446 = vst [vmem:[#allocation4 + $0x80] sm:$0x3] %v18624_v33 }
 0x543   : > { %10395 = vmatmul.mubr.bf16.gmra.mrb[52].mxu1 %v7410_v14  ;;  %v7356_v40 = vsel %vm1955_vm11, %v7354_v13, %v7355_v28  ;;  %v7366_v14 = vrot.slane %v15526_v49, 2  ;;  %v5747_v13 = vld [vmem:[#allocation3 + $0x158] sm:$0xcc]  ;;  %v7427_v49 = vrot.slane %v22086_v61, 2  ;;  %v18149_v61 = vld [vmem:[%s23842_s4 + $0xa0] ss:$8 sps:$4 sm:$0xff]  }
 0x544   : > { %10446 = vmatpush1.bf16.msra.mxu1 %v18097_v55  ;;  %10404 = vmatprep.mubr.bf16.mxu1 %v7425_v5  ;;  %v5737_v55 = vld [vmem:[#allocation3 + $0x68] sm:$0xcc]  ;;  %v7382_v5 = vrot.slane %v21959_v52, 2  ;;  %11447 = vst [vmem:[#allocation4 + $0x88] sm:$0x3] %v18624_v33 }
 0x545   : > { %10447 = vmatprep.subr.bf16.mxu1 %v18102_v37  ;;  %v15531_v37 = vcombine.high %v5737_v55, %v18609_v27  ;;  %v5741_v52 = vld [vmem:[#allocation3 + $0xc8] sm:$0xcc]  ;;  %11448 = vst [vmem:[#allocation4 + $0xa0] sm:$0x3] %v18624_v33  ;;  %11449 = vst [vmem:[#allocation4 + $0xa8] sm:$0x3] %v18624_v33 }
 0x546   : > { %11450 = vst [vmem:[#allocation4 + $0xc0] sm:$0x3] %v18624_v33  ;;  %11451 = vst [vmem:[#allocation4 + $0xc8] sm:$0x3] %v18624_v33 }
 0x547   : > { %v7381_v9 = vrot.slane %v15531_v37, 2  ;;  %v15550_v37 = vcombine.low %v5747_v13, %v18614_v53  ;;  %11452 = vst [vmem:[#allocation4 + $0xe0] sm:$0x3] %v18624_v33  ;;  %11453 = vst [vmem:[#allocation4 + $0xe8] sm:$0x3] %v18624_v33 }
 0x548   : > { %10448 = vmatpush1.bf16.msra.mxu1 %v18100_v11  ;;  %v7368_v11 = vsel %vm1955_vm11, %v7366_v14, %v7367_v43  ;;  %v7439_v14 = vrot.slane %v22112_v4, 2  ;;  %v18152_v4 = vld [vmem:[%s23842_s4 + $0xb0] ss:$8 sps:$4 sm:$0xff]   ;;  %11454 = vst [vmem:[#allocation4 + $0x10] sm:$0xc] %v18624_v33 }
 0x549   : > { %10449 = vmatprep.subr.bf16.mxu1 %v18105_v38  ;;  %v7383_v44 = vsel %vm1955_vm11, %v7381_v9, %v7382_v5  ;;  %v15530_v38 = vcombine.low %v5737_v55, %v18609_v27  ;;  %v7442_v55 = vrot.slane %v22089_v56, 2  ;;  %v7438_v43 = vrot.slane %v15550_v37, 2  ;;  %v18151_v56 = vld [vmem:[%s23842_s4 + $0xa4] ss:$8 sps:$4 sm:$0xff]   ;;  %v18154_v9 = vld [vmem:[%s23842_s4 + $0xb4] ss:$8 sps:$4 sm:$0xff]  }
 0x54a   : > { %12994 = vmatprep.subr.bf16.mxu0 %v18151_v56  ;;  %11455 = vst [vmem:[#allocation4 + $0x18] sm:$0xc] %v18624_v33  ;;  %11456 = vst [vmem:[#allocation4 + $0x30] sm:$0xc] %v18624_v33 }
 0x54b   : > { %10405 = vmatmul.mubr.bf16.gmra.mrb[56].mxu1 %v7422_v10  ;;  %v18611_v10 = vld [vmem:[#allocation3 + $0xd8] sm:$0xff]  ;;  %v7440_v5 = vsel %vm1955_vm11, %v7438_v43, %v7439_v14  ;;  %12995 = vmatpush1.bf16.msra.mxu0 %v18149_v61  ;;  %11457 = vst [vmem:[#allocation4 + $0x38] sm:$0xc] %v18624_v33  ;;  %11458 = vst [vmem:[#allocation4 + $0x50] sm:$0xc] %v18624_v33 }
 0x54c   : > { %10450 = vmatpush1.bf16.msra.mxu1 %v18103_v17  ;;  %10414 = vmatprep.mubr.bf16.mxu1 %v7437_v59  ;;  %v7378_v17 = vrot.slane %v15530_v38, 2  ;;  %v15539_v51 = vcombine.high %v5741_v52, %v18611_v10  ;;  %v7391_v59 = vrot.slane %v22008_v16, 2  ;;  %v18160_v38 = vld [vmem:[%s23842_s4 + $0xd4] ss:$8 sps:$4 sm:$0xff]   ;;  %11459 = vst [vmem:[#allocation4 + $0x58] sm:$0xc] %v18624_v33 }
 0x54d   : > { %10451 = vmatprep.subr.bf16.mxu1 %v18108_v15  ;;  %v15534_v15 = vcombine.low %v5739_v58, %v18610_v34  ;;  %12996 = vmatprep.subr.bf16.mxu0 %v18154_v9  ;;  %v18157_v58 = vld [vmem:[%s23842_s4 + $0xc4] ss:$8 sps:$4 sm:$0xff]   ;;  %v18161_v34 = vld [vmem:[%s23842_s4 + $0xe0] ss:$8 sps:$4 sm:$0xff]   ;;  %11460 = vst [vmem:[#allocation4 + $0x70] sm:$0xc] %v18624_v33 }
 0x54e   : > { %v7380_v62 = vsel %vm1955_vm11, %v7378_v17, %v7379_v19  ;;  %v7405_v12 = vrot.slane %v15539_v51, 2  ;;  %v18164_v19 = vld [vmem:[%s23842_s4 + $0xf0] ss:$8 sps:$4 sm:$0xff]   ;;  %v18169_v17 = vld [vmem:[%s23842_s4 + $0x104] ss:$8 sps:$4 sm:$0xff]  }
 0x54f   : > { %v7390_v21 = vrot.slane %v15534_v15, 2  ;;  %12997 = vmatpush1.bf16.msra.mxu0 %v18152_v4  ;;  %11461 = vst [vmem:[#allocation4 + $0x78] sm:$0xc] %v18624_v33  ;;  %11462 = vst [vmem:[#allocation4 + $0x90] sm:$0xc] %v18624_v33 }
 0x550   : > { %10452 = vmatpush1.bf16.msra.mxu1 %v18106_v0  ;;  %v5743_v0 = vld [vmem:[#allocation3 + $0xf8] sm:$0xcc]  ;;  %v7407_v30 = vsel %vm1955_vm11, %v7405_v12, %v7406_v31  ;;  %12998 = vmatprep.subr.bf16.mxu0 %v18157_v58  ;;  %11463 = vst [vmem:[#allocation4 + $0x98] sm:$0xc] %v18624_v33  ;;  %11464 = vst [vmem:[#allocation4 + $0xb0] sm:$0xc] %v18624_v33 }
 0x551   : > { %10453 = vmatprep.subr.bf16.mxu1 %v18111_v6  ;;  %v7392_v20 = vsel %vm1955_vm11, %v7390_v21, %v7391_v59  ;;  %v15538_v6 = vcombine.low %v5741_v52, %v18611_v10  ;;  %v15543_v18 = vcombine.high %v5743_v0, %v18612_v47  ;;  %v15542_v8 = vcombine.low %v5743_v0, %v18612_v47 }
 0x552   : > { %11465 = vst [vmem:[#allocation4 + $0xb8] sm:$0xc] %v18624_v33  ;;  %11466 = vst [vmem:[#allocation4 + $0xd0] sm:$0xc] %v18624_v33 }
 0x553   : > { %10415 = vmatmul.mubr.bf16.gmra.mrb[60].mxu1 %v7434_v3  ;;  %v7402_v57 = vrot.slane %v15538_v6, 2  ;;  %v7417_v16 = vrot.slane %v15543_v18, 2  ;;  %11467 = vst [vmem:[#allocation4 + $0xd8] sm:$0xc] %v18624_v33  ;;  %11468 = vst [vmem:[#allocation4 + $0xf0] sm:$0xc] %v18624_v33 }
 0x554   : > { %10454 = vmatpush1.bf16.msra.mxu1 %v18109_v45  ;;  %10457 = vmatprep.mubr.bf16.mxu1 %v7359_v50  ;;  %v7418_v45 = vrot.slane %v22037_v32, 2  ;;  %11469 = vst [vmem:[#allocation4 + $0xf8] sm:$0xc] %v18624_v33 }
 0x555   : > { %10455 = vmatprep.subr.bf16.mxu1 %v18116_v41  ;;  %v7404_v2 = vsel %vm1955_vm11, %v7402_v57, %v7403_v54  ;;  %v5745_v41 = vld [vmem:[#allocation3 + $0x128] sm:$0xcc] }
 0x556   : > { %v7419_v3 = vsel %vm1955_vm11, %v7417_v16, %v7418_v45  ;;  %v15547_v50 = vcombine.high %v5745_v41, %v18613_v25  ;;  %v15546_v42 = vcombine.low %v5745_v41, %v18613_v25 }
 0x558   : > { %10456 = vmatpush1.bf16.msra.mxu1 %v18114_v39  ;;  %v7414_v39 = vrot.slane %v15542_v8, 2  ;;  %v7429_v35 = vrot.slane %v15547_v50, 2 }
 0x55a   : > { %v7416_v32 = vsel %vm1955_vm11, %v7414_v39, %v7415_v63  ;;  %v7431_v28 = vsel %vm1955_vm11, %v7429_v35, %v7430_v36 }
 0x55b   : > { %10458 = vmatmul.mubr.bf16.vlgmr.msra.gmra.mrb[32].mxu1 %v7356_v40  ;;  %v15551_v40 = vcombine.high %v5747_v13, %v18614_v53 }
 0x55c   : > { %10467 = vmatprep.mubr.bf16.mxu1 %v7371_v48  ;;  %v7426_v48 = vrot.slane %v15546_v42, 2 }
 0x55d   : > { %v7441_v60 = vrot.slane %v15551_v40, 2 }
 0x55e   : > { %v7428_v46 = vsel %vm1955_vm11, %v7426_v48, %v7427_v49 }
 0x55f   : > { %v7443_v27 = vsel %vm1955_vm11, %v7441_v60, %v7442_v55 }
 0x563   : > { %10468 = vmatmul.mubr.bf16.gmra.mrb[36].mxu1 %v7368_v11  ;;  %v18155_v11 = vld [vmem:[%s23842_s4 + $0xc0] ss:$8 sps:$4 sm:$0xff]  }
 0x564   : > { %10477 = vmatprep.mubr.bf16.mxu1 %v7383_v44  ;;  %12999 = vmatpush1.bf16.msra.mxu0 %v18155_v11  ;;  %v18158_v44 = vld [vmem:[%s23842_s4 + $0xd0] ss:$8 sps:$4 sm:$0xff]  }
 0x565   : > { %13000 = vmatprep.subr.bf16.mxu0 %v18160_v38 }
 0x568   : > { %13001 = vmatpush1.bf16.msra.mxu0 %v18158_v44 }
 0x569   : > { %13002 = vmatprep.subr.bf16.mxu0 %v18163_v1 }
 0x56b   : > { %10478 = vmatmul.mubr.bf16.gmra.mrb[40].mxu1 %v7380_v62  ;;  %v7796_v62 = vld [vmem:[%s23849_s11] sm:$0x3] }
 0x56c   : > { %10487 = vmatprep.mubr.bf16.mxu1 %v7395_v29  ;;  %13003 = vmatpush1.bf16.msra.mxu0 %v18161_v34  ;;  %v22444_v52 = vrot.slane %v7796_v62, %v19043_v24  ;;  %v18625_v29 = vmov 1966171168   ;;  %v22447_v10 = vrot.slane %v7796_v62, %v19049_v26 }
 0x56d   : > { %13004 = vmatprep.subr.bf16.mxu0 %v18166_v7  ;;  %v10652_v15 = vunpack.c.l.s4 %v18625_v29 }
 0x56f   : > { %v10653_v21 = vunpack.c.0.s8 %v10652_v15 }
 0x570   : > { %13005 = vmatpush1.bf16.msra.mxu0 %v18164_v19 }
 0x571   : > { %13055 = vmatprep.subr.bf16.mxu0 %v18169_v17  ;;  %v22454_v45 = vsub.s32 %v10653_v21, %v19040_v23  ;;  %v18209_v23 = vld [vmem:[%s23842_s4 + $0x1e0] ss:$8 sps:$4 sm:$0xff]  }
 0x573   : > { %10488 = vmatmul.mubr.bf16.gmra.mrb[44].mxu1 %v7392_v20 }
 0x574   : > { %10497 = vmatprep.mubr.bf16.mxu1 %v7407_v30 }
 0x57b   : > { %10498 = vmatmul.mubr.bf16.gmra.mrb[48].mxu1 %v7404_v2 }
 0x57c   : > { %10507 = vmatprep.mubr.bf16.mxu1 %v7419_v3 }
 0x583   : > { %10508 = vmatmul.mubr.bf16.gmra.mrb[52].mxu1 %v7416_v32 }
 0x584   : > { %10517 = vmatprep.mubr.bf16.mxu1 %v7431_v28 }
 0x58b   : > { %10518 = vmatmul.mubr.bf16.gmra.mrb[56].mxu1 %v7428_v46 }
 0x58c   : > { %10527 = vmatprep.mubr.bf16.mxu1 %v7443_v27 }
 0x593   : > { %10528 = vmatmul.mubr.bf16.gmra.mrb[60].mxu1 %v7440_v5 }
 0x62e   : > { %v10459_v51 = vpop.f32.mrb[32].mxu1 }
 0x62f   : > { %v16347_v59 = vadd.f32 %v10459_v51, %v22444_v52  ;;  %v10461_v31 = vpop.f32.mrb[33].mxu1 }
 0x630   : > { %v16348_v12 = vadd.f32 %v10461_v31, %v22447_v10  ;;  %v10463_v20 = vpop.f32.mrb[34].mxu1 }
 0x631   : > { %vm10538_vm7 = vcmp.ge.f32.partialorder %v16347_v59, 0.0  ;;  %v10570_v0 = vmul.f32 0.1, %v16347_v59  ;;  %v16349_v30 = vadd.f32 %v10463_v20, %v22444_v52  ;;  %v10465_v6 = vpop.f32.mrb[35].mxu1 }
 0x632   : > { %vm10539_vm8 = vcmp.ge.f32.partialorder %v16348_v12, 0.0  ;;  %v10571_v47 = vmul.f32 0.1, %v16348_v12  ;;  %v16350_v18 = vadd.f32 %v10465_v6, %v22447_v10 }
 0x633   : > { %v10602_v54 = vsel %vm10538_vm7, %v16347_v59, %v10570_v0  ;;  %vm10540_vm10 = vcmp.ge.f32.partialorder %v16349_v30, 0.0  ;;  %v10572_v57 = vmul.f32 0.1, %v16349_v30 }
 0x634   : > { %v10603_v16 = vsel %vm10539_vm8, %v16348_v12, %v10571_v47  ;;  %vm10541_vm0 = vcmp.ge.f32.partialorder %v16350_v18, 0.0  ;;  %v10573_v2 = vmul.f32 0.1, %v16350_v18 }
 0x635   : > { %v10650_v41 = vcombine.low %v10602_v54, %v10603_v16  ;;  %v10846_v3 = vcombine.high %v10602_v54, %v10603_v16  ;;  %v10604_v8 = vsel %vm10540_vm10, %v16349_v30, %v10572_v57 }
 0x636   : > { %v10605_v25 = vsel %vm10541_vm0, %v16350_v18, %v10573_v2  ;;  %v10469_v50 = vpop.f32.mrb[36].mxu1 }
 0x637   : > { %v10657_v63 = vrot.slane %v10650_v41, %v22454_v45  ;;  %v10853_v36 = vrot.slane %v10846_v3, %v22454_v45  ;;  %v11054_v39 = vcombine.low %v10604_v8, %v10605_v25  ;;  %v11246_v35 = vcombine.high %v10604_v8, %v10605_v25  ;;  %v10471_v32 = vpop.f32.mrb[37].mxu1  ;;  %v18167_v25 = vld [vmem:[%s23842_s4 + $0x100] ss:$8 sps:$4 sm:$0xff]  }
 0x638   : > { %v16351_v13 = vadd.f32 %v10469_v50, %v22444_v52  ;;  %v16352_v28 = vadd.f32 %v10471_v32, %v22447_v10  ;;  %v10473_v42 = vpop.f32.mrb[38].mxu1 }
 0x639   : > { %v10664_v53 = vrot.slane %v10657_v63, %v22454_v45  ;;  %v10860_v40 = vrot.slane %v10853_v36, %v22454_v45  ;;  %v11061_v49 = vrot.slane %v11054_v39, %v22454_v45  ;;  %v11253_v55 = vrot.slane %v11246_v35, %v22454_v45  ;;  %v10475_v48 = vpop.f32.mrb[39].mxu1  ;;  %v18172_v35 = vld [vmem:[%s23842_s4 + $0x114] ss:$8 sps:$4 sm:$0xff]  }
 0x63a   : > { %vm10542_vm2 = vcmp.ge.f32.partialorder %v16351_v13, 0.0  ;;  %v10574_v60 = vmul.f32 0.1, %v16351_v13  ;;  %vm10543_vm3 = vcmp.ge.f32.partialorder %v16352_v28, 0.0  ;;  %v10575_v22 = vmul.f32 0.1, %v16352_v28 }
 0x63b   : > { %10783 = vst.msk [vmem:[#allocation4 + $0x2] ss:$8 sm:$0x3] %vm22459_vm1, %v10664_v53  ;;  %v10806_v46 = vcombine.high %v10664_v53, %v10664_v53  ;;  %10975 = vst.msk [vmem:[#allocation4 + $0x4] ss:$8 sm:$0x3] %vm22459_vm1, %v10860_v40  ;;  %v10998_v27 = vcombine.high %v10860_v40, %v10860_v40  ;;  %v11068_v37 = vrot.slane %v11061_v49, %v22454_v45 }
 0x63c   : > { %v11260_v14 = vrot.slane %v11253_v55, %v22454_v45  ;;  %v10606_v43 = vsel %vm10542_vm2, %v16351_v13, %v10574_v60  ;;  %v10607_v5 = vsel %vm10543_vm3, %v16352_v28, %v10575_v22  ;;  %v16353_v61 = vadd.f32 %v10473_v42, %v22444_v52 }
 0x63d   : > { %v16354_v56 = vadd.f32 %v10475_v48, %v22447_v10  ;;  %10823 = vst.msk [vmem:[#allocation4 + $0x3] ss:$8 sm:$0x3] %vm22459_vm1, %v10806_v46  ;;  %11015 = vst.msk [vmem:[#allocation4 + $0x5] ss:$8 sm:$0x3] %vm22459_vm1, %v10998_v27  ;;  %v11206_v9 = vcombine.high %v11068_v37, %v11068_v37  ;;  %v10665_v11 = vcombine.low %v10606_v43, %v10607_v5 }
 0x63e   : > { %11183 = vst.msk [vmem:[#allocation4 + $0x6] ss:$8 sm:$0x3] %vm22459_vm1, %v11068_v37  ;;  %11375 = vst.msk [vmem:[#allocation4 + $0x10] ss:$8 sm:$0x3] %vm22459_vm1, %v11260_v14  ;;  %v11398_v4 = vcombine.high %v11260_v14, %v11260_v14  ;;  %v10861_v58 = vcombine.high %v10606_v43, %v10607_v5 }
 0x63f   : > { %vm10544_vm4 = vcmp.ge.f32.partialorder %v16353_v61, 0.0  ;;  %v10576_v44 = vmul.f32 0.1, %v16353_v61  ;;  %vm10545_vm5 = vcmp.ge.f32.partialorder %v16354_v56, 0.0  ;;  %v10577_v38 = vmul.f32 0.1, %v16354_v56 }
 0x640   : > { %11223 = vst.msk [vmem:[#allocation4 + $0x7] ss:$8 sm:$0x3] %vm22459_vm1, %v11206_v9  ;;  %11415 = vst.msk [vmem:[#allocation4 + $0x11] ss:$8 sm:$0x3] %vm22459_vm1, %v11398_v4  ;;  %v10672_v34 = vrot.slane %v10665_v11, %v22454_v45  ;;  %v10868_v1 = vrot.slane %v10861_v58, %v22454_v45 }
 0x641   : > { %v10479_v19 = vpop.f32.mrb[40].mxu1  ;;  %v10608_v7 = vsel %vm10544_vm4, %v16353_v61, %v10576_v44  ;;  %v10609_v17 = vsel %vm10545_vm5, %v16354_v56, %v10577_v38  ;;  %v18170_v14 = vld [vmem:[%s23842_s4 + $0x110] ss:$8 sps:$4 sm:$0xff]   ;;  %v18175_v56 = vld [vmem:[%s23842_s4 + $0x124] ss:$8 sps:$4 sm:$0xff]  }
 0x642   : > { %v16355_v62 = vadd.f32 %v10479_v19, %v22444_v52  ;;  %v10481_v29 = vpop.f32.mrb[41].mxu1  ;;  %v10679_v15 = vrot.slane %v10672_v34, %v22454_v45  ;;  %v10875_v51 = vrot.slane %v10868_v1, %v22454_v45  ;;  %v11069_v59 = vcombine.low %v10608_v7, %v10609_v17 }
 0x643   : > { %v11261_v31 = vcombine.high %v10608_v7, %v10609_v17  ;;  %v10483_v21 = vpop.f32.mrb[42].mxu1  ;;  %v16356_v20 = vadd.f32 %v10481_v29, %v22447_v10 }
 0x644   : > { %vm10546_vm12 = vcmp.ge.f32.partialorder %v16355_v62, 0.0  ;;  %v10578_v12 = vmul.f32 0.1, %v16355_v62  ;;  %v16357_v0 = vadd.f32 %v10483_v21, %v22444_v52  ;;  %v10485_v30 = vpop.f32.mrb[43].mxu1  ;;  %v10807_v6 = vcombine.high %v10679_v15, %v10679_v15 }
 0x645   : > { %10786 = vst.msk [vmem:[#allocation4 + $0x22] ss:$8 sm:$0x3] %vm22459_vm1, %v10679_v15  ;;  %10978 = vst.msk [vmem:[#allocation4 + $0x24] ss:$8 sm:$0x3] %vm22459_vm1, %v10875_v51  ;;  %v10999_v47 = vcombine.high %v10875_v51, %v10875_v51  ;;  %v11076_v18 = vrot.slane %v11069_v59, %v22454_v45  ;;  %v11268_v54 = vrot.slane %v11261_v31, %v22454_v45 }
 0x646   : > { %v10610_v57 = vsel %vm10546_vm12, %v16355_v62, %v10578_v12  ;;  %vm10547_vm13 = vcmp.ge.f32.partialorder %v16356_v20, 0.0  ;;  %v10579_v16 = vmul.f32 0.1, %v16356_v20  ;;  %vm10548_vm14 = vcmp.ge.f32.partialorder %v16357_v0, 0.0  ;;  %v10489_v63 = vpop.f32.mrb[44].mxu1 }
 0x647   : > { %10826 = vst.msk [vmem:[#allocation4 + $0x23] ss:$8 sm:$0x3] %vm22459_vm1, %v10807_v6  ;;  %11018 = vst.msk [vmem:[#allocation4 + $0x25] ss:$8 sm:$0x3] %vm22459_vm1, %v10999_v47  ;;  %v11083_v2 = vrot.slane %v11076_v18, %v22454_v45  ;;  %v11275_v41 = vrot.slane %v11268_v54, %v22454_v45  ;;  %v16358_v8 = vadd.f32 %v10485_v30, %v22447_v10 }
 0x648   : > { %v10580_v3 = vmul.f32 0.1, %v16357_v0  ;;  %v10611_v50 = vsel %vm10547_vm13, %v16356_v20, %v10579_v16  ;;  %v11471_v36 = vld [vmem:[#allocation4 + $0x8] sm:$0xff]  ;;  %v11470_v39 = vld [vmem:[#allocation4] sm:$0xff]  ;;  %v10491_v53 = vpop.f32.mrb[45].mxu1  ;;  %v16359_v55 = vadd.f32 %v10489_v63, %v22444_v52 }
 0x649   : > { %11186 = vst.msk [vmem:[#allocation4 + $0x26] ss:$8 sm:$0x3] %vm22459_vm1, %v11083_v2  ;;  %v11207_v32 = vcombine.high %v11083_v2, %v11083_v2  ;;  %11378 = vst.msk [vmem:[#allocation4 + $0x30] ss:$8 sm:$0x3] %vm22459_vm1, %v11275_v41  ;;  %v11399_v13 = vcombine.high %v11275_v41, %v11275_v41  ;;  %v10680_v28 = vcombine.low %v10610_v57, %v10611_v50  ;;  %13006 = vmatprep.mubr.f32.mxu0 %v11471_v36 }
 0x64a   : > { %v10876_v42 = vcombine.high %v10610_v57, %v10611_v50  ;;  %v10612_v40 = vsel %vm10548_vm14, %v16357_v0, %v10580_v3  ;;  %vm10549_vm15 = vcmp.ge.f32.partialorder %v16358_v8, 0.0  ;;  %v10581_v49 = vmul.f32 0.1, %v16358_v8  ;;  %v10493_v48 = vpop.f32.mrb[46].mxu1  ;;  %13007 = vmatmul.mubr.f32.vlgmr.msra.gmra.mrb[64].mxu0 %v11470_v39  ;;  %v18173_v20 = vld [vmem:[%s23842_s4 + $0x120] ss:$8 sps:$4 sm:$0xff]  }
 0x64b   : > { %11226 = vst.msk [vmem:[#allocation4 + $0x27] ss:$8 sm:$0x3] %vm22459_vm1, %v11207_v32  ;;  %11418 = vst.msk [vmem:[#allocation4 + $0x31] ss:$8 sm:$0x3] %vm22459_vm1, %v11399_v13  ;;  %v10687_v60 = vrot.slane %v10680_v28, %v22454_v45  ;;  %v16360_v46 = vadd.f32 %v10491_v53, %v22447_v10  ;;  %v16361_v27 = vadd.f32 %v10493_v48, %v22444_v52  ;;  %13056 = vmatpush1.bf16.msra.mxu0 %v18167_v25 }
 0x64c   : > { %v10883_v22 = vrot.slane %v10876_v42, %v22454_v45  ;;  %v10495_v37 = vpop.f32.mrb[47].mxu1  ;;  %v10613_v43 = vsel %vm10549_vm15, %v16358_v8, %v10581_v49  ;;  %vm10550_vm7 = vcmp.ge.f32.partialorder %v16359_v55, 0.0  ;;  %v10582_v5 = vmul.f32 0.1, %v16359_v55  ;;  %13057 = vmatprep.subr.bf16.mxu0 %v18172_v35  ;;  %v18178_v16 = vld [vmem:[%s23842_s4 + $0x134] ss:$8 sps:$4 sm:$0xff]  }
 0x64d   : > { %v16362_v61 = vadd.f32 %v10495_v37, %v22447_v10  ;;  %v10694_v9 = vrot.slane %v10687_v60, %v22454_v45  ;;  %v11084_v11 = vcombine.low %v10612_v40, %v10613_v43  ;;  %v11276_v58 = vcombine.high %v10612_v40, %v10613_v43  ;;  %v18176_v13 = vld [vmem:[%s23842_s4 + $0x130] ss:$8 sps:$4 sm:$0xff]   ;;  %v18181_v49 = vld [vmem:[%s23842_s4 + $0x144] ss:$8 sps:$4 sm:$0xff]  }
 0x64e   : > { %v10890_v4 = vrot.slane %v10883_v22, %v22454_v45  ;;  %v10614_v44 = vsel %vm10550_vm7, %v16359_v55, %v10582_v5  ;;  %vm10551_vm8 = vcmp.ge.f32.partialorder %v16360_v46, 0.0  ;;  %v10583_v38 = vmul.f32 0.1, %v16360_v46  ;;  %v10499_v15 = vpop.f32.mrb[48].mxu1  ;;  %v18179_v5 = vld [vmem:[%s23842_s4 + $0x140] ss:$8 sps:$4 sm:$0xff]  }
 0x64f   : > { %vm10552_vm10 = vcmp.ge.f32.partialorder %v16361_v27, 0.0  ;;  %10789 = vst.msk [vmem:[#allocation4 + $0x42] ss:$8 sm:$0x3] %vm22459_vm1, %v10694_v9  ;;  %v10808_v34 = vcombine.high %v10694_v9, %v10694_v9  ;;  %v11091_v19 = vrot.slane %v11084_v11, %v22454_v45  ;;  %v11283_v7 = vrot.slane %v11276_v58, %v22454_v45  ;;  %13058 = vmatpush1.bf16.msra.mxu0 %v18170_v14  ;;  %v10501_v12 = vpop.f32.mrb[49].mxu1 }
 0x650   : > { %10981 = vst.msk [vmem:[#allocation4 + $0x44] ss:$8 sm:$0x3] %vm22459_vm1, %v10890_v4  ;;  %v11000_v1 = vcombine.high %v10890_v4, %v10890_v4  ;;  %v10615_v17 = vsel %vm10551_vm8, %v16360_v46, %v10583_v38  ;;  %v10584_v62 = vmul.f32 0.1, %v16361_v27  ;;  %vm10553_vm0 = vcmp.ge.f32.partialorder %v16362_v61, 0.0  ;;  %13059 = vmatprep.subr.bf16.mxu0 %v18175_v56 }
 0x651   : > { %v10585_v29 = vmul.f32 0.1, %v16362_v61  ;;  %10829 = vst.msk [vmem:[#allocation4 + $0x43] ss:$8 sm:$0x3] %vm22459_vm1, %v10808_v34  ;;  %v11098_v51 = vrot.slane %v11091_v19, %v22454_v45  ;;  %v11290_v59 = vrot.slane %v11283_v7, %v22454_v45  ;;  %v10695_v31 = vcombine.low %v10614_v44, %v10615_v17  ;;  %v10503_v54 = vpop.f32.mrb[50].mxu1 }
 0x652   : > { %11021 = vst.msk [vmem:[#allocation4 + $0x45] ss:$8 sm:$0x3] %vm22459_vm1, %v11000_v1  ;;  %v10891_v21 = vcombine.high %v10614_v44, %v10615_v17  ;;  %v10616_v0 = vsel %vm10552_vm10, %v16361_v27, %v10584_v62  ;;  %v16363_v6 = vadd.f32 %v10499_v15, %v22444_v52  ;;  %v16364_v47 = vadd.f32 %v10501_v12, %v22447_v10  ;;  %v11473_v18 = vld [vmem:[#allocation4 + $0x28] sm:$0xff]  ;;  %v11472_v57 = vld [vmem:[#allocation4 + $0x20] sm:$0xff]  ;;  %v10505_v25 = vpop.f32.mrb[51].mxu1 }
 0x653   : > { %v10617_v30 = vsel %vm10553_vm0, %v16362_v61, %v10585_v29  ;;  %11189 = vst.msk [vmem:[#allocation4 + $0x46] ss:$8 sm:$0x3] %vm22459_vm1, %v11098_v51  ;;  %v11208_v2 = vcombine.high %v11098_v51, %v11098_v51  ;;  %11381 = vst.msk [vmem:[#allocation4 + $0x50] ss:$8 sm:$0x3] %vm22459_vm1, %v11290_v59  ;;  %v11400_v41 = vcombine.high %v11290_v59, %v11290_v59  ;;  %13012 = vmatprep.mubr.f32.mxu0 %v11473_v18 }
 0x654   : > { %v10702_v3 = vrot.slane %v10695_v31, %v22454_v45  ;;  %v10898_v8 = vrot.slane %v10891_v21, %v22454_v45  ;;  %v11099_v50 = vcombine.low %v10616_v0, %v10617_v30  ;;  %v11291_v63 = vcombine.high %v10616_v0, %v10617_v30  ;;  %13013 = vmatmul.mubr.f32.gmra.mrb[66].mxu0 %v11472_v57  ;;  %v18184_v17 = vld [vmem:[%s23842_s4 + $0x154] ss:$8 sps:$4 sm:$0xff]   ;;  %v18182_v12 = vld [vmem:[%s23842_s4 + $0x150] ss:$8 sps:$4 sm:$0xff]  }
 0x655   : > { %vm10554_vm2 = vcmp.ge.f32.partialorder %v16363_v6, 0.0  ;;  %v10586_v36 = vmul.f32 0.1, %v16363_v6  ;;  %11229 = vst.msk [vmem:[#allocation4 + $0x47] ss:$8 sm:$0x3] %vm22459_vm1, %v11208_v2  ;;  %13060 = vmatpush1.bf16.msra.mxu0 %v18173_v20  ;;  %v16365_v40 = vadd.f32 %v10503_v54, %v22444_v52  ;;  %v16366_v22 = vadd.f32 %v10505_v25, %v22447_v10 }
 0x656   : > { %11421 = vst.msk [vmem:[#allocation4 + $0x51] ss:$8 sm:$0x3] %vm22459_vm1, %v11400_v41  ;;  %v10709_v39 = vrot.slane %v10702_v3, %v22454_v45  ;;  %v10905_v35 = vrot.slane %v10898_v8, %v22454_v45  ;;  %vm10555_vm3 = vcmp.ge.f32.partialorder %v16364_v47, 0.0  ;;  %v10587_v32 = vmul.f32 0.1, %v16364_v47  ;;  %13061 = vmatprep.subr.bf16.mxu0 %v18178_v16 }
 0x657   : > { %v11106_v28 = vrot.slane %v11099_v50, %v22454_v45  ;;  %v11298_v42 = vrot.slane %v11291_v63, %v22454_v45  ;;  %v10618_v53 = vsel %vm10554_vm2, %v16363_v6, %v10586_v36  ;;  %v10509_v43 = vpop.f32.mrb[52].mxu1  ;;  %vm10556_vm4 = vcmp.ge.f32.partialorder %v16365_v40, 0.0  ;;  %v18187_v54 = vld [vmem:[%s23842_s4 + $0x164] ss:$8 sps:$4 sm:$0xff]  }
 0x658   : > { %10792 = vst.msk [vmem:[#allocation4 + $0x62] ss:$8 sm:$0x3] %vm22459_vm1, %v10709_v39  ;;  %v10809_v55 = vcombine.high %v10709_v39, %v10709_v39  ;;  %10984 = vst.msk [vmem:[#allocation4 + $0x64] ss:$8 sm:$0x3] %vm22459_vm1, %v10905_v35  ;;  %v11001_v48 = vcombine.high %v10905_v35, %v10905_v35  ;;  %v10619_v60 = vsel %vm10555_vm3, %v16364_v47, %v10587_v32 }
 0x659   : > { %v11113_v46 = vrot.slane %v11106_v28, %v22454_v45  ;;  %v11305_v27 = vrot.slane %v11298_v42, %v22454_v45  ;;  %v10710_v37 = vcombine.low %v10618_v53, %v10619_v60  ;;  %v10906_v14 = vcombine.high %v10618_v53, %v10619_v60  ;;  %13062 = vmatpush1.bf16.msra.mxu0 %v18176_v13  ;;  %v10511_v44 = vpop.f32.mrb[53].mxu1  ;;  %v18185_v53 = vld [vmem:[%s23842_s4 + $0x160] ss:$8 sps:$4 sm:$0xff]  }
 0x65a   : > { %10832 = vst.msk [vmem:[#allocation4 + $0x63] ss:$8 sm:$0x3] %vm22459_vm1, %v10809_v55  ;;  %11024 = vst.msk [vmem:[#allocation4 + $0x65] ss:$8 sm:$0x3] %vm22459_vm1, %v11001_v48  ;;  %13063 = vmatprep.subr.bf16.mxu0 %v18181_v49  ;;  %v16367_v1 = vadd.f32 %v10509_v43, %v22444_v52  ;;  %v16368_v19 = vadd.f32 %v10511_v44, %v22447_v10 }
 0x65b   : > { %v10588_v61 = vmul.f32 0.1, %v16365_v40  ;;  %vm10557_vm5 = vcmp.ge.f32.partialorder %v16366_v22, 0.0  ;;  %v10589_v56 = vmul.f32 0.1, %v16366_v22  ;;  %v11209_v9 = vcombine.high %v11113_v46, %v11113_v46  ;;  %v10513_v7 = vpop.f32.mrb[54].mxu1 }
 0x65c   : > { %11192 = vst.msk [vmem:[#allocation4 + $0x66] ss:$8 sm:$0x3] %vm22459_vm1, %v11113_v46  ;;  %11384 = vst.msk [vmem:[#allocation4 + $0x70] ss:$8 sm:$0x3] %vm22459_vm1, %v11305_v27  ;;  %v11401_v4 = vcombine.high %v11305_v27, %v11305_v27  ;;  %v10717_v11 = vrot.slane %v10710_v37, %v22454_v45  ;;  %v10913_v58 = vrot.slane %v10906_v14, %v22454_v45 }
 0x65d   : > { %v10620_v38 = vsel %vm10556_vm4, %v16365_v40, %v10588_v61  ;;  %v10621_v34 = vsel %vm10557_vm5, %v16366_v22, %v10589_v56  ;;  %11232 = vst.msk [vmem:[#allocation4 + $0x67] ss:$8 sm:$0x3] %vm22459_vm1, %v11209_v9  ;;  %v11475_v59 = vld [vmem:[#allocation4 + $0x48] sm:$0xff]  ;;  %v11474_v31 = vld [vmem:[#allocation4 + $0x40] sm:$0xff]  ;;  %v10515_v21 = vpop.f32.mrb[55].mxu1  ;;  %13064 = vmatpush1.bf16.msra.mxu0 %v18179_v5  ;;  %v16369_v2 = vadd.f32 %v10513_v7, %v22444_v52 }
 0x65e   : > { %11424 = vst.msk [vmem:[#allocation4 + $0x71] ss:$8 sm:$0x3] %vm22459_vm1, %v11401_v4  ;;  %v10724_v62 = vrot.slane %v10717_v11, %v22454_v45  ;;  %v10920_v29 = vrot.slane %v10913_v58, %v22454_v45  ;;  %v11114_v15 = vcombine.low %v10620_v38, %v10621_v34  ;;  %v11306_v51 = vcombine.high %v10620_v38, %v10621_v34  ;;  %v10519_v63 = vpop.f32.mrb[56].mxu1  ;;  %v18190_v27 = vld [vmem:[%s23842_s4 + $0x174] ss:$8 sps:$4 sm:$0xff]  }
 0x65f   : > { %vm10558_vm12 = vcmp.ge.f32.partialorder %v16367_v1, 0.0  ;;  %v10590_v20 = vmul.f32 0.1, %v16367_v1  ;;  %vm10559_vm13 = vcmp.ge.f32.partialorder %v16368_v19, 0.0  ;;  %v10591_v0 = vmul.f32 0.1, %v16368_v19  ;;  %13018 = vmatprep.mubr.f32.mxu0 %v11475_v59  ;;  %13065 = vmatprep.subr.bf16.mxu0 %v18184_v17 }
 0x660   : > { %10795 = vst.msk [vmem:[#allocation4 + $0x82] ss:$8 sm:$0x3] %vm22459_vm1, %v10724_v62  ;;  %v10810_v30 = vcombine.high %v10724_v62, %v10724_v62  ;;  %10987 = vst.msk [vmem:[#allocation4 + $0x84] ss:$8 sm:$0x3] %vm22459_vm1, %v10920_v29  ;;  %v11002_v6 = vcombine.high %v10920_v29, %v10920_v29  ;;  %v11121_v47 = vrot.slane %v11114_v15, %v22454_v45  ;;  %13019 = vmatmul.mubr.f32.gmra.mrb[68].mxu0 %v11474_v31 }
 0x661   : > { %v11313_v18 = vrot.slane %v11306_v51, %v22454_v45  ;;  %v10622_v57 = vsel %vm10558_vm12, %v16367_v1, %v10590_v20  ;;  %v10623_v16 = vsel %vm10559_vm13, %v16368_v19, %v10591_v0  ;;  %v16370_v41 = vadd.f32 %v10515_v21, %v22447_v10  ;;  %13066 = vmatpush1.bf16.msra.mxu0 %v18182_v12  ;;  %v10521_v42 = vpop.f32.mrb[57].mxu1  ;;  %v18188_v38 = vld [vmem:[%s23842_s4 + $0x170] ss:$8 sps:$4 sm:$0xff]   ;;  %v18193_v17 = vld [vmem:[%s23842_s4 + $0x184] ss:$8 sps:$4 sm:$0xff]  }
 0x662   : > { %10835 = vst.msk [vmem:[#allocation4 + $0x83] ss:$8 sm:$0x3] %vm22459_vm1, %v10810_v30  ;;  %11027 = vst.msk [vmem:[#allocation4 + $0x85] ss:$8 sm:$0x3] %vm22459_vm1, %v11002_v6  ;;  %v11128_v3 = vrot.slane %v11121_v47, %v22454_v45  ;;  %v10725_v25 = vcombine.low %v10622_v57, %v10623_v16  ;;  %v10921_v50 = vcombine.high %v10622_v57, %v10623_v16  ;;  %13067 = vmatprep.subr.bf16.mxu0 %v18187_v54 }
 0x663   : > { %v11320_v8 = vrot.slane %v11313_v18, %v22454_v45  ;;  %vm10560_vm14 = vcmp.ge.f32.partialorder %v16369_v2, 0.0  ;;  %v10592_v36 = vmul.f32 0.1, %v16369_v2  ;;  %vm10561_vm15 = vcmp.ge.f32.partialorder %v16370_v41, 0.0  ;;  %v10523_v22 = vpop.f32.mrb[58].mxu1 }
 0x664   : > { %v10593_v39 = vmul.f32 0.1, %v16370_v41  ;;  %11195 = vst.msk [vmem:[#allocation4 + $0x86] ss:$8 sm:$0x3] %vm22459_vm1, %v11128_v3  ;;  %v11210_v35 = vcombine.high %v11128_v3, %v11128_v3  ;;  %v10732_v13 = vrot.slane %v10725_v25, %v22454_v45  ;;  %v10928_v28 = vrot.slane %v10921_v50, %v22454_v45  ;;  %v11477_v60 = vld [vmem:[#allocation4 + $0x68] sm:$0xff] }
 0x665   : > { %11387 = vst.msk [vmem:[#allocation4 + $0x90] ss:$8 sm:$0x3] %vm22459_vm1, %v11320_v8  ;;  %v11402_v32 = vcombine.high %v11320_v8, %v11320_v8  ;;  %v10624_v40 = vsel %vm10560_vm14, %v16369_v2, %v10592_v36  ;;  %v16371_v55 = vadd.f32 %v10519_v63, %v22444_v52  ;;  %v16372_v48 = vadd.f32 %v10521_v42, %v22447_v10  ;;  %v11476_v46 = vld [vmem:[#allocation4 + $0x60] sm:$0xff]  ;;  %v10525_v61 = vpop.f32.mrb[59].mxu1 }
 0x666   : > { %v10625_v49 = vsel %vm10561_vm15, %v16370_v41, %v10593_v39  ;;  %11235 = vst.msk [vmem:[#allocation4 + $0x87] ss:$8 sm:$0x3] %vm22459_vm1, %v11210_v35  ;;  %v10739_v37 = vrot.slane %v10732_v13, %v22454_v45  ;;  %v10935_v14 = vrot.slane %v10928_v28, %v22454_v45  ;;  %13024 = vmatprep.mubr.f32.mxu0 %v11477_v60  ;;  %v10529_v59 = vpop.f32.mrb[60].mxu1  ;;  %v18191_v47 = vld [vmem:[%s23842_s4 + $0x180] ss:$8 sps:$4 sm:$0xff]  }
 0x667   : > { %11427 = vst.msk [vmem:[#allocation4 + $0x91] ss:$8 sm:$0x3] %vm22459_vm1, %v11402_v32  ;;  %v11129_v43 = vcombine.low %v10624_v40, %v10625_v49  ;;  %v11321_v5 = vcombine.high %v10624_v40, %v10625_v49  ;;  %vm10562_vm7 = vcmp.ge.f32.partialorder %v16371_v55, 0.0  ;;  %v10594_v56 = vmul.f32 0.1, %v16371_v55  ;;  %13025 = vmatmul.mubr.f32.gmra.mrb[70].mxu0 %v11476_v46 }
 0x668   : > { %vm10563_vm8 = vcmp.ge.f32.partialorder %v16372_v48, 0.0  ;;  %v10595_v9 = vmul.f32 0.1, %v16372_v48  ;;  %10798 = vst.msk [vmem:[#allocation4 + $0xa2] ss:$8 sm:$0x3] %vm22459_vm1, %v10739_v37  ;;  %v10811_v4 = vcombine.high %v10739_v37, %v10739_v37  ;;  %v11003_v11 = vcombine.high %v10935_v14, %v10935_v14  ;;  %13068 = vmatpush1.bf16.msra.mxu0 %v18185_v53 }
 0x669   : > { %10990 = vst.msk [vmem:[#allocation4 + $0xa4] ss:$8 sm:$0x3] %vm22459_vm1, %v10935_v14  ;;  %v11136_v58 = vrot.slane %v11129_v43, %v22454_v45  ;;  %v11328_v44 = vrot.slane %v11321_v5, %v22454_v45  ;;  %v10626_v34 = vsel %vm10562_vm7, %v16371_v55, %v10594_v56  ;;  %v16373_v19 = vadd.f32 %v10523_v22, %v22444_v52  ;;  %v10531_v6 = vpop.f32.mrb[61].mxu1  ;;  %v18196_v8 = vld [vmem:[%s23842_s4 + $0x194] ss:$8 sps:$4 sm:$0xff]  }
 0x66a   : > { %v10627_v1 = vsel %vm10563_vm8, %v16372_v48, %v10595_v9  ;;  %v16374_v7 = vadd.f32 %v10525_v61, %v22447_v10  ;;  %13069 = vmatprep.subr.bf16.mxu0 %v18190_v27  ;;  %10838 = vst.msk [vmem:[#allocation4 + $0xa3] ss:$8 sm:$0x3] %vm22459_vm1, %v10811_v4  ;;  %11030 = vst.msk [vmem:[#allocation4 + $0xa5] ss:$8 sm:$0x3] %vm22459_vm1, %v11003_v11  ;;  %v16375_v57 = vadd.f32 %v10529_v59, %v22444_v52 }
 0x66b   : > { %v11143_v62 = vrot.slane %v11136_v58, %v22454_v45  ;;  %v11335_v29 = vrot.slane %v11328_v44, %v22454_v45  ;;  %v10740_v15 = vcombine.low %v10626_v34, %v10627_v1  ;;  %v10936_v51 = vcombine.high %v10626_v34, %v10627_v1  ;;  %v10533_v41 = vpop.f32.mrb[62].mxu1  ;;  %v18194_v40 = vld [vmem:[%s23842_s4 + $0x190] ss:$8 sps:$4 sm:$0xff]   ;;  %v18199_v22 = vld [vmem:[%s23842_s4 + $0x1a4] ss:$8 sps:$4 sm:$0xff]  }
 0x66c   : > { %vm10564_vm10 = vcmp.ge.f32.partialorder %v16373_v19, 0.0  ;;  %v10596_v31 = vmul.f32 0.1, %v16373_v19  ;;  %vm10565_vm0 = vcmp.ge.f32.partialorder %v16374_v7, 0.0  ;;  %v10597_v21 = vmul.f32 0.1, %v16374_v7  ;;  %13070 = vmatpush1.bf16.msra.mxu0 %v18188_v38 }
 0x66d   : > { %11198 = vst.msk [vmem:[#allocation4 + $0xa6] ss:$8 sm:$0x3] %vm22459_vm1, %v11143_v62  ;;  %v11211_v12 = vcombine.high %v11143_v62, %v11143_v62  ;;  %11390 = vst.msk [vmem:[#allocation4 + $0xb0] ss:$8 sm:$0x3] %vm22459_vm1, %v11335_v29  ;;  %v11403_v20 = vcombine.high %v11335_v29, %v11335_v29  ;;  %v10747_v0 = vrot.slane %v10740_v15, %v22454_v45  ;;  %13071 = vmatprep.subr.bf16.mxu0 %v18193_v17 }
 0x66e   : > { %v10943_v30 = vrot.slane %v10936_v51, %v22454_v45  ;;  %v10628_v18 = vsel %vm10564_vm10, %v16373_v19, %v10596_v31  ;;  %v10629_v54 = vsel %vm10565_vm0, %v16374_v7, %v10597_v21  ;;  %v16376_v16 = vadd.f32 %v10531_v6, %v22447_v10  ;;  %v11479_v2 = vld [vmem:[#allocation4 + $0x88] sm:$0xff]  ;;  %v11478_v3 = vld [vmem:[#allocation4 + $0x80] sm:$0xff]  ;;  %v10535_v39 = vpop.f32.mrb[63].mxu1  ;;  %v18202_v38 = vld [vmem:[%s23842_s4 + $0x1b4] ss:$8 sps:$4 sm:$0xff]  }
 0x66f   : > { %11238 = vst.msk [vmem:[#allocation4 + $0xa7] ss:$8 sm:$0x3] %vm22459_vm1, %v11211_v12  ;;  %11430 = vst.msk [vmem:[#allocation4 + $0xb1] ss:$8 sm:$0x3] %vm22459_vm1, %v11403_v20  ;;  %v10754_v25 = vrot.slane %v10747_v0, %v22454_v45  ;;  %v11144_v63 = vcombine.low %v10628_v18, %v10629_v54  ;;  %v11336_v36 = vcombine.high %v10628_v18, %v10629_v54  ;;  %13030 = vmatprep.mubr.f32.mxu0 %v11479_v2 }
 0x670   : > { %v10950_v50 = vrot.slane %v10943_v30, %v22454_v45  ;;  %vm10566_vm2 = vcmp.ge.f32.partialorder %v16375_v57, 0.0  ;;  %v10598_v35 = vmul.f32 0.1, %v16375_v57  ;;  %vm10567_vm3 = vcmp.ge.f32.partialorder %v16376_v16, 0.0  ;;  %13031 = vmatmul.mubr.f32.gmra.mrb[72].mxu0 %v11478_v3  ;;  %v18197_v9 = vld [vmem:[%s23842_s4 + $0x1a0] ss:$8 sps:$4 sm:$0xff]  }
 0x671   : > { %v10599_v32 = vmul.f32 0.1, %v16376_v16  ;;  %10801 = vst.msk [vmem:[#allocation4 + $0xc2] ss:$8 sm:$0x3] %vm22459_vm1, %v10754_v25  ;;  %v10812_v13 = vcombine.high %v10754_v25, %v10754_v25  ;;  %v11151_v42 = vrot.slane %v11144_v63, %v22454_v45  ;;  %v11343_v53 = vrot.slane %v11336_v36, %v22454_v45  ;;  %13072 = vmatpush1.bf16.msra.mxu0 %v18191_v47 }
 0x672   : > { %10993 = vst.msk [vmem:[#allocation4 + $0xc4] ss:$8 sm:$0x3] %vm22459_vm1, %v10950_v50  ;;  %v11004_v28 = vcombine.high %v10950_v50, %v10950_v50  ;;  %v10630_v49 = vsel %vm10566_vm2, %v16375_v57, %v10598_v35  ;;  %v16377_v48 = vadd.f32 %v10533_v41, %v22444_v52  ;;  %v16378_v60 = vadd.f32 %v10535_v39, %v22447_v10  ;;  %v18200_v51 = vld [vmem:[%s23842_s4 + $0x1b0] ss:$8 sps:$4 sm:$0xff]  }
 0x673   : > { %v10631_v55 = vsel %vm10567_vm3, %v16376_v16, %v10599_v32  ;;  %13073 = vmatprep.subr.bf16.mxu0 %v18196_v8  ;;  %10841 = vst.msk [vmem:[#allocation4 + $0xc3] ss:$8 sm:$0x3] %vm22459_vm1, %v10812_v13  ;;  %v11158_v46 = vrot.slane %v11151_v42, %v22454_v45  ;;  %v11350_v27 = vrot.slane %v11343_v53, %v22454_v45  ;;  %v18205_v59 = vld [vmem:[%s23842_s4 + $0x1c4] ss:$8 sps:$4 sm:$0xff]   ;;  %vm13444_vm14 = vcmask 1041409  }
 0x674   : > { %11033 = vst.msk [vmem:[#allocation4 + $0xc5] ss:$8 sm:$0x3] %vm22459_vm1, %v11004_v28  ;;  %v10755_v37 = vcombine.low %v10630_v49, %v10631_v55  ;;  %v10951_v14 = vcombine.high %v10630_v49, %v10631_v55  ;;  %vm10568_vm4 = vcmp.ge.f32.partialorder %v16377_v48, 0.0  ;;  %v10600_v52 = vmul.f32 0.1, %v16377_v48 }
 0x675   : > { %vm10569_vm5 = vcmp.ge.f32.partialorder %v16378_v60, 0.0  ;;  %v10601_v10 = vmul.f32 0.1, %v16378_v60  ;;  %11201 = vst.msk [vmem:[#allocation4 + $0xc6] ss:$8 sm:$0x3] %vm22459_vm1, %v11158_v46  ;;  %v11212_v43 = vcombine.high %v11158_v46, %v11158_v46  ;;  %v11404_v5 = vcombine.high %v11350_v27, %v11350_v27  ;;  %13074 = vmatpush1.bf16.msra.mxu0 %v18194_v40 }
 0x676   : > { %11393 = vst.msk [vmem:[#allocation4 + $0xd0] ss:$8 sm:$0x3] %vm22459_vm1, %v11350_v27  ;;  %v10762_v61 = vrot.slane %v10755_v37, %v22454_v45  ;;  %v10958_v56 = vrot.slane %v10951_v14, %v22454_v45  ;;  %v10632_v4 = vsel %vm10568_vm4, %v16377_v48, %v10600_v52  ;;  %v11481_v58 = vld [vmem:[#allocation4 + $0xa8] sm:$0xff]  ;;  %13075 = vmatprep.subr.bf16.mxu0 %v18199_v22  ;;  %v11480_v44 = vld [vmem:[#allocation4 + $0xa0] sm:$0xff]  ;;  %vm13447_vm15 = vcmask 1042434  }
 0x677   : > { %v10633_v11 = vsel %vm10569_vm5, %v16378_v60, %v10601_v10  ;;  %11241 = vst.msk [vmem:[#allocation4 + $0xc7] ss:$8 sm:$0x3] %vm22459_vm1, %v11212_v43  ;;  %11433 = vst.msk [vmem:[#allocation4 + $0xd1] ss:$8 sm:$0x3] %vm22459_vm1, %v11404_v5  ;;  %13036 = vmatprep.mubr.f32.mxu0 %v11481_v58 }
 0x678   : > { %v10769_v34 = vrot.slane %v10762_v61, %v22454_v45  ;;  %v10965_v1 = vrot.slane %v10958_v56, %v22454_v45  ;;  %v11159_v19 = vcombine.low %v10632_v4, %v10633_v11  ;;  %v11351_v7 = vcombine.high %v10632_v4, %v10633_v11  ;;  %13037 = vmatmul.mubr.f32.gmra.mrb[74].mxu0 %v11480_v44  ;;  %v18203_v0 = vld [vmem:[%s23842_s4 + $0x1c0] ss:$8 sps:$4 sm:$0xff]   ;;  %v18206_v47 = vld [vmem:[%s23842_s4 + $0x1d0] ss:$8 sps:$4 sm:$0xff]   ;;  %v18211_v54 = vld [vmem:[%s23842_s4 + $0x1e4] ss:$8 sps:$4 sm:$0xff]  }
 0x679   : > { %13076 = vmatpush1.bf16.msra.mxu0 %v18197_v9  ;;  %v11487_v18 = vld [vmem:[#allocation4 + $0x8] sm:$0xfe]  ;;  %v11489_v57 = vld [vmem:[#allocation4 + $0x18] sm:$0x1]  ;;  %v18214_v8 = vld [vmem:[%s23842_s4 + $0x1f4] ss:$8 sps:$4 sm:$0xff]  }
 0x67a   : > { %10804 = vst.msk [vmem:[#allocation4 + $0xe2] ss:$8 sm:$0x3] %vm22459_vm1, %v10769_v34  ;;  %v10813_v17 = vcombine.high %v10769_v34, %v10769_v34  ;;  %10996 = vst.msk [vmem:[#allocation4 + $0xe4] ss:$8 sm:$0x3] %vm22459_vm1, %v10965_v1  ;;  %v11005_v62 = vcombine.high %v10965_v1, %v10965_v1  ;;  %v11166_v29 = vrot.slane %v11159_v19, %v22454_v45  ;;  %13077 = vmatprep.subr.bf16.mxu0 %v18202_v38 }
 0x67b   : > { %v11358_v15 = vrot.slane %v11351_v7, %v22454_v45  ;;  %v11650_v16 = vrot.slane %v11487_v18, 1  ;;  %v11651_v3 = vrot.slane %v11489_v57, 1  ;;  %v11486_v50 = vld [vmem:[#allocation4] sm:$0xfe]  ;;  %v18212_v63 = vld [vmem:[%s23842_s4 + $0x1f0] ss:$8 sps:$4 sm:$0xff]  }
 0x67c   : > { %10844 = vst.msk [vmem:[#allocation4 + $0xe3] ss:$8 sm:$0x3] %vm22459_vm1, %v10813_v17  ;;  %11036 = vst.msk [vmem:[#allocation4 + $0xe5] ss:$8 sm:$0x3] %vm22459_vm1, %v11005_v62  ;;  %v11173_v31 = vrot.slane %v11166_v29, %v22454_v45 }
 0x67d   : > { %v11365_v21 = vrot.slane %v11358_v15, %v22454_v45  ;;  %13078 = vmatpush1.bf16.msra.mxu0 %v18200_v51  ;;  %v18208_v45 = vld [vmem:[%s23842_s4 + $0x1d4] ss:$8 sps:$4 sm:$0xff]   ;;  %v11652_v25 = vsel %vm1521_vm9, %v11650_v16, %v11651_v3  ;;  %v11491_v36 = vld [vmem:[#allocation4 + $0x28] sm:$0xfe]  ;;  %v11488_v39 = vld [vmem:[#allocation4 + $0x10] sm:$0x1] }
 0x67e   : > { %11204 = vst.msk [vmem:[#allocation4 + $0xe6] ss:$8 sm:$0x3] %vm22459_vm1, %v11173_v31  ;;  %v11213_v12 = vcombine.high %v11173_v31, %v11173_v31  ;;  %v11483_v30 = vld [vmem:[#allocation4 + $0xc8] sm:$0xff]  ;;  %13079 = vmatprep.subr.bf16.mxu0 %v18205_v59  ;;  %v11482_v6 = vld [vmem:[#allocation4 + $0xc0] sm:$0xff]  ;;  %v11647_v32 = vrot.slane %v11486_v50, 1 }
 0x67f   : > { %11396 = vst.msk [vmem:[#allocation4 + $0xf0] ss:$8 sm:$0x3] %vm22459_vm1, %v11365_v21  ;;  %v11405_v20 = vcombine.high %v11365_v21, %v11365_v21  ;;  %13042 = vmatprep.mubr.f32.mxu0 %v11483_v30  ;;  %v18217_v35 = vld [vmem:[%s23842_s4 + $0x204] ss:$8 sps:$4 sm:$0xff]   ;;  %v11656_v28 = vrot.slane %v11491_v36, 1 }
 0x680   : > { %11244 = vst.msk [vmem:[#allocation4 + $0xe7] ss:$8 sm:$0x3] %vm22459_vm1, %v11213_v12  ;;  %13043 = vmatmul.mubr.f32.gmra.mrb[76].mxu0 %v11482_v6  ;;  %v11493_v13 = vld [vmem:[#allocation4 + $0x38] sm:$0x1]  ;;  %v11648_v53 = vrot.slane %v11488_v39, 1 }
 0x681   : > { %11436 = vst.msk [vmem:[#allocation4 + $0xf1] ss:$8 sm:$0x3] %vm22459_vm1, %v11405_v20  ;;  %13080 = vmatpush1.bf16.msra.mxu0 %v18203_v0  ;;  %v11490_v42 = vld [vmem:[#allocation4 + $0x20] sm:$0xfe]  ;;  %v11657_v55 = vrot.slane %v11493_v13, 1 }
 0x682   : > { %13081 = vmatprep.subr.bf16.mxu0 %v18208_v45  ;;  %v18215_v40 = vld [vmem:[%s23842_s4 + $0x200] ss:$8 sps:$4 sm:$0xff]   ;;  %v11492_v48 = vld [vmem:[#allocation4 + $0x30] sm:$0x1]  ;;  %v18220_v60 = vld [vmem:[%s23842_s4 + $0x214] ss:$8 sps:$4 sm:$0xff]   ;;  %v11649_v22 = vsel %vm1521_vm9, %v11647_v32, %v11648_v53 }
 0x683   : > { %v11495_v49 = vld [vmem:[#allocation4 + $0x48] sm:$0xfe]  ;;  %v11653_v46 = vrot.slane %v11490_v42, 1  ;;  %v11497_v27 = vld [vmem:[#allocation4 + $0x58] sm:$0x1]  ;;  %v11658_v37 = vsel %vm1521_vm9, %v11656_v28, %v11657_v55  ;;  %v11654_v10 = vrot.slane %v11492_v48, 1 }
 0x684   : > { %v11662_v14 = vrot.slane %v11495_v49, 1  ;;  %v11494_v52 = vld [vmem:[#allocation4 + $0x40] sm:$0xfe]  ;;  %v18218_v43 = vld [vmem:[%s23842_s4 + $0x210] ss:$8 sps:$4 sm:$0xff]   ;;  %v11663_v61 = vrot.slane %v11497_v27, 1 }
 0x685   : > { %13082 = vmatpush1.bf16.msra.mxu0 %v18206_v47  ;;  %v11499_v5 = vld [vmem:[#allocation4 + $0x68] sm:$0xfe]  ;;  %v11496_v56 = vld [vmem:[#allocation4 + $0x50] sm:$0x1]  ;;  %v11655_v4 = vsel %vm1521_vm9, %v11653_v46, %v11654_v10  ;;  %v11659_v11 = vrot.slane %v11494_v52, 1  ;;  %vm13450_vm0 = vcmask 1043459  }
 0x686   : > { %13083 = vmatprep.subr.bf16.mxu0 %v18211_v54  ;;  %v18223_v9 = vld [vmem:[%s23842_s4 + $0x224] ss:$8 sps:$4 sm:$0xff]   ;;  %v11501_v58 = vld [vmem:[#allocation4 + $0x78] sm:$0x1]  ;;  %v11664_v44 = vsel %vm1521_vm9, %v11662_v14, %v11663_v61  ;;  %v11668_v38 = vrot.slane %v11499_v5, 1  ;;  %v11660_v1 = vrot.slane %v11496_v56, 1 }
 0x687   : > { %v11485_v2 = vld [vmem:[#allocation4 + $0xe8] sm:$0xff]  ;;  %v11484_v41 = vld [vmem:[#allocation4 + $0xe0] sm:$0xff]  ;;  %v11669_v17 = vrot.slane %v11501_v58, 1  ;;  %v11500_v62 = vld [vmem:[#allocation4 + $0x70] sm:$0x1] }
 0x688   : > { %13048 = vmatprep.mubr.f32.mxu0 %v11485_v2  ;;  %v11498_v34 = vld [vmem:[#allocation4 + $0x60] sm:$0xfe]  ;;  %v11503_v7 = vld [vmem:[#allocation4 + $0x88] sm:$0xfe]  ;;  %v18226_v29 = vld [vmem:[%s23842_s4 + $0x234] ss:$8 sps:$4 sm:$0xff]   ;;  %v11661_v15 = vsel %vm1521_vm9, %v11659_v11, %v11660_v1 }
 0x689   : > { %13049 = vmatmul.mubr.f32.gmra.mrb[78].mxu0 %v11484_v41  ;;  %v18221_v19 = vld [vmem:[%s23842_s4 + $0x220] ss:$8 sps:$4 sm:$0xff]   ;;  %v11665_v51 = vrot.slane %v11498_v34, 1  ;;  %v11505_v59 = vld [vmem:[#allocation4 + $0x98] sm:$0x1]  ;;  %v11670_v31 = vsel %vm1521_vm9, %v11668_v38, %v11669_v17  ;;  %v11674_v21 = vrot.slane %v11503_v7, 1 }
 0x68a   : > { %13084 = vmatpush1.bf16.msra.mxu0 %v18209_v23  ;;  %13087 = vmatprep.mubr.f32.mxu0 %v11652_v25  ;;  %v11502_v12 = vld [vmem:[#allocation4 + $0x80] sm:$0xfe]  ;;  %v11666_v20 = vrot.slane %v11500_v62, 1  ;;  %v18224_v0 = vld [vmem:[%s23842_s4 + $0x230] ss:$8 sps:$4 sm:$0xff]   ;;  %v11675_v6 = vrot.slane %v11505_v59, 1 }
 0x68b   : > { %13085 = vmatprep.subr.bf16.mxu0 %v18214_v8  ;;  %v11507_v30 = vld [vmem:[#allocation4 + $0xa8] sm:$0xfe]  ;;  %v11504_v45 = vld [vmem:[#allocation4 + $0x90] sm:$0x1]  ;;  %v11671_v54 = vrot.slane %v11502_v12, 1 }
 0x68c   : > { %v18229_v47 = vld [vmem:[%s23842_s4 + $0x244] ss:$8 sps:$4 sm:$0xff]   ;;  %v11667_v18 = vsel %vm1521_vm9, %v11665_v51, %v11666_v20  ;;  %v11509_v57 = vld [vmem:[#allocation4 + $0xb8] sm:$0x1]  ;;  %v11676_v16 = vsel %vm1521_vm9, %v11674_v21, %v11675_v6  ;;  %v11680_v23 = vrot.slane %v11507_v30, 1  ;;  %v11672_v41 = vrot.slane %v11504_v45, 1 }
 0x68d   : > { %v11506_v2 = vld [vmem:[#allocation4 + $0xa0] sm:$0xfe]  ;;  %v11511_v8 = vld [vmem:[#allocation4 + $0xc8] sm:$0xfe]  ;;  %v11681_v25 = vrot.slane %v11509_v57, 1 }
 0x68e   : > { %13086 = vmatpush1.bf16.msra.mxu0 %v18212_v63  ;;  %v18227_v3 = vld [vmem:[%s23842_s4 + $0x240] ss:$8 sps:$4 sm:$0xff]   ;;  %v11508_v50 = vld [vmem:[#allocation4 + $0xb0] sm:$0x1]  ;;  %v18232_v63 = vld [vmem:[%s23842_s4 + $0x254] ss:$8 sps:$4 sm:$0xff]   ;;  %v11673_v36 = vsel %vm1521_vm9, %v11671_v54, %v11672_v41 }
 0x68f   : > { %13136 = vmatprep.subr.bf16.mxu0 %v18217_v35  ;;  %v11677_v39 = vrot.slane %v11506_v2, 1  ;;  %v11513_v35 = vld [vmem:[#allocation4 + $0xd8] sm:$0x1]  ;;  %v11682_v32 = vsel %vm1521_vm9, %v11680_v23, %v11681_v25  ;;  %v11686_v13 = vrot.slane %v11511_v8, 1  ;;  %v11510_v28 = vld [vmem:[#allocation4 + $0xc0] sm:$0xfe] }
 0x690   : > { %v11678_v42 = vrot.slane %v11508_v50, 1  ;;  %v18230_v53 = vld [vmem:[%s23842_s4 + $0x250] ss:$8 sps:$4 sm:$0xff]   ;;  %v11687_v49 = vrot.slane %v11513_v35, 1  ;;  %v18235_v48 = vld [vmem:[%s23842_s4 + $0x264] ss:$8 sps:$4 sm:$0xff]  }
 0x691   : > { %13088 = vmatmul.mubr.f32.vlgmr.msra.gmra.mrb[64].mxu0 %v11649_v22  ;;  %v11512_v55 = vld [vmem:[#allocation4 + $0xd0] sm:$0x1]  ;;  %v11683_v22 = vrot.slane %v11510_v28, 1  ;;  %v11517_v46 = vld [vmem:[#allocation4 + $0xf8] sm:$0x1] }
 0x692   : > { %13093 = vmatprep.mubr.f32.mxu0 %v11658_v37  ;;  %13137 = vmatpush1.bf16.msra.mxu0 %v18215_v40  ;;  %v11515_v40 = vld [vmem:[#allocation4 + $0xe8] sm:$0xfe]  ;;  %v11688_v27 = vsel %vm1521_vm9, %v11686_v13, %v11687_v49  ;;  %v11514_v52 = vld [vmem:[#allocation4 + $0xe0] sm:$0xfe]  ;;  %v11684_v10 = vrot.slane %v11512_v55, 1  ;;  %v11693_v61 = vrot.slane %v11517_v46, 1 }
 0x693   : > { %13138 = vmatprep.subr.bf16.mxu0 %v18220_v60  ;;  %v11679_v60 = vsel %vm1521_vm9, %v11677_v39, %v11678_v42  ;;  %v18233_v37 = vld [vmem:[%s23842_s4 + $0x260] ss:$8 sps:$4 sm:$0xff]   ;;  %v11692_v14 = vrot.slane %v11515_v40, 1  ;;  %v11521_v5 = vld [vmem:[#allocation4 + $0x18] sm:$0x3]  ;;  %v11689_v11 = vrot.slane %v11514_v52, 1 }
 0x694   : > { %v11516_v56 = vld [vmem:[#allocation4 + $0xf0] sm:$0x1]  ;;  %v11748_v38 = vrot.slane %v11521_v5, 2  ;;  %v18239_v62 = vld [vmem:[%s23842_s4 + $0x280] ss:$8 sps:$4 sm:$0xff]  }
 0x695   : > { %13094 = vmatmul.mubr.f32.gmra.mrb[66].mxu0 %v11655_v4  ;;  %v11685_v4 = vsel %vm1521_vm9, %v11683_v22, %v11684_v10  ;;  %v11694_v58 = vsel %vm1521_vm9, %v11692_v14, %v11693_v61  ;;  %v11690_v34 = vrot.slane %v11516_v56, 1  ;;  %v18236_v1 = vld [vmem:[%s23842_s4 + $0x270] ss:$8 sps:$4 sm:$0xff]   ;;  %v18247_v51 = vld [vmem:[%s23842_s4 + $0x2a4] ss:$8 sps:$4 sm:$0xff]  }
 0x696   : > { %13099 = vmatprep.mubr.f32.mxu0 %v11664_v44  ;;  %13139 = vmatpush1.bf16.msra.mxu0 %v18218_v43  ;;  %v11519_v43 = vld [vmem:[#allocation4 + $0x8] sm:$0xfc]  ;;  %v18248_v21 = vld [vmem:[%s23842_s4 + $0x2b0] ss:$8 sps:$4 sm:$0xff]   ;;  %v11522_v50 = vld [vmem:[#allocation4 + $0x20] sm:$0xfc] }
 0x697   : > { %13140 = vmatprep.subr.bf16.mxu0 %v18223_v9  ;;  %v18238_v9 = vld [vmem:[%s23842_s4 + $0x274] ss:$8 sps:$4 sm:$0xff]   ;;  %v11747_v44 = vrot.slane %v11519_v43, 2  ;;  %v11691_v7 = vsel %vm1521_vm9, %v11689_v11, %v11690_v34  ;;  %v18245_v59 = vld [vmem:[%s23842_s4 + $0x2a0] ss:$8 sps:$4 sm:$0xff]   ;;  %v11750_v28 = vrot.slane %v11522_v50, 2 }
 0x698   : > { %v18253_v12 = vld [vmem:[%s23842_s4 + $0x2c4] ss:$8 sps:$4 sm:$0xff]   ;;  %v18251_v20 = vld [vmem:[%s23842_s4 + $0x2c0] ss:$8 sps:$4 sm:$0xff]   ;;  %v18254_v30 = vld [vmem:[%s23842_s4 + $0x2d0] ss:$8 sps:$4 sm:$0xff]  }
 0x699   : > { %13100 = vmatmul.mubr.f32.gmra.mrb[68].mxu0 %v11661_v15  ;;  %v11749_v17 = vsel %vm1955_vm11, %v11747_v44, %v11748_v38  ;;  %v18242_v15 = vld [vmem:[%s23842_s4 + $0x290] ss:$8 sps:$4 sm:$0xff]   ;;  %v18259_v6 = vld [vmem:[%s23842_s4 + $0x2e4] ss:$8 sps:$4 sm:$0xff]   ;;  %v18257_v45 = vld [vmem:[%s23842_s4 + $0x2e0] ss:$8 sps:$4 sm:$0xff]  }
 0x69a   : > { %13105 = vmatprep.mubr.f32.mxu0 %v11670_v31  ;;  %13141 = vmatpush1.bf16.msra.mxu0 %v18221_v19  ;;  %v18241_v19 = vld [vmem:[%s23842_s4 + $0x284] ss:$8 sps:$4 sm:$0xff]   ;;  %v18250_v31 = vld [vmem:[%s23842_s4 + $0x2b4] ss:$8 sps:$4 sm:$0xff]   ;;  %v11520_v54 = vld [vmem:[#allocation4 + $0x10] sm:$0x3] }
 0x69b   : > { %13142 = vmatprep.subr.bf16.mxu0 %v18226_v29  ;;  %v18244_v29 = vld [vmem:[%s23842_s4 + $0x294] ss:$8 sps:$4 sm:$0xff]   ;;  %v18260_v57 = vld [vmem:[%s23842_s4 + $0x2f0] ss:$8 sps:$4 sm:$0xff]   ;;  %v18265_v2 = vld [vmem:[%s23842_s4 + $0x304] ss:$8 sps:$4 sm:$0xff]  }
 0x69c   : > { %v11525_v23 = vld [vmem:[#allocation4 + $0x38] sm:$0x3]  ;;  %v11527_v39 = vld [vmem:[#allocation4 + $0x48] sm:$0xfc]  ;;  %v11526_v55 = vld [vmem:[#allocation4 + $0x40] sm:$0xfc] }
 0x69d   : > { %13106 = vmatmul.mubr.f32.gmra.mrb[70].mxu0 %v11667_v18  ;;  %v11518_v18 = vld [vmem:[#allocation4] sm:$0xfc]  ;;  %v11754_v25 = vrot.slane %v11525_v23, 2  ;;  %v11529_v35 = vld [vmem:[#allocation4 + $0x58] sm:$0x3]  ;;  %v11759_v40 = vrot.slane %v11527_v39, 2 }
 0x69e   : > { %13111 = vmatprep.mubr.f32.mxu0 %v11676_v16  ;;  %13143 = vmatpush1.bf16.msra.mxu0 %v18224_v0  ;;  %v18256_v0 = vld [vmem:[%s23842_s4 + $0x2d4] ss:$8 sps:$4 sm:$0xff]   ;;  %v11523_v16 = vld [vmem:[#allocation4 + $0x28] sm:$0xfc]  ;;  %v11744_v41 = vrot.slane %v11518_v18, 2  ;;  %v11760_v49 = vrot.slane %v11529_v35, 2 }
 0x69f   : > { %13144 = vmatprep.subr.bf16.mxu0 %v18229_v47  ;;  %v18262_v47 = vld [vmem:[%s23842_s4 + $0x2f4] ss:$8 sps:$4 sm:$0xff]   ;;  %v11753_v8 = vrot.slane %v11523_v16, 2  ;;  %v11531_v22 = vld [vmem:[#allocation4 + $0x68] sm:$0xfc]  ;;  %v11756_v14 = vrot.slane %v11526_v55, 2 }
 0x6a0   : > { %v11533_v46 = vld [vmem:[#allocation4 + $0x78] sm:$0x3]  ;;  %v11761_v10 = vsel %vm1955_vm11, %v11759_v40, %v11760_v49  ;;  %v11765_v43 = vrot.slane %v11531_v22, 2  ;;  %v11530_v61 = vld [vmem:[#allocation4 + $0x60] sm:$0xfc]  ;;  %vm11840_vm9 = vcmask 1044480  }
 0x6a1   : > { %13112 = vmatmul.mubr.f32.gmra.mrb[72].mxu0 %v11673_v36  ;;  %v18263_v36 = vld [vmem:[%s23842_s4 + $0x300] ss:$8 sps:$4 sm:$0xff]   ;;  %v11766_v5 = vrot.slane %v11533_v46, 2  ;;  %v11532_v56 = vld [vmem:[#allocation4 + $0x70] sm:$0x3]  ;;  %v11762_v38 = vrot.slane %v11530_v61, 2 }
 0x6a2   : > { %13117 = vmatprep.mubr.f32.mxu0 %v11682_v32  ;;  %13145 = vmatpush1.bf16.msra.mxu0 %v18227_v3  ;;  %v11745_v3 = vrot.slane %v11520_v54, 2  ;;  %v18268_v32 = vld [vmem:[%s23842_s4 + $0x314] ss:$8 sps:$4 sm:$0xff]   ;;  %v11537_v11 = vld [vmem:[#allocation4 + $0x98] sm:$0x3]  ;;  %v11763_v34 = vrot.slane %v11532_v56, 2 }
 0x6a3   : > { %13146 = vmatprep.subr.bf16.mxu0 %v18232_v63  ;;  %v11524_v63 = vld [vmem:[#allocation4 + $0x30] sm:$0x3]  ;;  %v11543_v18 = vld [vmem:[#allocation4 + $0xc8] sm:$0xfc]  ;;  %v11545_v54 = vld [vmem:[#allocation4 + $0xd8] sm:$0x3] }
 0x6a4   : > { %v11746_v13 = vsel %vm1955_vm11, %v11744_v41, %v11745_v3  ;;  %v11751_v42 = vrot.slane %v11524_v63, 2  ;;  %v11783_v3 = vrot.slane %v11543_v18, 2  ;;  %v11544_v50 = vld [vmem:[#allocation4 + $0xd0] sm:$0x3]  ;;  %v11549_v39 = vld [vmem:[#allocation4 + $0xf8] sm:$0x3] }
 0x6a5   : > { %13118 = vmatmul.mubr.f32.gmra.mrb[74].mxu0 %v11679_v60  ;;  %v18266_v60 = vld [vmem:[%s23842_s4 + $0x310] ss:$8 sps:$4 sm:$0xff]   ;;  %v18283_v35 = vld [vmem:[%s23842_s4 + $0x364] ss:$8 sps:$4 sm:$0xff]   ;;  %v11790_v40 = vrot.slane %v11549_v39, 2 }
 0x6a6   : > { %13123 = vmatprep.mubr.f32.mxu0 %v11688_v27  ;;  %13147 = vmatpush1.bf16.msra.mxu0 %v18230_v53  ;;  %v11755_v53 = vsel %vm1955_vm11, %v11753_v8, %v11754_v25  ;;  %v18271_v27 = vld [vmem:[%s23842_s4 + $0x324] ss:$8 sps:$4 sm:$0xff]   ;;  %v11784_v8 = vrot.slane %v11545_v54, 2  ;;  %v18278_v63 = vld [vmem:[%s23842_s4 + $0x350] ss:$8 sps:$4 sm:$0xff]  }
 0x6a7   : > { %13148 = vmatprep.subr.bf16.mxu0 %v18235_v48  ;;  %v11528_v48 = vld [vmem:[#allocation4 + $0x50] sm:$0x3]  ;;  %v11542_v25 = vld [vmem:[#allocation4 + $0xc0] sm:$0xfc]  ;;  %v11553_v22 = vld [vmem:[#allocation4 + $0x18] sm:$0x7] }
 0x6a8   : > { %v11757_v52 = vrot.slane %v11528_v48, 2  ;;  %v11546_v49 = vld [vmem:[#allocation4 + $0xe0] sm:$0xfc]  ;;  %v11548_v55 = vld [vmem:[#allocation4 + $0xf0] sm:$0x3] }
 0x6a9   : > { %13124 = vmatmul.mubr.f32.gmra.mrb[76].mxu0 %v11685_v4  ;;  %v11535_v4 = vld [vmem:[#allocation4 + $0x88] sm:$0xfc]  ;;  %v18286_v46 = vld [vmem:[%s23842_s4 + $0x374] ss:$8 sps:$4 sm:$0xff]   ;;  %v11554_v18 = vld [vmem:[#allocation4 + $0x20] sm:$0xf8] }
 0x6aa   : > { %13129 = vmatprep.mubr.f32.mxu0 %v11694_v58  ;;  %13149 = vmatpush1.bf16.msra.mxu0 %v18233_v37  ;;  %v11752_v37 = vsel %vm1955_vm11, %v11750_v28, %v11751_v42  ;;  %v18274_v58 = vld [vmem:[%s23842_s4 + $0x334] ss:$8 sps:$4 sm:$0xff]   ;;  %v11758_v44 = vsel %vm1955_vm11, %v11756_v14, %v11757_v52  ;;  %v11781_v28 = vrot.slane %v11544_v50, 2  ;;  %v11785_v42 = vsel %vm1955_vm11, %v11783_v3, %v11784_v8  ;;  %v18281_v48 = vld [vmem:[%s23842_s4 + $0x360] ss:$8 sps:$4 sm:$0xff]  }
 0x6ab   : > { %13150 = vmatprep.subr.bf16.mxu0 %v18238_v9  ;;  %v18269_v9 = vld [vmem:[%s23842_s4 + $0x320] ss:$8 sps:$4 sm:$0xff]   ;;  %v11787_v14 = vrot.slane %v11548_v55, 2  ;;  %v18289_v61 = vld [vmem:[%s23842_s4 + $0x384] ss:$8 sps:$4 sm:$0xff]   ;;  %v11847_v3 = vrot.slane %v11554_v18, 3 }
 0x6ac   : > { %v11556_v54 = vld [vmem:[#allocation4 + $0x30] sm:$0x7] }
 0x6ad   : > { %13130 = vmatmul.mubr.f32.gmra.mrb[78].mxu0 %v11691_v7  ;;  %v11772_v7 = vrot.slane %v11537_v11, 2  ;;  %v18292_v11 = vld [vmem:[%s23842_s4 + $0x394] ss:$8 sps:$4 sm:$0xff]   ;;  %v11848_v8 = vrot.slane %v11556_v54, 3  ;;  %v11560_v39 = vld [vmem:[#allocation4 + $0x50] sm:$0x7] }
 0x6ae   : > { %13151 = vmatpush1.bf16.msra.mxu0 %v18236_v1  ;;  %13168 = vmatprep.mubr.f32.mxu0 %v11749_v17  ;;  %v11767_v1 = vsel %vm1955_vm11, %v11765_v43, %v11766_v5  ;;  %v11534_v17 = vld [vmem:[#allocation4 + $0x80] sm:$0xfc]  ;;  %v11845_v43 = vrot.slane %v11553_v22, 3  ;;  %v18284_v5 = vld [vmem:[%s23842_s4 + $0x370] ss:$8 sps:$4 sm:$0xff]  }
 0x6af   : > { %13152 = vmatprep.subr.bf16.mxu0 %v18241_v19  ;;  %v11771_v19 = vrot.slane %v11535_v4, 2  ;;  %v18287_v4 = vld [vmem:[%s23842_s4 + $0x380] ss:$8 sps:$4 sm:$0xff]   ;;  %v11564_v22 = vld [vmem:[#allocation4 + $0x70] sm:$0x7] }
 0x6b0   : > { %v11576_v18 = vld [vmem:[#allocation4 + $0xd0] sm:$0x7] }
 0x6b1   : > { %v18326_v54 = vld [vmem:[%s23842_s4 + $0x450] ss:$8 sps:$4 sm:$0xff]  }
 0x6b2   : > { %13153 = vmatpush1.bf16.msra.mxu0 %v18239_v62  ;;  %v11536_v62 = vld [vmem:[#allocation4 + $0x90] sm:$0x3] }
 0x6b3   : > { %13154 = vmatprep.subr.bf16.mxu0 %v18244_v29  ;;  %v18272_v29 = vld [vmem:[%s23842_s4 + $0x330] ss:$8 sps:$4 sm:$0xff]  }
 0x6b6   : > { %13155 = vmatpush1.bf16.msra.mxu0 %v18242_v15  ;;  %v11539_v15 = vld [vmem:[#allocation4 + $0xa8] sm:$0xfc] }
 0x6b7   : > { %13156 = vmatprep.subr.bf16.mxu0 %v18247_v51  ;;  %v11541_v51 = vld [vmem:[#allocation4 + $0xb8] sm:$0x3] }
 0x6ba   : > { %13157 = vmatpush1.bf16.msra.mxu0 %v18245_v59  ;;  %v18277_v59 = vld [vmem:[%s23842_s4 + $0x344] ss:$8 sps:$4 sm:$0xff]  }
 0x6bb   : > { %13158 = vmatprep.subr.bf16.mxu0 %v18250_v31  ;;  %v11764_v31 = vsel %vm1955_vm11, %v11762_v38, %v11763_v34  ;;  %v18293_v38 = vld [vmem:[%s23842_s4 + $0x3a0] ss:$8 sps:$4 sm:$0xff]   ;;  %v18298_v34 = vld [vmem:[%s23842_s4 + $0x3b4] ss:$8 sps:$4 sm:$0xff]  }
 0x6be   : > { %13159 = vmatpush1.bf16.msra.mxu0 %v18248_v21  ;;  %v11768_v21 = vrot.slane %v11534_v17, 2  ;;  %v18304_v17 = vld [vmem:[%s23842_s4 + $0x3d4] ss:$8 sps:$4 sm:$0xff]  }
 0x6bf   : > { %13160 = vmatprep.subr.bf16.mxu0 %v18253_v12  ;;  %v11769_v12 = vrot.slane %v11536_v62, 2  ;;  %v18302_v62 = vld [vmem:[%s23842_s4 + $0x3d0] ss:$8 sps:$4 sm:$0xff]  }
 0x6c1   : > { %v11770_v16 = vsel %vm1955_vm11, %v11768_v21, %v11769_v12  ;;  %v18308_v21 = vld [vmem:[%s23842_s4 + $0x3f0] ss:$8 sps:$4 sm:$0xff]   ;;  %v11555_v12 = vld [vmem:[#allocation4 + $0x28] sm:$0xf8] }
 0x6c2   : > { %13161 = vmatpush1.bf16.msra.mxu0 %v18251_v20  ;;  %v11773_v20 = vsel %vm1955_vm11, %v11771_v19, %v11772_v7  ;;  %v18301_v19 = vld [vmem:[%s23842_s4 + $0x3c4] ss:$8 sps:$4 sm:$0xff]   ;;  %v18299_v7 = vld [vmem:[%s23842_s4 + $0x3c0] ss:$8 sps:$4 sm:$0xff]  }
 0x6c3   : > { %13162 = vmatprep.subr.bf16.mxu0 %v18256_v0  ;;  %v11777_v0 = vrot.slane %v11539_v15, 2  ;;  %v18305_v15 = vld [vmem:[%s23842_s4 + $0x3e0] ss:$8 sps:$4 sm:$0xff]  }
 0x6c6   : > { %13163 = vmatpush1.bf16.msra.mxu0 %v18254_v30  ;;  %v11778_v30 = vrot.slane %v11541_v51, 2  ;;  %v18310_v51 = vld [vmem:[%s23842_s4 + $0x3f4] ss:$8 sps:$4 sm:$0xff]  }
 0x6c7   : > { %13164 = vmatprep.subr.bf16.mxu0 %v18259_v6  ;;  %v11538_v6 = vld [vmem:[#allocation4 + $0xa0] sm:$0xfc] }
 0x6c8   : > { %v11774_v23 = vrot.slane %v11538_v6, 2  ;;  %v11779_v41 = vsel %vm1955_vm11, %v11777_v0, %v11778_v30  ;;  %v18313_v0 = vld [vmem:[%s23842_s4 + $0x404] ss:$8 sps:$4 sm:$0xff]  }
 0x6ca   : > { %13165 = vmatpush1.bf16.msra.mxu0 %v18257_v45  ;;  %v11540_v45 = vld [vmem:[#allocation4 + $0xb0] sm:$0x3] }
 0x6cb   : > { %13166 = vmatprep.subr.bf16.mxu0 %v18262_v47  ;;  %v18275_v47 = vld [vmem:[%s23842_s4 + $0x340] ss:$8 sps:$4 sm:$0xff]  }
 0x6ce   : > { %13167 = vmatpush1.bf16.msra.mxu0 %v18260_v57  ;;  %v18280_v57 = vld [vmem:[%s23842_s4 + $0x354] ss:$8 sps:$4 sm:$0xff]  }
 0x6cf   : > { %13217 = vmatprep.subr.bf16.mxu0 %v18265_v2  ;;  %v11775_v2 = vrot.slane %v11540_v45, 2  ;;  %v11850_v45 = vrot.slane %v11555_v12, 3 }
 0x6d1   : > { %13169 = vmatmul.mubr.f32.vlgmr.msra.gmra.mrb[64].mxu0 %v11746_v13  ;;  %v11780_v13 = vrot.slane %v11542_v25, 2 }
 0x6d2   : > { %13174 = vmatprep.mubr.f32.mxu0 %v11755_v53  ;;  %13218 = vmatpush1.bf16.msra.mxu0 %v18263_v36  ;;  %v11547_v36 = vld [vmem:[#allocation4 + $0xe8] sm:$0xfc] }
 0x6d3   : > { %13219 = vmatprep.subr.bf16.mxu0 %v18268_v32  ;;  %v11776_v32 = vsel %vm1955_vm11, %v11774_v23, %v11775_v2  ;;  %v11789_v53 = vrot.slane %v11547_v36, 2  ;;  %v11561_v23 = vld [vmem:[#allocation4 + $0x58] sm:$0x7]  ;;  %v18316_v2 = vld [vmem:[%s23842_s4 + $0x414] ss:$8 sps:$4 sm:$0xff]  }
 0x6d4   : > { %v11558_v36 = vld [vmem:[#allocation4 + $0x40] sm:$0xf8] }
 0x6d5   : > { %13175 = vmatmul.mubr.f32.gmra.mrb[66].mxu0 %v11752_v37  ;;  %v11786_v37 = vrot.slane %v11546_v49, 2  ;;  %v11791_v52 = vsel %vm1955_vm11, %v11789_v53, %v11790_v40  ;;  %v11853_v53 = vrot.slane %v11558_v36, 3  ;;  %v11854_v40 = vrot.slane %v11560_v39, 3  ;;  %v11580_v36 = vld [vmem:[#allocation4 + $0xf0] sm:$0x7] }
 0x6d6   : > { %13180 = vmatprep.mubr.f32.mxu0 %v11761_v10  ;;  %13220 = vmatpush1.bf16.msra.mxu0 %v18266_v60  ;;  %v11551_v60 = vld [vmem:[#allocation4 + $0x8] sm:$0xf8] }
 0x6d7   : > { %13221 = vmatprep.subr.bf16.mxu0 %v18271_v27  ;;  %v11782_v27 = vsel %vm1955_vm11, %v11780_v13, %v11781_v28  ;;  %v11844_v10 = vrot.slane %v11551_v60, 3  ;;  %v11788_v56 = vsel %vm1955_vm11, %v11786_v37, %v11787_v14  ;;  %v11565_v13 = vld [vmem:[#allocation4 + $0x78] sm:$0x7]  ;;  %v18319_v28 = vld [vmem:[%s23842_s4 + $0x424] ss:$8 sps:$4 sm:$0xff]   ;;  %vm11937_vm11 = vcmask 1043456  }
 0x6d8   : > { %v11562_v60 = vld [vmem:[#allocation4 + $0x60] sm:$0xf8]  ;;  %v11569_v37 = vld [vmem:[#allocation4 + $0x98] sm:$0x7]  ;;  %v18322_v14 = vld [vmem:[%s23842_s4 + $0x434] ss:$8 sps:$4 sm:$0xff]  }
 0x6d9   : > { %13181 = vmatmul.mubr.f32.gmra.mrb[68].mxu0 %v11758_v44  ;;  %v18295_v44 = vld [vmem:[%s23842_s4 + $0x3a4] ss:$8 sps:$4 sm:$0xff]   ;;  %v18329_v39 = vld [vmem:[%s23842_s4 + $0x460] ss:$8 sps:$4 sm:$0xff]  }
 0x6da   : > { %13186 = vmatprep.mubr.f32.mxu0 %v11767_v1  ;;  %13222 = vmatpush1.bf16.msra.mxu0 %v18269_v9  ;;  %v11846_v9 = vsel %vm11840_vm9, %v11844_v10, %v11845_v43  ;;  %v18296_v1 = vld [vmem:[%s23842_s4 + $0x3b0] ss:$8 sps:$4 sm:$0xff]   ;;  %v11859_v10 = vrot.slane %v11562_v60, 3  ;;  %v11860_v43 = vrot.slane %v11564_v22, 3  ;;  %v18337_v60 = vld [vmem:[%s23842_s4 + $0x484] ss:$8 sps:$4 sm:$0xff]  }
 0x6db   : > { %13223 = vmatprep.subr.bf16.mxu0 %v18274_v58  ;;  %v18290_v58 = vld [vmem:[%s23842_s4 + $0x390] ss:$8 sps:$4 sm:$0xff]  }
 0x6dd   : > { %13187 = vmatmul.mubr.f32.gmra.mrb[70].mxu0 %v11764_v31  ;;  %v11552_v31 = vld [vmem:[#allocation4 + $0x10] sm:$0x7] }
 0x6de   : > { %13192 = vmatprep.mubr.f32.mxu0 %v11773_v20  ;;  %13224 = vmatpush1.bf16.msra.mxu0 %v18272_v29  ;;  %v18307_v29 = vld [vmem:[%s23842_s4 + $0x3e4] ss:$8 sps:$4 sm:$0xff]   ;;  %v11557_v20 = vld [vmem:[#allocation4 + $0x38] sm:$0x7]  ;;  %v11842_v6 = vrot.slane %v11552_v31, 3 }
 0x6df   : > { %13225 = vmatprep.subr.bf16.mxu0 %v18277_v59  ;;  %v11550_v59 = vld [vmem:[#allocation4] sm:$0xf8]  ;;  %v11577_v31 = vld [vmem:[#allocation4 + $0xd8] sm:$0x7] }
 0x6e0   : > { %v11841_v30 = vrot.slane %v11550_v59, 3  ;;  %v11575_v59 = vld [vmem:[#allocation4 + $0xc8] sm:$0xf8] }
 0x6e1   : > { %13193 = vmatmul.mubr.f32.gmra.mrb[72].mxu0 %v11770_v16  ;;  %v11559_v16 = vld [vmem:[#allocation4 + $0x48] sm:$0xf8] }
 0x6e2   : > { %13198 = vmatprep.mubr.f32.mxu0 %v11779_v41  ;;  %13226 = vmatpush1.bf16.msra.mxu0 %v18275_v47  ;;  %v11851_v47 = vrot.slane %v11557_v20, 3  ;;  %v11843_v41 = vsel %vm11840_vm9, %v11841_v30, %v11842_v6  ;;  %v11856_v50 = vrot.slane %v11559_v16, 3  ;;  %v11880_v6 = vrot.slane %v11575_v59, 3  ;;  %v11581_v16 = vld [vmem:[#allocation4 + $0xf8] sm:$0x7] }
 0x6e3   : > { %13227 = vmatprep.subr.bf16.mxu0 %v18280_v57  ;;  %v18311_v57 = vld [vmem:[%s23842_s4 + $0x400] ss:$8 sps:$4 sm:$0xff]   ;;  %v11586_v59 = vld [vmem:[#allocation4 + $0x20] sm:$0xf0] }
 0x6e4   : > { %v11852_v25 = vsel %vm11840_vm9, %v11850_v45, %v11851_v47  ;;  %v11881_v45 = vrot.slane %v11577_v31, 3  ;;  %v11574_v47 = vld [vmem:[#allocation4 + $0xc0] sm:$0xf8]  ;;  %v11588_v31 = vld [vmem:[#allocation4 + $0x30] sm:$0xf] }
 0x6e5   : > { %13199 = vmatmul.mubr.f32.gmra.mrb[74].mxu0 %v11776_v32  ;;  %v11563_v32 = vld [vmem:[#allocation4 + $0x68] sm:$0xf8] }
 0x6e6   : > { %13204 = vmatprep.mubr.f32.mxu0 %v11785_v42  ;;  %13228 = vmatpush1.bf16.msra.mxu0 %v18278_v63  ;;  %v11857_v63 = vrot.slane %v11561_v23, 3  ;;  %v11849_v42 = vsel %vm11840_vm9, %v11847_v3, %v11848_v8  ;;  %v11862_v55 = vrot.slane %v11563_v32, 3  ;;  %v18331_v23 = vld [vmem:[%s23842_s4 + $0x464] ss:$8 sps:$4 sm:$0xff]   ;;  %v11878_v3 = vrot.slane %v11576_v18, 3 }
 0x6e7   : > { %13229 = vmatprep.subr.bf16.mxu0 %v18283_v35  ;;  %v18314_v35 = vld [vmem:[%s23842_s4 + $0x410] ss:$8 sps:$4 sm:$0xff]   ;;  %v11882_v8 = vsel %vm11840_vm9, %v11880_v6, %v11881_v45  ;;  %v11944_v6 = vrot.slane %v11586_v59, 4  ;;  %v11945_v45 = vrot.slane %v11588_v31, 4  ;;  %v11611_v31 = vld [vmem:[#allocation4 + $0xe8] sm:$0xf0] }
 0x6e8   : > { %v11858_v49 = vsel %vm11840_vm9, %v11856_v50, %v11857_v63  ;;  %v11887_v50 = vrot.slane %v11581_v16, 3  ;;  %v11578_v63 = vld [vmem:[#allocation4 + $0xe0] sm:$0xf8]  ;;  %v11585_v32 = vld [vmem:[#allocation4 + $0x18] sm:$0xf] }
 0x6e9   : > { %13205 = vmatmul.mubr.f32.gmra.mrb[76].mxu0 %v11782_v27  ;;  %v11567_v27 = vld [vmem:[#allocation4 + $0x88] sm:$0xf8]  ;;  %v11592_v16 = vld [vmem:[#allocation4 + $0x50] sm:$0xf] }
 0x6ea   : > { %13210 = vmatprep.mubr.f32.mxu0 %v11791_v52  ;;  %13230 = vmatpush1.bf16.msra.mxu0 %v18281_v48  ;;  %v11863_v48 = vrot.slane %v11565_v13, 3  ;;  %v11855_v52 = vsel %vm11840_vm9, %v11853_v53, %v11854_v40  ;;  %v18334_v13 = vld [vmem:[%s23842_s4 + $0x474] ss:$8 sps:$4 sm:$0xff]   ;;  %v11884_v53 = vrot.slane %v11580_v36, 3  ;;  %v11608_v59 = vld [vmem:[#allocation4 + $0xd0] sm:$0xf] }
 0x6eb   : > { %13231 = vmatprep.subr.bf16.mxu0 %v18286_v46  ;;  %v18317_v46 = vld [vmem:[%s23842_s4 + $0x420] ss:$8 sps:$4 sm:$0xff]  }
 0x6ed   : > { %13211 = vmatmul.mubr.f32.gmra.mrb[78].mxu0 %v11788_v56  ;;  %v11869_v56 = vrot.slane %v11569_v37, 3  ;;  %v18340_v37 = vld [vmem:[%s23842_s4 + $0x494] ss:$8 sps:$4 sm:$0xff]  }
 0x6ee   : > { %13232 = vmatpush1.bf16.msra.mxu0 %v18284_v5  ;;  %13249 = vmatprep.mubr.f32.mxu0 %v11846_v9  ;;  %v11864_v5 = vsel %vm11840_vm9, %v11862_v55, %v11863_v48  ;;  %v11566_v9 = vld [vmem:[#allocation4 + $0x80] sm:$0xf8]  ;;  %v11942_v55 = vrot.slane %v11585_v32, 4  ;;  %v18332_v48 = vld [vmem:[%s23842_s4 + $0x470] ss:$8 sps:$4 sm:$0xff]  }
 0x6ef   : > { %13233 = vmatprep.subr.bf16.mxu0 %v18289_v61  ;;  %v11868_v61 = vrot.slane %v11567_v27, 3  ;;  %v18335_v27 = vld [vmem:[%s23842_s4 + $0x480] ss:$8 sps:$4 sm:$0xff]   ;;  %v11596_v32 = vld [vmem:[#allocation4 + $0x70] sm:$0xf] }
 0x6f2   : > { %13234 = vmatpush1.bf16.msra.mxu0 %v18287_v4  ;;  %v11568_v4 = vld [vmem:[#allocation4 + $0x90] sm:$0x7] }
 0x6f3   : > { %13235 = vmatprep.subr.bf16.mxu0 %v18292_v11  ;;  %v18320_v11 = vld [vmem:[%s23842_s4 + $0x430] ss:$8 sps:$4 sm:$0xff]  }
 0x6f6   : > { %13236 = vmatpush1.bf16.msra.mxu0 %v18290_v58  ;;  %v11571_v58 = vld [vmem:[#allocation4 + $0xa8] sm:$0xf8] }
 0x6f7   : > { %13237 = vmatprep.subr.bf16.mxu0 %v18295_v44  ;;  %v11573_v44 = vld [vmem:[#allocation4 + $0xb8] sm:$0x7] }
 0x6fa   : > { %13238 = vmatpush1.bf16.msra.mxu0 %v18293_v38  ;;  %v18325_v38 = vld [vmem:[%s23842_s4 + $0x444] ss:$8 sps:$4 sm:$0xff]  }
 0x6fb   : > { %13239 = vmatprep.subr.bf16.mxu0 %v18298_v34  ;;  %v11861_v34 = vsel %vm11840_vm9, %v11859_v10, %v11860_v43  ;;  %v18341_v10 = vld [vmem:[%s23842_s4 + $0x4a0] ss:$8 sps:$4 sm:$0xff]   ;;  %v18346_v43 = vld [vmem:[%s23842_s4 + $0x4b4] ss:$8 sps:$4 sm:$0xff]  }
 0x6fe   : > { %13240 = vmatpush1.bf16.msra.mxu0 %v18296_v1  ;;  %v11865_v1 = vrot.slane %v11566_v9, 3  ;;  %v18352_v9 = vld [vmem:[%s23842_s4 + $0x4d4] ss:$8 sps:$4 sm:$0xff]  }
 0x6ff   : > { %13241 = vmatprep.subr.bf16.mxu0 %v18301_v19  ;;  %v11866_v19 = vrot.slane %v11568_v4, 3  ;;  %v18350_v4 = vld [vmem:[%s23842_s4 + $0x4d0] ss:$8 sps:$4 sm:$0xff]  }
 0x701   : > { %v11867_v12 = vsel %vm11840_vm9, %v11865_v1, %v11866_v19  ;;  %v18356_v1 = vld [vmem:[%s23842_s4 + $0x4f0] ss:$8 sps:$4 sm:$0xff]   ;;  %v11587_v19 = vld [vmem:[#allocation4 + $0x28] sm:$0xf0] }
 0x702   : > { %13242 = vmatpush1.bf16.msra.mxu0 %v18299_v7  ;;  %v11870_v7 = vsel %vm11840_vm9, %v11868_v61, %v11869_v56  ;;  %v18349_v61 = vld [vmem:[%s23842_s4 + $0x4c4] ss:$8 sps:$4 sm:$0xff]   ;;  %v18347_v56 = vld [vmem:[%s23842_s4 + $0x4c0] ss:$8 sps:$4 sm:$0xff]  }
 0x703   : > { %13243 = vmatprep.subr.bf16.mxu0 %v18304_v17  ;;  %v11874_v17 = vrot.slane %v11571_v58, 3  ;;  %v18353_v58 = vld [vmem:[%s23842_s4 + $0x4e0] ss:$8 sps:$4 sm:$0xff]  }
 0x706   : > { %13244 = vmatpush1.bf16.msra.mxu0 %v18302_v62  ;;  %v11875_v62 = vrot.slane %v11573_v44, 3  ;;  %v18358_v44 = vld [vmem:[%s23842_s4 + $0x4f4] ss:$8 sps:$4 sm:$0xff]  }
 0x707   : > { %13245 = vmatprep.subr.bf16.mxu0 %v18307_v29  ;;  %v11570_v29 = vld [vmem:[#allocation4 + $0xa0] sm:$0xf8] }
 0x708   : > { %v11871_v20 = vrot.slane %v11570_v29, 3  ;;  %v11876_v30 = vsel %vm11840_vm9, %v11874_v17, %v11875_v62  ;;  %v18361_v17 = vld [vmem:[%s23843_s5 + $0x4] ss:$8 sps:$4 sm:$0xff]  }
 0x70a   : > { %13246 = vmatpush1.bf16.msra.mxu0 %v18305_v15  ;;  %v11572_v15 = vld [vmem:[#allocation4 + $0xb0] sm:$0x7] }
 0x70b   : > { %13247 = vmatprep.subr.bf16.mxu0 %v18310_v51  ;;  %v18323_v51 = vld [vmem:[%s23842_s4 + $0x440] ss:$8 sps:$4 sm:$0xff]  }
 0x70e   : > { %13248 = vmatpush1.bf16.msra.mxu0 %v18308_v21  ;;  %v18328_v21 = vld [vmem:[%s23842_s4 + $0x454] ss:$8 sps:$4 sm:$0xff]  }
 0x70f   : > { %13298 = vmatprep.subr.bf16.mxu0 %v18313_v0  ;;  %v11872_v0 = vrot.slane %v11572_v15, 3  ;;  %v11947_v15 = vrot.slane %v11587_v19, 4 }
 0x711   : > { %13250 = vmatmul.mubr.f32.vlgmr.msra.gmra.mrb[64].mxu0 %v11843_v41  ;;  %v11877_v41 = vrot.slane %v11574_v47, 3 }
 0x712   : > { %13255 = vmatprep.mubr.f32.mxu0 %v11852_v25  ;;  %13299 = vmatpush1.bf16.msra.mxu0 %v18311_v57  ;;  %v11579_v57 = vld [vmem:[#allocation4 + $0xe8] sm:$0xf8] }
 0x713   : > { %13300 = vmatprep.subr.bf16.mxu0 %v18316_v2  ;;  %v11873_v2 = vsel %vm11840_vm9, %v11871_v20, %v11872_v0  ;;  %v11886_v25 = vrot.slane %v11579_v57, 3  ;;  %v18359_v20 = vld [vmem:[%s23843_s5] ss:$8 sps:$4 sm:$0xff]   ;;  %v18364_v0 = vld [vmem:[%s23843_s5 + $0x14] ss:$8 sps:$4 sm:$0xff]  }
 0x714   : > { %v11590_v57 = vld [vmem:[#allocation4 + $0x40] sm:$0xf0] }
 0x715   : > { %13256 = vmatmul.mubr.f32.gmra.mrb[66].mxu0 %v11849_v42  ;;  %v11883_v42 = vrot.slane %v11578_v63, 3  ;;  %v11888_v40 = vsel %vm11840_vm9, %v11886_v25, %v11887_v50  ;;  %v11950_v25 = vrot.slane %v11590_v57, 4  ;;  %v11951_v50 = vrot.slane %v11592_v16, 4 }
 0x716   : > { %13261 = vmatprep.mubr.f32.mxu0 %v11858_v49  ;;  %13301 = vmatpush1.bf16.msra.mxu0 %v18314_v35  ;;  %v11583_v35 = vld [vmem:[#allocation4 + $0x8] sm:$0xf0] }
 0x717   : > { %13302 = vmatprep.subr.bf16.mxu0 %v18319_v28  ;;  %v11879_v28 = vsel %vm11840_vm9, %v11877_v41, %v11878_v3  ;;  %v11941_v49 = vrot.slane %v11583_v35, 4  ;;  %v11885_v22 = vsel %vm11840_vm9, %v11883_v42, %v11884_v53  ;;  %v18362_v41 = vld [vmem:[%s23843_s5 + $0x10] ss:$8 sps:$4 sm:$0xff]   ;;  %v18367_v3 = vld [vmem:[%s23843_s5 + $0x24] ss:$8 sps:$4 sm:$0xff]   ;;  %vm13456_vm9 = vcmask 1045509  }
 0x718   : > { %v11594_v35 = vld [vmem:[#allocation4 + $0x60] sm:$0xf0]  ;;  %v18365_v42 = vld [vmem:[%s23843_s5 + $0x20] ss:$8 sps:$4 sm:$0xff]   ;;  %v18370_v53 = vld [vmem:[%s23843_s5 + $0x34] ss:$8 sps:$4 sm:$0xff]  }
 0x719   : > { %13262 = vmatmul.mubr.f32.gmra.mrb[68].mxu0 %v11855_v52  ;;  %v18343_v52 = vld [vmem:[%s23842_s4 + $0x4a4] ss:$8 sps:$4 sm:$0xff]  }
 0x71a   : > { %13267 = vmatprep.mubr.f32.mxu0 %v11864_v5  ;;  %13303 = vmatpush1.bf16.msra.mxu0 %v18317_v46  ;;  %v11943_v46 = vsel %vm11937_vm11, %v11941_v49, %v11942_v55  ;;  %v18344_v5 = vld [vmem:[%s23842_s4 + $0x4b0] ss:$8 sps:$4 sm:$0xff]   ;;  %v11956_v49 = vrot.slane %v11594_v35, 4  ;;  %v11957_v55 = vrot.slane %v11596_v32, 4  ;;  %v18388_v35 = vld [vmem:[%s23843_s5 + $0x94] ss:$8 sps:$4 sm:$0xff]  }
 0x71b   : > { %13304 = vmatprep.subr.bf16.mxu0 %v18322_v14  ;;  %v18338_v14 = vld [vmem:[%s23842_s4 + $0x490] ss:$8 sps:$4 sm:$0xff]   ;;  %v18389_v32 = vld [vmem:[%s23843_s5 + $0xa0] ss:$8 sps:$4 sm:$0xff]  }
 0x71d   : > { %13268 = vmatmul.mubr.f32.gmra.mrb[70].mxu0 %v11861_v34  ;;  %v11584_v34 = vld [vmem:[#allocation4 + $0x10] sm:$0xf] }
 0x71e   : > { %13273 = vmatprep.mubr.f32.mxu0 %v11870_v7  ;;  %13305 = vmatpush1.bf16.msra.mxu0 %v18320_v11  ;;  %v18355_v11 = vld [vmem:[%s23842_s4 + $0x4e4] ss:$8 sps:$4 sm:$0xff]   ;;  %v11589_v7 = vld [vmem:[#allocation4 + $0x38] sm:$0xf]  ;;  %v11939_v29 = vrot.slane %v11584_v34, 4 }
 0x71f   : > { %13306 = vmatprep.subr.bf16.mxu0 %v18325_v38  ;;  %v11582_v38 = vld [vmem:[#allocation4] sm:$0xf0]  ;;  %v18371_v34 = vld [vmem:[%s23843_s5 + $0x40] ss:$8 sps:$4 sm:$0xff]  }
 0x720   : > { %v11938_v62 = vrot.slane %v11582_v38, 4  ;;  %v11609_v38 = vld [vmem:[#allocation4 + $0xd8] sm:$0xf] }
 0x721   : > { %13274 = vmatmul.mubr.f32.gmra.mrb[72].mxu0 %v11867_v12  ;;  %v11593_v12 = vld [vmem:[#allocation4 + $0x58] sm:$0xf] }
 0x722   : > { %13279 = vmatprep.mubr.f32.mxu0 %v11876_v30  ;;  %13307 = vmatpush1.bf16.msra.mxu0 %v18323_v51  ;;  %v11948_v51 = vrot.slane %v11589_v7, 4  ;;  %v11940_v30 = vsel %vm11937_vm11, %v11938_v62, %v11939_v29 }
 0x723   : > { %13308 = vmatprep.subr.bf16.mxu0 %v18328_v21  ;;  %v11591_v21 = vld [vmem:[#allocation4 + $0x48] sm:$0xf0] }
 0x724   : > { %v11949_v47 = vsel %vm11937_vm11, %v11947_v15, %v11948_v51  ;;  %v11953_v18 = vrot.slane %v11591_v21, 4  ;;  %v11978_v15 = vrot.slane %v11609_v38, 4  ;;  %v11606_v51 = vld [vmem:[#allocation4 + $0xc0] sm:$0xf0]  ;;  %v11613_v21 = vld [vmem:[#allocation4 + $0xf8] sm:$0xf] }
 0x725   : > { %13280 = vmatmul.mubr.f32.gmra.mrb[74].mxu0 %v11873_v2  ;;  %v11597_v2 = vld [vmem:[#allocation4 + $0x78] sm:$0xf] }
 0x726   : > { %13285 = vmatprep.mubr.f32.mxu0 %v11882_v8  ;;  %13309 = vmatpush1.bf16.msra.mxu0 %v18326_v54  ;;  %v11954_v54 = vrot.slane %v11593_v12, 4  ;;  %v11946_v8 = vsel %vm11937_vm11, %v11944_v6, %v11945_v45  ;;  %v18374_v12 = vld [vmem:[%s23843_s5 + $0x50] ss:$8 sps:$4 sm:$0xff]   ;;  %v11983_v45 = vrot.slane %v11611_v31, 4 }
 0x727   : > { %13310 = vmatprep.subr.bf16.mxu0 %v18331_v23  ;;  %v11595_v23 = vld [vmem:[#allocation4 + $0x68] sm:$0xf0] }
 0x728   : > { %v11955_v63 = vsel %vm11937_vm11, %v11953_v18, %v11954_v54  ;;  %v11959_v36 = vrot.slane %v11595_v23, 4  ;;  %v11610_v18 = vld [vmem:[#allocation4 + $0xe0] sm:$0xf0]  ;;  %v11612_v54 = vld [vmem:[#allocation4 + $0xf0] sm:$0xf] }
 0x729   : > { %13286 = vmatmul.mubr.f32.gmra.mrb[76].mxu0 %v11879_v28  ;;  %v11601_v28 = vld [vmem:[#allocation4 + $0x98] sm:$0xf]  ;;  %v11980_v16 = vrot.slane %v11610_v18, 4  ;;  %v11981_v23 = vrot.slane %v11612_v54, 4 }
 0x72a   : > { %13291 = vmatprep.mubr.f32.mxu0 %v11888_v40  ;;  %13311 = vmatpush1.bf16.msra.mxu0 %v18329_v39  ;;  %v11960_v39 = vrot.slane %v11597_v2, 4  ;;  %v11952_v40 = vsel %vm11937_vm11, %v11950_v25, %v11951_v50  ;;  %v18380_v25 = vld [vmem:[%s23843_s5 + $0x70] ss:$8 sps:$4 sm:$0xff]   ;;  %v18382_v50 = vld [vmem:[%s23843_s5 + $0x74] ss:$8 sps:$4 sm:$0xff]  }
 0x72b   : > { %13312 = vmatprep.subr.bf16.mxu0 %v18334_v13  ;;  %v11599_v13 = vld [vmem:[#allocation4 + $0x88] sm:$0xf0] }
 0x72d   : > { %13292 = vmatmul.mubr.f32.gmra.mrb[78].mxu0 %v11885_v22  ;;  %v11966_v22 = vrot.slane %v11601_v28, 4  ;;  %v18392_v28 = vld [vmem:[%s23843_s5 + $0xb0] ss:$8 sps:$4 sm:$0xff]  }
 0x72e   : > { %13313 = vmatpush1.bf16.msra.mxu0 %v18332_v48  ;;  %13330 = vmatprep.mubr.f32.mxu0 %v11943_v46  ;;  %v11961_v48 = vsel %vm11937_vm11, %v11959_v36, %v11960_v39  ;;  %v11598_v46 = vld [vmem:[#allocation4 + $0x80] sm:$0xf0]  ;;  %v18386_v39 = vld [vmem:[%s23843_s5 + $0x90] ss:$8 sps:$4 sm:$0xff]  }
 0x72f   : > { %13314 = vmatprep.subr.bf16.mxu0 %v18337_v60  ;;  %v11965_v60 = vrot.slane %v11599_v13, 4  ;;  %v18385_v36 = vld [vmem:[%s23843_s5 + $0x84] ss:$8 sps:$4 sm:$0xff]  }
 0x730   : > { %v18391_v13 = vld [vmem:[%s23843_s5 + $0xa4] ss:$8 sps:$4 sm:$0xff]  }
 0x732   : > { %13315 = vmatpush1.bf16.msra.mxu0 %v18335_v27  ;;  %v11600_v27 = vld [vmem:[#allocation4 + $0x90] sm:$0xf] }
 0x733   : > { %13316 = vmatprep.subr.bf16.mxu0 %v18340_v37  ;;  %v11603_v37 = vld [vmem:[#allocation4 + $0xa8] sm:$0xf0] }
 0x736   : > { %13317 = vmatpush1.bf16.msra.mxu0 %v18338_v14  ;;  %v11605_v14 = vld [vmem:[#allocation4 + $0xb8] sm:$0xf] }
 0x737   : > { %13318 = vmatprep.subr.bf16.mxu0 %v18343_v52  ;;  %v18368_v52 = vld [vmem:[%s23843_s5 + $0x30] ss:$8 sps:$4 sm:$0xff]  }
 0x73a   : > { %13319 = vmatpush1.bf16.msra.mxu0 %v18341_v10  ;;  %v18373_v10 = vld [vmem:[%s23843_s5 + $0x44] ss:$8 sps:$4 sm:$0xff]  }
 0x73b   : > { %13320 = vmatprep.subr.bf16.mxu0 %v18346_v43  ;;  %v11958_v43 = vsel %vm11937_vm11, %v11956_v49, %v11957_v55  ;;  %v18400_v49 = vld [vmem:[%s23843_s5 + $0xd4] ss:$8 sps:$4 sm:$0xff]   ;;  %v18398_v55 = vld [vmem:[%s23843_s5 + $0xd0] ss:$8 sps:$4 sm:$0xff]  }
 0x73e   : > { %13321 = vmatpush1.bf16.msra.mxu0 %v18344_v5  ;;  %v11962_v5 = vrot.slane %v11598_v46, 4  ;;  %v18404_v46 = vld [vmem:[%s23843_s5 + $0xf0] ss:$8 sps:$4 sm:$0xff]  }
 0x73f   : > { %13322 = vmatprep.subr.bf16.mxu0 %v18349_v61  ;;  %v11963_v61 = vrot.slane %v11600_v27, 4  ;;  %v18409_v27 = vld [vmem:[%s23843_s5 + $0x104] ss:$8 sps:$4 sm:$0xff]  }
 0x741   : > { %v11964_v19 = vsel %vm11937_vm11, %v11962_v5, %v11963_v61 }
 0x742   : > { %13323 = vmatpush1.bf16.msra.mxu0 %v18347_v56  ;;  %v11967_v56 = vsel %vm11937_vm11, %v11965_v60, %v11966_v22  ;;  %v18401_v60 = vld [vmem:[%s23843_s5 + $0xe0] ss:$8 sps:$4 sm:$0xff]   ;;  %v18406_v22 = vld [vmem:[%s23843_s5 + $0xf4] ss:$8 sps:$4 sm:$0xff]  }
 0x743   : > { %13324 = vmatprep.subr.bf16.mxu0 %v18352_v9  ;;  %v11971_v9 = vrot.slane %v11603_v37, 4  ;;  %v12162_v37 = vld [vmem:[%s23850_s12] sm:$0x3] }
 0x746   : > { %13325 = vmatpush1.bf16.msra.mxu0 %v18350_v4  ;;  %v11972_v4 = vrot.slane %v11605_v14, 4  ;;  %v23231_v14 = vrot.slane %v12162_v37, %v19043_v24 }
 0x747   : > { %13326 = vmatprep.subr.bf16.mxu0 %v18355_v11  ;;  %v11602_v11 = vld [vmem:[#allocation4 + $0xa0] sm:$0xf0] }
 0x748   : > { %v11968_v7 = vrot.slane %v11602_v11, 4  ;;  %v11973_v62 = vsel %vm11937_vm11, %v11971_v9, %v11972_v4 }
 0x74a   : > { %13327 = vmatpush1.bf16.msra.mxu0 %v18353_v58  ;;  %v11604_v58 = vld [vmem:[#allocation4 + $0xb0] sm:$0xf] }
 0x74b   : > { %13328 = vmatprep.subr.bf16.mxu0 %v18358_v44  ;;  %v11607_v44 = vld [vmem:[#allocation4 + $0xc8] sm:$0xf0] }
 0x74c   : > { %v11977_v29 = vrot.slane %v11607_v44, 4 }
 0x74e   : > { %13329 = vmatpush1.bf16.msra.mxu0 %v18356_v1  ;;  %v18376_v1 = vld [vmem:[%s23843_s5 + $0x54] ss:$8 sps:$4 sm:$0xff]   ;;  %v11979_v6 = vsel %vm11937_vm11, %v11977_v29, %v11978_v15 }
 0x74f   : > { %14358 = vmatprep.subr.bf16.mxu0 %v18361_v17  ;;  %v11969_v17 = vrot.slane %v11604_v58, 4 }
 0x751   : > { %13331 = vmatmul.mubr.f32.vlgmr.msra.gmra.mrb[64].mxu0 %v11940_v30  ;;  %v11975_v30 = vrot.slane %v11608_v59, 4 }
 0x752   : > { %13336 = vmatprep.mubr.f32.mxu0 %v11949_v47  ;;  %14359 = vmatpush1.bf16.msra.mxu0 %v18359_v20  ;;  %v11970_v20 = vsel %vm11937_vm11, %v11968_v7, %v11969_v17  ;;  %v11984_v47 = vrot.slane %v11613_v21, 4 }
 0x753   : > { %14360 = vmatprep.subr.bf16.mxu0 %v18364_v0  ;;  %v11974_v0 = vrot.slane %v11606_v51, 4 }
 0x754   : > { %v11985_v2 = vsel %vm11937_vm11, %v11983_v45, %v11984_v47 }
 0x755   : > { %13337 = vmatmul.mubr.f32.gmra.mrb[66].mxu0 %v11946_v8  ;;  %v11976_v57 = vsel %vm11937_vm11, %v11974_v0, %v11975_v30  ;;  %v18379_v8 = vld [vmem:[%s23843_s5 + $0x64] ss:$8 sps:$4 sm:$0xff]  }
 0x756   : > { %13342 = vmatprep.mubr.f32.mxu0 %v11955_v63  ;;  %14361 = vmatpush1.bf16.msra.mxu0 %v18362_v41  ;;  %v11982_v41 = vsel %vm11937_vm11, %v11980_v16, %v11981_v23  ;;  %v18383_v63 = vld [vmem:[%s23843_s5 + $0x80] ss:$8 sps:$4 sm:$0xff]   ;;  %vm13459_vm11 = vcmask 1046534  }
 0x757   : > { %14362 = vmatprep.subr.bf16.mxu0 %v18367_v3  ;;  %v18377_v3 = vld [vmem:[%s23843_s5 + $0x60] ss:$8 sps:$4 sm:$0xff]  }
 0x759   : > { %13343 = vmatmul.mubr.f32.gmra.mrb[68].mxu0 %v11952_v40  ;;  %v18397_v40 = vld [vmem:[%s23843_s5 + $0xc4] ss:$8 sps:$4 sm:$0xff]  }
 0x75a   : > { %13348 = vmatprep.mubr.f32.mxu0 %v11961_v48  ;;  %14363 = vmatpush1.bf16.msra.mxu0 %v18365_v42  ;;  %v18394_v42 = vld [vmem:[%s23843_s5 + $0xb4] ss:$8 sps:$4 sm:$0xff]   ;;  %v18403_v48 = vld [vmem:[%s23843_s5 + $0xe4] ss:$8 sps:$4 sm:$0xff]  }
 0x75b   : > { %14364 = vmatprep.subr.bf16.mxu0 %v18370_v53  ;;  %v18395_v53 = vld [vmem:[%s23843_s5 + $0xc0] ss:$8 sps:$4 sm:$0xff]  }
 0x75d   : > { %13349 = vmatmul.mubr.f32.gmra.mrb[70].mxu0 %v11958_v43 }
 0x75e   : > { %13354 = vmatprep.mubr.f32.mxu0 %v11967_v56  ;;  %14365 = vmatpush1.bf16.msra.mxu0 %v18368_v52  ;;  %v23234_v52 = vrot.slane %v12162_v37, %v19049_v26 }
 0x75f   : > { %14366 = vmatprep.subr.bf16.mxu0 %v18373_v10 }
 0x761   : > { %13355 = vmatmul.mubr.f32.gmra.mrb[72].mxu0 %v11964_v19 }
 0x762   : > { %13360 = vmatprep.mubr.f32.mxu0 %v11973_v62  ;;  %14367 = vmatpush1.bf16.msra.mxu0 %v18371_v34 }
 0x763   : > { %14368 = vmatprep.subr.bf16.mxu0 %v18376_v1 }
 0x765   : > { %13361 = vmatmul.mubr.f32.gmra.mrb[74].mxu0 %v11970_v20 }
 0x766   : > { %13366 = vmatprep.mubr.f32.mxu0 %v11979_v6  ;;  %14369 = vmatpush1.bf16.msra.mxu0 %v18374_v12 }
 0x767   : > { %14370 = vmatprep.subr.bf16.mxu0 %v18379_v8 }
 0x769   : > { %13367 = vmatmul.mubr.f32.gmra.mrb[76].mxu0 %v11976_v57 }
 0x76a   : > { %13372 = vmatprep.mubr.f32.mxu0 %v11985_v2  ;;  %14371 = vmatpush1.bf16.msra.mxu0 %v18377_v3 }
 0x76b   : > { %14372 = vmatprep.subr.bf16.mxu0 %v18382_v50 }
 0x76d   : > { %13373 = vmatmul.mubr.f32.gmra.mrb[78].mxu0 %v11982_v41 }
 0x76e   : > { %14373 = vmatpush1.bf16.msra.mxu0 %v18380_v25 }
 0x76f   : > { %14374 = vmatprep.subr.bf16.mxu0 %v18385_v36 }
 0x772   : > { %14375 = vmatpush1.bf16.msra.mxu0 %v18383_v63 }
 0x773   : > { %14376 = vmatprep.subr.bf16.mxu0 %v18388_v35 }
 0x776   : > { %14377 = vmatpush1.bf16.msra.mxu0 %v18386_v39 }
 0x777   : > { %14378 = vmatprep.subr.bf16.mxu0 %v18391_v13 }
 0x77a   : > { %14379 = vmatpush1.bf16.msra.mxu0 %v18389_v32 }
 0x77b   : > { %14380 = vmatprep.subr.bf16.mxu0 %v18394_v42 }
 0x77e   : > { %14381 = vmatpush1.bf16.msra.mxu0 %v18392_v28 }
 0x77f   : > { %14382 = vmatprep.subr.bf16.mxu0 %v18397_v40 }
 0x782   : > { %14383 = vmatpush1.bf16.msra.mxu0 %v18395_v53 }
 0x783   : > { %14384 = vmatprep.subr.bf16.mxu0 %v18400_v49 }
 0x786   : > { %14385 = vmatpush1.bf16.msra.mxu0 %v18398_v55 }
 0x787   : > { %14386 = vmatprep.subr.bf16.mxu0 %v18403_v48 }
 0x78a   : > { %14387 = vmatpush1.bf16.msra.mxu0 %v18401_v60 }
 0x78b   : > { %14388 = vmatprep.subr.bf16.mxu0 %v18406_v22 }
 0x78e   : > { %14389 = vmatpush1.bf16.msra.mxu0 %v18404_v46 }
 0x78f   : > { %14399 = vmatprep.subr.bf16.mxu0 %v18409_v27 }
 0x824   : > { %v13332_v10 = vpop.f32.mrb[64].mxu0 }
 0x825   : > { %v16379_v43 = vadd.f32 %v13332_v10, %v23231_v14  ;;  %v13334_v5 = vpop.f32.mrb[65].mxu0 }
 0x826   : > { %v16380_v61 = vadd.f32 %v13334_v5, %v23234_v52 }
 0x827   : > { %vm13379_vm1 = vcmp.ge.f32.partialorder %v16379_v43, 0.0  ;;  %v13395_v56 = vmul.f32 0.1, %v16379_v43 }
 0x828   : > { %vm13380_vm12 = vcmp.ge.f32.partialorder %v16380_v61, 0.0  ;;  %v13396_v9 = vmul.f32 0.1, %v16380_v61  ;;  %v13338_v4 = vpop.f32.mrb[66].mxu0 }
 0x829   : > { %v13411_v11 = vsel %vm13379_vm1, %v16379_v43, %v13395_v56  ;;  %v16381_v58 = vadd.f32 %v13338_v4, %v23231_v14  ;;  %v13340_v44 = vpop.f32.mrb[67].mxu0 }
 0x82a   : > { %v13412_v38 = vsel %vm13380_vm12, %v16380_v61, %v13396_v9  ;;  %v13480_v34 = vrot.slane %v13411_v11, 2  ;;  %v13510_v1 = vrot.slane %v13411_v11, 4  ;;  %v13540_v19 = vrot.slane %v13411_v11, 6 }
 0x82b   : > { %vm13381_vm13 = vcmp.ge.f32.partialorder %v16381_v58, 0.0  ;;  %v13397_v7 = vmul.f32 0.1, %v16381_v58  ;;  %v16382_v17 = vadd.f32 %v13340_v44, %v23234_v52  ;;  %v13494_v29 = vrot.slane %v13412_v38, 2 }
 0x82c   : > { %v13344_v62 = vpop.f32.mrb[68].mxu0  ;;  %v13524_v15 = vrot.slane %v13412_v38, 4  ;;  %v13554_v51 = vrot.slane %v13412_v38, 6 }
 0x82d   : > { %v16383_v59 = vadd.f32 %v13344_v62, %v23231_v14  ;;  %v13346_v31 = vpop.f32.mrb[69].mxu0  ;;  %v13413_v21 = vsel %vm13381_vm13, %v16381_v58, %v13397_v7  ;;  %vm13382_vm7 = vcmp.ge.f32.partialorder %v16382_v17, 0.0  ;;  %v13398_v12 = vmul.f32 0.1, %v16382_v17 }
 0x82e   : > { %v16384_v20 = vadd.f32 %v13346_v31, %v23234_v52  ;;  %v13443_v0 = vrot.slane %v13413_v21, 7  ;;  %v13481_v30 = vrot.slane %v13413_v21, 1  ;;  %v13511_v6 = vrot.slane %v13413_v21, 3 }
 0x82f   : > { %v13541_v45 = vrot.slane %v13413_v21, 5  ;;  %v13414_v47 = vsel %vm13382_vm7, %v16382_v17, %v13398_v12  ;;  %vm13383_vm8 = vcmp.ge.f32.partialorder %v16383_v59, 0.0  ;;  %v13399_v18 = vmul.f32 0.1, %v16383_v59 }
 0x830   : > { %vm13384_vm10 = vcmp.ge.f32.partialorder %v16384_v20, 0.0  ;;  %v13350_v54 = vpop.f32.mrb[70].mxu0  ;;  %v13445_v57 = vsel %vm13444_vm14, %v13443_v0, %v13411_v11  ;;  %v13512_v16 = vsel %vm13444_vm14, %v13511_v6, %v13510_v1  ;;  %v13464_v2 = vrot.slane %v13414_v47, 7 }
 0x831   : > { %v13542_v23 = vsel %vm13444_vm14, %v13541_v45, %v13540_v19  ;;  %v13352_v41 = vpop.f32.mrb[71].mxu0  ;;  %v13495_v3 = vrot.slane %v13414_v47, 1  ;;  %v13525_v8 = vrot.slane %v13414_v47, 3  ;;  %v13555_v25 = vrot.slane %v13414_v47, 5 }
 0x832   : > { %v13415_v50 = vsel %vm13383_vm8, %v16383_v59, %v13399_v18  ;;  %v13465_v63 = vsel %vm13444_vm14, %v13464_v2, %v13412_v38  ;;  %v13482_v39 = vsel %vm13444_vm14, %v13481_v30, %v13480_v34  ;;  %v13400_v49 = vmul.f32 0.1, %v16384_v20 }
 0x833   : > { %v13446_v36 = vrot.slane %v13415_v50, 6  ;;  %v13513_v35 = vrot.slane %v13415_v50, 2  ;;  %v13526_v32 = vsel %vm13444_vm14, %v13525_v8, %v13524_v15  ;;  %v13556_v13 = vsel %vm13444_vm14, %v13555_v25, %v13554_v51 }
 0x834   : > { %v13483_v28 = vsel %vm13447_vm15, %v13415_v50, %v13482_v39  ;;  %v13543_v42 = vrot.slane %v13415_v50, 4  ;;  %v13356_v53 = vpop.f32.mrb[72].mxu0  ;;  %v13496_v55 = vsel %vm13444_vm14, %v13495_v3, %v13494_v29  ;;  %v16385_v48 = vadd.f32 %v13350_v54, %v23231_v14 }
 0x835   : > { %v13448_v40 = vsel %vm13447_vm15, %v13446_v36, %v13445_v57  ;;  %v13358_v60 = vpop.f32.mrb[73].mxu0  ;;  %v16386_v46 = vadd.f32 %v13352_v41, %v23234_v52  ;;  %v16387_v27 = vadd.f32 %v13356_v53, %v23231_v14  ;;  %v13514_v37 = vsel %vm13447_vm15, %v13513_v35, %v13512_v16 }
 0x836   : > { %v13544_v22 = vsel %vm13447_vm15, %v13543_v42, %v13542_v23  ;;  %v13416_v10 = vsel %vm13384_vm10, %v16384_v20, %v13400_v49  ;;  %vm13385_vm2 = vcmp.ge.f32.partialorder %v16385_v48, 0.0  ;;  %v13401_v43 = vmul.f32 0.1, %v16385_v48 }
 0x837   : > { %v16388_v5 = vadd.f32 %v13358_v60, %v23234_v52  ;;  %v13466_v61 = vrot.slane %v13416_v10, 6  ;;  %v23260_v56 = vsel %vm13447_vm15, %v13416_v10, %v13496_v55  ;;  %v13527_v9 = vrot.slane %v13416_v10, 2 }
 0x838   : > { %v13557_v4 = vrot.slane %v13416_v10, 4  ;;  %v13362_v11 = vpop.f32.mrb[74].mxu0  ;;  %v13417_v58 = vsel %vm13385_vm2, %v16385_v48, %v13401_v43  ;;  %vm13386_vm3 = vcmp.ge.f32.partialorder %v16386_v46, 0.0  ;;  %v13402_v44 = vmul.f32 0.1, %v16386_v46 }
 0x839   : > { %vm13387_vm4 = vcmp.ge.f32.partialorder %v16387_v27, 0.0  ;;  %v13364_v38 = vpop.f32.mrb[75].mxu0  ;;  %v13467_v34 = vsel %vm13447_vm15, %v13466_v61, %v13465_v63  ;;  %v13449_v19 = vrot.slane %v13417_v58, 5  ;;  %v13484_v7 = vrot.slane %v13417_v58, 7 }
 0x83a   : > { %v23264_v1 = vsel %vm13447_vm15, %v13557_v4, %v13556_v13  ;;  %v13515_v17 = vrot.slane %v13417_v58, 1  ;;  %v13545_v62 = vrot.slane %v13417_v58, 3  ;;  %v23266_v29 = vsel %vm13386_vm3, %v16386_v46, %v13402_v44 }
 0x83b   : > { %v13403_v15 = vmul.f32 0.1, %v16387_v27  ;;  %v13451_v51 = vsel %vm13450_vm0, %v13449_v19, %v13448_v40  ;;  %v13485_v59 = vsel %vm13450_vm0, %v13484_v7, %v13483_v28  ;;  %v13468_v12 = vrot.slane %v23266_v29, 5 }
 0x83c   : > { %v13368_v31 = vpop.f32.mrb[76].mxu0  ;;  %v13546_v21 = vsel %vm13450_vm0, %v13545_v62, %v13544_v22  ;;  %v13529_v20 = vrot.slane %v23266_v29, 1  ;;  %v13516_v47 = vsel %vm13450_vm0, %v13515_v17, %v13514_v37  ;;  %vm13388_vm5 = vcmp.ge.f32.partialorder %v16388_v5, 0.0 }
 0x83d   : > { %v13419_v0 = vsel %vm13387_vm4, %v16387_v27, %v13403_v15  ;;  %v13370_v30 = vpop.f32.mrb[77].mxu0  ;;  %v13404_v57 = vmul.f32 0.1, %v16388_v5  ;;  %v13528_v16 = vsel %vm13447_vm15, %v13527_v9, %v13526_v32  ;;  %v16389_v3 = vadd.f32 %v13362_v11, %v23231_v14 }
 0x83e   : > { %v13452_v6 = vrot.slane %v13419_v0, 4  ;;  %v13486_v45 = vrot.slane %v13419_v0, 6  ;;  %v13547_v18 = vrot.slane %v13419_v0, 2  ;;  %v23276_v54 = vsel %vm998_vm6, %v13419_v0, %v13516_v47 }
 0x83f   : > { %v13530_v41 = vsel %vm13450_vm0, %v13529_v20, %v13528_v16  ;;  %v23285_v25 = vsel %vm13388_vm5, %v16388_v5, %v13404_v57  ;;  %v16390_v50 = vadd.f32 %v13364_v38, %v23234_v52  ;;  %v16391_v63 = vadd.f32 %v13368_v31, %v23231_v14 }
 0x840   : > { %v13454_v23 = vsel %vm998_vm6, %v13452_v6, %v13451_v51  ;;  %v23281_v2 = vsel %vm998_vm6, %v13486_v45, %v13485_v59  ;;  %v13374_v8 = vpop.f32.mrb[78].mxu0  ;;  %v13548_v36 = vsel %vm998_vm6, %v13547_v18, %v13546_v21  ;;  %v13498_v35 = vrot.slane %v23266_v29, 7 }
 0x841   : > { %v13376_v39 = vpop.f32.mrb[79].mxu0  ;;  %v23293_v32 = vsel %vm998_vm6, %v23285_v25, %v13530_v41  ;;  %vm13389_vm1 = vcmp.ge.f32.partialorder %v16389_v3, 0.0  ;;  %v13405_v13 = vmul.f32 0.1, %v16389_v3  ;;  %vm13390_vm12 = vcmp.ge.f32.partialorder %v16390_v50, 0.0 }
 0x842   : > { %v13406_v28 = vmul.f32 0.1, %v16390_v50  ;;  %v13559_v42 = vrot.slane %v23266_v29, 3  ;;  %v13470_v53 = vrot.slane %v23285_v25, 4  ;;  %vm13391_vm13 = vcmp.ge.f32.partialorder %v16391_v63, 0.0 }
 0x843   : > { %v13407_v40 = vmul.f32 0.1, %v16391_v63  ;;  %vm13462_vm14 = vcmask 1047559   ;;  %v23297_v49 = vsel %vm13389_vm1, %v16389_v3, %v13405_v13  ;;  %v16392_v48 = vadd.f32 %v13370_v30, %v23234_v52  ;;  %v18407_v13 = vld [vmem:[%s23843_s5 + $0x100] ss:$8 sps:$4 sm:$0xff]  }
 0x844   : > { %v23299_v55 = vsel %vm13390_vm12, %v16390_v50, %v13406_v28  ;;  %v13469_v60 = vsel %vm13450_vm0, %v13468_v12, %v13467_v34  ;;  %v13455_v22 = vrot.slane %v23297_v49, 3  ;;  %v13549_v46 = vrot.slane %v23297_v49, 1 }
 0x845   : > { %v16393_v27 = vadd.f32 %v13374_v8, %v23231_v14  ;;  %v16394_v37 = vadd.f32 %v13376_v39, %v23234_v52  ;;  %v13500_v10 = vrot.slane %v23285_v25, 6  ;;  %v13488_v43 = vrot.slane %v23297_v49, 5 }
 0x846   : > { %v13518_v5 = vrot.slane %v23297_v49, 7  ;;  %v13472_v61 = vrot.slane %v23299_v55, 3  ;;  %v13457_v9 = vsel %vm13456_vm9, %v13455_v22, %v13454_v23  ;;  %v13502_v4 = vrot.slane %v23299_v55, 5 }
 0x847   : > { %v13423_v11 = vsel %vm13391_vm13, %v16391_v63, %v13407_v40  ;;  %v13550_v58 = vsel %vm13456_vm9, %v13549_v46, %v13548_v36  ;;  %v13532_v14 = vrot.slane %v23299_v55, 7  ;;  %vm13392_vm15 = vcmp.ge.f32.partialorder %v16392_v48, 0.0 }
 0x848   : > { %v13458_v44 = vrot.slane %v13423_v11, 2  ;;  %v23317_v52 = vsel %vm13459_vm11, %v13423_v11, %v13550_v58  ;;  %v13408_v38 = vmul.f32 0.1, %v16392_v48  ;;  %vm13393_vm7 = vcmp.ge.f32.partialorder %v16393_v27, 0.0  ;;  %v18424_v58 = vld [vmem:[%s23843_s5 + $0x154] ss:$8 sps:$4 sm:$0xff]  }
 0x849   : > { %v13409_v34 = vmul.f32 0.1, %v16393_v27  ;;  %vm13394_vm8 = vcmp.ge.f32.partialorder %v16394_v37, 0.0  ;;  %v13410_v7 = vmul.f32 0.1, %v16394_v37  ;;  %v13471_v17 = vsel %vm998_vm6, %v13470_v53, %v13469_v60 }
 0x84a   : > { %v13460_v19 = vsel %vm13459_vm11, %v13458_v44, %v13457_v9  ;;  %v13499_v62 = vsel %vm13450_vm0, %v13498_v35, %v23260_v56  ;;  %v13424_v15 = vsel %vm13392_vm15, %v16392_v48, %v13408_v38  ;;  %v13473_v59 = vsel %vm13456_vm9, %v13472_v61, %v13471_v17  ;;  %v18413_v9 = vld [vmem:[%s23843_s5 + $0x120] ss:$8 sps:$4 sm:$0xff]   ;;  %v18427_v44 = vld [vmem:[%s23843_s5 + $0x164] ss:$8 sps:$4 sm:$0xff]  }
 0x84b   : > { %v23323_v51 = vsel %vm13393_vm7, %v16393_v27, %v13409_v34  ;;  %v13501_v31 = vsel %vm998_vm6, %v13500_v10, %v13499_v62  ;;  %v13490_v21 = vrot.slane %v13423_v11, 4  ;;  %v13474_v12 = vrot.slane %v13424_v15, 2  ;;  %v18415_v10 = vld [vmem:[%s23843_s5 + $0x124] ss:$8 sps:$4 sm:$0xff]   ;;  %v18425_v38 = vld [vmem:[%s23843_s5 + $0x160] ss:$8 sps:$4 sm:$0xff]  }
 0x84c   : > { %v13504_v20 = vrot.slane %v13424_v15, 4  ;;  %v13461_v0 = vrot.slane %v23323_v51, 1  ;;  %v13520_v30 = vrot.slane %v13423_v11, 6  ;;  %v13534_v6 = vrot.slane %v13424_v15, 6  ;;  %v18419_v11 = vld [vmem:[%s23843_s5 + $0x140] ss:$8 sps:$4 sm:$0xff]  }
 0x84d   : > { %v13492_v45 = vrot.slane %v23323_v51, 3  ;;  %v13426_v47 = vsel %vm13394_vm8, %v16394_v37, %v13410_v7  ;;  %v13475_v56 = vsel %vm13459_vm11, %v13474_v12, %v13473_v59  ;;  %v13503_v16 = vsel %vm13456_vm9, %v13502_v4, %v13501_v31  ;;  %v18410_v37 = vld [vmem:[%s23843_s5 + $0x110] ss:$8 sps:$4 sm:$0xff]   ;;  %v18421_v4 = vld [vmem:[%s23843_s5 + $0x144] ss:$8 sps:$4 sm:$0xff]  }
 0x84e   : > { %v13476_v18 = vrot.slane %v13426_v47, 1  ;;  %v13463_v57 = vsel %vm13462_vm14, %v13461_v0, %v13460_v19  ;;  %v13522_v23 = vrot.slane %v23323_v51, 5  ;;  %v13505_v41 = vsel %vm13459_vm11, %v13504_v20, %v13503_v16  ;;  %v18430_v34 = vld [vmem:[%s23843_s5 + $0x174] ss:$8 sps:$4 sm:$0xff]   ;;  %v18428_v19 = vld [vmem:[%s23843_s5 + $0x170] ss:$8 sps:$4 sm:$0xff]  }
 0x84f   : > { %v13506_v3 = vrot.slane %v13426_v47, 3  ;;  %v13489_v8 = vsel %vm13456_vm9, %v13488_v43, %v23281_v2  ;;  %v13533_v36 = vsel %vm13456_vm9, %v13532_v14, %v23293_v32  ;;  %v13536_v39 = vrot.slane %v13426_v47, 5  ;;  %v18412_v32 = vld [vmem:[%s23843_s5 + $0x114] ss:$8 sps:$4 sm:$0xff]   ;;  %v18422_v14 = vld [vmem:[%s23843_s5 + $0x150] ss:$8 sps:$4 sm:$0xff]  }
 0x850   : > { %v13477_v50 = vsel %vm13462_vm14, %v13476_v18, %v13475_v56  ;;  %v13491_v63 = vsel %vm13459_vm11, %v13490_v21, %v13489_v8  ;;  %v13535_v2 = vsel %vm13459_vm11, %v13534_v6, %v13533_v36  ;;  %v13561_v40 = vrot.slane %v23285_v25, 2  ;;  %v18433_v7 = vld [vmem:[%s23843_s5 + $0x184] ss:$8 sps:$4 sm:$0xff]   ;;  %v18431_v17 = vld [vmem:[%s23843_s5 + $0x180] ss:$8 sps:$4 sm:$0xff]  }
 0x851   : > { %v13571_v35 = vpack.c.bf16 %v13477_v50, %v13477_v50  ;;  %v13507_v28 = vsel %vm13462_vm14, %v13506_v3, %v13505_v41  ;;  %v23346_v53 = vsel %vm13462_vm14, %v13492_v45, %v13491_v63  ;;  %v13570_v49 = vpack.c.bf16 %v13463_v57, %v13463_v57  ;;  %v18436_v62 = vld [vmem:[%s23843_s5 + $0x194] ss:$8 sps:$4 sm:$0xff]   ;;  %v18439_v59 = vld [vmem:[%s23843_s5 + $0x1a4] ss:$8 sps:$4 sm:$0xff]   ;;  %v18437_v31 = vld [vmem:[%s23843_s5 + $0x1a0] ss:$8 sps:$4 sm:$0xff]  }
 0x852   : > { %v23354_v48 = vsel %vm13462_vm14, %v13536_v39, %v13535_v2  ;;  %v13519_v60 = vsel %vm13456_vm9, %v13518_v5, %v23276_v54  ;;  %v13563_v22 = vrot.slane %v23299_v55, 1  ;;  %v13573_v46 = vpack.c.bf16 %v13507_v28, %v13507_v28  ;;  %v18442_v21 = vld [vmem:[%s23843_s5 + $0x1b4] ss:$8 sps:$4 sm:$0xff]   ;;  %v18440_v12 = vld [vmem:[%s23843_s5 + $0x1b0] ss:$8 sps:$4 sm:$0xff]  }
 0x853   : > { %14390 = vmatprep.mubr.bf16.mxu0 %v13571_v35  ;;  %v13521_v27 = vsel %vm13459_vm11, %v13520_v30, %v13519_v60  ;;  %v13560_v54 = vsel %vm13450_vm0, %v13559_v42, %v23264_v1  ;;  %v13566_v55 = vrot.slane %v13426_v47, 7  ;;  %v18418_v1 = vld [vmem:[%s23843_s5 + $0x134] ss:$8 sps:$4 sm:$0xff]   ;;  %v18416_v42 = vld [vmem:[%s23843_s5 + $0x130] ss:$8 sps:$4 sm:$0xff]   ;;  %v13552_v18 = vrot.slane %v23323_v51, 7 }
 0x854   : > { %14391 = vmatmul.mubr.bf16.vlgmr.msra.gmra.mrb[80].mxu0 %v13570_v49  ;;  %v23361_v25 = vsel %vm13462_vm14, %v13522_v23, %v13521_v27  ;;  %v13562_v43 = vsel %vm998_vm6, %v13561_v40, %v13560_v54  ;;  %v18445_v20 = vld [vmem:[%s23843_s5 + $0x1c4] ss:$8 sps:$4 sm:$0xff]   ;;  %v18443_v0 = vld [vmem:[%s23843_s5 + $0x1c0] ss:$8 sps:$4 sm:$0xff]   ;;  %v18448_v30 = vld [vmem:[%s23843_s5 + $0x1d4] ss:$8 sps:$4 sm:$0xff]   ;;  %v13572_v51 = vpack.c.bf16 %v23346_v53, %v23346_v53  ;;  %v13575_v8 = vpack.c.bf16 %v23354_v48, %v23354_v48 }
 0x855   : > { %14400 = vmatpush1.bf16.msra.mxu0 %v18407_v13  ;;  %14431 = vmatprep.mubr.bf16.mxu0 %v13573_v46  ;;  %v13564_v5 = vsel %vm13456_vm9, %v13563_v22, %v13562_v43  ;;  %v18446_v6 = vld [vmem:[%s23843_s5 + $0x1d0] ss:$8 sps:$4 sm:$0xff]   ;;  %v18451_v45 = vld [vmem:[%s23843_s5 + $0x1e4] ss:$8 sps:$4 sm:$0xff]   ;;  %v18449_v47 = vld [vmem:[%s23843_s5 + $0x1e0] ss:$8 sps:$4 sm:$0xff]   ;;  %v23469_v41 = vsel %vm13462_vm14, %v13552_v18, %v23317_v52 }
 0x856   : > { %14401 = vmatprep.subr.bf16.mxu0 %v18412_v32  ;;  %v13565_v61 = vsel %vm13459_vm11, %v13424_v15, %v13564_v5  ;;  %v18434_v15 = vld [vmem:[%s23843_s5 + $0x190] ss:$8 sps:$4 sm:$0xff]   ;;  %v18454_v56 = vld [vmem:[%s23843_s5 + $0x1f4] ss:$8 sps:$4 sm:$0xff]   ;;  %v18457_v16 = vld [vmem:[%s23843_s5 + $0x204] ss:$8 sps:$4 sm:$0xff]  }
 0x857   : > { %v23380_v29 = vsel %vm13462_vm14, %v13566_v55, %v13565_v61  ;;  %v18452_v57 = vld [vmem:[%s23843_s5 + $0x1f0] ss:$8 sps:$4 sm:$0xff]   ;;  %v18455_v23 = vld [vmem:[%s23843_s5 + $0x200] ss:$8 sps:$4 sm:$0xff]   ;;  %v18460_v3 = vld [vmem:[%s23843_s5 + $0x214] ss:$8 sps:$4 sm:$0xff]  }
 0x858   : > { %v18458_v50 = vld [vmem:[%s23843_s5 + $0x210] ss:$8 sps:$4 sm:$0xff]   ;;  %v18463_v52 = vld [vmem:[%s23843_s5 + $0x224] ss:$8 sps:$4 sm:$0xff]   ;;  %v18461_v63 = vld [vmem:[%s23843_s5 + $0x220] ss:$8 sps:$4 sm:$0xff]  }
 0x859   : > { %14402 = vmatpush1.bf16.msra.mxu0 %v18410_v37  ;;  %v18466_v36 = vld [vmem:[%s23843_s5 + $0x234] ss:$8 sps:$4 sm:$0xff]   ;;  %v18464_v39 = vld [vmem:[%s23843_s5 + $0x230] ss:$8 sps:$4 sm:$0xff]   ;;  %v18469_v35 = vld [vmem:[%s23843_s5 + $0x244] ss:$8 sps:$4 sm:$0xff]  }
 0x85a   : > { %14403 = vmatprep.subr.bf16.mxu0 %v18415_v10  ;;  %v18467_v13 = vld [vmem:[%s23843_s5 + $0x240] ss:$8 sps:$4 sm:$0xff]   ;;  %v18472_v28 = vld [vmem:[%s23843_s5 + $0x254] ss:$8 sps:$4 sm:$0xff]   ;;  %v18470_v53 = vld [vmem:[%s23843_s5 + $0x250] ss:$8 sps:$4 sm:$0xff]  }
 0x85b   : > { %v18475_v2 = vld [vmem:[%s23843_s5 + $0x264] ss:$8 sps:$4 sm:$0xff]   ;;  %v18473_v40 = vld [vmem:[%s23843_s5 + $0x260] ss:$8 sps:$4 sm:$0xff]   ;;  %v18478_v49 = vld [vmem:[%s23843_s5 + $0x274] ss:$8 sps:$4 sm:$0xff]  }
 0x85c   : > { %v18476_v32 = vld [vmem:[%s23843_s5 + $0x270] ss:$8 sps:$4 sm:$0xff]   ;;  %v18481_v48 = vld [vmem:[%s23843_s5 + $0x284] ss:$8 sps:$4 sm:$0xff]   ;;  %v18479_v60 = vld [vmem:[%s23843_s5 + $0x280] ss:$8 sps:$4 sm:$0xff]  }
 0x85d   : > { %14404 = vmatpush1.bf16.msra.mxu0 %v18413_v9  ;;  %v18484_v22 = vld [vmem:[%s23843_s5 + $0x294] ss:$8 sps:$4 sm:$0xff]   ;;  %v18482_v46 = vld [vmem:[%s23843_s5 + $0x290] ss:$8 sps:$4 sm:$0xff]   ;;  %v18487_v27 = vld [vmem:[%s23843_s5 + $0x2a4] ss:$8 sps:$4 sm:$0xff]  }
 0x85e   : > { %14405 = vmatprep.subr.bf16.mxu0 %v18418_v1  ;;  %v18485_v37 = vld [vmem:[%s23843_s5 + $0x2a0] ss:$8 sps:$4 sm:$0xff]   ;;  %v18490_v54 = vld [vmem:[%s23843_s5 + $0x2b4] ss:$8 sps:$4 sm:$0xff]   ;;  %v18488_v55 = vld [vmem:[%s23843_s5 + $0x2b0] ss:$8 sps:$4 sm:$0xff]  }
 0x85f   : > { %v18493_v10 = vld [vmem:[%s23843_s5 + $0x2c4] ss:$8 sps:$4 sm:$0xff]   ;;  %v18491_v43 = vld [vmem:[%s23843_s5 + $0x2c0] ss:$8 sps:$4 sm:$0xff]   ;;  %v18496_v5 = vld [vmem:[%s23843_s5 + $0x2d4] ss:$8 sps:$4 sm:$0xff]  }
 0x860   : > { %v18494_v61 = vld [vmem:[%s23843_s5 + $0x2d0] ss:$8 sps:$4 sm:$0xff]   ;;  %v18499_v9 = vld [vmem:[%s23843_s5 + $0x2e4] ss:$8 sps:$4 sm:$0xff]   ;;  %v18497_v1 = vld [vmem:[%s23843_s5 + $0x2e0] ss:$8 sps:$4 sm:$0xff]  }
 0x861   : > { %14406 = vmatpush1.bf16.msra.mxu0 %v18416_v42  ;;  %v18502_v42 = vld [vmem:[%s23843_s5 + $0x2f4] ss:$8 sps:$4 sm:$0xff]   ;;  %vm14854_vm4 = vcmask 7168  }
 0x862   : > { %14407 = vmatprep.subr.bf16.mxu0 %v18421_v4  ;;  %v18500_v4 = vld [vmem:[%s23843_s5 + $0x2f0] ss:$8 sps:$4 sm:$0xff]   ;;  %v18538_v18 = vld [vmem:[%s23843_s5 + $0x3b4] ss:$8 sps:$4 sm:$0xff]  }
 0x865   : > { %14408 = vmatpush1.bf16.msra.mxu0 %v18419_v11  ;;  %v18505_v11 = vld [vmem:[%s23843_s5 + $0x304] ss:$8 sps:$4 sm:$0xff]  }
 0x866   : > { %14409 = vmatprep.subr.bf16.mxu0 %v18424_v58  ;;  %v18503_v58 = vld [vmem:[%s23843_s5 + $0x300] ss:$8 sps:$4 sm:$0xff]  }
 0x869   : > { %14410 = vmatpush1.bf16.msra.mxu0 %v18422_v14  ;;  %v13574_v14 = vpack.c.bf16 %v23361_v25, %v23361_v25  ;;  %v18511_v25 = vld [vmem:[%s23843_s5 + $0x324] ss:$8 sps:$4 sm:$0xff]  }
 0x86a   : > { %14411 = vmatprep.subr.bf16.mxu0 %v18427_v44  ;;  %v18508_v44 = vld [vmem:[%s23843_s5 + $0x314] ss:$8 sps:$4 sm:$0xff]  }
 0x86d   : > { %14412 = vmatpush1.bf16.msra.mxu0 %v18425_v38  ;;  %v13577_v38 = vpack.c.bf16 %v23380_v29, %v23380_v29  ;;  %v18514_v29 = vld [vmem:[%s23843_s5 + $0x334] ss:$8 sps:$4 sm:$0xff]  }
 0x86e   : > { %14413 = vmatprep.subr.bf16.mxu0 %v18430_v34  ;;  %v18506_v34 = vld [vmem:[%s23843_s5 + $0x310] ss:$8 sps:$4 sm:$0xff]  }
 0x871   : > { %14414 = vmatpush1.bf16.msra.mxu0 %v18428_v19  ;;  %v18509_v19 = vld [vmem:[%s23843_s5 + $0x320] ss:$8 sps:$4 sm:$0xff]  }
 0x872   : > { %14415 = vmatprep.subr.bf16.mxu0 %v18433_v7  ;;  %v18512_v7 = vld [vmem:[%s23843_s5 + $0x330] ss:$8 sps:$4 sm:$0xff]  }
 0x875   : > { %14416 = vmatpush1.bf16.msra.mxu0 %v18431_v17  ;;  %v18517_v17 = vld [vmem:[%s23843_s5 + $0x344] ss:$8 sps:$4 sm:$0xff]  }
 0x876   : > { %14417 = vmatprep.subr.bf16.mxu0 %v18436_v62  ;;  %v18515_v62 = vld [vmem:[%s23843_s5 + $0x340] ss:$8 sps:$4 sm:$0xff]  }
 0x879   : > { %14418 = vmatpush1.bf16.msra.mxu0 %v18434_v15  ;;  %v18520_v15 = vld [vmem:[%s23843_s5 + $0x354] ss:$8 sps:$4 sm:$0xff]  }
 0x87a   : > { %14419 = vmatprep.subr.bf16.mxu0 %v18439_v59  ;;  %v18518_v59 = vld [vmem:[%s23843_s5 + $0x350] ss:$8 sps:$4 sm:$0xff]  }
 0x87d   : > { %14420 = vmatpush1.bf16.msra.mxu0 %v18437_v31  ;;  %v18523_v31 = vld [vmem:[%s23843_s5 + $0x364] ss:$8 sps:$4 sm:$0xff]  }
 0x87e   : > { %14421 = vmatprep.subr.bf16.mxu0 %v18442_v21  ;;  %v18521_v21 = vld [vmem:[%s23843_s5 + $0x360] ss:$8 sps:$4 sm:$0xff]  }
 0x881   : > { %14422 = vmatpush1.bf16.msra.mxu0 %v18440_v12  ;;  %v18526_v12 = vld [vmem:[%s23843_s5 + $0x374] ss:$8 sps:$4 sm:$0xff]  }
 0x882   : > { %14423 = vmatprep.subr.bf16.mxu0 %v18445_v20  ;;  %v18524_v20 = vld [vmem:[%s23843_s5 + $0x370] ss:$8 sps:$4 sm:$0xff]  }
 0x885   : > { %14424 = vmatpush1.bf16.msra.mxu0 %v18443_v0  ;;  %v18529_v0 = vld [vmem:[%s23843_s5 + $0x384] ss:$8 sps:$4 sm:$0xff]  }
 0x886   : > { %14425 = vmatprep.subr.bf16.mxu0 %v18448_v30  ;;  %v18527_v30 = vld [vmem:[%s23843_s5 + $0x380] ss:$8 sps:$4 sm:$0xff]  }
 0x889   : > { %14426 = vmatpush1.bf16.msra.mxu0 %v18446_v6  ;;  %v18532_v6 = vld [vmem:[%s23843_s5 + $0x394] ss:$8 sps:$4 sm:$0xff]  }
 0x88a   : > { %14427 = vmatprep.subr.bf16.mxu0 %v18451_v45  ;;  %v18530_v45 = vld [vmem:[%s23843_s5 + $0x390] ss:$8 sps:$4 sm:$0xff]  }
 0x88d   : > { %14428 = vmatpush1.bf16.msra.mxu0 %v18449_v47  ;;  %v18535_v47 = vld [vmem:[%s23843_s5 + $0x3a4] ss:$8 sps:$4 sm:$0xff]  }
 0x88e   : > { %14429 = vmatprep.subr.bf16.mxu0 %v18454_v56  ;;  %v18533_v56 = vld [vmem:[%s23843_s5 + $0x3a0] ss:$8 sps:$4 sm:$0xff]  }
 0x891   : > { %14430 = vmatpush1.bf16.msra.mxu0 %v18452_v57  ;;  %v18536_v57 = vld [vmem:[%s23843_s5 + $0x3b0] ss:$8 sps:$4 sm:$0xff]  }
 0x892   : > { %14440 = vmatprep.subr.bf16.mxu0 %v18457_v16  ;;  %v18541_v16 = vld [vmem:[%s23843_s5 + $0x3c4] ss:$8 sps:$4 sm:$0xff]  }
 0x894   : > { %14432 = vmatmul.mubr.bf16.vlgmr.msra.gmra.mrb[80].mxu0 %v13572_v51  ;;  %v18544_v51 = vld [vmem:[%s23843_s5 + $0x3d4] ss:$8 sps:$4 sm:$0xff]  }
 0x895   : > { %14441 = vmatpush1.bf16.msra.mxu0 %v18455_v23  ;;  %14472 = vmatprep.mubr.bf16.mxu0 %v13575_v8  ;;  %v18539_v23 = vld [vmem:[%s23843_s5 + $0x3c0] ss:$8 sps:$4 sm:$0xff]   ;;  %v18547_v8 = vld [vmem:[%s23843_s5 + $0x3e4] ss:$8 sps:$4 sm:$0xff]  }
 0x896   : > { %14442 = vmatprep.subr.bf16.mxu0 %v18460_v3  ;;  %v18542_v3 = vld [vmem:[%s23843_s5 + $0x3d0] ss:$8 sps:$4 sm:$0xff]  }
 0x899   : > { %14443 = vmatpush1.bf16.msra.mxu0 %v18458_v50  ;;  %v18545_v50 = vld [vmem:[%s23843_s5 + $0x3e0] ss:$8 sps:$4 sm:$0xff]  }
 0x89a   : > { %14444 = vmatprep.subr.bf16.mxu0 %v18463_v52  ;;  %v18550_v52 = vld [vmem:[%s23843_s5 + $0x3f4] ss:$8 sps:$4 sm:$0xff]  }
 0x89d   : > { %14445 = vmatpush1.bf16.msra.mxu0 %v18461_v63  ;;  %v18548_v63 = vld [vmem:[%s23843_s5 + $0x3f0] ss:$8 sps:$4 sm:$0xff]  }
 0x89e   : > { %14446 = vmatprep.subr.bf16.mxu0 %v18466_v36  ;;  %v18551_v36 = vld [vmem:[%s23844_s6 + $0x40] sm:$0xff]  }
 0x8a1   : > { %14447 = vmatpush1.bf16.msra.mxu0 %v18464_v39  ;;  %v18552_v39 = vld [vmem:[%s23844_s6] sm:$0xff]  }
 0x8a2   : > { %14448 = vmatprep.subr.bf16.mxu0 %v18469_v35  ;;  %v13576_v35 = vpack.c.bf16 %v23469_v41, %v23469_v41  ;;  %v18556_v41 = vld [vmem:[%s23844_s6 + $0x10] sm:$0xff]  }
 0x8a5   : > { %14449 = vmatpush1.bf16.msra.mxu0 %v18467_v13  ;;  %v18553_v13 = vld [vmem:[%s23844_s6 + $0x48] sm:$0xff]  }
 0x8a6   : > { %14450 = vmatprep.subr.bf16.mxu0 %v18472_v28  ;;  %v18554_v28 = vld [vmem:[%s23844_s6 + $0x8] sm:$0xff]  }
 0x8a9   : > { %14451 = vmatpush1.bf16.msra.mxu0 %v18470_v53  ;;  %v18555_v53 = vld [vmem:[%s23844_s6 + $0x50] sm:$0xff]  }
 0x8aa   : > { %14452 = vmatprep.subr.bf16.mxu0 %v18475_v2  ;;  %v18557_v2 = vld [vmem:[%s23844_s6 + $0x58] sm:$0xff]  }
 0x8ad   : > { %14453 = vmatpush1.bf16.msra.mxu0 %v18473_v40  ;;  %v18558_v40 = vld [vmem:[%s23844_s6 + $0x18] sm:$0xff]  }
 0x8ae   : > { %14454 = vmatprep.subr.bf16.mxu0 %v18478_v49  ;;  %v18559_v49 = vld [vmem:[%s23844_s6 + $0x60] sm:$0xff]  }
 0x8b1   : > { %14455 = vmatpush1.bf16.msra.mxu0 %v18476_v32  ;;  %v18560_v32 = vld [vmem:[%s23844_s6 + $0x20] sm:$0xff]  }
 0x8b2   : > { %14456 = vmatprep.subr.bf16.mxu0 %v18481_v48  ;;  %v18561_v48 = vld [vmem:[%s23844_s6 + $0x68] sm:$0xff]  }
 0x8b5   : > { %14457 = vmatpush1.bf16.msra.mxu0 %v18479_v60  ;;  %v18562_v60 = vld [vmem:[%s23844_s6 + $0x28] sm:$0xff]  }
 0x8b6   : > { %14458 = vmatprep.subr.bf16.mxu0 %v18484_v22  ;;  %v18563_v22 = vld [vmem:[%s23844_s6 + $0x70] sm:$0xff]  }
 0x8b9   : > { %14459 = vmatpush1.bf16.msra.mxu0 %v18482_v46  ;;  %v18564_v46 = vld [vmem:[%s23844_s6 + $0x30] sm:$0xff]  }
 0x8ba   : > { %14460 = vmatprep.subr.bf16.mxu0 %v18487_v27  ;;  %v18565_v27 = vld [vmem:[%s23844_s6 + $0x78] sm:$0xff]  }
 0x8bd   : > { %14461 = vmatpush1.bf16.msra.mxu0 %v18485_v37  ;;  %v18566_v37 = vld [vmem:[%s23844_s6 + $0x38] sm:$0xff]  }
 0x8be   : > { %14462 = vmatprep.subr.bf16.mxu0 %v18490_v54  ;;  %v14709_v54 = vld [vmem:[%s23845_s7 + $0x8] sm:$0xff] }
 0x8c1   : > { %14463 = vmatpush1.bf16.msra.mxu0 %v18488_v55  ;;  %v14711_v55 = vld [vmem:[%s23845_s7 + $0x18] sm:$0xff] }
 0x8c2   : > { %14464 = vmatprep.subr.bf16.mxu0 %v18493_v10  ;;  %v16251_v10 = vpack.c.bf16 %v14711_v55, %v14709_v54 }
 0x8c5   : > { %14465 = vmatpush1.bf16.msra.mxu0 %v18491_v43  ;;  %v13706_v43 = vld [vmem:[%s23851_s13] sm:$0x3] }
 0x8c6   : > { %14466 = vmatprep.subr.bf16.mxu0 %v18496_v5  ;;  %v13711_v5 = vrot.slane %v13706_v43, %v19043_v24 }
 0x8c9   : > { %14467 = vmatpush1.bf16.msra.mxu0 %v18494_v61  ;;  %v13715_v61 = vrot.slane %v13706_v43, %v19049_v26 }
 0x8ca   : > { %14468 = vmatprep.subr.bf16.mxu0 %v18499_v9 }
 0x8cd   : > { %14469 = vmatpush1.bf16.msra.mxu0 %v18497_v1 }
 0x8ce   : > { %14470 = vmatprep.subr.bf16.mxu0 %v18502_v42 }
 0x8d1   : > { %14471 = vmatpush1.bf16.msra.mxu0 %v18500_v4 }
 0x8d2   : > { %14481 = vmatprep.subr.bf16.mxu0 %v18505_v11 }
 0x8d4   : > { %14473 = vmatmul.mubr.bf16.vlgmr.msra.gmra.mrb[80].mxu0 %v13574_v14 }
 0x8d5   : > { %14482 = vmatpush1.bf16.msra.mxu0 %v18503_v58  ;;  %14513 = vmatprep.mubr.bf16.mxu0 %v13577_v38  ;;  %v14708_v38 = vld [vmem:[%s23845_s7] sm:$0xff] }
 0x8d6   : > { %14483 = vmatprep.subr.bf16.mxu0 %v18508_v44 }
 0x8d9   : > { %14484 = vmatpush1.bf16.msra.mxu0 %v18506_v34  ;;  %v14710_v34 = vld [vmem:[%s23845_s7 + $0x10] sm:$0xff] }
 0x8da   : > { %14485 = vmatprep.subr.bf16.mxu0 %v18511_v25 }
 0x8dd   : > { %14486 = vmatpush1.bf16.msra.mxu0 %v18509_v19  ;;  %v14713_v19 = vld [vmem:[%s23845_s7 + $0x28] sm:$0xff] }
 0x8de   : > { %14487 = vmatprep.subr.bf16.mxu0 %v18514_v29  ;;  %v14715_v29 = vld [vmem:[%s23845_s7 + $0x38] sm:$0xff] }
 0x8e1   : > { %14488 = vmatpush1.bf16.msra.mxu0 %v18512_v7 }
 0x8e2   : > { %14489 = vmatprep.subr.bf16.mxu0 %v18517_v17 }
 0x8e5   : > { %14490 = vmatpush1.bf16.msra.mxu0 %v18515_v62  ;;  %v16253_v62 = vpack.c.bf16 %v14710_v34, %v14708_v38 }
 0x8e6   : > { %14491 = vmatprep.subr.bf16.mxu0 %v18520_v15 }
 0x8e9   : > { %14492 = vmatpush1.bf16.msra.mxu0 %v18518_v59  ;;  %v16255_v59 = vpack.c.bf16 %v14715_v29, %v14713_v19 }
 0x8ea   : > { %14493 = vmatprep.subr.bf16.mxu0 %v18523_v31  ;;  %v14712_v31 = vld [vmem:[%s23845_s7 + $0x20] sm:$0xff] }
 0x8ed   : > { %14494 = vmatpush1.bf16.msra.mxu0 %v18521_v21  ;;  %v14714_v21 = vld [vmem:[%s23845_s7 + $0x30] sm:$0xff] }
 0x8ee   : > { %14495 = vmatprep.subr.bf16.mxu0 %v18526_v12  ;;  %v14717_v12 = vld [vmem:[%s23845_s7 + $0x48] sm:$0xff] }
 0x8f1   : > { %14496 = vmatpush1.bf16.msra.mxu0 %v18524_v20  ;;  %v14719_v20 = vld [vmem:[%s23845_s7 + $0x58] sm:$0xff] }
 0x8f2   : > { %14497 = vmatprep.subr.bf16.mxu0 %v18529_v0  ;;  %v16257_v0 = vpack.c.bf16 %v14714_v21, %v14712_v31 }
 0x8f5   : > { %14498 = vmatpush1.bf16.msra.mxu0 %v18527_v30  ;;  %v16259_v30 = vpack.c.bf16 %v14719_v20, %v14717_v12  ;;  %v16177_v20 = vld [vmem:[#allocation5] ss:$0 sm:$0xff] }
 0x8f6   : > { %14499 = vmatprep.subr.bf16.mxu0 %v18532_v6  ;;  %v14716_v6 = vld [vmem:[%s23845_s7 + $0x40] sm:$0xff] }
 0x8f9   : > { %14500 = vmatpush1.bf16.msra.mxu0 %v18530_v45  ;;  %v14718_v45 = vld [vmem:[%s23845_s7 + $0x50] sm:$0xff] }
 0x8fa   : > { %14501 = vmatprep.subr.bf16.mxu0 %v18535_v47  ;;  %v14721_v47 = vld [vmem:[%s23845_s7 + $0x68] sm:$0xff] }
 0x8fd   : > { %14502 = vmatpush1.bf16.msra.mxu0 %v18533_v56  ;;  %v14723_v56 = vld [vmem:[%s23845_s7 + $0x78] sm:$0xff] }
 0x8fe   : > { %14503 = vmatprep.subr.bf16.mxu0 %v18538_v18  ;;  %v16263_v18 = vpack.c.bf16 %v14723_v56, %v14721_v47 }
 0x901   : > { %14504 = vmatpush1.bf16.msra.mxu0 %v18536_v57  ;;  %v14720_v57 = vld [vmem:[%s23845_s7 + $0x60] sm:$0xff] }
 0x902   : > { %14505 = vmatprep.subr.bf16.mxu0 %v18541_v16  ;;  %v14722_v16 = vld [vmem:[%s23845_s7 + $0x70] sm:$0xff] }
 0x905   : > { %14506 = vmatpush1.bf16.msra.mxu0 %v18539_v23  ;;  %v14725_v23 = vld [vmem:[%s23845_s7 + $0x88] sm:$0xff] }
 0x906   : > { %14507 = vmatprep.subr.bf16.mxu0 %v18544_v51  ;;  %v14727_v51 = vld [vmem:[%s23845_s7 + $0x98] sm:$0xff] }
 0x909   : > { %14508 = vmatpush1.bf16.msra.mxu0 %v18542_v3  ;;  %v16265_v3 = vpack.c.bf16 %v14722_v16, %v14720_v57 }
 0x90a   : > { %14509 = vmatprep.subr.bf16.mxu0 %v18547_v8  ;;  %v16267_v8 = vpack.c.bf16 %v14727_v51, %v14725_v23 }
 0x90d   : > { %14510 = vmatpush1.bf16.msra.mxu0 %v18545_v50  ;;  %v14724_v50 = vld [vmem:[%s23845_s7 + $0x80] sm:$0xff] }
 0x90e   : > { %14511 = vmatprep.subr.bf16.mxu0 %v18550_v52  ;;  %v14726_v52 = vld [vmem:[%s23845_s7 + $0x90] sm:$0xff] }
 0x911   : > { %14512 = vmatpush1.bf16.msra.mxu0 %v18548_v63  ;;  %v14729_v63 = vld [vmem:[%s23845_s7 + $0xa8] sm:$0xff] }
 0x912   : > { %16229 = vmatprep.subr.bf16.mxu0 %v18551_v36  ;;  %v14731_v36 = vld [vmem:[%s23845_s7 + $0xb8] sm:$0xff] }
 0x914   : > { %14514 = vmatmul.mubr.bf16.vlgmr.msra.gmra.mrb[80].mxu0 %v13576_v35  ;;  %v16271_v35 = vpack.c.bf16 %v14731_v36, %v14729_v63 }
 0x915   : > { %16230 = vmatpush3.bf16.msra.mxu0 %v18552_v39  ;;  %v16269_v39 = vpack.c.bf16 %v14726_v52, %v14724_v50 }
 0x916   : > { %16231 = vmatprep.subr.bf16.mxu0 %v18553_v13  ;;  %v14728_v13 = vld [vmem:[%s23845_s7 + $0xa0] sm:$0xff] }
 0x919   : > { %16232 = vmatpush3.bf16.msra.mxu0 %v18554_v28  ;;  %v14730_v28 = vld [vmem:[%s23845_s7 + $0xb0] sm:$0xff] }
 0x91a   : > { %16233 = vmatprep.subr.bf16.mxu0 %v18555_v53  ;;  %v16273_v53 = vpack.c.bf16 %v14730_v28, %v14728_v13 }
 0x91d   : > { %16234 = vmatpush3.bf16.msra.mxu0 %v18556_v41  ;;  %v14733_v41 = vld [vmem:[%s23845_s7 + $0xc8] sm:$0xff] }
 0x91e   : > { %16235 = vmatprep.subr.bf16.mxu0 %v18557_v2  ;;  %v14735_v2 = vld [vmem:[%s23845_s7 + $0xd8] sm:$0xff] }
 0x921   : > { %16236 = vmatpush3.bf16.msra.mxu0 %v18558_v40  ;;  %v14732_v40 = vld [vmem:[%s23845_s7 + $0xc0] sm:$0xff] }
 0x922   : > { %16237 = vmatprep.subr.bf16.mxu0 %v18559_v49  ;;  %v16275_v49 = vpack.c.bf16 %v14735_v2, %v14733_v41 }
 0x925   : > { %16238 = vmatpush3.bf16.msra.mxu0 %v18560_v32  ;;  %v14734_v32 = vld [vmem:[%s23845_s7 + $0xd0] sm:$0xff] }
 0x926   : > { %16239 = vmatprep.subr.bf16.mxu0 %v18561_v48  ;;  %v14737_v48 = vld [vmem:[%s23845_s7 + $0xe8] sm:$0xff] }
 0x929   : > { %16240 = vmatpush3.bf16.msra.mxu0 %v18562_v60  ;;  %v14739_v60 = vld [vmem:[%s23845_s7 + $0xf8] sm:$0xff] }
 0x92a   : > { %16241 = vmatprep.subr.bf16.mxu0 %v18563_v22  ;;  %v16277_v22 = vpack.c.bf16 %v14734_v32, %v14732_v40 }
 0x92d   : > { %16242 = vmatpush3.bf16.msra.mxu0 %v18564_v46  ;;  %v16279_v46 = vpack.c.bf16 %v14739_v60, %v14737_v48 }
 0x92e   : > { %16243 = vmatprep.subr.bf16.mxu0 %v18565_v27  ;;  %v14736_v27 = vld [vmem:[%s23845_s7 + $0xe0] sm:$0xff] }
 0x931   : > { %16244 = vmatpush3.bf16.msra.mxu0 %v18566_v37  ;;  %v14738_v37 = vld [vmem:[%s23845_s7 + $0xf0] sm:$0xff] }
 0x932   : > { %16252 = vmatprep.subr.bf16.mxu0 %v16251_v10  ;;  %v16281_v54 = vpack.c.bf16 %v14738_v37, %v14736_v27  ;;  %v16160_v10 = vld [vmem:[%s23852_s14] ss:$0 sm:$0xff] }
 0x9e7   : > { %v14515_v9 = vpop.f32.mrb[80].mxu0 }
 0x9e8   : > { %v16395_v1 = vadd.f32 %v14515_v9, %v13711_v5  ;;  %v14517_v42 = vpop.f32.mrb[81].mxu0 }
 0x9e9   : > { %v16396_v4 = vadd.f32 %v14517_v42, %v13715_v61  ;;  %v14519_v11 = vpop.f32.mrb[82].mxu0 }
 0x9ea   : > { %vm14522_vm6 = vcmp.ge.f32.partialorder %v16395_v1, 0.0  ;;  %v14524_v58 = vmul.f32 0.1, %v16395_v1  ;;  %v14520_v14 = vpop.f32.mrb[83].mxu0  ;;  %v14740_v11 = vld [vmem:[%s23853_s15] sm:$0x3] }
 0x9eb   : > { %vm14523_vm10 = vcmp.ge.f32.partialorder %v16396_v4, 0.0  ;;  %v14525_v44 = vmul.f32 0.1, %v16396_v4  ;;  %v14749_v14 = vrot.slane %v14740_v11, %v19049_v26 }
 0x9ec   : > { %v14526_v25 = vsel %vm14522_vm6, %v16395_v1, %v14524_v58  ;;  %v14745_v58 = vrot.slane %v14740_v11, %v19043_v24 }
 0x9ed   : > { %v14527_v7 = vsel %vm14523_vm10, %v16396_v4, %v14525_v44  ;;  %v14528_v15 = vpack.c.bf16 %v14526_v25, %v14526_v25  ;;  %v14829_v44 = vld [vmem:[%s23846_s8] sm:$0x3] }
 0x9ee   : > { %v14529_v17 = vpack.c.bf16 %v14527_v7, %v14527_v7  ;;  %v14834_v29 = vrot.slane %v14829_v44, %v19043_v24 }
 0x9f0   : > { %14697 = vmatprep.mubr.bf16.mxu0 %v14529_v17  ;;  %v14838_v17 = vrot.slane %v14829_v44, %v19049_v26 }
 0x9f1   : > { %14698 = vmatmul.mubr.bf16.vlgmr.msra.gmra.mrb[84].mxu0 %v14528_v15 }
 0x9f2   : > { %16254 = vmatpush1.bf16.msra.mxu0 %v16253_v62  ;;  %14816 = vmatprep.mubr.f32.mxu0 %v18624_v33  ;;  %v16261_v33 = vpack.c.bf16 %v14718_v45, %v14716_v6 }
 0x9f3   : > { %16256 = vmatprep.subr.bf16.mxu0 %v16255_v59 }
 0x9f6   : > { %16258 = vmatpush1.bf16.msra.mxu0 %v16257_v0 }
 0x9f7   : > { %16260 = vmatprep.subr.bf16.mxu0 %v16259_v30 }
 0x9fa   : > { %16262 = vmatpush1.bf16.msra.mxu0 %v16261_v33 }
 0x9fb   : > { %16264 = vmatprep.subr.bf16.mxu0 %v16263_v18 }
 0x9fe   : > { %16266 = vmatpush1.bf16.msra.mxu0 %v16265_v3 }
 0x9ff   : > { %16268 = vmatprep.subr.bf16.mxu0 %v16267_v8 }
 0xa02   : > { %16270 = vmatpush1.bf16.msra.mxu0 %v16269_v39 }
 0xa03   : > { %16272 = vmatprep.subr.bf16.mxu0 %v16271_v35 }
 0xa06   : > { %16274 = vmatpush1.bf16.msra.mxu0 %v16273_v53 }
 0xa07   : > { %16276 = vmatprep.subr.bf16.mxu0 %v16275_v49 }
 0xa0a   : > { %16278 = vmatpush1.bf16.msra.mxu0 %v16277_v22 }
 0xa0b   : > { %16280 = vmatprep.subr.bf16.mxu0 %v16279_v46 }
 0xa0e   : > { %16282 = vmatpush1.bf16.msra.mxu0 %v16281_v54 }
 0xac4   : > { %v16245_v55 = vpop.f32.mrb[84].mxu0 }
 0xac5   : > { %v16246_v43 = vpop.f32.mrb[85].mxu0 }
 0xac6   : > { %v16247_v5 = vadd.f32 %v16246_v43, %v16245_v55  ;;  %v16248_v61 = vpop.f32.mrb[86].mxu0 }
 0xac7   : > { %v16249_v9 = vpop.f32.mrb[87].mxu0 }
 0xac8   : > { %v14700_v1 = vadd.f32 %v16247_v5, %v16160_v10 }
 0xaca   : > { %v14706_v42 = vmul.f32 0.1, %v14700_v1  ;;  %vm14705_vm0 = vcmp.ge.f32.partialorder %v14700_v1, 0.0 }
 0xacc   : > { %v14707_v4 = vsel %vm14705_vm0, %v14700_v1, %v14706_v42 }
 0xacd   : > { %14817 = vmatmul.mubr.f32.vlgmr.msra.gmra.mrb[88].mxu0 %v14707_v4 }
 0xba0   : > { %v14818_v38 = vpop.f32.mrb[88].mxu0 }
 0xba1   : > { %v14819_v34 = vadd.f32 %v14818_v38, %v14745_v58  ;;  %v14820_v25 = vpop.f32.mrb[89].mxu0 }
 0xba2   : > { %v14821_v19 = vadd.f32 %v14820_v25, %v14749_v14 }
 0xba3   : > { %vm14823_vm2 = vcmp.ge.f32.partialorder %v14819_v34, 0.0  ;;  %v14825_v7 = vmul.f32 0.1, %v14819_v34 }
 0xba4   : > { %vm14824_vm3 = vcmp.ge.f32.partialorder %v14821_v19, 0.0  ;;  %v14826_v62 = vmul.f32 0.1, %v14821_v19 }
 0xba5   : > { %v14827_v15 = vsel %vm14823_vm2, %v14819_v34, %v14825_v7 }
 0xba6   : > { %v14828_v59 = vsel %vm14824_vm3, %v14821_v19, %v14826_v62  ;;  %v14841_v31 = vmul.f32 %v14834_v29, %v14827_v15 }
 0xba7   : > { %v14842_v21 = vmul.f32 %v14838_v17, %v14828_v59 }
 0xba9   : > { %v14843_v12 = vadd.f32 %v14842_v21, %v14841_v31 }
 0xbab   : > { %14844 = vadd.xlane.f32.xlu0 %v14843_v12 }
 0xc38   : > { %v14845_v24 = vpop.xlane.xlu0 %14844 }
 0xc39   : > { %v14853_v0 = vadd.f32 %v16177_v20, %v14845_v24 }
 0xc3b   : > { %14855 = vst.msk [vmem:[%s553_s18] sm:$0xff] %vm14854_vm4, %v14853_v0 }
 0xc3c PF: > { %s29_s26 = sadd.s32 1, %s18621_s26  }
 0xc3d   : > { %p26_p5 = scmp.ge.s32.totalorder %s29_s26, 4  }
 0xc3f   :  { %28 = sbr.rel (!%p26_p5) target bundleno = 3 (0x3), region = 182 }

</bundles_post_ra>
